<compile_context>
chip_gen: v6e
topology: v6e:2x2x1
jax: 0.10.0
libtpu: 0.0.40
codegen_flags: <defaults>
</compile_context>

<pallas_src>
import functools
import math

import jax
import jax.numpy as jnp
from jax.experimental import pallas as pl
from jax.experimental.pallas import tpu as pltpu


# ------------------------------ helpers ------------------------------

def _round_up(x, m):
    return int(pl.cdiv(x, m)) * m


def _choose_tile(n_pad, *, target_steps=8, max_tile=1024, min_tile=128):
    """Pick a lane tile (multiple of 128) giving >= target_steps grid steps."""
    t = max_tile
    while t > min_tile and (n_pad % t != 0 or n_pad // t < target_steps):
        t //= 2
    if n_pad % t != 0:
        t = min_tile
    if n_pad % t != 0:
        t = n_pad
    return t


def _pad_lanes(a, n_pad):
    n = a.shape[-1]
    if n == n_pad:
        return a
    return jnp.pad(a, [(0, 0)] * (a.ndim - 1) + [(0, n_pad - n)])


def _gelu_erf(x):
    # exact (erf) GELU, matching torch.nn.functional.gelu default
    return 0.5 * x * (1.0 + jax.lax.erf(x * (1.0 / math.sqrt(2.0))))


# ------------------------------ Pallas kernels ------------------------------

def _linear_kernel(x_ref, w_ref, b_ref, o_ref):
    # o = W @ x + b   (fc0 lifting layer; bf16 operands, f32 accumulate)
    acc = jnp.dot(w_ref[...], x_ref[...], preferred_element_type=jnp.float32)
    o_ref[...] = (acc + b_ref[...]).astype(o_ref.dtype)


def _layer_kernel(x_ref, x1_ref, w_ref, b_ref, o_ref, *, apply_gelu):
    # o = gelu?( spectral_branch + W_1x1 @ x + b )  -- fused FNO layer tail.
    # bf16 MXU operands / HBM streams, all VPU math in f32 (v5e-safe).
    acc = jnp.dot(w_ref[...], x_ref[...], preferred_element_type=jnp.float32)
    y = x1_ref[...].astype(jnp.float32) + acc + b_ref[...]
    if apply_gelu:
        y = _gelu_erf(y)
    o_ref[...] = y.astype(o_ref.dtype)


def _spectral_kernel(xr_ref, xi_ref, wa_ref, wb_ref, wc_ref, or_ref, oi_ref):
    # Complex per-mode channel mixing (one mode-block, one batch element):
    #   out[o, m] = sum_i x[i, m] * w[i, o, m]      (complex)
    # Modes m live on lanes; the Cin contraction is a VPU broadcast-multiply
    # accumulated with an unrolled fori_loop (no (Cin, Cout, Mb) temporary;
    # the MXU would only see degenerate tiny matmuls here).
    # 3-multiply complex product: wa = wr, wb = wi - wr, wc = wr + wi
    #   k1 = (xr + xi) * wa ;  real = k1 - xi * wc ;  imag = k1 + xr * wb
    cin, cout, mb = wa_ref.shape

    def body(i, carry):
        re, im = carry
        xr_i = xr_ref[pl.ds(i, 1), :]          # (1, Mb)
        xi_i = xi_ref[pl.ds(i, 1), :]
        wa_i = wa_ref[i]                       # (Cout, Mb)
        wb_i = wb_ref[i]
        wc_i = wc_ref[i]
        k1 = (xr_i + xi_i) * wa_i
        re = re + (k1 - xi_i * wc_i)
        im = im + (k1 + xr_i * wb_i)
        return re, im

    zeros = jnp.zeros((cout, mb), jnp.float32)
    re, im = jax.lax.fori_loop(0, cin, body, (zeros, zeros), unroll=True)
    or_ref[...] = re
    oi_ref[...] = im


# ------------------------------ Pallas wrappers ------------------------------

def pallas_linear(x_cn, w, b, *, tile_n, out_dtype=jnp.bfloat16):
    """fc0: (cin, N) -> (cout, N), out = W @ x + b, lane-dense output."""
    cin, n = x_cn.shape
    cout = w.shape[0]
    assert n % tile_n == 0
    return pl.pallas_call(
        _linear_kernel,
        out_shape=jax.ShapeDtypeStruct((cout, n), out_dtype),
        grid=(n // tile_n,),
        in_specs=[pl.BlockSpec((cin, tile_n), lambda i: (0, i)),
                  pl.BlockSpec((cout, cin), lambda i: (0, 0)),
                  pl.BlockSpec((cout, 1), lambda i: (0, 0))],
        out_specs=pl.BlockSpec((cout, tile_n), lambda i: (0, i)),
        compiler_params=pltpu.CompilerParams(
            dimension_semantics=("parallel",)),
    )(x_cn, w, b.reshape(cout, 1))


def pallas_layer(x_cn, x1_cn, w, b, *, apply_gelu, out_dtype, tile_n):
    """One FNO layer tail: out = gelu?(x1 + W_1x1 @ x + b), channels-first."""
    cin, n = x_cn.shape
    cout = w.shape[0]
    assert n % tile_n == 0
    kernel = functools.partial(_layer_kernel, apply_gelu=apply_gelu)
    return pl.pallas_call(
        kernel,
        out_shape=jax.ShapeDtypeStruct((cout, n), out_dtype),
        grid=(n // tile_n,),
        in_specs=[pl.BlockSpec((cin, tile_n), lambda i: (0, i)),
                  pl.BlockSpec((cout, tile_n), lambda i: (0, i)),
                  pl.BlockSpec((cout, cin), lambda i: (0, 0)),
                  pl.BlockSpec((cout, 1), lambda i: (0, 0))],
        out_specs=pl.BlockSpec((cout, tile_n), lambda i: (0, i)),
        compiler_params=pltpu.CompilerParams(
            dimension_semantics=("parallel",)),
    )(x_cn, x1_cn, w, b.reshape(cout, 1))


def pallas_spectral(xr, xi, wa, wb, wc, *, mb=128):
    """Per-mode complex channel mixing of the 4 retained-mode corner blocks.
    xr/xi: (B, Cin, Mpad) f32, wa/wb/wc: (Cin, Cout, Mpad) f32
    -> (real, imag), each (B, Cout, Mpad) f32."""
    bsz, cin, mpad = xr.shape
    cout = wa.shape[1]
    assert mpad % mb == 0
    sd = jax.ShapeDtypeStruct((bsz, cout, mpad), jnp.float32)
    return pl.pallas_call(
        _spectral_kernel,
        out_shape=(sd, sd),
        grid=(mpad // mb, bsz),
        in_specs=[
            pl.BlockSpec((None, cin, mb), lambda m, i: (i, 0, m)),
            pl.BlockSpec((None, cin, mb), lambda m, i: (i, 0, m)),
            pl.BlockSpec((cin, cout, mb), lambda m, i: (0, 0, m)),
            pl.BlockSpec((cin, cout, mb), lambda m, i: (0, 0, m)),
            pl.BlockSpec((cin, cout, mb), lambda m, i: (0, 0, m)),
        ],
        out_specs=(pl.BlockSpec((None, cout, mb), lambda m, i: (i, 0, m)),
                   pl.BlockSpec((None, cout, mb), lambda m, i: (i, 0, m))),
        compiler_params=pltpu.CompilerParams(
            dimension_semantics=("parallel", "arbitrary")),
    )(xr, xi, wa, wb, wc)


def _fused_gelu_supported():
    """Probe whether exact-erf GELU lowers inside a Pallas TPU kernel."""
    def k(x_ref, o_ref):
        o_ref[...] = _gelu_erf(x_ref[...])
    try:
        y = pl.pallas_call(
            k, out_shape=jax.ShapeDtypeStruct((8, 128), jnp.float32),
        )(jnp.zeros((8, 128), jnp.float32))
        jax.block_until_ready(y)
        return True
    except Exception:
        return False


# ------------------------------ parameters ------------------------------

def init_params(key, in_ch, width, m1, m2, m3, num_layers):
    keys = jax.random.split(key, 2 + 4 * num_layers)
    p = {}
    in_pad = _round_up(in_ch, 16)          # bf16 sublane packing for fc0 input
    s0 = 1.0 / math.sqrt(in_ch)
    # fc0 stored torch-style as (out, in): kernel computes W @ x
    fc0_w = jax.random.uniform(keys[0], (width, in_ch), jnp.float32, -s0, s0)
    p['fc0_w'] = jnp.pad(fc0_w, ((0, 0), (0, in_pad - in_ch))).astype(jnp.bfloat16)
    p['fc0_b'] = jax.random.uniform(keys[1], (width,), jnp.float32, -s0, s0)

    m4 = 4 * m1 * m2 * m3
    mpad = _round_up(m4, 128)
    spec_scale = 1.0 / (width * width)      # scale * rand, as in SpectralConv3d
    s1 = 1.0 / math.sqrt(width)
    layers = []
    k = 2
    for _ in range(num_layers):
        # torch weights1..4 each have shape (in, out, m1, m2, m3), complex
        shape = (4, width, width, m1, m2, m3)
        wr = spec_scale * jax.random.uniform(keys[k], shape, jnp.float32); k += 1
        wi = spec_scale * jax.random.uniform(keys[k], shape, jnp.float32); k += 1

        def to_kernel(w):
            # -> (Cin, Cout, Mpad): flattened (corner, m1, m2, m3) mode index
            #    on lanes, zero-padded to a multiple of 128
            w = w.transpose(1, 2, 0, 3, 4, 5).reshape(width, width, m4)
            return jnp.pad(w, ((0, 0), (0, 0), (0, mpad - m4)))

        cw = jax.random.uniform(keys[k], (width, width), jnp.float32, -s1, s1); k += 1
        cb = jax.random.uniform(keys[k], (width,), jnp.float32, -s1, s1); k += 1
        layers.append({'spec_wa': to_kernel(wr),        # wr
                       'spec_wb': to_kernel(wi - wr),   # wi - wr
                       'spec_wc': to_kernel(wr + wi),   # wr + wi
                       'w1x1': cw.astype(jnp.bfloat16),
                       'b1x1': cb})
    p['layers'] = layers
    return p


# ------------------------------ forward pass ------------------------------

def pwno_forward(params, residue, fourier_grid, *, modes, width, fuse_gelu):
    m1, m2, m3 = modes
    x = jnp.concatenate([residue, fourier_grid], axis=-1)      # (B,X,Y,T, nft+3)
    B, X, Y, T, cin0 = x.shape
    N = B * X * Y * T
    M4 = 4 * m1 * m2 * m3
    Kt = T // 2 + 1

    n_pad = _round_up(N, 128)
    tile_n = _choose_tile(n_pad)
    cin_pad = params['fc0_w'].shape[1]

    # channels-first 2-D layout: (C, N) padded ONCE, threaded through all layers
    x_cn = x.reshape(N, cin0).T                                 # (cin0, N)
    x_cn = jnp.pad(x_cn, ((0, cin_pad - cin0), (0, n_pad - N))).astype(jnp.bfloat16)

    # fc0 lift (Pallas matmul, lane-dense bf16 output, f32 accumulation)
    x_cn = pallas_linear(x_cn, params['fc0_w'], params['fc0_b'],
                         tile_n=tile_n)                          # (width, n_pad)

    num_layers = len(params['layers'])
    for i, lyr in enumerate(params['layers']):
        mpad = lyr['spec_wa'].shape[-1]

        # ---- spectral branch (SpectralConv3d); FFTs stay in XLA ----
        x5 = x_cn[:, :N].astype(jnp.float32).reshape(width, B, X, Y, T)
        x_ft = jnp.fft.rfftn(x5, axes=(2, 3, 4))      # (C,B,X,Y,Kt) complex64
        corners = jnp.stack(
            [x_ft[:, :, :m1, :m2, :m3],
             x_ft[:, :, X - m1:, :m2, :m3],
             x_ft[:, :, :m1, Y - m2:, :m3],
             x_ft[:, :, X - m1:, Y - m2:, :m3]], axis=2)   # (C,B,4,m1,m2,m3)
        xs = jnp.swapaxes(corners.reshape(width, B, M4), 0, 1)     # (B,C,M4)
        xr = _pad_lanes(jnp.real(xs), mpad)                        # (B,C,Mpad)
        xi = _pad_lanes(jnp.imag(xs), mpad)
        outr, outi = pallas_spectral(xr, xi, lyr['spec_wa'],
                                     lyr['spec_wb'], lyr['spec_wc'])
        out_c = (outr[:, :, :M4] + 1j * outi[:, :, :M4]).astype(jnp.complex64)
        out_c = jnp.swapaxes(out_c, 0, 1).reshape(width, B, 4, m1, m2, m3)

        out_ft = jnp.zeros((width, B, X, Y, Kt), jnp.complex64)
        out_ft = out_ft.at[:, :, :m1, :m2, :m3].set(out_c[:, :, 0])
        out_ft = out_ft.at[:, :, X - m1:, :m2, :m3].set(out_c[:, :, 1])
        out_ft = out_ft.at[:, :, :m1, Y - m2:, :m3].set(out_c[:, :, 2])
        out_ft = out_ft.at[:, :, X - m1:, Y - m2:, :m3].set(out_c[:, :, 3])
        x1 = jnp.fft.irfftn(out_ft, s=(X, Y, T), axes=(2, 3, 4))   # (C,B,X,Y,T)

        # ---- pointwise 1x1 Conv3d branch + add (+ GELU), fused in Pallas ----
        last = (i == num_layers - 1)
        fused = fuse_gelu and not last
        x1_cn = x1.astype(jnp.bfloat16).reshape(width, N)
        if n_pad != N:
            x1_cn = jnp.pad(x1_cn, ((0, 0), (0, n_pad - N)))
        out_dtype = jnp.float32 if (last or not fuse_gelu) else jnp.bfloat16
        x_cn = pallas_layer(x_cn, x1_cn, lyr['w1x1'], lyr['b1x1'],
                            apply_gelu=fused, out_dtype=out_dtype,
                            tile_n=tile_n)
        if (not fused) and not last:
            # fallback if exact-erf GELU does not lower inside the kernel
            x_cn = jax.nn.gelu(x_cn, approximate=False).astype(jnp.bfloat16)

    # channels-last output == torch's final x.permute(0, 2, 3, 4, 1)
    return x_cn[:, :N].reshape(width, B, X, Y, T).transpose(1, 2, 3, 4, 0)


# ------------------------------ main ------------------------------

if __name__ == "__main__":
    key = jax.random.PRNGKey(0)
    B, X, Y, T = 2, 16, 16, 8
    width, m1, m2, m3 = 32, 4, 4, 3
    num_fourier_time, num_layers = 10, 2            # padding=0, using_ff=False

    k_res, k_grid, k_par = jax.random.split(key, 3)
    residue = jax.random.normal(k_res, (B, X, Y, T, num_fourier_time), jnp.float32)
    fourier_grid = jax.random.normal(k_grid, (B, X, Y, T, 3), jnp.float32)

    params = init_params(k_par, num_fourier_time + 3, width, m1, m2, m3, num_layers)

    fuse_gelu = _fused_gelu_supported()

    fwd = jax.jit(functools.partial(pwno_forward, modes=(m1, m2, m3),
                                    width=width, fuse_gelu=fuse_gelu))
    out = fwd(params, residue, fourier_grid)
    out = jax.block_until_ready(out)

    assert out.shape == (B, X, Y, T, width)
    assert out.dtype == jnp.float32
    print("KERNEL_OK")
</pallas_src>

<mosaic_0001>
module attributes {stable_mosaic.version = 11 : i64} {
  func.func @k(%arg0: memref<8x128xf32, #tpu.memory_space<vmem>>, %arg1: memref<8x128xf32, #tpu.memory_space<vmem>>) attributes {dimension_semantics = [], scalar_prefetch = 0 : i64, scratch_operands = 0 : i64, tpu.core_type = #tpu.core_type<tc>} {
    %c0 = arith.constant 0 : index
    %c0_0 = arith.constant 0 : index
    %0 = vector.load %arg0[%c0, %c0_0] : memref<8x128xf32, #tpu.memory_space<vmem>>, vector<8x128xf32>
    %cst = arith.constant 5.000000e-01 : f32
    %1 = vector.broadcast %cst : f32 to vector<8x128xf32>
    %2 = arith.mulf %1, %0 : vector<8x128xf32>
    %cst_1 = arith.constant 0.707106769 : f32
    %3 = vector.broadcast %cst_1 : f32 to vector<8x128xf32>
    %4 = arith.mulf %0, %3 : vector<8x128xf32>
    %5 = math.erf %4 : vector<8x128xf32>
    %cst_2 = arith.constant 1.000000e+00 : f32
    %6 = vector.broadcast %cst_2 : f32 to vector<8x128xf32>
    %7 = arith.addf %6, %5 : vector<8x128xf32>
    %8 = arith.mulf %2, %7 : vector<8x128xf32>
    %c0_3 = arith.constant 0 : index
    %c0_4 = arith.constant 0 : index
    %9 = vector.load %arg1[%c0_3, %c0_4] : memref<8x128xf32, #tpu.memory_space<vmem>>, vector<8x128xf32>
    tpu.vector_store %arg1[%c0_3, %c0_4], %8 {strides = array<i32>} : memref<8x128xf32, #tpu.memory_space<vmem>>, vector<8x128xf32>,
    return
  }
}

module attributes {stable_mosaic.version = 11 : i64} {
  func.func @_linear_kernel(%arg0: i32, %arg1: memref<16x512xbf16, #tpu.memory_space<vmem>>, %arg2: memref<32x16xbf16, #tpu.memory_space<vmem>>, %arg3: memref<32x1xf32, #tpu.memory_space<vmem>>, %arg4: memref<32x512xbf16, #tpu.memory_space<vmem>>) attributes {dimension_semantics = [#tpu.dimension_semantics<parallel>], iteration_bounds = array<i64: 8>, scalar_prefetch = 0 : i64, scratch_operands = 0 : i64, tpu.core_type = #tpu.core_type<tc>, window_params = [{transform_indices = @transform_0, window_bounds = array<i64: 16, 512>}, {pipeline_mode = #tpu.pipeline_mode<synchronous>, transform_indices = @transform_1, window_bounds = array<i64: 32, 16>}, {pipeline_mode = #tpu.pipeline_mode<synchronous>, transform_indices = @transform_2, window_bounds = array<i64: 32, 1>}, {transform_indices = @transform_3, window_bounds = array<i64: 32, 512>}]} {
    %c0 = arith.constant 0 : index
    %c0_0 = arith.constant 0 : index
    %0 = vector.load %arg2[%c0, %c0_0] : memref<32x16xbf16, #tpu.memory_space<vmem>>, vector<32x16xbf16>
    %c0_1 = arith.constant 0 : index
    %c0_2 = arith.constant 0 : index
    %1 = vector.load %arg1[%c0_1, %c0_2] : memref<16x512xbf16, #tpu.memory_space<vmem>>, vector<16x512xbf16>
    %cst = arith.constant dense<0.000000e+00> : vector<32x512xf32>
    %2 = tpu.matmul %0, %1, %cst {dimension_numbers = #tpu.dot_dimension_numbers<[1], [0], [0], [1], [0, 0, 1, 1], [], []>} : vector<32x16xbf16>, vector<16x512xbf16>, vector<32x512xf32> -> vector<32x512xf32>
    %c0_3 = arith.constant 0 : index
    %c0_4 = arith.constant 0 : index
    %3 = vector.load %arg3[%c0_3, %c0_4] : memref<32x1xf32, #tpu.memory_space<vmem>>, vector<32x1xf32>
    %4 = vector.broadcast %3 : vector<32x1xf32> to vector<32x512xf32>
    %5 = arith.addf %2, %4 : vector<32x512xf32>
    %6 = arith.truncf %5 : vector<32x512xf32> to vector<32x512xbf16>
    %c0_5 = arith.constant 0 : index
    %c0_6 = arith.constant 0 : index
    %7 = vector.load %arg4[%c0_5, %c0_6] : memref<32x512xbf16, #tpu.memory_space<vmem>>, vector<32x512xbf16>
    tpu.vector_store %arg4[%c0_5, %c0_6], %6 {strides = array<i32>} : memref<32x512xbf16, #tpu.memory_space<vmem>>, vector<32x512xbf16>,
    return
  }
  func.func @transform_0(%arg0: i32) -> (i32, i32) {
    %c0_i32 = arith.constant 0 : i32
    %c0_i32_0 = arith.constant 0 : i32
    return %c0_i32, %arg0 : i32, i32
  }
  func.func @transform_1(%arg0: i32) -> (i32, i32) {
    %c0_i32 = arith.constant 0 : i32
    %c0_i32_0 = arith.constant 0 : i32
    %c0_i32_1 = arith.constant 0 : i32
    return %c0_i32, %c0_i32_0 : i32, i32
  }
  func.func @transform_2(%arg0: i32) -> (i32, i32) {
    %c0_i32 = arith.constant 0 : i32
    %c0_i32_0 = arith.constant 0 : i32
    %c0_i32_1 = arith.constant 0 : i32
    return %c0_i32, %c0_i32_0 : i32, i32
  }
  func.func @transform_3(%arg0: i32) -> (i32, i32) {
    %c0_i32 = arith.constant 0 : i32
    %c0_i32_0 = arith.constant 0 : i32
    return %c0_i32, %arg0 : i32, i32
  }
}

module attributes {stable_mosaic.version = 11 : i64} {
  func.func @_spectral_kernel(%arg0: i32, %arg1: i32, %arg2: memref<1x32x128xf32, #tpu.memory_space<vmem>>, %arg3: memref<1x32x128xf32, #tpu.memory_space<vmem>>, %arg4: memref<32x32x128xf32, #tpu.memory_space<vmem>>, %arg5: memref<32x32x128xf32, #tpu.memory_space<vmem>>, %arg6: memref<32x32x128xf32, #tpu.memory_space<vmem>>, %arg7: memref<1x32x128xf32, #tpu.memory_space<vmem>>, %arg8: memref<1x32x128xf32, #tpu.memory_space<vmem>>) attributes {dimension_semantics = [#tpu.dimension_semantics<parallel>, #tpu.dimension_semantics<arbitrary>], iteration_bounds = array<i64: 2, 2>, scalar_prefetch = 0 : i64, scratch_operands = 0 : i64, tpu.core_type = #tpu.core_type<tc>, window_params = [{transform_indices = @transform_0, window_bounds = array<i64: 1, 32, 128>}, {transform_indices = @transform_1, window_bounds = array<i64: 1, 32, 128>}, {transform_indices = @transform_2, window_bounds = array<i64: 32, 32, 128>}, {transform_indices = @transform_3, window_bounds = array<i64: 32, 32, 128>}, {transform_indices = @transform_4, window_bounds = array<i64: 32, 32, 128>}, {transform_indices = @transform_5, window_bounds = array<i64: 1, 32, 128>}, {transform_indices = @transform_6, window_bounds = array<i64: 1, 32, 128>}]} {
    %cst = arith.constant 0.000000e+00 : f32
    %0 = vector.broadcast %cst : f32 to vector<32x128xf32>
    %c0_i32 = arith.constant 0 : i32
    %c0 = arith.constant 0 : index
    %1 = arith.index_cast %c0_i32 : i32 to index
    %c0_0 = arith.constant 0 : index
    %2 = vector.load %arg2[%c0, %1, %c0_0] : memref<1x32x128xf32, #tpu.memory_space<vmem>>, vector<1x1x128xf32>
    %3 = vector.shape_cast %2 : vector<1x1x128xf32> to vector<1x128xf32>
    %c0_1 = arith.constant 0 : index
    %4 = arith.index_cast %c0_i32 : i32 to index
    %c0_2 = arith.constant 0 : index
    %5 = vector.load %arg3[%c0_1, %4, %c0_2] : memref<1x32x128xf32, #tpu.memory_space<vmem>>, vector<1x1x128xf32>
    %6 = vector.shape_cast %5 : vector<1x1x128xf32> to vector<1x128xf32>
    %7 = arith.index_cast %c0_i32 : i32 to index
    %c0_3 = arith.constant 0 : index
    %c0_4 = arith.constant 0 : index
    %8 = vector.load %arg4[%7, %c0_3, %c0_4] : memref<32x32x128xf32, #tpu.memory_space<vmem>>, vector<1x32x128xf32>
    %9 = vector.shape_cast %8 : vector<1x32x128xf32> to vector<32x128xf32>
    %10 = arith.index_cast %c0_i32 : i32 to index
    %c0_5 = arith.constant 0 : index
    %c0_6 = arith.constant 0 : index
    %11 = vector.load %arg5[%10, %c0_5, %c0_6] : memref<32x32x128xf32, #tpu.memory_space<vmem>>, vector<1x32x128xf32>
    %12 = vector.shape_cast %11 : vector<1x32x128xf32> to vector<32x128xf32>
    %13 = arith.index_cast %c0_i32 : i32 to index
    %c0_7 = arith.constant 0 : index
    %c0_8 = arith.constant 0 : index
    %14 = vector.load %arg6[%13, %c0_7, %c0_8] : memref<32x32x128xf32, #tpu.memory_space<vmem>>, vector<1x32x128xf32>
    %15 = vector.shape_cast %14 : vector<1x32x128xf32> to vector<32x128xf32>
    %16 = arith.addf %3, %6 : vector<1x128xf32>
    %17 = vector.broadcast %16 : vector<1x128xf32> to vector<32x128xf32>
    %18 = arith.mulf %17, %9 : vector<32x128xf32>
    %19 = vector.broadcast %6 : vector<1x128xf32> to vector<32x128xf32>
    %20 = arith.mulf %19, %15 : vector<32x128xf32>
    %21 = arith.subf %18, %20 : vector<32x128xf32>
    %22 = arith.addf %0, %21 : vector<32x128xf32>
    %23 = vector.broadcast %3 : vector<1x128xf32> to vector<32x128xf32>
    %24 = arith.mulf %23, %12 : vector<32x128xf32>
    %25 = arith.addf %18, %24 : vector<32x128xf32>
    %26 = arith.addf %0, %25 : vector<32x128xf32>
    %c1_i32 = arith.constant 1 : i32
    %c0_9 = arith.constant 0 : index
    %27 = arith.index_cast %c1_i32 : i32 to index
    %c0_10 = arith.constant 0 : index
    %28 = vector.load %arg2[%c0_9, %27, %c0_10] : memref<1x32x128xf32, #tpu.memory_space<vmem>>, vector<1x1x128xf32>
    %29 = vector.shape_cast %28 : vector<1x1x128xf32> to vector<1x128xf32>
    %c0_11 = arith.constant 0 : index
    %30 = arith.index_cast %c1_i32 : i32 to index
    %c0_12 = arith.constant 0 : index
    %31 = vector.load %arg3[%c0_11, %30, %c0_12] : memref<1x32x128xf32, #tpu.memory_space<vmem>>, vector<1x1x128xf32>
    %32 = vector.shape_cast %31 : vector<1x1x128xf32> to vector<1x128xf32>
    %33 = arith.index_cast %c1_i32 : i32 to index
    %c0_13 = arith.constant 0 : index
    %c0_14 = arith.constant 0 : index
    %34 = vector.load %arg4[%33, %c0_13, %c0_14] : memref<32x32x128xf32, #tpu.memory_space<vmem>>, vector<1x32x128xf32>
    %35 = vector.shape_cast %34 : vector<1x32x128xf32> to vector<32x128xf32>
    %36 = arith.index_cast %c1_i32 : i32 to index
    %c0_15 = arith.constant 0 : index
    %c0_16 = arith.constant 0 : index
    %37 = vector.load %arg5[%36, %c0_15, %c0_16] : memref<32x32x128xf32, #tpu.memory_space<vmem>>, vector<1x32x128xf32>
    %38 = vector.shape_cast %37 : vector<1x32x128xf32> to vector<32x128xf32>
    %39 = arith.index_cast %c1_i32 : i32 to index
    %c0_17 = arith.constant 0 : index
    %c0_18 = arith.constant 0 : index
    %40 = vector.load %arg6[%39, %c0_17, %c0_18] : memref<32x32x128xf32, #tpu.memory_space<vmem>>, vector<1x32x128xf32>
    %41 = vector.shape_cast %40 : vector<1x32x128xf32> to vector<32x128xf32>
    %42 = arith.addf %29, %32 : vector<1x128xf32>
    %43 = vector.broadcast %42 : vector<1x128xf32> to vector<32x128xf32>
    %44 = arith.mulf %43, %35 : vector<32x128xf32>
    %45 = vector.broadcast %32 : vector<1x128xf32> to vector<32x128xf32>
    %46 = arith.mulf %45, %41 : vector<32x128xf32>
    %47 = arith.subf %44, %46 : vector<32x128xf32>
    %48 = arith.addf %22, %47 : vector<32x128xf32>
    %49 = vector.broadcast %29 : vector<1x128xf32> to vector<32x128xf32>
    %50 = arith.mulf %49, %38 : vector<32x128xf32>
    %51 = arith.addf %44, %50 : vector<32x128xf32>
    %52 = arith.addf %26, %51 : vector<32x128xf32>
    %c2_i32 = arith.constant 2 : i32
    %c0_19 = arith.constant 0 : index
    %53 = arith.index_cast %c2_i32 : i32 to index
    %c0_20 = arith.constant 0 : index
    %54 = vector.load %arg2[%c0_19, %53, %c0_20] : memref<1x32x128xf32, #tpu.memory_space<vmem>>, vector<1x1x128xf32>
    %55 = vector.shape_cast %54 : vector<1x1x128xf32> to vector<1x128xf32>
    %c0_21 = arith.constant 0 : index
    %56 = arith.index_cast %c2_i32 : i32 to index
    %c0_22 = arith.constant 0 : index
    %57 = vector.load %arg3[%c0_21, %56, %c0_22] : memref<1x32x128xf32, #tpu.memory_space<vmem>>, vector<1x1x128xf32>
    %58 = vector.shape_cast %57 : vector<1x1x128xf32> to vector<1x128xf32>
    %59 = arith.index_cast %c2_i32 : i32 to index
    %c0_23 = arith.constant 0 : index
    %c0_24 = arith.constant 0 : index
    %60 = vector.load %arg4[%59, %c0_23, %c0_24] : memref<32x32x128xf32, #tpu.memory_space<vmem>>, vector<1x32x128xf32>
    %61 = vector.shape_cast %60 : vector<1x32x128xf32> to vector<32x128xf32>
    %62 = arith.index_cast %c2_i32 : i32 to index
    %c0_25 = arith.constant 0 : index
    %c0_26 = arith.constant 0 : index
    %63 = vector.load %arg5[%62, %c0_25, %c0_26] : memref<32x32x128xf32, #tpu.memory_space<vmem>>, vector<1x32x128xf32>
    %64 = vector.shape_cast %63 : vector<1x32x128xf32> to vector<32x128xf32>
    %65 = arith.index_cast %c2_i32 : i32 to index
    %c0_27 = arith.constant 0 : index
    %c0_28 = arith.constant 0 : index
    %66 = vector.load %arg6[%65, %c0_27, %c0_28] : memref<32x32x128xf32, #tpu.memory_space<vmem>>, vector<1x32x128xf32>
    %67 = vector.shape_cast %66 : vector<1x32x128xf32> to vector<32x128xf32>
    %68 = arith.addf %55, %58 : vector<1x128xf32>
    %69 = vector.broadcast %68 : vector<1x128xf32> to vector<32x128xf32>
    %70 = arith.mulf %69, %61 : vector<32x128xf32>
    %71 = vector.broadcast %58 : vector<1x128xf32> to vector<32x128xf32>
    %72 = arith.mulf %71, %67 : vector<32x128xf32>
    %73 = arith.subf %70, %72 : vector<32x128xf32>
    %74 = arith.addf %48, %73 : vector<32x128xf32>
    %75 = vector.broadcast %55 : vector<1x128xf32> to vector<32x128xf32>
    %76 = arith.mulf %75, %64 : vector<32x128xf32>
    %77 = arith.addf %70, %76 : vector<32x128xf32>
    %78 = arith.addf %52, %77 : vector<32x128xf32>
    %c3_i32 = arith.constant 3 : i32
    %c0_29 = arith.constant 0 : index
    %79 = arith.index_cast %c3_i32 : i32 to index
    %c0_30 = arith.constant 0 : index
    %80 = vector.load %arg2[%c0_29, %79, %c0_30] : memref<1x32x128xf32, #tpu.memory_space<vmem>>, vector<1x1x128xf32>
    %81 = vector.shape_cast %80 : vector<1x1x128xf32> to vector<1x128xf32>
    %c0_31 = arith.constant 0 : index
    %82 = arith.index_cast %c3_i32 : i32 to index
    %c0_32 = arith.constant 0 : index
    %83 = vector.load %arg3[%c0_31, %82, %c0_32] : memref<1x32x128xf32, #tpu.memory_space<vmem>>, vector<1x1x128xf32>
    %84 = vector.shape_cast %83 : vector<1x1x128xf32> to vector<1x128xf32>
    %85 = arith.index_cast %c3_i32 : i32 to index
    %c0_33 = arith.constant 0 : index
    %c0_34 = arith.constant 0 : index
    %86 = vector.load %arg4[%85, %c0_33, %c0_34] : memref<32x32x128xf32, #tpu.memory_space<vmem>>, vector<1x32x128xf32>
    %87 = vector.shape_cast %86 : vector<1x32x128xf32> to vector<32x128xf32>
    %88 = arith.index_cast %c3_i32 : i32 to index
    %c0_35 = arith.constant 0 : index
    %c0_36 = arith.constant 0 : index
    %89 = vector.load %arg5[%88, %c0_35, %c0_36] : memref<32x32x128xf32, #tpu.memory_space<vmem>>, vector<1x32x128xf32>
    %90 = vector.shape_cast %89 : vector<1x32x128xf32> to vector<32x128xf32>
    %91 = arith.index_cast %c3_i32 : i32 to index
    %c0_37 = arith.constant 0 : index
    %c0_38 = arith.constant 0 : index
    %92 = vector.load %arg6[%91, %c0_37, %c0_38] : memref<32x32x128xf32, #tpu.memory_space<vmem>>, vector<1x32x128xf32>
    %93 = vector.shape_cast %92 : vector<1x32x128xf32> to vector<32x128xf32>
    %94 = arith.addf %81, %84 : vector<1x128xf32>
    %95 = vector.broadcast %94 : vector<1x128xf32> to vector<32x128xf32>
    %96 = arith.mulf %95, %87 : vector<32x128xf32>
    %97 = vector.broadcast %84 : vector<1x128xf32> to vector<32x128xf32>
    %98 = arith.mulf %97, %93 : vector<32x128xf32>
    %99 = arith.subf %96, %98 : vector<32x128xf32>
    %100 = arith.addf %74, %99 : vector<32x128xf32>
    %101 = vector.broadcast %81 : vector<1x128xf32> to vector<32x128xf32>
    %102 = arith.mulf %101, %90 : vector<32x128xf32>
    %103 = arith.addf %96, %102 : vector<32x128xf32>
    %104 = arith.addf %78, %103 : vector<32x128xf32>
    %c4_i32 = arith.constant 4 : i32
    %c0_39 = arith.constant 0 : index
    %105 = arith.index_cast %c4_i32 : i32 to index
    %c0_40 = arith.constant 0 : index
    %106 = vector.load %arg2[%c0_39, %105, %c0_40] : memref<1x32x128xf32, #tpu.memory_space<vmem>>, vector<1x1x128xf32>
    %107 = vector.shape_cast %106 : vector<1x1x128xf32> to vector<1x128xf32>
    %c0_41 = arith.constant 0 : index
    %108 = arith.index_cast %c4_i32 : i32 to index
    %c0_42 = arith.constant 0 : index
    %109 = vector.load %arg3[%c0_41, %108, %c0_42] : memref<1x32x128xf32, #tpu.memory_space<vmem>>, vector<1x1x128xf32>
    %110 = vector.shape_cast %109 : vector<1x1x128xf32> to vector<1x128xf32>
    %111 = arith.index_cast %c4_i32 : i32 to index
    %c0_43 = arith.constant 0 : index
    %c0_44 = arith.constant 0 : index
    %112 = vector.load %arg4[%111, %c0_43, %c0_44] : memref<32x32x128xf32, #tpu.memory_space<vmem>>, vector<1x32x128xf32>
    %113 = vector.shape_cast %112 : vector<1x32x128xf32> to vector<32x128xf32>
    %114 = arith.index_cast %c4_i32 : i32 to index
    %c0_45 = arith.constant 0 : index
    %c0_46 = arith.constant 0 : index
    %115 = vector.load %arg5[%114, %c0_45, %c0_46] : memref<32x32x128xf32, #tpu.memory_space<vmem>>, vector<1x32x128xf32>
    %116 = vector.shape_cast %115 : vector<1x32x128xf32> to vector<32x128xf32>
    %117 = arith.index_cast %c4_i32 : i32 to index
    %c0_47 = arith.constant 0 : index
    %c0_48 = arith.constant 0 : index
    %118 = vector.load %arg6[%117, %c0_47, %c0_48] : memref<32x32x128xf32, #tpu.memory_space<vmem>>, vector<1x32x128xf32>
    %119 = vector.shape_cast %118 : vector<1x32x128xf32> to vector<32x128xf32>
    %120 = arith.addf %107, %110 : vector<1x128xf32>
    %121 = vector.broadcast %120 : vector<1x128xf32> to vector<32x128xf32>
    %122 = arith.mulf %121, %113 : vector<32x128xf32>
    %123 = vector.broadcast %110 : vector<1x128xf32> to vector<32x128xf32>
    %124 = arith.mulf %123, %119 : vector<32x128xf32>
    %125 = arith.subf %122, %124 : vector<32x128xf32>
    %126 = arith.addf %100, %125 : vector<32x128xf32>
    %127 = vector.broadcast %107 : vector<1x128xf32> to vector<32x128xf32>
    %128 = arith.mulf %127, %116 : vector<32x128xf32>
    %129 = arith.addf %122, %128 : vector<32x128xf32>
    %130 = arith.addf %104, %129 : vector<32x128xf32>
    %c5_i32 = arith.constant 5 : i32
    %c0_49 = arith.constant 0 : index
    %131 = arith.index_cast %c5_i32 : i32 to index
    %c0_50 = arith.constant 0 : index
    %132 = vector.load %arg2[%c0_49, %131, %c0_50] : memref<1x32x128xf32, #tpu.memory_space<vmem>>, vector<1x1x128xf32>
    %133 = vector.shape_cast %132 : vector<1x1x128xf32> to vector<1x128xf32>
    %c0_51 = arith.constant 0 : index
    %134 = arith.index_cast %c5_i32 : i32 to index
    %c0_52 = arith.constant 0 : index
    %135 = vector.load %arg3[%c0_51, %134, %c0_52] : memref<1x32x128xf32, #tpu.memory_space<vmem>>, vector<1x1x128xf32>
    %136 = vector.shape_cast %135 : vector<1x1x128xf32> to vector<1x128xf32>
    %137 = arith.index_cast %c5_i32 : i32 to index
    %c0_53 = arith.constant 0 : index
    %c0_54 = arith.constant 0 : index
    %138 = vector.load %arg4[%137, %c0_53, %c0_54] : memref<32x32x128xf32, #tpu.memory_space<vmem>>, vector<1x32x128xf32>
    %139 = vector.shape_cast %138 : vector<1x32x128xf32> to vector<32x128xf32>
    %140 = arith.index_cast %c5_i32 : i32 to index
    %c0_55 = arith.constant 0 : index
    %c0_56 = arith.constant 0 : index
    %141 = vector.load %arg5[%140, %c0_55, %c0_56] : memref<32x32x128xf32, #tpu.memory_space<vmem>>, vector<1x32x128xf32>
    %142 = vector.shape_cast %141 : vector<1x32x128xf32> to vector<32x128xf32>
    %143 = arith.index_cast %c5_i32 : i32 to index
    %c0_57 = arith.constant 0 : index
    %c0_58 = arith.constant 0 : index
    %144 = vector.load %arg6[%143, %c0_57, %c0_58] : memref<32x32x128xf32, #tpu.memory_space<vmem>>, vector<1x32x128xf32>
    %145 = vector.shape_cast %144 : vector<1x32x128xf32> to vector<32x128xf32>
    %146 = arith.addf %133, %136 : vector<1x128xf32>
    %147 = vector.broadcast %146 : vector<1x128xf32> to vector<32x128xf32>
    %148 = arith.mulf %147, %139 : vector<32x128xf32>
    %149 = vector.broadcast %136 : vector<1x128xf32> to vector<32x128xf32>
    %150 = arith.mulf %149, %145 : vector<32x128xf32>
    %151 = arith.subf %148, %150 : vector<32x128xf32>
    %152 = arith.addf %126, %151 : vector<32x128xf32>
    %153 = vector.broadcast %133 : vector<1x128xf32> to vector<32x128xf32>
    %154 = arith.mulf %153, %142 : vector<32x128xf32>
    %155 = arith.addf %148, %154 : vector<32x128xf32>
    %156 = arith.addf %130, %155 : vector<32x128xf32>
    %c6_i32 = arith.constant 6 : i32
    %c0_59 = arith.constant 0 : index
    %157 = arith.index_cast %c6_i32 : i32 to index
    %c0_60 = arith.constant 0 : index
    %158 = vector.load %arg2[%c0_59, %157, %c0_60] : memref<1x32x128xf32, #tpu.memory_space<vmem>>, vector<1x1x128xf32>
    %159 = vector.shape_cast %158 : vector<1x1x128xf32> to vector<1x128xf32>
    %c0_61 = arith.constant 0 : index
    %160 = arith.index_cast %c6_i32 : i32 to index
    %c0_62 = arith.constant 0 : index
    %161 = vector.load %arg3[%c0_61, %160, %c0_62] : memref<1x32x128xf32, #tpu.memory_space<vmem>>, vector<1x1x128xf32>
    %162 = vector.shape_cast %161 : vector<1x1x128xf32> to vector<1x128xf32>
    %163 = arith.index_cast %c6_i32 : i32 to index
    %c0_63 = arith.constant 0 : index
    %c0_64 = arith.constant 0 : index
    %164 = vector.load %arg4[%163, %c0_63, %c0_64] : memref<32x32x128xf32, #tpu.memory_space<vmem>>, vector<1x32x128xf32>
    %165 = vector.shape_cast %164 : vector<1x32x128xf32> to vector<32x128xf32>
    %166 = arith.index_cast %c6_i32 : i32 to index
    %c0_65 = arith.constant 0 : index
    %c0_66 = arith.constant 0 : index
    %167 = vector.load %arg5[%166, %c0_65, %c0_66] : memref<32x32x128xf32, #tpu.memory_space<vmem>>, vector<1x32x128xf32>
    %168 = vector.shape_cast %167 : vector<1x32x128xf32> to vector<32x128xf32>
    %169 = arith.index_cast %c6_i32 : i32 to index
    %c0_67 = arith.constant 0 : index
    %c0_68 = arith.constant 0 : index
    %170 = vector.load %arg6[%169, %c0_67, %c0_68] : memref<32x32x128xf32, #tpu.memory_space<vmem>>, vector<1x32x128xf32>
    %171 = vector.shape_cast %170 : vector<1x32x128xf32> to vector<32x128xf32>
    %172 = arith.addf %159, %162 : vector<1x128xf32>
    %173 = vector.broadcast %172 : vector<1x128xf32> to vector<32x128xf32>
    %174 = arith.mulf %173, %165 : vector<32x128xf32>
    %175 = vector.broadcast %162 : vector<1x128xf32> to vector<32x128xf32>
    %176 = arith.mulf %175, %171 : vector<32x128xf32>
    %177 = arith.subf %174, %176 : vector<32x128xf32>
    %178 = arith.addf %152, %177 : vector<32x128xf32>
    %179 = vector.broadcast %159 : vector<1x128xf32> to vector<32x128xf32>
    %180 = arith.mulf %179, %168 : vector<32x128xf32>
    %181 = arith.addf %174, %180 : vector<32x128xf32>
    %182 = arith.addf %156, %181 : vector<32x128xf32>
    %c7_i32 = arith.constant 7 : i32
    %c0_69 = arith.constant 0 : index
    %183 = arith.index_cast %c7_i32 : i32 to index
    %c0_70 = arith.constant 0 : index
    %184 = vector.load %arg2[%c0_69, %183, %c0_70] : memref<1x32x128xf32, #tpu.memory_space<vmem>>, vector<1x1x128xf32>
    %185 = vector.shape_cast %184 : vector<1x1x128xf32> to vector<1x128xf32>
    %c0_71 = arith.constant 0 : index
    %186 = arith.index_cast %c7_i32 : i32 to index
    %c0_72 = arith.constant 0 : index
    %187 = vector.load %arg3[%c0_71, %186, %c0_72] : memref<1x32x128xf32, #tpu.memory_space<vmem>>, vector<1x1x128xf32>
    %188 = vector.shape_cast %187 : vector<1x1x128xf32> to vector<1x128xf32>
    %189 = arith.index_cast %c7_i32 : i32 to index
    %c0_73 = arith.constant 0 : index
    %c0_74 = arith.constant 0 : index
    %190 = vector.load %arg4[%189, %c0_73, %c0_74] : memref<32x32x128xf32, #tpu.memory_space<vmem>>, vector<1x32x128xf32>
    %191 = vector.shape_cast %190 : vector<1x32x128xf32> to vector<32x128xf32>
    %192 = arith.index_cast %c7_i32 : i32 to index
    %c0_75 = arith.constant 0 : index
    %c0_76 = arith.constant 0 : index
    %193 = vector.load %arg5[%192, %c0_75, %c0_76] : memref<32x32x128xf32, #tpu.memory_space<vmem>>, vector<1x32x128xf32>
    %194 = vector.shape_cast %193 : vector<1x32x128xf32> to vector<32x128xf32>
    %195 = arith.index_cast %c7_i32 : i32 to index
    %c0_77 = arith.constant 0 : index
    %c0_78 = arith.constant 0 : index
    %196 = vector.load %arg6[%195, %c0_77, %c0_78] : memref<32x32x128xf32, #tpu.memory_space<vmem>>, vector<1x32x128xf32>
    %197 = vector.shape_cast %196 : vector<1x32x128xf32> to vector<32x128xf32>
    %198 = arith.addf %185, %188 : vector<1x128xf32>
    %199 = vector.broadcast %198 : vector<1x128xf32> to vector<32x128xf32>
    %200 = arith.mulf %199, %191 : vector<32x128xf32>
    %201 = vector.broadcast %188 : vector<1x128xf32> to vector<32x128xf32>
    %202 = arith.mulf %201, %197 : vector<32x128xf32>
    %203 = arith.subf %200, %202 : vector<32x128xf32>
    %204 = arith.addf %178, %203 : vector<32x128xf32>
    %205 = vector.broadcast %185 : vector<1x128xf32> to vector<32x128xf32>
    %206 = arith.mulf %205, %194 : vector<32x128xf32>
    %207 = arith.addf %200, %206 : vector<32x128xf32>
    %208 = arith.addf %182, %207 : vector<32x128xf32>
    %c8_i32 = arith.constant 8 : i32
    %c0_79 = arith.constant 0 : index
    %209 = arith.index_cast %c8_i32 : i32 to index
    %c0_80 = arith.constant 0 : index
    %210 = vector.load %arg2[%c0_79, %209, %c0_80] : memref<1x32x128xf32, #tpu.memory_space<vmem>>, vector<1x1x128xf32>
    %211 = vector.shape_cast %210 : vector<1x1x128xf32> to vector<1x128xf32>
    %c0_81 = arith.constant 0 : index
    %212 = arith.index_cast %c8_i32 : i32 to index
    %c0_82 = arith.constant 0 : index
    %213 = vector.load %arg3[%c0_81, %212, %c0_82] : memref<1x32x128xf32, #tpu.memory_space<vmem>>, vector<1x1x128xf32>
    %214 = vector.shape_cast %213 : vector<1x1x128xf32> to vector<1x128xf32>
    %215 = arith.index_cast %c8_i32 : i32 to index
    %c0_83 = arith.constant 0 : index
    %c0_84 = arith.constant 0 : index
    %216 = vector.load %arg4[%215, %c0_83, %c0_84] : memref<32x32x128xf32, #tpu.memory_space<vmem>>, vector<1x32x128xf32>
    %217 = vector.shape_cast %216 : vector<1x32x128xf32> to vector<32x128xf32>
    %218 = arith.index_cast %c8_i32 : i32 to index
    %c0_85 = arith.constant 0 : index
    %c0_86 = arith.constant 0 : index
    %219 = vector.load %arg5[%218, %c0_85, %c0_86] : memref<32x32x128xf32, #tpu.memory_space<vmem>>, vector<1x32x128xf32>
    %220 = vector.shape_cast %219 : vector<1x32x128xf32> to vector<32x128xf32>
    %221 = arith.index_cast %c8_i32 : i32 to index
    %c0_87 = arith.constant 0 : index
    %c0_88 = arith.constant 0 : index
    %222 = vector.load %arg6[%221, %c0_87, %c0_88] : memref<32x32x128xf32, #tpu.memory_space<vmem>>, vector<1x32x128xf32>
    %223 = vector.shape_cast %222 : vector<1x32x128xf32> to vector<32x128xf32>
    %224 = arith.addf %211, %214 : vector<1x128xf32>
    %225 = vector.broadcast %224 : vector<1x128xf32> to vector<32x128xf32>
    %226 = arith.mulf %225, %217 : vector<32x128xf32>
    %227 = vector.broadcast %214 : vector<1x128xf32> to vector<32x128xf32>
    %228 = arith.mulf %227, %223 : vector<32x128xf32>
    %229 = arith.subf %226, %228 : vector<32x128xf32>
    %230 = arith.addf %204, %229 : vector<32x128xf32>
    %231 = vector.broadcast %211 : vector<1x128xf32> to vector<32x128xf32>
    %232 = arith.mulf %231, %220 : vector<32x128xf32>
    %233 = arith.addf %226, %232 : vector<32x128xf32>
    %234 = arith.addf %208, %233 : vector<32x128xf32>
    %c9_i32 = arith.constant 9 : i32
    %c0_89 = arith.constant 0 : index
    %235 = arith.index_cast %c9_i32 : i32 to index
    %c0_90 = arith.constant 0 : index
    %236 = vector.load %arg2[%c0_89, %235, %c0_90] : memref<1x32x128xf32, #tpu.memory_space<vmem>>, vector<1x1x128xf32>
    %237 = vector.shape_cast %236 : vector<1x1x128xf32> to vector<1x128xf32>
    %c0_91 = arith.constant 0 : index
    %238 = arith.index_cast %c9_i32 : i32 to index
    %c0_92 = arith.constant 0 : index
    %239 = vector.load %arg3[%c0_91, %238, %c0_92] : memref<1x32x128xf32, #tpu.memory_space<vmem>>, vector<1x1x128xf32>
    %240 = vector.shape_cast %239 : vector<1x1x128xf32> to vector<1x128xf32>
    %241 = arith.index_cast %c9_i32 : i32 to index
    %c0_93 = arith.constant 0 : index
    %c0_94 = arith.constant 0 : index
    %242 = vector.load %arg4[%241, %c0_93, %c0_94] : memref<32x32x128xf32, #tpu.memory_space<vmem>>, vector<1x32x128xf32>
    %243 = vector.shape_cast %242 : vector<1x32x128xf32> to vector<32x128xf32>
    %244 = arith.index_cast %c9_i32 : i32 to index
    %c0_95 = arith.constant 0 : index
    %c0_96 = arith.constant 0 : index
    %245 = vector.load %arg5[%244, %c0_95, %c0_96] : memref<32x32x128xf32, #tpu.memory_space<vmem>>, vector<1x32x128xf32>
    %246 = vector.shape_cast %245 : vector<1x32x128xf32> to vector<32x128xf32>
    %247 = arith.index_cast %c9_i32 : i32 to index
    %c0_97 = arith.constant 0 : index
    %c0_98 = arith.constant 0 : index
    %248 = vector.load %arg6[%247, %c0_97, %c0_98] : memref<32x32x128xf32, #tpu.memory_space<vmem>>, vector<1x32x128xf32>
    %249 = vector.shape_cast %248 : vector<1x32x128xf32> to vector<32x128xf32>
    %250 = arith.addf %237, %240 : vector<1x128xf32>
    %251 = vector.broadcast %250 : vector<1x128xf32> to vector<32x128xf32>
    %252 = arith.mulf %251, %243 : vector<32x128xf32>
    %253 = vector.broadcast %240 : vector<1x128xf32> to vector<32x128xf32>
    %254 = arith.mulf %253, %249 : vector<32x128xf32>
    %255 = arith.subf %252, %254 : vector<32x128xf32>
    %256 = arith.addf %230, %255 : vector<32x128xf32>
    %257 = vector.broadcast %237 : vector<1x128xf32> to vector<32x128xf32>
    %258 = arith.mulf %257, %246 : vector<32x128xf32>
    %259 = arith.addf %252, %258 : vector<32x128xf32>
    %260 = arith.addf %234, %259 : vector<32x128xf32>
    %c10_i32 = arith.constant 10 : i32
    %c0_99 = arith.constant 0 : index
    %261 = arith.index_cast %c10_i32 : i32 to index
    %c0_100 = arith.constant 0 : index
    %262 = vector.load %arg2[%c0_99, %261, %c0_100] : memref<1x32x128xf32, #tpu.memory_space<vmem>>, vector<1x1x128xf32>
    %263 = vector.shape_cast %262 : vector<1x1x128xf32> to vector<1x128xf32>
    %c0_101 = arith.constant 0 : index
    %264 = arith.index_cast %c10_i32 : i32 to index
    %c0_102 = arith.constant 0 : index
    %265 = vector.load %arg3[%c0_101, %264, %c0_102] : memref<1x32x128xf32, #tpu.memory_space<vmem>>, vector<1x1x128xf32>
    %266 = vector.shape_cast %265 : vector<1x1x128xf32> to vector<1x128xf32>
    %267 = arith.index_cast %c10_i32 : i32 to index
    %c0_103 = arith.constant 0 : index
    %c0_104 = arith.constant 0 : index
    %268 = vector.load %arg4[%267, %c0_103, %c0_104] : memref<32x32x128xf32, #tpu.memory_space<vmem>>, vector<1x32x128xf32>
    %269 = vector.shape_cast %268 : vector<1x32x128xf32> to vector<32x128xf32>
    %270 = arith.index_cast %c10_i32 : i32 to index
    %c0_105 = arith.constant 0 : index
    %c0_106 = arith.constant 0 : index
    %271 = vector.load %arg5[%270, %c0_105, %c0_106] : memref<32x32x128xf32, #tpu.memory_space<vmem>>, vector<1x32x128xf32>
    %272 = vector.shape_cast %271 : vector<1x32x128xf32> to vector<32x128xf32>
    %273 = arith.index_cast %c10_i32 : i32 to index
    %c0_107 = arith.constant 0 : index
    %c0_108 = arith.constant 0 : index
    %274 = vector.load %arg6[%273, %c0_107, %c0_108] : memref<32x32x128xf32, #tpu.memory_space<vmem>>, vector<1x32x128xf32>
    %275 = vector.shape_cast %274 : vector<1x32x128xf32> to vector<32x128xf32>
    %276 = arith.addf %263, %266 : vector<1x128xf32>
    %277 = vector.broadcast %276 : vector<1x128xf32> to vector<32x128xf32>
    %278 = arith.mulf %277, %269 : vector<32x128xf32>
    %279 = vector.broadcast %266 : vector<1x128xf32> to vector<32x128xf32>
    %280 = arith.mulf %279, %275 : vector<32x128xf32>
    %281 = arith.subf %278, %280 : vector<32x128xf32>
    %282 = arith.addf %256, %281 : vector<32x128xf32>
    %283 = vector.broadcast %263 : vector<1x128xf32> to vector<32x128xf32>
    %284 = arith.mulf %283, %272 : vector<32x128xf32>
    %285 = arith.addf %278, %284 : vector<32x128xf32>
    %286 = arith.addf %260, %285 : vector<32x128xf32>
    %c11_i32 = arith.constant 11 : i32
    %c0_109 = arith.constant 0 : index
    %287 = arith.index_cast %c11_i32 : i32 to index
    %c0_110 = arith.constant 0 : index
    %288 = vector.load %arg2[%c0_109, %287, %c0_110] : memref<1x32x128xf32, #tpu.memory_space<vmem>>, vector<1x1x128xf32>
    %289 = vector.shape_cast %288 : vector<1x1x128xf32> to vector<1x128xf32>
    %c0_111 = arith.constant 0 : index
    %290 = arith.index_cast %c11_i32 : i32 to index
    %c0_112 = arith.constant 0 : index
    %291 = vector.load %arg3[%c0_111, %290, %c0_112] : memref<1x32x128xf32, #tpu.memory_space<vmem>>, vector<1x1x128xf32>
    %292 = vector.shape_cast %291 : vector<1x1x128xf32> to vector<1x128xf32>
    %293 = arith.index_cast %c11_i32 : i32 to index
    %c0_113 = arith.constant 0 : index
    %c0_114 = arith.constant 0 : index
    %294 = vector.load %arg4[%293, %c0_113, %c0_114] : memref<32x32x128xf32, #tpu.memory_space<vmem>>, vector<1x32x128xf32>
    %295 = vector.shape_cast %294 : vector<1x32x128xf32> to vector<32x128xf32>
    %296 = arith.index_cast %c11_i32 : i32 to index
    %c0_115 = arith.constant 0 : index
    %c0_116 = arith.constant 0 : index
    %297 = vector.load %arg5[%296, %c0_115, %c0_116] : memref<32x32x128xf32, #tpu.memory_space<vmem>>, vector<1x32x128xf32>
    %298 = vector.shape_cast %297 : vector<1x32x128xf32> to vector<32x128xf32>
    %299 = arith.index_cast %c11_i32 : i32 to index
    %c0_117 = arith.constant 0 : index
    %c0_118 = arith.constant 0 : index
    %300 = vector.load %arg6[%299, %c0_117, %c0_118] : memref<32x32x128xf32, #tpu.memory_space<vmem>>, vector<1x32x128xf32>
    %301 = vector.shape_cast %300 : vector<1x32x128xf32> to vector<32x128xf32>
    %302 = arith.addf %289, %292 : vector<1x128xf32>
    %303 = vector.broadcast %302 : vector<1x128xf32> to vector<32x128xf32>
    %304 = arith.mulf %303, %295 : vector<32x128xf32>
    %305 = vector.broadcast %292 : vector<1x128xf32> to vector<32x128xf32>
    %306 = arith.mulf %305, %301 : vector<32x128xf32>
    %307 = arith.subf %304, %306 : vector<32x128xf32>
    %308 = arith.addf %282, %307 : vector<32x128xf32>
    %309 = vector.broadcast %289 : vector<1x128xf32> to vector<32x128xf32>
    %310 = arith.mulf %309, %298 : vector<32x128xf32>
    %311 = arith.addf %304, %310 : vector<32x128xf32>
    %312 = arith.addf %286, %311 : vector<32x128xf32>
    %c12_i32 = arith.constant 12 : i32
    %c0_119 = arith.constant 0 : index
    %313 = arith.index_cast %c12_i32 : i32 to index
    %c0_120 = arith.constant 0 : index
    %314 = vector.load %arg2[%c0_119, %313, %c0_120] : memref<1x32x128xf32, #tpu.memory_space<vmem>>, vector<1x1x128xf32>
    %315 = vector.shape_cast %314 : vector<1x1x128xf32> to vector<1x128xf32>
    %c0_121 = arith.constant 0 : index
    %316 = arith.index_cast %c12_i32 : i32 to index
    %c0_122 = arith.constant 0 : index
    %317 = vector.load %arg3[%c0_121, %316, %c0_122] : memref<1x32x128xf32, #tpu.memory_space<vmem>>, vector<1x1x128xf32>
    %318 = vector.shape_cast %317 : vector<1x1x128xf32> to vector<1x128xf32>
    %319 = arith.index_cast %c12_i32 : i32 to index
    %c0_123 = arith.constant 0 : index
    %c0_124 = arith.constant 0 : index
    %320 = vector.load %arg4[%319, %c0_123, %c0_124] : memref<32x32x128xf32, #tpu.memory_space<vmem>>, vector<1x32x128xf32>
    %321 = vector.shape_cast %320 : vector<1x32x128xf32> to vector<32x128xf32>
    %322 = arith.index_cast %c12_i32 : i32 to index
    %c0_125 = arith.constant 0 : index
    %c0_126 = arith.constant 0 : index
    %323 = vector.load %arg5[%322, %c0_125, %c0_126] : memref<32x32x128xf32, #tpu.memory_space<vmem>>, vector<1x32x128xf32>
    %324 = vector.shape_cast %323 : vector<1x32x128xf32> to vector<32x128xf32>
    %325 = arith.index_cast %c12_i32 : i32 to index
    %c0_127 = arith.constant 0 : index
    %c0_128 = arith.constant 0 : index
    %326 = vector.load %arg6[%325, %c0_127, %c0_128] : memref<32x32x128xf32, #tpu.memory_space<vmem>>, vector<1x32x128xf32>
    %327 = vector.shape_cast %326 : vector<1x32x128xf32> to vector<32x128xf32>
    %328 = arith.addf %315, %318 : vector<1x128xf32>
    %329 = vector.broadcast %328 : vector<1x128xf32> to vector<32x128xf32>
    %330 = arith.mulf %329, %321 : vector<32x128xf32>
    %331 = vector.broadcast %318 : vector<1x128xf32> to vector<32x128xf32>
    %332 = arith.mulf %331, %327 : vector<32x128xf32>
    %333 = arith.subf %330, %332 : vector<32x128xf32>
    %334 = arith.addf %308, %333 : vector<32x128xf32>
    %335 = vector.broadcast %315 : vector<1x128xf32> to vector<32x128xf32>
    %336 = arith.mulf %335, %324 : vector<32x128xf32>
    %337 = arith.addf %330, %336 : vector<32x128xf32>
    %338 = arith.addf %312, %337 : vector<32x128xf32>
    %c13_i32 = arith.constant 13 : i32
    %c0_129 = arith.constant 0 : index
    %339 = arith.index_cast %c13_i32 : i32 to index
    %c0_130 = arith.constant 0 : index
    %340 = vector.load %arg2[%c0_129, %339, %c0_130] : memref<1x32x128xf32, #tpu.memory_space<vmem>>, vector<1x1x128xf32>
    %341 = vector.shape_cast %340 : vector<1x1x128xf32> to vector<1x128xf32>
    %c0_131 = arith.constant 0 : index
    %342 = arith.index_cast %c13_i32 : i32 to index
    %c0_132 = arith.constant 0 : index
    %343 = vector.load %arg3[%c0_131, %342, %c0_132] : memref<1x32x128xf32, #tpu.memory_space<vmem>>, vector<1x1x128xf32>
    %344 = vector.shape_cast %343 : vector<1x1x128xf32> to vector<1x128xf32>
    %345 = arith.index_cast %c13_i32 : i32 to index
    %c0_133 = arith.constant 0 : index
    %c0_134 = arith.constant 0 : index
    %346 = vector.load %arg4[%345, %c0_133, %c0_134] : memref<32x32x128xf32, #tpu.memory_space<vmem>>, vector<1x32x128xf32>
    %347 = vector.shape_cast %346 : vector<1x32x128xf32> to vector<32x128xf32>
    %348 = arith.index_cast %c13_i32 : i32 to index
    %c0_135 = arith.constant 0 : index
    %c0_136 = arith.constant 0 : index
    %349 = vector.load %arg5[%348, %c0_135, %c0_136] : memref<32x32x128xf32, #tpu.memory_space<vmem>>, vector<1x32x128xf32>
    %350 = vector.shape_cast %349 : vector<1x32x128xf32> to vector<32x128xf32>
    %351 = arith.index_cast %c13_i32 : i32 to index
    %c0_137 = arith.constant 0 : index
    %c0_138 = arith.constant 0 : index
    %352 = vector.load %arg6[%351, %c0_137, %c0_138] : memref<32x32x128xf32, #tpu.memory_space<vmem>>, vector<1x32x128xf32>
    %353 = vector.shape_cast %352 : vector<1x32x128xf32> to vector<32x128xf32>
    %354 = arith.addf %341, %344 : vector<1x128xf32>
    %355 = vector.broadcast %354 : vector<1x128xf32> to vector<32x128xf32>
    %356 = arith.mulf %355, %347 : vector<32x128xf32>
    %357 = vector.broadcast %344 : vector<1x128xf32> to vector<32x128xf32>
    %358 = arith.mulf %357, %353 : vector<32x128xf32>
    %359 = arith.subf %356, %358 : vector<32x128xf32>
    %360 = arith.addf %334, %359 : vector<32x128xf32>
    %361 = vector.broadcast %341 : vector<1x128xf32> to vector<32x128xf32>
    %362 = arith.mulf %361, %350 : vector<32x128xf32>
    %363 = arith.addf %356, %362 : vector<32x128xf32>
    %364 = arith.addf %338, %363 : vector<32x128xf32>
    %c14_i32 = arith.constant 14 : i32
    %c0_139 = arith.constant 0 : index
    %365 = arith.index_cast %c14_i32 : i32 to index
    %c0_140 = arith.constant 0 : index
    %366 = vector.load %arg2[%c0_139, %365, %c0_140] : memref<1x32x128xf32, #tpu.memory_space<vmem>>, vector<1x1x128xf32>
    %367 = vector.shape_cast %366 : vector<1x1x128xf32> to vector<1x128xf32>
    %c0_141 = arith.constant 0 : index
    %368 = arith.index_cast %c14_i32 : i32 to index
    %c0_142 = arith.constant 0 : index
    %369 = vector.load %arg3[%c0_141, %368, %c0_142] : memref<1x32x128xf32, #tpu.memory_space<vmem>>, vector<1x1x128xf32>
    %370 = vector.shape_cast %369 : vector<1x1x128xf32> to vector<1x128xf32>
    %371 = arith.index_cast %c14_i32 : i32 to index
    %c0_143 = arith.constant 0 : index
    %c0_144 = arith.constant 0 : index
    %372 = vector.load %arg4[%371, %c0_143, %c0_144] : memref<32x32x128xf32, #tpu.memory_space<vmem>>, vector<1x32x128xf32>
    %373 = vector.shape_cast %372 : vector<1x32x128xf32> to vector<32x128xf32>
    %374 = arith.index_cast %c14_i32 : i32 to index
    %c0_145 = arith.constant 0 : index
    %c0_146 = arith.constant 0 : index
    %375 = vector.load %arg5[%374, %c0_145, %c0_146] : memref<32x32x128xf32, #tpu.memory_space<vmem>>, vector<1x32x128xf32>
    %376 = vector.shape_cast %375 : vector<1x32x128xf32> to vector<32x128xf32>
    %377 = arith.index_cast %c14_i32 : i32 to index
    %c0_147 = arith.constant 0 : index
    %c0_148 = arith.constant 0 : index
    %378 = vector.load %arg6[%377, %c0_147, %c0_148] : memref<32x32x128xf32, #tpu.memory_space<vmem>>, vector<1x32x128xf32>
    %379 = vector.shape_cast %378 : vector<1x32x128xf32> to vector<32x128xf32>
    %380 = arith.addf %367, %370 : vector<1x128xf32>
    %381 = vector.broadcast %380 : vector<1x128xf32> to vector<32x128xf32>
    %382 = arith.mulf %381, %373 : vector<32x128xf32>
    %383 = vector.broadcast %370 : vector<1x128xf32> to vector<32x128xf32>
    %384 = arith.mulf %383, %379 : vector<32x128xf32>
    %385 = arith.subf %382, %384 : vector<32x128xf32>
    %386 = arith.addf %360, %385 : vector<32x128xf32>
    %387 = vector.broadcast %367 : vector<1x128xf32> to vector<32x128xf32>
    %388 = arith.mulf %387, %376 : vector<32x128xf32>
    %389 = arith.addf %382, %388 : vector<32x128xf32>
    %390 = arith.addf %364, %389 : vector<32x128xf32>
    %c15_i32 = arith.constant 15 : i32
    %c0_149 = arith.constant 0 : index
    %391 = arith.index_cast %c15_i32 : i32 to index
    %c0_150 = arith.constant 0 : index
    %392 = vector.load %arg2[%c0_149, %391, %c0_150] : memref<1x32x128xf32, #tpu.memory_space<vmem>>, vector<1x1x128xf32>
    %393 = vector.shape_cast %392 : vector<1x1x128xf32> to vector<1x128xf32>
    %c0_151 = arith.constant 0 : index
    %394 = arith.index_cast %c15_i32 : i32 to index
    %c0_152 = arith.constant 0 : index
    %395 = vector.load %arg3[%c0_151, %394, %c0_152] : memref<1x32x128xf32, #tpu.memory_space<vmem>>, vector<1x1x128xf32>
    %396 = vector.shape_cast %395 : vector<1x1x128xf32> to vector<1x128xf32>
    %397 = arith.index_cast %c15_i32 : i32 to index
    %c0_153 = arith.constant 0 : index
    %c0_154 = arith.constant 0 : index
    %398 = vector.load %arg4[%397, %c0_153, %c0_154] : memref<32x32x128xf32, #tpu.memory_space<vmem>>, vector<1x32x128xf32>
    %399 = vector.shape_cast %398 : vector<1x32x128xf32> to vector<32x128xf32>
    %400 = arith.index_cast %c15_i32 : i32 to index
    %c0_155 = arith.constant 0 : index
    %c0_156 = arith.constant 0 : index
    %401 = vector.load %arg5[%400, %c0_155, %c0_156] : memref<32x32x128xf32, #tpu.memory_space<vmem>>, vector<1x32x128xf32>
    %402 = vector.shape_cast %401 : vector<1x32x128xf32> to vector<32x128xf32>
    %403 = arith.index_cast %c15_i32 : i32 to index
    %c0_157 = arith.constant 0 : index
    %c0_158 = arith.constant 0 : index
    %404 = vector.load %arg6[%403, %c0_157, %c0_158] : memref<32x32x128xf32, #tpu.memory_space<vmem>>, vector<1x32x128xf32>
    %405 = vector.shape_cast %404 : vector<1x32x128xf32> to vector<32x128xf32>
    %406 = arith.addf %393, %396 : vector<1x128xf32>
    %407 = vector.broadcast %406 : vector<1x128xf32> to vector<32x128xf32>
    %408 = arith.mulf %407, %399 : vector<32x128xf32>
    %409 = vector.broadcast %396 : vector<1x128xf32> to vector<32x128xf32>
    %410 = arith.mulf %409, %405 : vector<32x128xf32>
    %411 = arith.subf %408, %410 : vector<32x128xf32>
    %412 = arith.addf %386, %411 : vector<32x128xf32>
    %413 = vector.broadcast %393 : vector<1x128xf32> to vector<32x128xf32>
    %414 = arith.mulf %413, %402 : vector<32x128xf32>
    %415 = arith.addf %408, %414 : vector<32x128xf32>
    %416 = arith.addf %390, %415 : vector<32x128xf32>
    %c16_i32 = arith.constant 16 : i32
    %c0_159 = arith.constant 0 : index
    %417 = arith.index_cast %c16_i32 : i32 to index
    %c0_160 = arith.constant 0 : index
    %418 = vector.load %arg2[%c0_159, %417, %c0_160] : memref<1x32x128xf32, #tpu.memory_space<vmem>>, vector<1x1x128xf32>
    %419 = vector.shape_cast %418 : vector<1x1x128xf32> to vector<1x128xf32>
    %c0_161 = arith.constant 0 : index
    %420 = arith.index_cast %c16_i32 : i32 to index
    %c0_162 = arith.constant 0 : index
    %421 = vector.load %arg3[%c0_161, %420, %c0_162] : memref<1x32x128xf32, #tpu.memory_space<vmem>>, vector<1x1x128xf32>
    %422 = vector.shape_cast %421 : vector<1x1x128xf32> to vector<1x128xf32>
    %423 = arith.index_cast %c16_i32 : i32 to index
    %c0_163 = arith.constant 0 : index
    %c0_164 = arith.constant 0 : index
    %424 = vector.load %arg4[%423, %c0_163, %c0_164] : memref<32x32x128xf32, #tpu.memory_space<vmem>>, vector<1x32x128xf32>
    %425 = vector.shape_cast %424 : vector<1x32x128xf32> to vector<32x128xf32>
    %426 = arith.index_cast %c16_i32 : i32 to index
    %c0_165 = arith.constant 0 : index
    %c0_166 = arith.constant 0 : index
    %427 = vector.load %arg5[%426, %c0_165, %c0_166] : memref<32x32x128xf32, #tpu.memory_space<vmem>>, vector<1x32x128xf32>
    %428 = vector.shape_cast %427 : vector<1x32x128xf32> to vector<32x128xf32>
    %429 = arith.index_cast %c16_i32 : i32 to index
    %c0_167 = arith.constant 0 : index
    %c0_168 = arith.constant 0 : index
    %430 = vector.load %arg6[%429, %c0_167, %c0_168] : memref<32x32x128xf32, #tpu.memory_space<vmem>>, vector<1x32x128xf32>
    %431 = vector.shape_cast %430 : vector<1x32x128xf32> to vector<32x128xf32>
    %432 = arith.addf %419, %422 : vector<1x128xf32>
    %433 = vector.broadcast %432 : vector<1x128xf32> to vector<32x128xf32>
    %434 = arith.mulf %433, %425 : vector<32x128xf32>
    %435 = vector.broadcast %422 : vector<1x128xf32> to vector<32x128xf32>
    %436 = arith.mulf %435, %431 : vector<32x128xf32>
    %437 = arith.subf %434, %436 : vector<32x128xf32>
    %438 = arith.addf %412, %437 : vector<32x128xf32>
    %439 = vector.broadcast %419 : vector<1x128xf32> to vector<32x128xf32>
    %440 = arith.mulf %439, %428 : vector<32x128xf32>
    %441 = arith.addf %434, %440 : vector<32x128xf32>
    %442 = arith.addf %416, %441 : vector<32x128xf32>
    %c17_i32 = arith.constant 17 : i32
    %c0_169 = arith.constant 0 : index
    %443 = arith.index_cast %c17_i32 : i32 to index
    %c0_170 = arith.constant 0 : index
    %444 = vector.load %arg2[%c0_169, %443, %c0_170] : memref<1x32x128xf32, #tpu.memory_space<vmem>>, vector<1x1x128xf32>
    %445 = vector.shape_cast %444 : vector<1x1x128xf32> to vector<1x128xf32>
    %c0_171 = arith.constant 0 : index
    %446 = arith.index_cast %c17_i32 : i32 to index
    %c0_172 = arith.constant 0 : index
    %447 = vector.load %arg3[%c0_171, %446, %c0_172] : memref<1x32x128xf32, #tpu.memory_space<vmem>>, vector<1x1x128xf32>
    %448 = vector.shape_cast %447 : vector<1x1x128xf32> to vector<1x128xf32>
    %449 = arith.index_cast %c17_i32 : i32 to index
    %c0_173 = arith.constant 0 : index
    %c0_174 = arith.constant 0 : index
    %450 = vector.load %arg4[%449, %c0_173, %c0_174] : memref<32x32x128xf32, #tpu.memory_space<vmem>>, vector<1x32x128xf32>
    %451 = vector.shape_cast %450 : vector<1x32x128xf32> to vector<32x128xf32>
    %452 = arith.index_cast %c17_i32 : i32 to index
    %c0_175 = arith.constant 0 : index
    %c0_176 = arith.constant 0 : index
    %453 = vector.load %arg5[%452, %c0_175, %c0_176] : memref<32x32x128xf32, #tpu.memory_space<vmem>>, vector<1x32x128xf32>
    %454 = vector.shape_cast %453 : vector<1x32x128xf32> to vector<32x128xf32>
    %455 = arith.index_cast %c17_i32 : i32 to index
    %c0_177 = arith.constant 0 : index
    %c0_178 = arith.constant 0 : index
    %456 = vector.load %arg6[%455, %c0_177, %c0_178] : memref<32x32x128xf32, #tpu.memory_space<vmem>>, vector<1x32x128xf32>
    %457 = vector.shape_cast %456 : vector<1x32x128xf32> to vector<32x128xf32>
    %458 = arith.addf %445, %448 : vector<1x128xf32>
    %459 = vector.broadcast %458 : vector<1x128xf32> to vector<32x128xf32>
    %460 = arith.mulf %459, %451 : vector<32x128xf32>
    %461 = vector.broadcast %448 : vector<1x128xf32> to vector<32x128xf32>
    %462 = arith.mulf %461, %457 : vector<32x128xf32>
    %463 = arith.subf %460, %462 : vector<32x128xf32>
    %464 = arith.addf %438, %463 : vector<32x128xf32>
    %465 = vector.broadcast %445 : vector<1x128xf32> to vector<32x128xf32>
    %466 = arith.mulf %465, %454 : vector<32x128xf32>
    %467 = arith.addf %460, %466 : vector<32x128xf32>
    %468 = arith.addf %442, %467 : vector<32x128xf32>
    %c18_i32 = arith.constant 18 : i32
    %c0_179 = arith.constant 0 : index
    %469 = arith.index_cast %c18_i32 : i32 to index
    %c0_180 = arith.constant 0 : index
    %470 = vector.load %arg2[%c0_179, %469, %c0_180] : memref<1x32x128xf32, #tpu.memory_space<vmem>>, vector<1x1x128xf32>
    %471 = vector.shape_cast %470 : vector<1x1x128xf32> to vector<1x128xf32>
    %c0_181 = arith.constant 0 : index
    %472 = arith.index_cast %c18_i32 : i32 to index
    %c0_182 = arith.constant 0 : index
    %473 = vector.load %arg3[%c0_181, %472, %c0_182] : memref<1x32x128xf32, #tpu.memory_space<vmem>>, vector<1x1x128xf32>
    %474 = vector.shape_cast %473 : vector<1x1x128xf32> to vector<1x128xf32>
    %475 = arith.index_cast %c18_i32 : i32 to index
    %c0_183 = arith.constant 0 : index
    %c0_184 = arith.constant 0 : index
    %476 = vector.load %arg4[%475, %c0_183, %c0_184] : memref<32x32x128xf32, #tpu.memory_space<vmem>>, vector<1x32x128xf32>
    %477 = vector.shape_cast %476 : vector<1x32x128xf32> to vector<32x128xf32>
    %478 = arith.index_cast %c18_i32 : i32 to index
    %c0_185 = arith.constant 0 : index
    %c0_186 = arith.constant 0 : index
    %479 = vector.load %arg5[%478, %c0_185, %c0_186] : memref<32x32x128xf32, #tpu.memory_space<vmem>>, vector<1x32x128xf32>
    %480 = vector.shape_cast %479 : vector<1x32x128xf32> to vector<32x128xf32>
    %481 = arith.index_cast %c18_i32 : i32 to index
    %c0_187 = arith.constant 0 : index
    %c0_188 = arith.constant 0 : index
    %482 = vector.load %arg6[%481, %c0_187, %c0_188] : memref<32x32x128xf32, #tpu.memory_space<vmem>>, vector<1x32x128xf32>
    %483 = vector.shape_cast %482 : vector<1x32x128xf32> to vector<32x128xf32>
    %484 = arith.addf %471, %474 : vector<1x128xf32>
    %485 = vector.broadcast %484 : vector<1x128xf32> to vector<32x128xf32>
    %486 = arith.mulf %485, %477 : vector<32x128xf32>
    %487 = vector.broadcast %474 : vector<1x128xf32> to vector<32x128xf32>
    %488 = arith.mulf %487, %483 : vector<32x128xf32>
    %489 = arith.subf %486, %488 : vector<32x128xf32>
    %490 = arith.addf %464, %489 : vector<32x128xf32>
    %491 = vector.broadcast %471 : vector<1x128xf32> to vector<32x128xf32>
    %492 = arith.mulf %491, %480 : vector<32x128xf32>
    %493 = arith.addf %486, %492 : vector<32x128xf32>
    %494 = arith.addf %468, %493 : vector<32x128xf32>
    %c19_i32 = arith.constant 19 : i32
    %c0_189 = arith.constant 0 : index
    %495 = arith.index_cast %c19_i32 : i32 to index
    %c0_190 = arith.constant 0 : index
    %496 = vector.load %arg2[%c0_189, %495, %c0_190] : memref<1x32x128xf32, #tpu.memory_space<vmem>>, vector<1x1x128xf32>
    %497 = vector.shape_cast %496 : vector<1x1x128xf32> to vector<1x128xf32>
    %c0_191 = arith.constant 0 : index
    %498 = arith.index_cast %c19_i32 : i32 to index
    %c0_192 = arith.constant 0 : index
    %499 = vector.load %arg3[%c0_191, %498, %c0_192] : memref<1x32x128xf32, #tpu.memory_space<vmem>>, vector<1x1x128xf32>
    %500 = vector.shape_cast %499 : vector<1x1x128xf32> to vector<1x128xf32>
    %501 = arith.index_cast %c19_i32 : i32 to index
    %c0_193 = arith.constant 0 : index
    %c0_194 = arith.constant 0 : index
    %502 = vector.load %arg4[%501, %c0_193, %c0_194] : memref<32x32x128xf32, #tpu.memory_space<vmem>>, vector<1x32x128xf32>
    %503 = vector.shape_cast %502 : vector<1x32x128xf32> to vector<32x128xf32>
    %504 = arith.index_cast %c19_i32 : i32 to index
    %c0_195 = arith.constant 0 : index
    %c0_196 = arith.constant 0 : index
    %505 = vector.load %arg5[%504, %c0_195, %c0_196] : memref<32x32x128xf32, #tpu.memory_space<vmem>>, vector<1x32x128xf32>
    %506 = vector.shape_cast %505 : vector<1x32x128xf32> to vector<32x128xf32>
    %507 = arith.index_cast %c19_i32 : i32 to index
    %c0_197 = arith.constant 0 : index
    %c0_198 = arith.constant 0 : index
    %508 = vector.load %arg6[%507, %c0_197, %c0_198] : memref<32x32x128xf32, #tpu.memory_space<vmem>>, vector<1x32x128xf32>
    %509 = vector.shape_cast %508 : vector<1x32x128xf32> to vector<32x128xf32>
    %510 = arith.addf %497, %500 : vector<1x128xf32>
    %511 = vector.broadcast %510 : vector<1x128xf32> to vector<32x128xf32>
    %512 = arith.mulf %511, %503 : vector<32x128xf32>
    %513 = vector.broadcast %500 : vector<1x128xf32> to vector<32x128xf32>
    %514 = arith.mulf %513, %509 : vector<32x128xf32>
    %515 = arith.subf %512, %514 : vector<32x128xf32>
    %516 = arith.addf %490, %515 : vector<32x128xf32>
    %517 = vector.broadcast %497 : vector<1x128xf32> to vector<32x128xf32>
    %518 = arith.mulf %517, %506 : vector<32x128xf32>
    %519 = arith.addf %512, %518 : vector<32x128xf32>
    %520 = arith.addf %494, %519 : vector<32x128xf32>
    %c20_i32 = arith.constant 20 : i32
    %c0_199 = arith.constant 0 : index
    %521 = arith.index_cast %c20_i32 : i32 to index
    %c0_200 = arith.constant 0 : index
    %522 = vector.load %arg2[%c0_199, %521, %c0_200] : memref<1x32x128xf32, #tpu.memory_space<vmem>>, vector<1x1x128xf32>
    %523 = vector.shape_cast %522 : vector<1x1x128xf32> to vector<1x128xf32>
    %c0_201 = arith.constant 0 : index
    %524 = arith.index_cast %c20_i32 : i32 to index
    %c0_202 = arith.constant 0 : index
    %525 = vector.load %arg3[%c0_201, %524, %c0_202] : memref<1x32x128xf32, #tpu.memory_space<vmem>>, vector<1x1x128xf32>
    %526 = vector.shape_cast %525 : vector<1x1x128xf32> to vector<1x128xf32>
    %527 = arith.index_cast %c20_i32 : i32 to index
    %c0_203 = arith.constant 0 : index
    %c0_204 = arith.constant 0 : index
    %528 = vector.load %arg4[%527, %c0_203, %c0_204] : memref<32x32x128xf32, #tpu.memory_space<vmem>>, vector<1x32x128xf32>
    %529 = vector.shape_cast %528 : vector<1x32x128xf32> to vector<32x128xf32>
    %530 = arith.index_cast %c20_i32 : i32 to index
    %c0_205 = arith.constant 0 : index
    %c0_206 = arith.constant 0 : index
    %531 = vector.load %arg5[%530, %c0_205, %c0_206] : memref<32x32x128xf32, #tpu.memory_space<vmem>>, vector<1x32x128xf32>
    %532 = vector.shape_cast %531 : vector<1x32x128xf32> to vector<32x128xf32>
    %533 = arith.index_cast %c20_i32 : i32 to index
    %c0_207 = arith.constant 0 : index
    %c0_208 = arith.constant 0 : index
    %534 = vector.load %arg6[%533, %c0_207, %c0_208] : memref<32x32x128xf32, #tpu.memory_space<vmem>>, vector<1x32x128xf32>
    %535 = vector.shape_cast %534 : vector<1x32x128xf32> to vector<32x128xf32>
    %536 = arith.addf %523, %526 : vector<1x128xf32>
    %537 = vector.broadcast %536 : vector<1x128xf32> to vector<32x128xf32>
    %538 = arith.mulf %537, %529 : vector<32x128xf32>
    %539 = vector.broadcast %526 : vector<1x128xf32> to vector<32x128xf32>
    %540 = arith.mulf %539, %535 : vector<32x128xf32>
    %541 = arith.subf %538, %540 : vector<32x128xf32>
    %542 = arith.addf %516, %541 : vector<32x128xf32>
    %543 = vector.broadcast %523 : vector<1x128xf32> to vector<32x128xf32>
    %544 = arith.mulf %543, %532 : vector<32x128xf32>
    %545 = arith.addf %538, %544 : vector<32x128xf32>
    %546 = arith.addf %520, %545 : vector<32x128xf32>
    %c21_i32 = arith.constant 21 : i32
    %c0_209 = arith.constant 0 : index
    %547 = arith.index_cast %c21_i32 : i32 to index
    %c0_210 = arith.constant 0 : index
    %548 = vector.load %arg2[%c0_209, %547, %c0_210] : memref<1x32x128xf32, #tpu.memory_space<vmem>>, vector<1x1x128xf32>
    %549 = vector.shape_cast %548 : vector<1x1x128xf32> to vector<1x128xf32>
    %c0_211 = arith.constant 0 : index
    %550 = arith.index_cast %c21_i32 : i32 to index
    %c0_212 = arith.constant 0 : index
    %551 = vector.load %arg3[%c0_211, %550, %c0_212] : memref<1x32x128xf32, #tpu.memory_space<vmem>>, vector<1x1x128xf32>
    %552 = vector.shape_cast %551 : vector<1x1x128xf32> to vector<1x128xf32>
    %553 = arith.index_cast %c21_i32 : i32 to index
    %c0_213 = arith.constant 0 : index
    %c0_214 = arith.constant 0 : index
    %554 = vector.load %arg4[%553, %c0_213, %c0_214] : memref<32x32x128xf32, #tpu.memory_space<vmem>>, vector<1x32x128xf32>
    %555 = vector.shape_cast %554 : vector<1x32x128xf32> to vector<32x128xf32>
    %556 = arith.index_cast %c21_i32 : i32 to index
    %c0_215 = arith.constant 0 : index
    %c0_216 = arith.constant 0 : index
    %557 = vector.load %arg5[%556, %c0_215, %c0_216] : memref<32x32x128xf32, #tpu.memory_space<vmem>>, vector<1x32x128xf32>
    %558 = vector.shape_cast %557 : vector<1x32x128xf32> to vector<32x128xf32>
    %559 = arith.index_cast %c21_i32 : i32 to index
    %c0_217 = arith.constant 0 : index
    %c0_218 = arith.constant 0 : index
    %560 = vector.load %arg6[%559, %c0_217, %c0_218] : memref<32x32x128xf32, #tpu.memory_space<vmem>>, vector<1x32x128xf32>
    %561 = vector.shape_cast %560 : vector<1x32x128xf32> to vector<32x128xf32>
    %562 = arith.addf %549, %552 : vector<1x128xf32>
    %563 = vector.broadcast %562 : vector<1x128xf32> to vector<32x128xf32>
    %564 = arith.mulf %563, %555 : vector<32x128xf32>
    %565 = vector.broadcast %552 : vector<1x128xf32> to vector<32x128xf32>
    %566 = arith.mulf %565, %561 : vector<32x128xf32>
    %567 = arith.subf %564, %566 : vector<32x128xf32>
    %568 = arith.addf %542, %567 : vector<32x128xf32>
    %569 = vector.broadcast %549 : vector<1x128xf32> to vector<32x128xf32>
    %570 = arith.mulf %569, %558 : vector<32x128xf32>
    %571 = arith.addf %564, %570 : vector<32x128xf32>
    %572 = arith.addf %546, %571 : vector<32x128xf32>
    %c22_i32 = arith.constant 22 : i32
    %c0_219 = arith.constant 0 : index
    %573 = arith.index_cast %c22_i32 : i32 to index
    %c0_220 = arith.constant 0 : index
    %574 = vector.load %arg2[%c0_219, %573, %c0_220] : memref<1x32x128xf32, #tpu.memory_space<vmem>>, vector<1x1x128xf32>
    %575 = vector.shape_cast %574 : vector<1x1x128xf32> to vector<1x128xf32>
    %c0_221 = arith.constant 0 : index
    %576 = arith.index_cast %c22_i32 : i32 to index
    %c0_222 = arith.constant 0 : index
    %577 = vector.load %arg3[%c0_221, %576, %c0_222] : memref<1x32x128xf32, #tpu.memory_space<vmem>>, vector<1x1x128xf32>
    %578 = vector.shape_cast %577 : vector<1x1x128xf32> to vector<1x128xf32>
    %579 = arith.index_cast %c22_i32 : i32 to index
    %c0_223 = arith.constant 0 : index
    %c0_224 = arith.constant 0 : index
    %580 = vector.load %arg4[%579, %c0_223, %c0_224] : memref<32x32x128xf32, #tpu.memory_space<vmem>>, vector<1x32x128xf32>
    %581 = vector.shape_cast %580 : vector<1x32x128xf32> to vector<32x128xf32>
    %582 = arith.index_cast %c22_i32 : i32 to index
    %c0_225 = arith.constant 0 : index
    %c0_226 = arith.constant 0 : index
    %583 = vector.load %arg5[%582, %c0_225, %c0_226] : memref<32x32x128xf32, #tpu.memory_space<vmem>>, vector<1x32x128xf32>
    %584 = vector.shape_cast %583 : vector<1x32x128xf32> to vector<32x128xf32>
    %585 = arith.index_cast %c22_i32 : i32 to index
    %c0_227 = arith.constant 0 : index
    %c0_228 = arith.constant 0 : index
    %586 = vector.load %arg6[%585, %c0_227, %c0_228] : memref<32x32x128xf32, #tpu.memory_space<vmem>>, vector<1x32x128xf32>
    %587 = vector.shape_cast %586 : vector<1x32x128xf32> to vector<32x128xf32>
    %588 = arith.addf %575, %578 : vector<1x128xf32>
    %589 = vector.broadcast %588 : vector<1x128xf32> to vector<32x128xf32>
    %590 = arith.mulf %589, %581 : vector<32x128xf32>
    %591 = vector.broadcast %578 : vector<1x128xf32> to vector<32x128xf32>
    %592 = arith.mulf %591, %587 : vector<32x128xf32>
    %593 = arith.subf %590, %592 : vector<32x128xf32>
    %594 = arith.addf %568, %593 : vector<32x128xf32>
    %595 = vector.broadcast %575 : vector<1x128xf32> to vector<32x128xf32>
    %596 = arith.mulf %595, %584 : vector<32x128xf32>
    %597 = arith.addf %590, %596 : vector<32x128xf32>
    %598 = arith.addf %572, %597 : vector<32x128xf32>
    %c23_i32 = arith.constant 23 : i32
    %c0_229 = arith.constant 0 : index
    %599 = arith.index_cast %c23_i32 : i32 to index
    %c0_230 = arith.constant 0 : index
    %600 = vector.load %arg2[%c0_229, %599, %c0_230] : memref<1x32x128xf32, #tpu.memory_space<vmem>>, vector<1x1x128xf32>
    %601 = vector.shape_cast %600 : vector<1x1x128xf32> to vector<1x128xf32>
    %c0_231 = arith.constant 0 : index
    %602 = arith.index_cast %c23_i32 : i32 to index
    %c0_232 = arith.constant 0 : index
    %603 = vector.load %arg3[%c0_231, %602, %c0_232] : memref<1x32x128xf32, #tpu.memory_space<vmem>>, vector<1x1x128xf32>
    %604 = vector.shape_cast %603 : vector<1x1x128xf32> to vector<1x128xf32>
    %605 = arith.index_cast %c23_i32 : i32 to index
    %c0_233 = arith.constant 0 : index
    %c0_234 = arith.constant 0 : index
    %606 = vector.load %arg4[%605, %c0_233, %c0_234] : memref<32x32x128xf32, #tpu.memory_space<vmem>>, vector<1x32x128xf32>
    %607 = vector.shape_cast %606 : vector<1x32x128xf32> to vector<32x128xf32>
    %608 = arith.index_cast %c23_i32 : i32 to index
    %c0_235 = arith.constant 0 : index
    %c0_236 = arith.constant 0 : index
    %609 = vector.load %arg5[%608, %c0_235, %c0_236] : memref<32x32x128xf32, #tpu.memory_space<vmem>>, vector<1x32x128xf32>
    %610 = vector.shape_cast %609 : vector<1x32x128xf32> to vector<32x128xf32>
    %611 = arith.index_cast %c23_i32 : i32 to index
    %c0_237 = arith.constant 0 : index
    %c0_238 = arith.constant 0 : index
    %612 = vector.load %arg6[%611, %c0_237, %c0_238] : memref<32x32x128xf32, #tpu.memory_space<vmem>>, vector<1x32x128xf32>
    %613 = vector.shape_cast %612 : vector<1x32x128xf32> to vector<32x128xf32>
    %614 = arith.addf %601, %604 : vector<1x128xf32>
    %615 = vector.broadcast %614 : vector<1x128xf32> to vector<32x128xf32>
    %616 = arith.mulf %615, %607 : vector<32x128xf32>
    %617 = vector.broadcast %604 : vector<1x128xf32> to vector<32x128xf32>
    %618 = arith.mulf %617, %613 : vector<32x128xf32>
    %619 = arith.subf %616, %618 : vector<32x128xf32>
    %620 = arith.addf %594, %619 : vector<32x128xf32>
    %621 = vector.broadcast %601 : vector<1x128xf32> to vector<32x128xf32>
    %622 = arith.mulf %621, %610 : vector<32x128xf32>
    %623 = arith.addf %616, %622 : vector<32x128xf32>
    %624 = arith.addf %598, %623 : vector<32x128xf32>
    %c24_i32 = arith.constant 24 : i32
    %c0_239 = arith.constant 0 : index
    %625 = arith.index_cast %c24_i32 : i32 to index
    %c0_240 = arith.constant 0 : index
    %626 = vector.load %arg2[%c0_239, %625, %c0_240] : memref<1x32x128xf32, #tpu.memory_space<vmem>>, vector<1x1x128xf32>
    %627 = vector.shape_cast %626 : vector<1x1x128xf32> to vector<1x128xf32>
    %c0_241 = arith.constant 0 : index
    %628 = arith.index_cast %c24_i32 : i32 to index
    %c0_242 = arith.constant 0 : index
    %629 = vector.load %arg3[%c0_241, %628, %c0_242] : memref<1x32x128xf32, #tpu.memory_space<vmem>>, vector<1x1x128xf32>
    %630 = vector.shape_cast %629 : vector<1x1x128xf32> to vector<1x128xf32>
    %631 = arith.index_cast %c24_i32 : i32 to index
    %c0_243 = arith.constant 0 : index
    %c0_244 = arith.constant 0 : index
    %632 = vector.load %arg4[%631, %c0_243, %c0_244] : memref<32x32x128xf32, #tpu.memory_space<vmem>>, vector<1x32x128xf32>
    %633 = vector.shape_cast %632 : vector<1x32x128xf32> to vector<32x128xf32>
    %634 = arith.index_cast %c24_i32 : i32 to index
    %c0_245 = arith.constant 0 : index
    %c0_246 = arith.constant 0 : index
    %635 = vector.load %arg5[%634, %c0_245, %c0_246] : memref<32x32x128xf32, #tpu.memory_space<vmem>>, vector<1x32x128xf32>
    %636 = vector.shape_cast %635 : vector<1x32x128xf32> to vector<32x128xf32>
    %637 = arith.index_cast %c24_i32 : i32 to index
    %c0_247 = arith.constant 0 : index
    %c0_248 = arith.constant 0 : index
    %638 = vector.load %arg6[%637, %c0_247, %c0_248] : memref<32x32x128xf32, #tpu.memory_space<vmem>>, vector<1x32x128xf32>
    %639 = vector.shape_cast %638 : vector<1x32x128xf32> to vector<32x128xf32>
    %640 = arith.addf %627, %630 : vector<1x128xf32>
    %641 = vector.broadcast %640 : vector<1x128xf32> to vector<32x128xf32>
    %642 = arith.mulf %641, %633 : vector<32x128xf32>
    %643 = vector.broadcast %630 : vector<1x128xf32> to vector<32x128xf32>
    %644 = arith.mulf %643, %639 : vector<32x128xf32>
    %645 = arith.subf %642, %644 : vector<32x128xf32>
    %646 = arith.addf %620, %645 : vector<32x128xf32>
    %647 = vector.broadcast %627 : vector<1x128xf32> to vector<32x128xf32>
    %648 = arith.mulf %647, %636 : vector<32x128xf32>
    %649 = arith.addf %642, %648 : vector<32x128xf32>
    %650 = arith.addf %624, %649 : vector<32x128xf32>
    %c25_i32 = arith.constant 25 : i32
    %c0_249 = arith.constant 0 : index
    %651 = arith.index_cast %c25_i32 : i32 to index
    %c0_250 = arith.constant 0 : index
    %652 = vector.load %arg2[%c0_249, %651, %c0_250] : memref<1x32x128xf32, #tpu.memory_space<vmem>>, vector<1x1x128xf32>
    %653 = vector.shape_cast %652 : vector<1x1x128xf32> to vector<1x128xf32>
    %c0_251 = arith.constant 0 : index
    %654 = arith.index_cast %c25_i32 : i32 to index
    %c0_252 = arith.constant 0 : index
    %655 = vector.load %arg3[%c0_251, %654, %c0_252] : memref<1x32x128xf32, #tpu.memory_space<vmem>>, vector<1x1x128xf32>
    %656 = vector.shape_cast %655 : vector<1x1x128xf32> to vector<1x128xf32>
    %657 = arith.index_cast %c25_i32 : i32 to index
    %c0_253 = arith.constant 0 : index
    %c0_254 = arith.constant 0 : index
    %658 = vector.load %arg4[%657, %c0_253, %c0_254] : memref<32x32x128xf32, #tpu.memory_space<vmem>>, vector<1x32x128xf32>
    %659 = vector.shape_cast %658 : vector<1x32x128xf32> to vector<32x128xf32>
    %660 = arith.index_cast %c25_i32 : i32 to index
    %c0_255 = arith.constant 0 : index
    %c0_256 = arith.constant 0 : index
    %661 = vector.load %arg5[%660, %c0_255, %c0_256] : memref<32x32x128xf32, #tpu.memory_space<vmem>>, vector<1x32x128xf32>
    %662 = vector.shape_cast %661 : vector<1x32x128xf32> to vector<32x128xf32>
    %663 = arith.index_cast %c25_i32 : i32 to index
    %c0_257 = arith.constant 0 : index
    %c0_258 = arith.constant 0 : index
    %664 = vector.load %arg6[%663, %c0_257, %c0_258] : memref<32x32x128xf32, #tpu.memory_space<vmem>>, vector<1x32x128xf32>
    %665 = vector.shape_cast %664 : vector<1x32x128xf32> to vector<32x128xf32>
    %666 = arith.addf %653, %656 : vector<1x128xf32>
    %667 = vector.broadcast %666 : vector<1x128xf32> to vector<32x128xf32>
    %668 = arith.mulf %667, %659 : vector<32x128xf32>
    %669 = vector.broadcast %656 : vector<1x128xf32> to vector<32x128xf32>
    %670 = arith.mulf %669, %665 : vector<32x128xf32>
    %671 = arith.subf %668, %670 : vector<32x128xf32>
    %672 = arith.addf %646, %671 : vector<32x128xf32>
    %673 = vector.broadcast %653 : vector<1x128xf32> to vector<32x128xf32>
    %674 = arith.mulf %673, %662 : vector<32x128xf32>
    %675 = arith.addf %668, %674 : vector<32x128xf32>
    %676 = arith.addf %650, %675 : vector<32x128xf32>
    %c26_i32 = arith.constant 26 : i32
    %c0_259 = arith.constant 0 : index
    %677 = arith.index_cast %c26_i32 : i32 to index
    %c0_260 = arith.constant 0 : index
    %678 = vector.load %arg2[%c0_259, %677, %c0_260] : memref<1x32x128xf32, #tpu.memory_space<vmem>>, vector<1x1x128xf32>
    %679 = vector.shape_cast %678 : vector<1x1x128xf32> to vector<1x128xf32>
    %c0_261 = arith.constant 0 : index
    %680 = arith.index_cast %c26_i32 : i32 to index
    %c0_262 = arith.constant 0 : index
    %681 = vector.load %arg3[%c0_261, %680, %c0_262] : memref<1x32x128xf32, #tpu.memory_space<vmem>>, vector<1x1x128xf32>
    %682 = vector.shape_cast %681 : vector<1x1x128xf32> to vector<1x128xf32>
    %683 = arith.index_cast %c26_i32 : i32 to index
    %c0_263 = arith.constant 0 : index
    %c0_264 = arith.constant 0 : index
    %684 = vector.load %arg4[%683, %c0_263, %c0_264] : memref<32x32x128xf32, #tpu.memory_space<vmem>>, vector<1x32x128xf32>
    %685 = vector.shape_cast %684 : vector<1x32x128xf32> to vector<32x128xf32>
    %686 = arith.index_cast %c26_i32 : i32 to index
    %c0_265 = arith.constant 0 : index
    %c0_266 = arith.constant 0 : index
    %687 = vector.load %arg5[%686, %c0_265, %c0_266] : memref<32x32x128xf32, #tpu.memory_space<vmem>>, vector<1x32x128xf32>
    %688 = vector.shape_cast %687 : vector<1x32x128xf32> to vector<32x128xf32>
    %689 = arith.index_cast %c26_i32 : i32 to index
    %c0_267 = arith.constant 0 : index
    %c0_268 = arith.constant 0 : index
    %690 = vector.load %arg6[%689, %c0_267, %c0_268] : memref<32x32x128xf32, #tpu.memory_space<vmem>>, vector<1x32x128xf32>
    %691 = vector.shape_cast %690 : vector<1x32x128xf32> to vector<32x128xf32>
    %692 = arith.addf %679, %682 : vector<1x128xf32>
    %693 = vector.broadcast %692 : vector<1x128xf32> to vector<32x128xf32>
    %694 = arith.mulf %693, %685 : vector<32x128xf32>
    %695 = vector.broadcast %682 : vector<1x128xf32> to vector<32x128xf32>
    %696 = arith.mulf %695, %691 : vector<32x128xf32>
    %697 = arith.subf %694, %696 : vector<32x128xf32>
    %698 = arith.addf %672, %697 : vector<32x128xf32>
    %699 = vector.broadcast %679 : vector<1x128xf32> to vector<32x128xf32>
    %700 = arith.mulf %699, %688 : vector<32x128xf32>
    %701 = arith.addf %694, %700 : vector<32x128xf32>
    %702 = arith.addf %676, %701 : vector<32x128xf32>
    %c27_i32 = arith.constant 27 : i32
    %c0_269 = arith.constant 0 : index
    %703 = arith.index_cast %c27_i32 : i32 to index
    %c0_270 = arith.constant 0 : index
    %704 = vector.load %arg2[%c0_269, %703, %c0_270] : memref<1x32x128xf32, #tpu.memory_space<vmem>>, vector<1x1x128xf32>
    %705 = vector.shape_cast %704 : vector<1x1x128xf32> to vector<1x128xf32>
    %c0_271 = arith.constant 0 : index
    %706 = arith.index_cast %c27_i32 : i32 to index
    %c0_272 = arith.constant 0 : index
    %707 = vector.load %arg3[%c0_271, %706, %c0_272] : memref<1x32x128xf32, #tpu.memory_space<vmem>>, vector<1x1x128xf32>
    %708 = vector.shape_cast %707 : vector<1x1x128xf32> to vector<1x128xf32>
    %709 = arith.index_cast %c27_i32 : i32 to index
    %c0_273 = arith.constant 0 : index
    %c0_274 = arith.constant 0 : index
    %710 = vector.load %arg4[%709, %c0_273, %c0_274] : memref<32x32x128xf32, #tpu.memory_space<vmem>>, vector<1x32x128xf32>
    %711 = vector.shape_cast %710 : vector<1x32x128xf32> to vector<32x128xf32>
    %712 = arith.index_cast %c27_i32 : i32 to index
    %c0_275 = arith.constant 0 : index
    %c0_276 = arith.constant 0 : index
    %713 = vector.load %arg5[%712, %c0_275, %c0_276] : memref<32x32x128xf32, #tpu.memory_space<vmem>>, vector<1x32x128xf32>
    %714 = vector.shape_cast %713 : vector<1x32x128xf32> to vector<32x128xf32>
    %715 = arith.index_cast %c27_i32 : i32 to index
    %c0_277 = arith.constant 0 : index
    %c0_278 = arith.constant 0 : index
    %716 = vector.load %arg6[%715, %c0_277, %c0_278] : memref<32x32x128xf32, #tpu.memory_space<vmem>>, vector<1x32x128xf32>
    %717 = vector.shape_cast %716 : vector<1x32x128xf32> to vector<32x128xf32>
    %718 = arith.addf %705, %708 : vector<1x128xf32>
    %719 = vector.broadcast %718 : vector<1x128xf32> to vector<32x128xf32>
    %720 = arith.mulf %719, %711 : vector<32x128xf32>
    %721 = vector.broadcast %708 : vector<1x128xf32> to vector<32x128xf32>
    %722 = arith.mulf %721, %717 : vector<32x128xf32>
    %723 = arith.subf %720, %722 : vector<32x128xf32>
    %724 = arith.addf %698, %723 : vector<32x128xf32>
    %725 = vector.broadcast %705 : vector<1x128xf32> to vector<32x128xf32>
    %726 = arith.mulf %725, %714 : vector<32x128xf32>
    %727 = arith.addf %720, %726 : vector<32x128xf32>
    %728 = arith.addf %702, %727 : vector<32x128xf32>
    %c28_i32 = arith.constant 28 : i32
    %c0_279 = arith.constant 0 : index
    %729 = arith.index_cast %c28_i32 : i32 to index
    %c0_280 = arith.constant 0 : index
    %730 = vector.load %arg2[%c0_279, %729, %c0_280] : memref<1x32x128xf32, #tpu.memory_space<vmem>>, vector<1x1x128xf32>
    %731 = vector.shape_cast %730 : vector<1x1x128xf32> to vector<1x128xf32>
    %c0_281 = arith.constant 0 : index
    %732 = arith.index_cast %c28_i32 : i32 to index
    %c0_282 = arith.constant 0 : index
    %733 = vector.load %arg3[%c0_281, %732, %c0_282] : memref<1x32x128xf32, #tpu.memory_space<vmem>>, vector<1x1x128xf32>
    %734 = vector.shape_cast %733 : vector<1x1x128xf32> to vector<1x128xf32>
    %735 = arith.index_cast %c28_i32 : i32 to index
    %c0_283 = arith.constant 0 : index
    %c0_284 = arith.constant 0 : index
    %736 = vector.load %arg4[%735, %c0_283, %c0_284] : memref<32x32x128xf32, #tpu.memory_space<vmem>>, vector<1x32x128xf32>
    %737 = vector.shape_cast %736 : vector<1x32x128xf32> to vector<32x128xf32>
    %738 = arith.index_cast %c28_i32 : i32 to index
    %c0_285 = arith.constant 0 : index
    %c0_286 = arith.constant 0 : index
    %739 = vector.load %arg5[%738, %c0_285, %c0_286] : memref<32x32x128xf32, #tpu.memory_space<vmem>>, vector<1x32x128xf32>
    %740 = vector.shape_cast %739 : vector<1x32x128xf32> to vector<32x128xf32>
    %741 = arith.index_cast %c28_i32 : i32 to index
    %c0_287 = arith.constant 0 : index
    %c0_288 = arith.constant 0 : index
    %742 = vector.load %arg6[%741, %c0_287, %c0_288] : memref<32x32x128xf32, #tpu.memory_space<vmem>>, vector<1x32x128xf32>
    %743 = vector.shape_cast %742 : vector<1x32x128xf32> to vector<32x128xf32>
    %744 = arith.addf %731, %734 : vector<1x128xf32>
    %745 = vector.broadcast %744 : vector<1x128xf32> to vector<32x128xf32>
    %746 = arith.mulf %745, %737 : vector<32x128xf32>
    %747 = vector.broadcast %734 : vector<1x128xf32> to vector<32x128xf32>
    %748 = arith.mulf %747, %743 : vector<32x128xf32>
    %749 = arith.subf %746, %748 : vector<32x128xf32>
    %750 = arith.addf %724, %749 : vector<32x128xf32>
    %751 = vector.broadcast %731 : vector<1x128xf32> to vector<32x128xf32>
    %752 = arith.mulf %751, %740 : vector<32x128xf32>
    %753 = arith.addf %746, %752 : vector<32x128xf32>
    %754 = arith.addf %728, %753 : vector<32x128xf32>
    %c29_i32 = arith.constant 29 : i32
    %c0_289 = arith.constant 0 : index
    %755 = arith.index_cast %c29_i32 : i32 to index
    %c0_290 = arith.constant 0 : index
    %756 = vector.load %arg2[%c0_289, %755, %c0_290] : memref<1x32x128xf32, #tpu.memory_space<vmem>>, vector<1x1x128xf32>
    %757 = vector.shape_cast %756 : vector<1x1x128xf32> to vector<1x128xf32>
    %c0_291 = arith.constant 0 : index
    %758 = arith.index_cast %c29_i32 : i32 to index
    %c0_292 = arith.constant 0 : index
    %759 = vector.load %arg3[%c0_291, %758, %c0_292] : memref<1x32x128xf32, #tpu.memory_space<vmem>>, vector<1x1x128xf32>
    %760 = vector.shape_cast %759 : vector<1x1x128xf32> to vector<1x128xf32>
    %761 = arith.index_cast %c29_i32 : i32 to index
    %c0_293 = arith.constant 0 : index
    %c0_294 = arith.constant 0 : index
    %762 = vector.load %arg4[%761, %c0_293, %c0_294] : memref<32x32x128xf32, #tpu.memory_space<vmem>>, vector<1x32x128xf32>
    %763 = vector.shape_cast %762 : vector<1x32x128xf32> to vector<32x128xf32>
    %764 = arith.index_cast %c29_i32 : i32 to index
    %c0_295 = arith.constant 0 : index
    %c0_296 = arith.constant 0 : index
    %765 = vector.load %arg5[%764, %c0_295, %c0_296] : memref<32x32x128xf32, #tpu.memory_space<vmem>>, vector<1x32x128xf32>
    %766 = vector.shape_cast %765 : vector<1x32x128xf32> to vector<32x128xf32>
    %767 = arith.index_cast %c29_i32 : i32 to index
    %c0_297 = arith.constant 0 : index
    %c0_298 = arith.constant 0 : index
    %768 = vector.load %arg6[%767, %c0_297, %c0_298] : memref<32x32x128xf32, #tpu.memory_space<vmem>>, vector<1x32x128xf32>
    %769 = vector.shape_cast %768 : vector<1x32x128xf32> to vector<32x128xf32>
    %770 = arith.addf %757, %760 : vector<1x128xf32>
    %771 = vector.broadcast %770 : vector<1x128xf32> to vector<32x128xf32>
    %772 = arith.mulf %771, %763 : vector<32x128xf32>
    %773 = vector.broadcast %760 : vector<1x128xf32> to vector<32x128xf32>
    %774 = arith.mulf %773, %769 : vector<32x128xf32>
    %775 = arith.subf %772, %774 : vector<32x128xf32>
    %776 = arith.addf %750, %775 : vector<32x128xf32>
    %777 = vector.broadcast %757 : vector<1x128xf32> to vector<32x128xf32>
    %778 = arith.mulf %777, %766 : vector<32x128xf32>
    %779 = arith.addf %772, %778 : vector<32x128xf32>
    %780 = arith.addf %754, %779 : vector<32x128xf32>
    %c30_i32 = arith.constant 30 : i32
    %c0_299 = arith.constant 0 : index
    %781 = arith.index_cast %c30_i32 : i32 to index
    %c0_300 = arith.constant 0 : index
    %782 = vector.load %arg2[%c0_299, %781, %c0_300] : memref<1x32x128xf32, #tpu.memory_space<vmem>>, vector<1x1x128xf32>
    %783 = vector.shape_cast %782 : vector<1x1x128xf32> to vector<1x128xf32>
    %c0_301 = arith.constant 0 : index
    %784 = arith.index_cast %c30_i32 : i32 to index
    %c0_302 = arith.constant 0 : index
    %785 = vector.load %arg3[%c0_301, %784, %c0_302] : memref<1x32x128xf32, #tpu.memory_space<vmem>>, vector<1x1x128xf32>
    %786 = vector.shape_cast %785 : vector<1x1x128xf32> to vector<1x128xf32>
    %787 = arith.index_cast %c30_i32 : i32 to index
    %c0_303 = arith.constant 0 : index
    %c0_304 = arith.constant 0 : index
    %788 = vector.load %arg4[%787, %c0_303, %c0_304] : memref<32x32x128xf32, #tpu.memory_space<vmem>>, vector<1x32x128xf32>
    %789 = vector.shape_cast %788 : vector<1x32x128xf32> to vector<32x128xf32>
    %790 = arith.index_cast %c30_i32 : i32 to index
    %c0_305 = arith.constant 0 : index
    %c0_306 = arith.constant 0 : index
    %791 = vector.load %arg5[%790, %c0_305, %c0_306] : memref<32x32x128xf32, #tpu.memory_space<vmem>>, vector<1x32x128xf32>
    %792 = vector.shape_cast %791 : vector<1x32x128xf32> to vector<32x128xf32>
    %793 = arith.index_cast %c30_i32 : i32 to index
    %c0_307 = arith.constant 0 : index
    %c0_308 = arith.constant 0 : index
    %794 = vector.load %arg6[%793, %c0_307, %c0_308] : memref<32x32x128xf32, #tpu.memory_space<vmem>>, vector<1x32x128xf32>
    %795 = vector.shape_cast %794 : vector<1x32x128xf32> to vector<32x128xf32>
    %796 = arith.addf %783, %786 : vector<1x128xf32>
    %797 = vector.broadcast %796 : vector<1x128xf32> to vector<32x128xf32>
    %798 = arith.mulf %797, %789 : vector<32x128xf32>
    %799 = vector.broadcast %786 : vector<1x128xf32> to vector<32x128xf32>
    %800 = arith.mulf %799, %795 : vector<32x128xf32>
    %801 = arith.subf %798, %800 : vector<32x128xf32>
    %802 = arith.addf %776, %801 : vector<32x128xf32>
    %803 = vector.broadcast %783 : vector<1x128xf32> to vector<32x128xf32>
    %804 = arith.mulf %803, %792 : vector<32x128xf32>
    %805 = arith.addf %798, %804 : vector<32x128xf32>
    %806 = arith.addf %780, %805 : vector<32x128xf32>
    %c31_i32 = arith.constant 31 : i32
    %c0_309 = arith.constant 0 : index
    %807 = arith.index_cast %c31_i32 : i32 to index
    %c0_310 = arith.constant 0 : index
    %808 = vector.load %arg2[%c0_309, %807, %c0_310] : memref<1x32x128xf32, #tpu.memory_space<vmem>>, vector<1x1x128xf32>
    %809 = vector.shape_cast %808 : vector<1x1x128xf32> to vector<1x128xf32>
    %c0_311 = arith.constant 0 : index
    %810 = arith.index_cast %c31_i32 : i32 to index
    %c0_312 = arith.constant 0 : index
    %811 = vector.load %arg3[%c0_311, %810, %c0_312] : memref<1x32x128xf32, #tpu.memory_space<vmem>>, vector<1x1x128xf32>
    %812 = vector.shape_cast %811 : vector<1x1x128xf32> to vector<1x128xf32>
    %813 = arith.index_cast %c31_i32 : i32 to index
    %c0_313 = arith.constant 0 : index
    %c0_314 = arith.constant 0 : index
    %814 = vector.load %arg4[%813, %c0_313, %c0_314] : memref<32x32x128xf32, #tpu.memory_space<vmem>>, vector<1x32x128xf32>
    %815 = vector.shape_cast %814 : vector<1x32x128xf32> to vector<32x128xf32>
    %816 = arith.index_cast %c31_i32 : i32 to index
    %c0_315 = arith.constant 0 : index
    %c0_316 = arith.constant 0 : index
    %817 = vector.load %arg5[%816, %c0_315, %c0_316] : memref<32x32x128xf32, #tpu.memory_space<vmem>>, vector<1x32x128xf32>
    %818 = vector.shape_cast %817 : vector<1x32x128xf32> to vector<32x128xf32>
    %819 = arith.index_cast %c31_i32 : i32 to index
    %c0_317 = arith.constant 0 : index
    %c0_318 = arith.constant 0 : index
    %820 = vector.load %arg6[%819, %c0_317, %c0_318] : memref<32x32x128xf32, #tpu.memory_space<vmem>>, vector<1x32x128xf32>
    %821 = vector.shape_cast %820 : vector<1x32x128xf32> to vector<32x128xf32>
    %822 = arith.addf %809, %812 : vector<1x128xf32>
    %823 = vector.broadcast %822 : vector<1x128xf32> to vector<32x128xf32>
    %824 = arith.mulf %823, %815 : vector<32x128xf32>
    %825 = vector.broadcast %812 : vector<1x128xf32> to vector<32x128xf32>
    %826 = arith.mulf %825, %821 : vector<32x128xf32>
    %827 = arith.subf %824, %826 : vector<32x128xf32>
    %828 = arith.addf %802, %827 : vector<32x128xf32>
    %829 = vector.broadcast %809 : vector<1x128xf32> to vector<32x128xf32>
    %830 = arith.mulf %829, %818 : vector<32x128xf32>
    %831 = arith.addf %824, %830 : vector<32x128xf32>
    %832 = arith.addf %806, %831 : vector<32x128xf32>
    %c32_i32 = arith.constant 32 : i32
    %c0_319 = arith.constant 0 : index
    %c0_320 = arith.constant 0 : index
    %c0_321 = arith.constant 0 : index
    %833 = vector.load %arg7[%c0_319, %c0_320, %c0_321] : memref<1x32x128xf32, #tpu.memory_space<vmem>>, vector<1x32x128xf32>
    %834 = vector.shape_cast %833 : vector<1x32x128xf32> to vector<32x128xf32>
    %835 = vector.shape_cast %828 : vector<32x128xf32> to vector<1x32x128xf32>
    tpu.vector_store %arg7[%c0_319, %c0_320, %c0_321], %835 {strides = array<i32>} : memref<1x32x128xf32, #tpu.memory_space<vmem>>, vector<1x32x128xf32>,
    %c0_322 = arith.constant 0 : index
    %c0_323 = arith.constant 0 : index
    %c0_324 = arith.constant 0 : index
    %836 = vector.load %arg8[%c0_322, %c0_323, %c0_324] : memref<1x32x128xf32, #tpu.memory_space<vmem>>, vector<1x32x128xf32>
    %837 = vector.shape_cast %836 : vector<1x32x128xf32> to vector<32x128xf32>
    %838 = vector.shape_cast %832 : vector<32x128xf32> to vector<1x32x128xf32>
    tpu.vector_store %arg8[%c0_322, %c0_323, %c0_324], %838 {strides = array<i32>} : memref<1x32x128xf32, #tpu.memory_space<vmem>>, vector<1x32x128xf32>,
    return
  }
  func.func @transform_0(%arg0: i32, %arg1: i32) -> (i32, i32, i32) {
    %c0_i32 = arith.constant 0 : i32
    %c0_i32_0 = arith.constant 0 : i32
    return %arg1, %c0_i32, %arg0 : i32, i32, i32
  }
  func.func @transform_1(%arg0: i32, %arg1: i32) -> (i32, i32, i32) {
    %c0_i32 = arith.constant 0 : i32
    %c0_i32_0 = arith.constant 0 : i32
    return %arg1, %c0_i32, %arg0 : i32, i32, i32
  }
  func.func @transform_2(%arg0: i32, %arg1: i32) -> (i32, i32, i32) {
    %c0_i32 = arith.constant 0 : i32
    %c0_i32_0 = arith.constant 0 : i32
    %c0_i32_1 = arith.constant 0 : i32
    return %c0_i32, %c0_i32_0, %arg0 : i32, i32, i32
  }
  func.func @transform_3(%arg0: i32, %arg1: i32) -> (i32, i32, i32) {
    %c0_i32 = arith.constant 0 : i32
    %c0_i32_0 = arith.constant 0 : i32
    %c0_i32_1 = arith.constant 0 : i32
    return %c0_i32, %c0_i32_0, %arg0 : i32, i32, i32
  }
  func.func @transform_4(%arg0: i32, %arg1: i32) -> (i32, i32, i32) {
    %c0_i32 = arith.constant 0 : i32
    %c0_i32_0 = arith.constant 0 : i32
    %c0_i32_1 = arith.constant 0 : i32
    return %c0_i32, %c0_i32_0, %arg0 : i32, i32, i32
  }
  func.func @transform_5(%arg0: i32, %arg1: i32) -> (i32, i32, i32) {
    %c0_i32 = arith.constant 0 : i32
    %c0_i32_0 = arith.constant 0 : i32
    return %arg1, %c0_i32, %arg0 : i32, i32, i32
  }
  func.func @transform_6(%arg0: i32, %arg1: i32) -> (i32, i32, i32) {
    %c0_i32 = arith.constant 0 : i32
    %c0_i32_0 = arith.constant 0 : i32
    return %arg1, %c0_i32, %arg0 : i32, i32, i32
  }
}

module attributes {stable_mosaic.version = 11 : i64} {
  func.func @_layer_kernel(%arg0: i32, %arg1: memref<32x512xbf16, #tpu.memory_space<vmem>>, %arg2: memref<32x512xbf16, #tpu.memory_space<vmem>>, %arg3: memref<32x32xbf16, #tpu.memory_space<vmem>>, %arg4: memref<32x1xf32, #tpu.memory_space<vmem>>, %arg5: memref<32x512xf32, #tpu.memory_space<vmem>>) attributes {dimension_semantics = [#tpu.dimension_semantics<parallel>], iteration_bounds = array<i64: 8>, scalar_prefetch = 0 : i64, scratch_operands = 0 : i64, tpu.core_type = #tpu.core_type<tc>, window_params = [{transform_indices = @transform_0, window_bounds = array<i64: 32, 512>}, {transform_indices = @transform_1, window_bounds = array<i64: 32, 512>}, {pipeline_mode = #tpu.pipeline_mode<synchronous>, transform_indices = @transform_2, window_bounds = array<i64: 32, 32>}, {pipeline_mode = #tpu.pipeline_mode<synchronous>, transform_indices = @transform_3, window_bounds = array<i64: 32, 1>}, {transform_indices = @transform_4, window_bounds = array<i64: 32, 512>}]} {
    %c0 = arith.constant 0 : index
    %c0_0 = arith.constant 0 : index
    %0 = vector.load %arg3[%c0, %c0_0] : memref<32x32xbf16, #tpu.memory_space<vmem>>, vector<32x32xbf16>
    %c0_1 = arith.constant 0 : index
    %c0_2 = arith.constant 0 : index
    %1 = vector.load %arg1[%c0_1, %c0_2] : memref<32x512xbf16, #tpu.memory_space<vmem>>, vector<32x512xbf16>
    %cst = arith.constant dense<0.000000e+00> : vector<32x512xf32>
    %2 = tpu.matmul %0, %1, %cst {dimension_numbers = #tpu.dot_dimension_numbers<[1], [0], [0], [1], [0, 0, 1, 1], [], []>} : vector<32x32xbf16>, vector<32x512xbf16>, vector<32x512xf32> -> vector<32x512xf32>
    %c0_3 = arith.constant 0 : index
    %c0_4 = arith.constant 0 : index
    %3 = vector.load %arg2[%c0_3, %c0_4] : memref<32x512xbf16, #tpu.memory_space<vmem>>, vector<32x512xbf16>
    %4 = arith.extf %3 : vector<32x512xbf16> to vector<32x512xf32>
    %5 = arith.addf %4, %2 : vector<32x512xf32>
    %c0_5 = arith.constant 0 : index
    %c0_6 = arith.constant 0 : index
    %6 = vector.load %arg4[%c0_5, %c0_6] : memref<32x1xf32, #tpu.memory_space<vmem>>, vector<32x1xf32>
    %7 = vector.broadcast %6 : vector<32x1xf32> to vector<32x512xf32>
    %8 = arith.addf %5, %7 : vector<32x512xf32>
    %c0_7 = arith.constant 0 : index
    %c0_8 = arith.constant 0 : index
    %9 = vector.load %arg5[%c0_7, %c0_8] : memref<32x512xf32, #tpu.memory_space<vmem>>, vector<32x512xf32>
    tpu.vector_store %arg5[%c0_7, %c0_8], %8 {strides = array<i32>} : memref<32x512xf32, #tpu.memory_space<vmem>>, vector<32x512xf32>,
    return
  }
  func.func @transform_0(%arg0: i32) -> (i32, i32) {
    %c0_i32 = arith.constant 0 : i32
    %c0_i32_0 = arith.constant 0 : i32
    return %c0_i32, %arg0 : i32, i32
  }
  func.func @transform_1(%arg0: i32) -> (i32, i32) {
    %c0_i32 = arith.constant 0 : i32
    %c0_i32_0 = arith.constant 0 : i32
    return %c0_i32, %arg0 : i32, i32
  }
  func.func @transform_2(%arg0: i32) -> (i32, i32) {
    %c0_i32 = arith.constant 0 : i32
    %c0_i32_0 = arith.constant 0 : i32
    %c0_i32_1 = arith.constant 0 : i32
    return %c0_i32, %c0_i32_0 : i32, i32
  }
  func.func @transform_3(%arg0: i32) -> (i32, i32) {
    %c0_i32 = arith.constant 0 : i32
    %c0_i32_0 = arith.constant 0 : i32
    %c0_i32_1 = arith.constant 0 : i32
    return %c0_i32, %c0_i32_0 : i32, i32
  }
  func.func @transform_4(%arg0: i32) -> (i32, i32) {
    %c0_i32 = arith.constant 0 : i32
    %c0_i32_0 = arith.constant 0 : i32
    return %c0_i32, %arg0 : i32, i32
  }
}

</mosaic_0001>

<bundles_post_ra>
// kernel: tpu_custom_call.1
= control target key start
LH: loop header
LB: loop body
LE: loop exit
PB: predicated region body
PF: predicated region fallthrough
CT: control target
= control target key end

     0   :  { %6 = vsyncpa [#allocation3], 0  ;;  %s109_s0 = inlined_call_operand.hbm [shape: f32[8,128], index: 0, kind: input, shape index: {}]   ;;  %s110_s1 = inlined_call_operand.hbm [shape: f32[8,128], index: 1, kind: output, shape index: {}]  }
   0x1   :  { %7 = vsyncpa [#allocation4], 0  ;;  %s91_s6 = smov [#allocation2]  }
   0x2   :  { %s14_s7 = sshll.u32 %s91_s6, 4  ;;  %s15_s7 = int_to_ptr.vmem [resolvable:$true] %s14_s7 }
   0x3   :  { %s55_s8 = scalar_lea.vmem %s15_s7, 128  ;;  %p60_p1 = scmp.lt.s32.totalorder %s15_s7, %s15_s7 }
   0x4   :  { %p56_p0 = scmp.ne.s32.totalorder %s15_s7, %s55_s8  ;;  %p61_p2 = scmp.lt.s32.totalorder %s55_s8, %s55_s8 }
   0x6   :  { %p62_p3 = por %p61_p2, %p60_p1 }
   0x8   :  { %p63_p4 = pnand %p62_p3, %p56_p0 }
   0xa   :  { %66 = shalt.err (!%p63_p4)
}
   0xb   :  { %17 = dma.hbm_to_vmem [thread:$0]  %s109_s0, 128, %s15_s7, [#allocation3]  }
   0xc   :  { %87 = dma.done.wait [#allocation3], 128  }
   0xd   :  { %88 = vsyncadd [#allocation3], 4294967168  ;;  %v21_v0 = vld [vmem:[#allocation2] sm:$0xff]  ;;  %s92_s11 = smov [#allocation5]  }
   0xe   :  { %v23_v1 = vmul.f32 0.70710677, %v21_v0  ;;  %v22_v2 = vmul.f32 0.5, %v21_v0  ;;  %s34_s12 = sshll.u32 %s92_s11, 4  ;;  %s35_s12 = int_to_ptr.vmem [resolvable:$true] %s34_s12 }
   0xf   :  { %s67_s13 = scalar_lea.vmem %s35_s12, 128  ;;  %p72_p6 = scmp.lt.s32.totalorder %s35_s12, %s35_s12 }
  0x10   :  { %45 = verf.f32 %v23_v1  ;;  %p68_p5 = scmp.ne.s32.totalorder %s35_s12, %s67_s13  ;;  %p73_p7 = scmp.lt.s32.totalorder %s67_s13, %s67_s13 }
  0x12   :  { %p74_p8 = por %p73_p7, %p72_p6 }
  0x14   :  { %p75_p9 = pnand %p74_p8, %p68_p5 }
  0x1d   :  { %v46_v3 = vpop.eup %45 }
  0x1e   :  { %v25_v4 = vadd.f32 1.0, %v46_v3 }
  0x20   :  { %v26_v5 = vmul.f32 %v25_v4, %v22_v2 }
  0x22   :  { %27 = vst [vmem:[#allocation5] sm:$0xff] %v26_v5 }
  0x23   :  { %78 = shalt.err (!%p75_p9)
}
  0x24   :  { %37 = dma.vmem_to_hbm [thread:$0]  %s35_s12, 128, %s110_s1, [#allocation4]  }
  0x25   :  { %89 = dma.done.wait [#allocation4], 128  }
  0x26   :  { %90 = vsyncadd [#allocation4], 4294967168 }
  0x27   :  { %41 = vsyncpa [#allocation3], 1 }
  0x28   :  { %42 = vsyncpa [#allocation4], 1 }

// kernel: pwno_forward.5
= control target key start
LH: loop header
LB: loop body
LE: loop exit
PB: predicated region body
PF: predicated region fallthrough
CT: control target
= control target key end

     0   :  { %s645_s12 = smov 0   ;;  %s647_s13 = smov 0   ;;  %s745_s0 = inlined_call_operand.vmem [shape: bf16[16,4096], index: 0, kind: input, shape index: {}]   ;;  %s746_s1 = inlined_call_operand.vmem [shape: bf16[32,16], index: 1, kind: input, shape index: {}]   ;;  %s747_s2 = inlined_call_operand.vmem [shape: f32[32,1], index: 2, kind: input, shape index: {}]   ;;  %s748_s3 = inlined_call_operand.vmem [shape: bf16[32,4096], index: 3, kind: output, shape index: {}]  }
   0x1   :  { %s649_s14 = smov 0  }
   0x2 LB: > { %s522_s15 = sadd.s32 4294967295, %s622_s14   ;;  %s662_s16 = sadd.s32 1, %s622_s14   ;;  %s622_s14 = sphi %s649_s14, %s752_s14   ;;  %s618_s13 = sphi %s647_s13, %s751_s13   ;;  %s614_s12 = sphi %s645_s12, %s750_s12  }
   0x3   : > { %s17_s17 = ssub.s32 %s622_s14, %s662_s16  ;;  %s20_s18 = sadd.s32 1, %s618_s13 }
   0x4   : > { %p18_p0 = scmp.eq.s32.totalorder %s17_s17, 0  ;;  %p27_p1 = scmp.ne.s32.totalorder %s618_s13, %s614_s12 }
   0x5   : > { %p28_p2 = scmp.eq.s32.totalorder %s622_s14, 0  ;;  %p99_p3 = scmp.eq.s32.totalorder %s522_s15, 7 }
   0x6   : > { %s673_s19 = scalar_select %p18_p0, %s618_s13, %s20_s18  }
   0x7   : > { %p29_p4 = por %p28_p2, %p27_p1  ;;  %p675_p5 = por %p99_p3, %p27_p1 }
   0x8   : > { %p525_p6 = scmp.ge.s32.totalorder %s622_s14, 8 }
   0xa   : > { %127 = sbr.rel (%p525_p6) target bundleno = 21 (0x15), region = 24 }
   0xf   : > { %130 = sbr.rel (!%p29_p4) target bundleno = 21 (0x15), region = 28  ;;  %s132_s21 = sand.u32 (%p29_p4), 1, %s618_s13  }
  0x10   : > { %s555_s22 = sshll.u32 (%p29_p4), %s622_s14, 4  ;;  %s526_s23 = sshll.u32 (%p29_p4), %s132_s21, 5 }
  0x11   : > { %s137_s26 = scalar_lea.vmem (%p29_p4), %s745_s0, %s555_s22  ;;  %s134_s27 = scalar_lea.vmem (%p29_p4), [#allocation2], %s526_s23 }
  0x12   : > { %v150_v0 = vld [vmem:[%s137_s26] sm:$0xff] (%p29_p4)  ;;  %v152_v1 = vld [vmem:[%s137_s26 + $0x8] sm:$0xff] (%p29_p4) }
  0x13   : > { %v154_v2 = vld [vmem:[%s137_s26 + $0x80] sm:$0xff] (%p29_p4)  ;;  %151 = vst [vmem:[%s134_s27] sm:$0xff] (%p29_p4), %v150_v0  ;;  %153 = vst [vmem:[%s134_s27 + $0x8] sm:$0xff] (%p29_p4), %v152_v1  ;;  %v156_v3 = vld [vmem:[%s137_s26 + $0x88] sm:$0xff] (%p29_p4) }
  0x14   : > { %155 = vst [vmem:[%s134_s27 + $0x10] sm:$0xff] %v154_v2  ;;  %157 = vst [vmem:[%s134_s27 + $0x18] sm:$0xff] %v156_v3 }
  0x15 PF: > { %p529_p7 = scmp.ge.s32.totalorder %s622_s14, 1  ;;  %p162_p8 = scmp.lt.s32.totalorder %s622_s14, 9 }
  0x17   : > { %p163_p9 = pnand %p529_p7, %p162_p8 }
  0x18   : > { %s169_s28 = sand.u32 (!%p163_p9), 1, %s614_s12  }
  0x19   : > { %166 = sbr.rel (%p163_p9) target bundleno = 258 (0x102), region = 51  ;;  %s530_s29 = sshll.u32 (!%p163_p9), %s169_s28, 5 }
  0x1a   : > { %s171_s5 = scalar_lea.vmem (!%p163_p9), [#allocation2], %s530_s29  ;;  %s531_s23 = sshll.u32 (!%p163_p9), %s169_s28, 6 }
  0x1b   : > { %s710_s24 = scalar_lea.vmem (!%p163_p9), [#allocation3], %s531_s23 }
  0x1e   : > { %v624_v4 = vmov 0   ;;  %v202_v5 = vld [vmem:[%s747_s2] sm:$0xff]  ;;  %v594_v7 = vld [vmem:[%s171_s5 + $0xc] ss:$16 sps:$4 sm:$0xff]   ;;  %v597_v9 = vld [vmem:[%s171_s5 + $0x8] ss:$16 sps:$4 sm:$0xff]  }
  0x1f   : > { %295 = vmatprep.mubr.bf16.mxu0 %v624_v4  ;;  %348 = vmatprep.mubr.bf16.mxu1 %v624_v4  ;;  %v592_v6 = vld [vmem:[%s171_s5 + $0x4] ss:$16 sps:$4 sm:$0xff]   ;;  %v596_v8 = vld [vmem:[%s171_s5] ss:$16 sps:$4 sm:$0xff]   ;;  %v203_v10 = vld [vmem:[%s747_s2 + $0x8] sm:$0xff]  ;;  %vm256_vm0 = vcmask 130048  }
  0x20   : > { %590 = vset.pattern.permute.xlu0 %v624_v4  ;;  %591 = vset.pattern.permute.xlu1 %v624_v4  ;;  %v598_v11 = vld [vmem:[%s746_s1] sm:$0xff]   ;;  %v204_v12 = vld [vmem:[%s747_s2 + $0x10] sm:$0xff]  ;;  %v205_v13 = vld [vmem:[%s747_s2 + $0x18] sm:$0xff]  ;;  %s564_s12 = sshll.u32 (%p675_p5), %s522_s15, 4 }
  0x21   : > { %208 = vperm.xlu0 %590, %v202_v5   ;;  %277 = vmatprep.subr.bf16.mxu0 %v592_v6  ;;  %v599_v14 = vld [vmem:[%s746_s1 + $0x8] sm:$0xff]   ;;  %s434_s27 = scalar_lea.vmem (%p675_p5), %s748_s3, %s564_s12 }
  0x22   : > { %330 = vmatprep.subr.bf16.mxu1 %v594_v7  ;;  %278 = vmatpush1.bf16.msra.mxu0 %v596_v8 }
  0x23   : > { %331 = vmatpush1.bf16.msra.mxu1 %v597_v9  ;;  %218 = vperm.xlu1 %591, %v204_v12  }
  0x25   : > { %213 = vperm.xlu0 %590, %v203_v10   ;;  %538 = vmatmul.mubr.msk.bf16.vlgmr.msra.gmra.mxu0 %vm256_vm0, %v598_v11 }
  0x26   : > { %540 = vmatmul.mubr.msk.bf16.vlgmr.msra.gmra.mxu1 %vm256_vm0, %v598_v11  ;;  %305 = vmatprep.mubr.bf16.mxu0 %v624_v4 }
  0x27   : > { %358 = vmatprep.mubr.bf16.mxu1 %v624_v4  ;;  %223 = vperm.xlu1 %591, %v205_v13  }
  0x2d   : > { %539 = vmatmul.mubr.msk.bf16.gmra.mxu0 %vm256_vm0, %v599_v14 }
  0x2e   : > { %541 = vmatmul.mubr.msk.bf16.gmra.mxu1 %vm256_vm0, %v599_v14 }
  0x9c   : > { %v209_v15 = vpop.permute.xlu0 %208 }
  0x9e   : > { %v219_v33 = vpop.permute.xlu1 %218 }
  0xa0   : > { %v214_v24 = vpop.permute.xlu0 %213 }
  0xa2   : > { %v224_v48 = vpop.permute.xlu1 %223 }
  0xe5   : > { %v297_v16 = vpop.f32.mrf.mxu0 }
  0xe6   : > { %v350_v17 = vpop.f32.mrf.mxu1  ;;  %v298_v20 = vadd.f32 %v297_v16, %v209_v15 }
  0xe7   : > { %v299_v18 = vpop.f32.mrf.mxu0  ;;  %v351_v21 = vadd.f32 %v350_v17, %v209_v15 }
  0xe8   : > { %v352_v19 = vpop.f32.mrf.mxu1  ;;  %v300_v22 = vadd.f32 %v299_v18, %v209_v15 }
  0xe9   : > { %v353_v23 = vadd.f32 %v352_v19, %v209_v15  ;;  %v301_v25 = vpop.f32.mrf.mxu0 }
  0xea   : > { %v354_v26 = vpop.f32.mrf.mxu1  ;;  %v556_v27 = vpack.c.bf16 %v300_v22, %v298_v20  ;;  %v302_v31 = vadd.f32 %v301_v25, %v214_v24 }
  0xeb   : > { %v557_v28 = vpack.c.bf16 %v353_v23, %v351_v21  ;;  %v303_v29 = vpop.f32.mrf.mxu0  ;;  %v355_v32 = vadd.f32 %v354_v26, %v214_v24 }
  0xec   : > { %v356_v30 = vpop.f32.mrf.mxu1  ;;  %417 = vst [vmem:[%s710_s24] sm:$0xff] %v556_v27  ;;  %v304_v34 = vadd.f32 %v303_v29, %v214_v24 }
  0xed   : > { %418 = vst [vmem:[%s710_s24 + $0x8] sm:$0xff] %v557_v28  ;;  %v357_v35 = vadd.f32 %v356_v30, %v214_v24  ;;  %v307_v36 = vpop.f32.mrf.mxu0 }
  0xee   : > { %v360_v37 = vpop.f32.mrf.mxu1  ;;  %v558_v38 = vpack.c.bf16 %v304_v34, %v302_v31  ;;  %v308_v42 = vadd.f32 %v307_v36, %v219_v33 }
  0xef   : > { %v559_v39 = vpack.c.bf16 %v357_v35, %v355_v32  ;;  %v309_v40 = vpop.f32.mrf.mxu0  ;;  %v361_v43 = vadd.f32 %v360_v37, %v219_v33 }
  0xf0   : > { %v362_v41 = vpop.f32.mrf.mxu1  ;;  %419 = vst [vmem:[%s710_s24 + $0x10] sm:$0xff] %v558_v38  ;;  %v310_v44 = vadd.f32 %v309_v40, %v219_v33 }
  0xf1   : > { %420 = vst [vmem:[%s710_s24 + $0x18] sm:$0xff] %v559_v39  ;;  %v363_v45 = vadd.f32 %v362_v41, %v219_v33  ;;  %v311_v46 = vpop.f32.mrf.mxu0 }
  0xf2   : > { %v364_v47 = vpop.f32.mrf.mxu1  ;;  %v560_v49 = vpack.c.bf16 %v310_v44, %v308_v42  ;;  %v312_v53 = vadd.f32 %v311_v46, %v224_v48 }
  0xf3   : > { %v561_v50 = vpack.c.bf16 %v363_v45, %v361_v43  ;;  %v313_v51 = vpop.f32.mrf.mxu0  ;;  %v365_v54 = vadd.f32 %v364_v47, %v224_v48  ;;  %v447_v59 = vld [vmem:[%s710_s24] sm:$0xff] (%p675_p5) }
  0xf4   : > { %v366_v52 = vpop.f32.mrf.mxu1  ;;  %421 = vst [vmem:[%s710_s24 + $0x20] sm:$0xff] %v560_v49  ;;  %v314_v55 = vadd.f32 %v313_v51, %v224_v48  ;;  %v449_v60 = vld [vmem:[%s710_s24 + $0x8] sm:$0xff] (%p675_p5)  ;;  %448 = vst [vmem:[%s434_s27] sm:$0xff] (%p675_p5), %v447_v59 }
  0xf5   : > { %422 = vst [vmem:[%s710_s24 + $0x28] sm:$0xff] %v561_v50  ;;  %v367_v56 = vadd.f32 %v366_v52, %v224_v48  ;;  %431 = sbr.rel (!%p675_p5) target bundleno = 258 (0x102), region = 59  ;;  %450 = vst [vmem:[%s434_s27 + $0x8] sm:$0xff] (%p675_p5), %v449_v60 }
  0xf6   : > { %v562_v57 = vpack.c.bf16 %v314_v55, %v312_v53 }
  0xf7   : > { %v563_v58 = vpack.c.bf16 %v367_v56, %v365_v54  ;;  %v451_v61 = vld [vmem:[%s710_s24 + $0x10] sm:$0xff] (%p675_p5) }
  0xf8   : > { %423 = vst [vmem:[%s710_s24 + $0x30] sm:$0xff] %v562_v57  ;;  %v453_v62 = vld [vmem:[%s710_s24 + $0x18] sm:$0xff] (%p675_p5)  ;;  %452 = vst [vmem:[%s434_s27 + $0x80] sm:$0xff] (%p675_p5), %v451_v61 }
  0xf9   : > { %424 = vst [vmem:[%s710_s24 + $0x38] sm:$0xff] %v563_v58  ;;  %454 = vst [vmem:[%s434_s27 + $0x88] sm:$0xff] (%p675_p5), %v453_v62 }
  0xfb   : > { %v455_v63 = vld [vmem:[%s710_s24 + $0x20] sm:$0xff] }
  0xfc   : > { %v457_v0 = vld [vmem:[%s710_s24 + $0x28] sm:$0xff]  ;;  %456 = vst [vmem:[%s434_s27 + $0x100] sm:$0xff] %v455_v63 }
  0xfd   : > { %458 = vst [vmem:[%s434_s27 + $0x108] sm:$0xff] %v457_v0 }
  0xff   : > { %v459_v1 = vld [vmem:[%s710_s24 + $0x30] sm:$0xff] }
 0x100   : > { %v461_v2 = vld [vmem:[%s710_s24 + $0x38] sm:$0xff]  ;;  %460 = vst [vmem:[%s434_s27 + $0x180] sm:$0xff] %v459_v1 }
 0x101   : > { %462 = vst [vmem:[%s434_s27 + $0x188] sm:$0xff] %v461_v2 }
 0x102 PF: > { %p10_p10 = scmp.ge.s32.totalorder %s662_s16, 10   ;;  %s750_s12 = smov %s618_s13 }
 0x103   : > { %s751_s13 = smov %s673_s19  ;;  %s752_s14 = smov %s662_s16 }
 0x104   :  { %12 = sbr.rel (!%p10_p10) target bundleno = 2 (0x2), region = 113 }

// kernel: pwno_forward.6
= control target key start
LH: loop header
LB: loop body
LE: loop exit
PB: predicated region body
PF: predicated region fallthrough
CT: control target
= control target key end

     0   :  { %s6398_s0 = inlined_call_operand.vmem [shape: f32[2,32,256], index: 0, kind: input, shape index: {}]   ;;  %s6399_s1 = inlined_call_operand.vmem [shape: f32[2,32,256], index: 1, kind: input, shape index: {}]   ;;  %s6400_s2 = inlined_call_operand.vmem [shape: f32[32,32,256], index: 2, kind: input, shape index: {}]   ;;  %s6401_s3 = inlined_call_operand.vmem [shape: f32[32,32,256], index: 3, kind: input, shape index: {}]   ;;  %s6402_s4 = inlined_call_operand.vmem [shape: f32[32,32,256], index: 4, kind: input, shape index: {}]   ;;  %s6403_s5 = inlined_call_operand.vmem [shape: f32[2,32,256], index: 5, kind: output, shape index: {0}]   ;;  %s6404_s6 = inlined_call_operand.vmem [shape: f32[2,32,256], index: 6, kind: output, shape index: {1}]  }
   0x1   :  { %6406 = sst [smem:[#allocation10_spill]] %s6398_s0 }
   0x2   :  { %s4812_s21 = smov 0   ;;  %s4814_s22 = smov 0  }
   0x3   :  { %s4816_s23 = smov 0   ;;  %s4818_s24 = smov 0  }
   0x4   :  { %s4820_s25 = smov 0   ;;  %s4822_s26 = smov 0  }
   0x5   :  { %s4824_s27 = smov 0   ;;  %s4826_s28 = smov 0  }
   0x6   :  { %s4828_s29 = smov 0  }
   0x7 LB: > { %s26_s30 = sadd.s32 1, %s4767_s27  ;;  %s29_s7 = sadd.s32 1, %s4771_s28  ;;  %s4775_s29 = sphi %s4828_s29, %s17_s29   ;;  %s4771_s28 = sphi %s4826_s28, %s6420_s28   ;;  %s4767_s27 = sphi %s4824_s27, %s6419_s27   ;;  %s4763_s26 = sphi %s4822_s26, %s6418_s26   ;;  %s4759_s25 = sphi %s4820_s25, %s6417_s25   ;;  %s4755_s24 = sphi %s4818_s24, %s6416_s24   ;;  %s4751_s23 = sphi %s4816_s23, %s6415_s23   ;;  %s4747_s22 = sphi %s4814_s22, %s6414_s22   ;;  %s4743_s21 = sphi %s4812_s21, %s6413_s21  }
   0x8   : > { %p27_p0 = scmp.ge.s32.totalorder %s26_s30, 2  ;;  %s4229_s8 = sadd.s32 4294967295, %s4775_s29  }
   0x9   : > { %p45_p1 = scmp.ne.s32.totalorder %s4755_s24, %s4751_s23  ;;  %s38_s9 = sadd.s32 1, %s4755_s24 }
   0xa   : > { %s6422_s30 = smov (%p27_p0, %s26_s30), 0  ;;  %s6424_s7 = smov (!%p27_p0, %s29_s7), %s4771_s28 }
   0xb   : > { %p46_p2 = scmp.eq.s32.totalorder %s4775_s29, 0  ;;  %p31_p3 = scmp.ge.s32.totalorder %s6424_s7, 2 }
   0xc   : > { %s33_s10 = ssub.s32 %s4767_s27, %s6422_s30  ;;  %p99_p5 = scmp.ne.s32.totalorder %s4747_s22, %s4743_s21 }
   0xd   : > { %p4872_p4 = por %p46_p2, %p45_p1  ;;  %s6426_s7 = smov (%p31_p3, %s6424_s7), 0 }
   0xe   : > { %6408 = sst [smem:[#allocation9_spill]] %s6426_s7  ;;  %p4880_p6 = por %p99_p5, %p46_p2 }
   0xf   : > { %p183_p7 = scmp.eq.s32.totalorder %s4229_s8, 3  ;;  %s34_s13 = ssub.s32 %s4771_s28, %s6426_s7 }
  0x10   : > { %s92_s14 = sadd.s32 1, %s4747_s22  ;;  %s35_s15 = sor.u32 %s34_s13, %s33_s10 }
  0x11   : > { %p90_p8 = scmp.eq.s32.totalorder %s34_s13, 0  ;;  %p36_p9 = scmp.eq.s32.totalorder %s35_s15, 0 }
  0x12   : > { %p4890_p10 = por %p183_p7, %p45_p1  ;;  %p4232_p11 = scmp.ge.s32.totalorder %s4775_s29, 4 }
  0x13   : > { %s4895_s17 = scalar_select %p90_p8, %s4747_s22, %s92_s14  }
  0x14   : > { %s4898_s18 = scalar_select %p36_p9, %s4755_s24, %s38_s9  }
  0x15   : > { %233 = sbr.rel (%p4232_p11) target bundleno = 250 (0xfa), region = 16 }
  0x1a   : > { %236 = sbr.rel (!%p4872_p4) target bundleno = 38 (0x26), region = 20  ;;  %s238_s19 = sand.u32 (%p4872_p4), 1, %s4755_s24  }
  0x1b   : > { %s4234_s20 = sshll.u32 (%p4872_p4), %s4767_s27, 3  ;;  %s4233_s8 = sshll.u32 (%p4872_p4), %s238_s19, 5 }
  0x1c   : > { %s242_s10 = sadd.s32 (%p4872_p4), %s4771_s28, %s4234_s20  ;;  %s6411_s0 = sld [smem:[#allocation10_spill]] (%p4872_p4) }
  0x1d   : > { %s4235_s13 = sshll.u32 (%p4872_p4), %s242_s10, 3  ;;  %s240_s9 = scalar_lea.vmem (%p4872_p4), [#allocation2], %s4233_s8 }
  0x22   : > { %s244_s14 = scalar_lea.vmem %s6411_s0, %s4235_s13 }
  0x23   : > { %v279_v0 = vld [vmem:[%s244_s14] sm:$0xff]  ;;  %v281_v1 = vld [vmem:[%s244_s14 + $0x10] sm:$0xff] }
  0x24   : > { %v283_v2 = vld [vmem:[%s244_s14 + $0x20] sm:$0xff]  ;;  %280 = vst [vmem:[%s240_s9] sm:$0xff] %v279_v0  ;;  %282 = vst [vmem:[%s240_s9 + $0x8] sm:$0xff] %v281_v1  ;;  %v285_v3 = vld [vmem:[%s244_s14 + $0x30] sm:$0xff] }
  0x25   : > { %284 = vst [vmem:[%s240_s9 + $0x10] sm:$0xff] %v283_v2  ;;  %286 = vst [vmem:[%s240_s9 + $0x18] sm:$0xff] %v285_v3 }
  0x26 PF: > { %292 = sbr.rel (!%p4872_p4) target bundleno = 46 (0x2e), region = 58  ;;  %s294_s19 = sand.u32 (%p4872_p4), 1, %s4755_s24  }
  0x27   : > { %s4237_s20 = sshll.u32 (%p4872_p4), %s4767_s27, 3  ;;  %s4236_s7 = sshll.u32 (%p4872_p4), %s294_s19, 5 }
  0x28   : > { %s298_s10 = sadd.s32 (%p4872_p4), %s4771_s28, %s4237_s20  ;;  %s296_s14 = scalar_lea.vmem (%p4872_p4), [#allocation3], %s4236_s7 }
  0x29   : > { %s4238_s13 = sshll.u32 (%p4872_p4), %s298_s10, 3 }
  0x2a   : > { %s300_s8 = scalar_lea.vmem (%p4872_p4), %s6399_s1, %s4238_s13 }
  0x2b   : > { %v335_v4 = vld [vmem:[%s300_s8] sm:$0xff]  ;;  %v337_v5 = vld [vmem:[%s300_s8 + $0x10] sm:$0xff] }
  0x2c   : > { %v339_v6 = vld [vmem:[%s300_s8 + $0x20] sm:$0xff]  ;;  %336 = vst [vmem:[%s296_s14] sm:$0xff] %v335_v4  ;;  %338 = vst [vmem:[%s296_s14 + $0x8] sm:$0xff] %v337_v5  ;;  %v341_v7 = vld [vmem:[%s300_s8 + $0x30] sm:$0xff] }
  0x2d   : > { %340 = vst [vmem:[%s296_s14 + $0x10] sm:$0xff] %v339_v6  ;;  %342 = vst [vmem:[%s296_s14 + $0x18] sm:$0xff] %v341_v7 }
  0x2e PF: > { %348 = sbr.rel (!%p4880_p6) target bundleno = 114 (0x72), region = 96  ;;  %s350_s11 = sand.u32 (%p4880_p6), 1, %s4747_s22  }
  0x2f   : > { %s4240_s9 = sshll.u32 (%p4880_p6), %s4771_s28, 3  ;;  %s4239_s19 = sshll.u32 (%p4880_p6), %s350_s11, 10 }
  0x30   : > { %s4924_s10 = scalar_lea.vmem (%p4880_p6), %s6400_s2, %s4240_s9  ;;  %s4929_s7 = scalar_lea.vmem (%p4880_p6), [#allocation4], %s4239_s19 }
  0x31   : > { %v637_v8 = vld [vmem:[%s4924_s10] sm:$0xff] (%p4880_p6)  ;;  %v639_v9 = vld [vmem:[%s4924_s10 + $0x10] sm:$0xff] (%p4880_p6) }
  0x32   : > { %v641_v10 = vld [vmem:[%s4924_s10 + $0x20] sm:$0xff] (%p4880_p6)  ;;  %638 = vst [vmem:[%s4929_s7] sm:$0xff] (%p4880_p6), %v637_v8  ;;  %640 = vst [vmem:[%s4929_s7 + $0x8] sm:$0xff] (%p4880_p6), %v639_v9  ;;  %v643_v11 = vld [vmem:[%s4924_s10 + $0x30] sm:$0xff] (%p4880_p6) }
  0x33   : > { %642 = vst [vmem:[%s4929_s7 + $0x10] sm:$0xff] %v641_v10  ;;  %v645_v12 = vld [vmem:[%s4924_s10 + $0x40] sm:$0xff]  ;;  %v647_v13 = vld [vmem:[%s4924_s10 + $0x50] sm:$0xff]  ;;  %644 = vst [vmem:[%s4929_s7 + $0x18] sm:$0xff] %v643_v11 }
  0x34   : > { %646 = vst [vmem:[%s4929_s7 + $0x20] sm:$0xff] %v645_v12  ;;  %648 = vst [vmem:[%s4929_s7 + $0x28] sm:$0xff] %v647_v13  ;;  %v649_v14 = vld [vmem:[%s4924_s10 + $0x60] sm:$0xff]  ;;  %v651_v15 = vld [vmem:[%s4924_s10 + $0x70] sm:$0xff] }
  0x35   : > { %v653_v16 = vld [vmem:[%s4924_s10 + $0x80] sm:$0xff]  ;;  %650 = vst [vmem:[%s4929_s7 + $0x30] sm:$0xff] %v649_v14  ;;  %652 = vst [vmem:[%s4929_s7 + $0x38] sm:$0xff] %v651_v15  ;;  %v655_v17 = vld [vmem:[%s4924_s10 + $0x90] sm:$0xff] }
  0x36   : > { %654 = vst [vmem:[%s4929_s7 + $0x40] sm:$0xff] %v653_v16  ;;  %v657_v18 = vld [vmem:[%s4924_s10 + $0xa0] sm:$0xff]  ;;  %v659_v19 = vld [vmem:[%s4924_s10 + $0xb0] sm:$0xff]  ;;  %656 = vst [vmem:[%s4929_s7 + $0x48] sm:$0xff] %v655_v17 }
  0x37   : > { %658 = vst [vmem:[%s4929_s7 + $0x50] sm:$0xff] %v657_v18  ;;  %660 = vst [vmem:[%s4929_s7 + $0x58] sm:$0xff] %v659_v19  ;;  %v661_v20 = vld [vmem:[%s4924_s10 + $0xc0] sm:$0xff]  ;;  %v663_v21 = vld [vmem:[%s4924_s10 + $0xd0] sm:$0xff] }
  0x38   : > { %v665_v22 = vld [vmem:[%s4924_s10 + $0xe0] sm:$0xff]  ;;  %662 = vst [vmem:[%s4929_s7 + $0x60] sm:$0xff] %v661_v20  ;;  %664 = vst [vmem:[%s4929_s7 + $0x68] sm:$0xff] %v663_v21  ;;  %v667_v23 = vld [vmem:[%s4924_s10 + $0xf0] sm:$0xff] }
  0x39   : > { %666 = vst [vmem:[%s4929_s7 + $0x70] sm:$0xff] %v665_v22  ;;  %v669_v24 = vld [vmem:[%s4924_s10 + $0x100] sm:$0xff]  ;;  %v671_v25 = vld [vmem:[%s4924_s10 + $0x110] sm:$0xff]  ;;  %668 = vst [vmem:[%s4929_s7 + $0x78] sm:$0xff] %v667_v23 }
  0x3a   : > { %670 = vst [vmem:[%s4929_s7 + $0x80] sm:$0xff] %v669_v24  ;;  %672 = vst [vmem:[%s4929_s7 + $0x88] sm:$0xff] %v671_v25  ;;  %v673_v26 = vld [vmem:[%s4924_s10 + $0x120] sm:$0xff]  ;;  %v675_v27 = vld [vmem:[%s4924_s10 + $0x130] sm:$0xff] }
  0x3b   : > { %v677_v28 = vld [vmem:[%s4924_s10 + $0x140] sm:$0xff]  ;;  %674 = vst [vmem:[%s4929_s7 + $0x90] sm:$0xff] %v673_v26  ;;  %676 = vst [vmem:[%s4929_s7 + $0x98] sm:$0xff] %v675_v27  ;;  %v679_v29 = vld [vmem:[%s4924_s10 + $0x150] sm:$0xff] }
  0x3c   : > { %678 = vst [vmem:[%s4929_s7 + $0xa0] sm:$0xff] %v677_v28  ;;  %v681_v30 = vld [vmem:[%s4924_s10 + $0x160] sm:$0xff]  ;;  %v683_v31 = vld [vmem:[%s4924_s10 + $0x170] sm:$0xff]  ;;  %680 = vst [vmem:[%s4929_s7 + $0xa8] sm:$0xff] %v679_v29 }
  0x3d   : > { %682 = vst [vmem:[%s4929_s7 + $0xb0] sm:$0xff] %v681_v30  ;;  %684 = vst [vmem:[%s4929_s7 + $0xb8] sm:$0xff] %v683_v31  ;;  %v685_v32 = vld [vmem:[%s4924_s10 + $0x180] sm:$0xff]  ;;  %v687_v33 = vld [vmem:[%s4924_s10 + $0x190] sm:$0xff] }
  0x3e   : > { %v689_v34 = vld [vmem:[%s4924_s10 + $0x1a0] sm:$0xff]  ;;  %686 = vst [vmem:[%s4929_s7 + $0xc0] sm:$0xff] %v685_v32  ;;  %688 = vst [vmem:[%s4929_s7 + $0xc8] sm:$0xff] %v687_v33  ;;  %v691_v35 = vld [vmem:[%s4924_s10 + $0x1b0] sm:$0xff] }
  0x3f   : > { %690 = vst [vmem:[%s4929_s7 + $0xd0] sm:$0xff] %v689_v34  ;;  %v693_v36 = vld [vmem:[%s4924_s10 + $0x1c0] sm:$0xff]  ;;  %v695_v37 = vld [vmem:[%s4924_s10 + $0x1d0] sm:$0xff]  ;;  %692 = vst [vmem:[%s4929_s7 + $0xd8] sm:$0xff] %v691_v35 }
  0x40   : > { %694 = vst [vmem:[%s4929_s7 + $0xe0] sm:$0xff] %v693_v36  ;;  %696 = vst [vmem:[%s4929_s7 + $0xe8] sm:$0xff] %v695_v37  ;;  %v697_v38 = vld [vmem:[%s4924_s10 + $0x1e0] sm:$0xff]  ;;  %v699_v39 = vld [vmem:[%s4924_s10 + $0x1f0] sm:$0xff] }
  0x41   : > { %v701_v40 = vld [vmem:[%s4924_s10 + $0x200] sm:$0xff]  ;;  %698 = vst [vmem:[%s4929_s7 + $0xf0] sm:$0xff] %v697_v38  ;;  %700 = vst [vmem:[%s4929_s7 + $0xf8] sm:$0xff] %v699_v39  ;;  %v703_v41 = vld [vmem:[%s4924_s10 + $0x210] sm:$0xff] }
  0x42   : > { %702 = vst [vmem:[%s4929_s7 + $0x100] sm:$0xff] %v701_v40  ;;  %v705_v42 = vld [vmem:[%s4924_s10 + $0x220] sm:$0xff]  ;;  %v707_v43 = vld [vmem:[%s4924_s10 + $0x230] sm:$0xff]  ;;  %704 = vst [vmem:[%s4929_s7 + $0x108] sm:$0xff] %v703_v41 }
  0x43   : > { %706 = vst [vmem:[%s4929_s7 + $0x110] sm:$0xff] %v705_v42  ;;  %708 = vst [vmem:[%s4929_s7 + $0x118] sm:$0xff] %v707_v43  ;;  %v709_v44 = vld [vmem:[%s4924_s10 + $0x240] sm:$0xff]  ;;  %v711_v45 = vld [vmem:[%s4924_s10 + $0x250] sm:$0xff] }
  0x44   : > { %v713_v46 = vld [vmem:[%s4924_s10 + $0x260] sm:$0xff]  ;;  %710 = vst [vmem:[%s4929_s7 + $0x120] sm:$0xff] %v709_v44  ;;  %712 = vst [vmem:[%s4929_s7 + $0x128] sm:$0xff] %v711_v45  ;;  %v715_v47 = vld [vmem:[%s4924_s10 + $0x270] sm:$0xff] }
  0x45   : > { %714 = vst [vmem:[%s4929_s7 + $0x130] sm:$0xff] %v713_v46  ;;  %v717_v48 = vld [vmem:[%s4924_s10 + $0x280] sm:$0xff]  ;;  %v719_v49 = vld [vmem:[%s4924_s10 + $0x290] sm:$0xff]  ;;  %716 = vst [vmem:[%s4929_s7 + $0x138] sm:$0xff] %v715_v47 }
  0x46   : > { %718 = vst [vmem:[%s4929_s7 + $0x140] sm:$0xff] %v717_v48  ;;  %720 = vst [vmem:[%s4929_s7 + $0x148] sm:$0xff] %v719_v49  ;;  %v721_v50 = vld [vmem:[%s4924_s10 + $0x2a0] sm:$0xff]  ;;  %v723_v51 = vld [vmem:[%s4924_s10 + $0x2b0] sm:$0xff] }
  0x47   : > { %v725_v52 = vld [vmem:[%s4924_s10 + $0x2c0] sm:$0xff]  ;;  %722 = vst [vmem:[%s4929_s7 + $0x150] sm:$0xff] %v721_v50  ;;  %724 = vst [vmem:[%s4929_s7 + $0x158] sm:$0xff] %v723_v51  ;;  %v727_v53 = vld [vmem:[%s4924_s10 + $0x2d0] sm:$0xff] }
  0x48   : > { %726 = vst [vmem:[%s4929_s7 + $0x160] sm:$0xff] %v725_v52  ;;  %v729_v54 = vld [vmem:[%s4924_s10 + $0x2e0] sm:$0xff]  ;;  %v731_v55 = vld [vmem:[%s4924_s10 + $0x2f0] sm:$0xff]  ;;  %728 = vst [vmem:[%s4929_s7 + $0x168] sm:$0xff] %v727_v53 }
  0x49   : > { %730 = vst [vmem:[%s4929_s7 + $0x170] sm:$0xff] %v729_v54  ;;  %732 = vst [vmem:[%s4929_s7 + $0x178] sm:$0xff] %v731_v55  ;;  %v733_v56 = vld [vmem:[%s4924_s10 + $0x300] sm:$0xff]  ;;  %v735_v57 = vld [vmem:[%s4924_s10 + $0x310] sm:$0xff] }
  0x4a   : > { %v737_v58 = vld [vmem:[%s4924_s10 + $0x320] sm:$0xff]  ;;  %734 = vst [vmem:[%s4929_s7 + $0x180] sm:$0xff] %v733_v56  ;;  %736 = vst [vmem:[%s4929_s7 + $0x188] sm:$0xff] %v735_v57  ;;  %v739_v59 = vld [vmem:[%s4924_s10 + $0x330] sm:$0xff] }
  0x4b   : > { %738 = vst [vmem:[%s4929_s7 + $0x190] sm:$0xff] %v737_v58  ;;  %v741_v60 = vld [vmem:[%s4924_s10 + $0x340] sm:$0xff]  ;;  %v743_v61 = vld [vmem:[%s4924_s10 + $0x350] sm:$0xff]  ;;  %740 = vst [vmem:[%s4929_s7 + $0x198] sm:$0xff] %v739_v59 }
  0x4c   : > { %742 = vst [vmem:[%s4929_s7 + $0x1a0] sm:$0xff] %v741_v60  ;;  %744 = vst [vmem:[%s4929_s7 + $0x1a8] sm:$0xff] %v743_v61  ;;  %v745_v62 = vld [vmem:[%s4924_s10 + $0x360] sm:$0xff]  ;;  %v747_v63 = vld [vmem:[%s4924_s10 + $0x370] sm:$0xff] }
  0x4d   : > { %v749_v0 = vld [vmem:[%s4924_s10 + $0x380] sm:$0xff]  ;;  %746 = vst [vmem:[%s4929_s7 + $0x1b0] sm:$0xff] %v745_v62  ;;  %748 = vst [vmem:[%s4929_s7 + $0x1b8] sm:$0xff] %v747_v63  ;;  %v751_v1 = vld [vmem:[%s4924_s10 + $0x390] sm:$0xff] }
  0x4e   : > { %750 = vst [vmem:[%s4929_s7 + $0x1c0] sm:$0xff] %v749_v0  ;;  %v753_v2 = vld [vmem:[%s4924_s10 + $0x3a0] sm:$0xff]  ;;  %v755_v3 = vld [vmem:[%s4924_s10 + $0x3b0] sm:$0xff]  ;;  %752 = vst [vmem:[%s4929_s7 + $0x1c8] sm:$0xff] %v751_v1 }
  0x4f   : > { %754 = vst [vmem:[%s4929_s7 + $0x1d0] sm:$0xff] %v753_v2  ;;  %756 = vst [vmem:[%s4929_s7 + $0x1d8] sm:$0xff] %v755_v3  ;;  %v757_v4 = vld [vmem:[%s4924_s10 + $0x3c0] sm:$0xff]  ;;  %v759_v5 = vld [vmem:[%s4924_s10 + $0x3d0] sm:$0xff] }
  0x50   : > { %v761_v6 = vld [vmem:[%s4924_s10 + $0x3e0] sm:$0xff]  ;;  %758 = vst [vmem:[%s4929_s7 + $0x1e0] sm:$0xff] %v757_v4  ;;  %760 = vst [vmem:[%s4929_s7 + $0x1e8] sm:$0xff] %v759_v5  ;;  %v763_v7 = vld [vmem:[%s4924_s10 + $0x3f0] sm:$0xff] }
  0x51   : > { %762 = vst [vmem:[%s4929_s7 + $0x1f0] sm:$0xff] %v761_v6  ;;  %v765_v8 = vld [vmem:[%s4924_s10 + $0x400] sm:$0xff]  ;;  %v767_v9 = vld [vmem:[%s4924_s10 + $0x410] sm:$0xff]  ;;  %764 = vst [vmem:[%s4929_s7 + $0x1f8] sm:$0xff] %v763_v7 }
  0x52   : > { %766 = vst [vmem:[%s4929_s7 + $0x200] sm:$0xff] %v765_v8  ;;  %768 = vst [vmem:[%s4929_s7 + $0x208] sm:$0xff] %v767_v9  ;;  %v769_v10 = vld [vmem:[%s4924_s10 + $0x420] sm:$0xff]  ;;  %v771_v11 = vld [vmem:[%s4924_s10 + $0x430] sm:$0xff] }
  0x53   : > { %v773_v12 = vld [vmem:[%s4924_s10 + $0x440] sm:$0xff]  ;;  %770 = vst [vmem:[%s4929_s7 + $0x210] sm:$0xff] %v769_v10  ;;  %772 = vst [vmem:[%s4929_s7 + $0x218] sm:$0xff] %v771_v11  ;;  %v775_v13 = vld [vmem:[%s4924_s10 + $0x450] sm:$0xff] }
  0x54   : > { %774 = vst [vmem:[%s4929_s7 + $0x220] sm:$0xff] %v773_v12  ;;  %v777_v14 = vld [vmem:[%s4924_s10 + $0x460] sm:$0xff]  ;;  %v779_v15 = vld [vmem:[%s4924_s10 + $0x470] sm:$0xff]  ;;  %776 = vst [vmem:[%s4929_s7 + $0x228] sm:$0xff] %v775_v13 }
  0x55   : > { %778 = vst [vmem:[%s4929_s7 + $0x230] sm:$0xff] %v777_v14  ;;  %780 = vst [vmem:[%s4929_s7 + $0x238] sm:$0xff] %v779_v15  ;;  %v781_v16 = vld [vmem:[%s4924_s10 + $0x480] sm:$0xff]  ;;  %v783_v17 = vld [vmem:[%s4924_s10 + $0x490] sm:$0xff] }
  0x56   : > { %v785_v18 = vld [vmem:[%s4924_s10 + $0x4a0] sm:$0xff]  ;;  %782 = vst [vmem:[%s4929_s7 + $0x240] sm:$0xff] %v781_v16  ;;  %784 = vst [vmem:[%s4929_s7 + $0x248] sm:$0xff] %v783_v17  ;;  %v787_v19 = vld [vmem:[%s4924_s10 + $0x4b0] sm:$0xff] }
  0x57   : > { %786 = vst [vmem:[%s4929_s7 + $0x250] sm:$0xff] %v785_v18  ;;  %v789_v20 = vld [vmem:[%s4924_s10 + $0x4c0] sm:$0xff]  ;;  %v791_v21 = vld [vmem:[%s4924_s10 + $0x4d0] sm:$0xff]  ;;  %788 = vst [vmem:[%s4929_s7 + $0x258] sm:$0xff] %v787_v19 }
  0x58   : > { %790 = vst [vmem:[%s4929_s7 + $0x260] sm:$0xff] %v789_v20  ;;  %792 = vst [vmem:[%s4929_s7 + $0x268] sm:$0xff] %v791_v21  ;;  %v793_v22 = vld [vmem:[%s4924_s10 + $0x4e0] sm:$0xff]  ;;  %v795_v23 = vld [vmem:[%s4924_s10 + $0x4f0] sm:$0xff] }
  0x59   : > { %v797_v24 = vld [vmem:[%s4924_s10 + $0x500] sm:$0xff]  ;;  %794 = vst [vmem:[%s4929_s7 + $0x270] sm:$0xff] %v793_v22  ;;  %796 = vst [vmem:[%s4929_s7 + $0x278] sm:$0xff] %v795_v23  ;;  %v799_v25 = vld [vmem:[%s4924_s10 + $0x510] sm:$0xff] }
  0x5a   : > { %798 = vst [vmem:[%s4929_s7 + $0x280] sm:$0xff] %v797_v24  ;;  %v801_v26 = vld [vmem:[%s4924_s10 + $0x520] sm:$0xff]  ;;  %v803_v27 = vld [vmem:[%s4924_s10 + $0x530] sm:$0xff]  ;;  %800 = vst [vmem:[%s4929_s7 + $0x288] sm:$0xff] %v799_v25 }
  0x5b   : > { %802 = vst [vmem:[%s4929_s7 + $0x290] sm:$0xff] %v801_v26  ;;  %804 = vst [vmem:[%s4929_s7 + $0x298] sm:$0xff] %v803_v27  ;;  %v805_v28 = vld [vmem:[%s4924_s10 + $0x540] sm:$0xff]  ;;  %v807_v29 = vld [vmem:[%s4924_s10 + $0x550] sm:$0xff] }
  0x5c   : > { %v809_v30 = vld [vmem:[%s4924_s10 + $0x560] sm:$0xff]  ;;  %806 = vst [vmem:[%s4929_s7 + $0x2a0] sm:$0xff] %v805_v28  ;;  %808 = vst [vmem:[%s4929_s7 + $0x2a8] sm:$0xff] %v807_v29  ;;  %v811_v31 = vld [vmem:[%s4924_s10 + $0x570] sm:$0xff] }
  0x5d   : > { %810 = vst [vmem:[%s4929_s7 + $0x2b0] sm:$0xff] %v809_v30  ;;  %v813_v32 = vld [vmem:[%s4924_s10 + $0x580] sm:$0xff]  ;;  %v815_v33 = vld [vmem:[%s4924_s10 + $0x590] sm:$0xff]  ;;  %812 = vst [vmem:[%s4929_s7 + $0x2b8] sm:$0xff] %v811_v31 }
  0x5e   : > { %814 = vst [vmem:[%s4929_s7 + $0x2c0] sm:$0xff] %v813_v32  ;;  %816 = vst [vmem:[%s4929_s7 + $0x2c8] sm:$0xff] %v815_v33  ;;  %v817_v34 = vld [vmem:[%s4924_s10 + $0x5a0] sm:$0xff]  ;;  %v819_v35 = vld [vmem:[%s4924_s10 + $0x5b0] sm:$0xff] }
  0x5f   : > { %v821_v36 = vld [vmem:[%s4924_s10 + $0x5c0] sm:$0xff]  ;;  %818 = vst [vmem:[%s4929_s7 + $0x2d0] sm:$0xff] %v817_v34  ;;  %820 = vst [vmem:[%s4929_s7 + $0x2d8] sm:$0xff] %v819_v35  ;;  %v823_v37 = vld [vmem:[%s4924_s10 + $0x5d0] sm:$0xff] }
  0x60   : > { %822 = vst [vmem:[%s4929_s7 + $0x2e0] sm:$0xff] %v821_v36  ;;  %v825_v38 = vld [vmem:[%s4924_s10 + $0x5e0] sm:$0xff]  ;;  %v827_v39 = vld [vmem:[%s4924_s10 + $0x5f0] sm:$0xff]  ;;  %824 = vst [vmem:[%s4929_s7 + $0x2e8] sm:$0xff] %v823_v37 }
  0x61   : > { %826 = vst [vmem:[%s4929_s7 + $0x2f0] sm:$0xff] %v825_v38  ;;  %828 = vst [vmem:[%s4929_s7 + $0x2f8] sm:$0xff] %v827_v39  ;;  %v829_v40 = vld [vmem:[%s4924_s10 + $0x600] sm:$0xff]  ;;  %v831_v41 = vld [vmem:[%s4924_s10 + $0x610] sm:$0xff] }
  0x62   : > { %v833_v42 = vld [vmem:[%s4924_s10 + $0x620] sm:$0xff]  ;;  %830 = vst [vmem:[%s4929_s7 + $0x300] sm:$0xff] %v829_v40  ;;  %832 = vst [vmem:[%s4929_s7 + $0x308] sm:$0xff] %v831_v41  ;;  %v835_v43 = vld [vmem:[%s4924_s10 + $0x630] sm:$0xff] }
  0x63   : > { %834 = vst [vmem:[%s4929_s7 + $0x310] sm:$0xff] %v833_v42  ;;  %v837_v44 = vld [vmem:[%s4924_s10 + $0x640] sm:$0xff]  ;;  %v839_v45 = vld [vmem:[%s4924_s10 + $0x650] sm:$0xff]  ;;  %836 = vst [vmem:[%s4929_s7 + $0x318] sm:$0xff] %v835_v43 }
  0x64   : > { %838 = vst [vmem:[%s4929_s7 + $0x320] sm:$0xff] %v837_v44  ;;  %840 = vst [vmem:[%s4929_s7 + $0x328] sm:$0xff] %v839_v45  ;;  %v841_v46 = vld [vmem:[%s4924_s10 + $0x660] sm:$0xff]  ;;  %v843_v47 = vld [vmem:[%s4924_s10 + $0x670] sm:$0xff] }
  0x65   : > { %v845_v48 = vld [vmem:[%s4924_s10 + $0x680] sm:$0xff]  ;;  %842 = vst [vmem:[%s4929_s7 + $0x330] sm:$0xff] %v841_v46  ;;  %844 = vst [vmem:[%s4929_s7 + $0x338] sm:$0xff] %v843_v47  ;;  %v847_v49 = vld [vmem:[%s4924_s10 + $0x690] sm:$0xff] }
  0x66   : > { %846 = vst [vmem:[%s4929_s7 + $0x340] sm:$0xff] %v845_v48  ;;  %v849_v50 = vld [vmem:[%s4924_s10 + $0x6a0] sm:$0xff]  ;;  %v851_v51 = vld [vmem:[%s4924_s10 + $0x6b0] sm:$0xff]  ;;  %848 = vst [vmem:[%s4929_s7 + $0x348] sm:$0xff] %v847_v49 }
  0x67   : > { %850 = vst [vmem:[%s4929_s7 + $0x350] sm:$0xff] %v849_v50  ;;  %852 = vst [vmem:[%s4929_s7 + $0x358] sm:$0xff] %v851_v51  ;;  %v853_v52 = vld [vmem:[%s4924_s10 + $0x6c0] sm:$0xff]  ;;  %v855_v53 = vld [vmem:[%s4924_s10 + $0x6d0] sm:$0xff] }
  0x68   : > { %v857_v54 = vld [vmem:[%s4924_s10 + $0x6e0] sm:$0xff]  ;;  %854 = vst [vmem:[%s4929_s7 + $0x360] sm:$0xff] %v853_v52  ;;  %856 = vst [vmem:[%s4929_s7 + $0x368] sm:$0xff] %v855_v53  ;;  %v859_v55 = vld [vmem:[%s4924_s10 + $0x6f0] sm:$0xff] }
  0x69   : > { %858 = vst [vmem:[%s4929_s7 + $0x370] sm:$0xff] %v857_v54  ;;  %v861_v56 = vld [vmem:[%s4924_s10 + $0x700] sm:$0xff]  ;;  %v863_v57 = vld [vmem:[%s4924_s10 + $0x710] sm:$0xff]  ;;  %860 = vst [vmem:[%s4929_s7 + $0x378] sm:$0xff] %v859_v55 }
  0x6a   : > { %862 = vst [vmem:[%s4929_s7 + $0x380] sm:$0xff] %v861_v56  ;;  %864 = vst [vmem:[%s4929_s7 + $0x388] sm:$0xff] %v863_v57  ;;  %v865_v58 = vld [vmem:[%s4924_s10 + $0x720] sm:$0xff]  ;;  %v867_v59 = vld [vmem:[%s4924_s10 + $0x730] sm:$0xff] }
  0x6b   : > { %v869_v60 = vld [vmem:[%s4924_s10 + $0x740] sm:$0xff]  ;;  %866 = vst [vmem:[%s4929_s7 + $0x390] sm:$0xff] %v865_v58  ;;  %868 = vst [vmem:[%s4929_s7 + $0x398] sm:$0xff] %v867_v59  ;;  %v871_v61 = vld [vmem:[%s4924_s10 + $0x750] sm:$0xff] }
  0x6c   : > { %870 = vst [vmem:[%s4929_s7 + $0x3a0] sm:$0xff] %v869_v60  ;;  %v873_v62 = vld [vmem:[%s4924_s10 + $0x760] sm:$0xff]  ;;  %v875_v63 = vld [vmem:[%s4924_s10 + $0x770] sm:$0xff]  ;;  %872 = vst [vmem:[%s4929_s7 + $0x3a8] sm:$0xff] %v871_v61 }
  0x6d   : > { %874 = vst [vmem:[%s4929_s7 + $0x3b0] sm:$0xff] %v873_v62  ;;  %876 = vst [vmem:[%s4929_s7 + $0x3b8] sm:$0xff] %v875_v63  ;;  %v877_v0 = vld [vmem:[%s4924_s10 + $0x780] sm:$0xff]  ;;  %v879_v1 = vld [vmem:[%s4924_s10 + $0x790] sm:$0xff] }
  0x6e   : > { %v881_v2 = vld [vmem:[%s4924_s10 + $0x7a0] sm:$0xff]  ;;  %878 = vst [vmem:[%s4929_s7 + $0x3c0] sm:$0xff] %v877_v0  ;;  %880 = vst [vmem:[%s4929_s7 + $0x3c8] sm:$0xff] %v879_v1  ;;  %v883_v3 = vld [vmem:[%s4924_s10 + $0x7b0] sm:$0xff] }
  0x6f   : > { %882 = vst [vmem:[%s4929_s7 + $0x3d0] sm:$0xff] %v881_v2  ;;  %v885_v4 = vld [vmem:[%s4924_s10 + $0x7c0] sm:$0xff]  ;;  %v887_v5 = vld [vmem:[%s4924_s10 + $0x7d0] sm:$0xff]  ;;  %884 = vst [vmem:[%s4929_s7 + $0x3d8] sm:$0xff] %v883_v3 }
  0x70   : > { %886 = vst [vmem:[%s4929_s7 + $0x3e0] sm:$0xff] %v885_v4  ;;  %888 = vst [vmem:[%s4929_s7 + $0x3e8] sm:$0xff] %v887_v5  ;;  %v889_v6 = vld [vmem:[%s4924_s10 + $0x7e0] sm:$0xff]  ;;  %v891_v7 = vld [vmem:[%s4924_s10 + $0x7f0] sm:$0xff] }
  0x71   : > { %890 = vst [vmem:[%s4929_s7 + $0x3f0] sm:$0xff] %v889_v6  ;;  %892 = vst [vmem:[%s4929_s7 + $0x3f8] sm:$0xff] %v891_v7 }
  0x72 PF: > { %898 = sbr.rel (!%p4880_p6) target bundleno = 182 (0xb6), region = 134  ;;  %s900_s13 = sand.u32 (%p4880_p6), 1, %s4747_s22  }
  0x73   : > { %s4242_s15 = sshll.u32 (%p4880_p6), %s4771_s28, 3  ;;  %s4241_s8 = sshll.u32 (%p4880_p6), %s900_s13, 10 }
  0x74   : > { %s5191_s9 = scalar_lea.vmem (%p4880_p6), %s6401_s3, %s4242_s15  ;;  %s5196_s19 = scalar_lea.vmem (%p4880_p6), [#allocation5], %s4241_s8 }
  0x75   : > { %v1187_v8 = vld [vmem:[%s5191_s9] sm:$0xff] (%p4880_p6)  ;;  %v1189_v9 = vld [vmem:[%s5191_s9 + $0x10] sm:$0xff] (%p4880_p6) }
  0x76   : > { %v1191_v10 = vld [vmem:[%s5191_s9 + $0x20] sm:$0xff] (%p4880_p6)  ;;  %1188 = vst [vmem:[%s5196_s19] sm:$0xff] (%p4880_p6), %v1187_v8  ;;  %1190 = vst [vmem:[%s5196_s19 + $0x8] sm:$0xff] (%p4880_p6), %v1189_v9  ;;  %v1193_v11 = vld [vmem:[%s5191_s9 + $0x30] sm:$0xff] (%p4880_p6) }
  0x77   : > { %1192 = vst [vmem:[%s5196_s19 + $0x10] sm:$0xff] %v1191_v10  ;;  %v1195_v12 = vld [vmem:[%s5191_s9 + $0x40] sm:$0xff]  ;;  %v1197_v13 = vld [vmem:[%s5191_s9 + $0x50] sm:$0xff]  ;;  %1194 = vst [vmem:[%s5196_s19 + $0x18] sm:$0xff] %v1193_v11 }
  0x78   : > { %1196 = vst [vmem:[%s5196_s19 + $0x20] sm:$0xff] %v1195_v12  ;;  %1198 = vst [vmem:[%s5196_s19 + $0x28] sm:$0xff] %v1197_v13  ;;  %v1199_v14 = vld [vmem:[%s5191_s9 + $0x60] sm:$0xff]  ;;  %v1201_v15 = vld [vmem:[%s5191_s9 + $0x70] sm:$0xff] }
  0x79   : > { %v1203_v16 = vld [vmem:[%s5191_s9 + $0x80] sm:$0xff]  ;;  %1200 = vst [vmem:[%s5196_s19 + $0x30] sm:$0xff] %v1199_v14  ;;  %1202 = vst [vmem:[%s5196_s19 + $0x38] sm:$0xff] %v1201_v15  ;;  %v1205_v17 = vld [vmem:[%s5191_s9 + $0x90] sm:$0xff] }
  0x7a   : > { %1204 = vst [vmem:[%s5196_s19 + $0x40] sm:$0xff] %v1203_v16  ;;  %v1207_v18 = vld [vmem:[%s5191_s9 + $0xa0] sm:$0xff]  ;;  %v1209_v19 = vld [vmem:[%s5191_s9 + $0xb0] sm:$0xff]  ;;  %1206 = vst [vmem:[%s5196_s19 + $0x48] sm:$0xff] %v1205_v17 }
  0x7b   : > { %1208 = vst [vmem:[%s5196_s19 + $0x50] sm:$0xff] %v1207_v18  ;;  %1210 = vst [vmem:[%s5196_s19 + $0x58] sm:$0xff] %v1209_v19  ;;  %v1211_v20 = vld [vmem:[%s5191_s9 + $0xc0] sm:$0xff]  ;;  %v1213_v21 = vld [vmem:[%s5191_s9 + $0xd0] sm:$0xff] }
  0x7c   : > { %v1215_v22 = vld [vmem:[%s5191_s9 + $0xe0] sm:$0xff]  ;;  %1212 = vst [vmem:[%s5196_s19 + $0x60] sm:$0xff] %v1211_v20  ;;  %1214 = vst [vmem:[%s5196_s19 + $0x68] sm:$0xff] %v1213_v21  ;;  %v1217_v23 = vld [vmem:[%s5191_s9 + $0xf0] sm:$0xff] }
  0x7d   : > { %1216 = vst [vmem:[%s5196_s19 + $0x70] sm:$0xff] %v1215_v22  ;;  %v1219_v24 = vld [vmem:[%s5191_s9 + $0x100] sm:$0xff]  ;;  %v1221_v25 = vld [vmem:[%s5191_s9 + $0x110] sm:$0xff]  ;;  %1218 = vst [vmem:[%s5196_s19 + $0x78] sm:$0xff] %v1217_v23 }
  0x7e   : > { %1220 = vst [vmem:[%s5196_s19 + $0x80] sm:$0xff] %v1219_v24  ;;  %1222 = vst [vmem:[%s5196_s19 + $0x88] sm:$0xff] %v1221_v25  ;;  %v1223_v26 = vld [vmem:[%s5191_s9 + $0x120] sm:$0xff]  ;;  %v1225_v27 = vld [vmem:[%s5191_s9 + $0x130] sm:$0xff] }
  0x7f   : > { %v1227_v28 = vld [vmem:[%s5191_s9 + $0x140] sm:$0xff]  ;;  %1224 = vst [vmem:[%s5196_s19 + $0x90] sm:$0xff] %v1223_v26  ;;  %1226 = vst [vmem:[%s5196_s19 + $0x98] sm:$0xff] %v1225_v27  ;;  %v1229_v29 = vld [vmem:[%s5191_s9 + $0x150] sm:$0xff] }
  0x80   : > { %1228 = vst [vmem:[%s5196_s19 + $0xa0] sm:$0xff] %v1227_v28  ;;  %v1231_v30 = vld [vmem:[%s5191_s9 + $0x160] sm:$0xff]  ;;  %v1233_v31 = vld [vmem:[%s5191_s9 + $0x170] sm:$0xff]  ;;  %1230 = vst [vmem:[%s5196_s19 + $0xa8] sm:$0xff] %v1229_v29 }
  0x81   : > { %1232 = vst [vmem:[%s5196_s19 + $0xb0] sm:$0xff] %v1231_v30  ;;  %1234 = vst [vmem:[%s5196_s19 + $0xb8] sm:$0xff] %v1233_v31  ;;  %v1235_v32 = vld [vmem:[%s5191_s9 + $0x180] sm:$0xff]  ;;  %v1237_v33 = vld [vmem:[%s5191_s9 + $0x190] sm:$0xff] }
  0x82   : > { %v1239_v34 = vld [vmem:[%s5191_s9 + $0x1a0] sm:$0xff]  ;;  %1236 = vst [vmem:[%s5196_s19 + $0xc0] sm:$0xff] %v1235_v32  ;;  %1238 = vst [vmem:[%s5196_s19 + $0xc8] sm:$0xff] %v1237_v33  ;;  %v1241_v35 = vld [vmem:[%s5191_s9 + $0x1b0] sm:$0xff] }
  0x83   : > { %1240 = vst [vmem:[%s5196_s19 + $0xd0] sm:$0xff] %v1239_v34  ;;  %v1243_v36 = vld [vmem:[%s5191_s9 + $0x1c0] sm:$0xff]  ;;  %v1245_v37 = vld [vmem:[%s5191_s9 + $0x1d0] sm:$0xff]  ;;  %1242 = vst [vmem:[%s5196_s19 + $0xd8] sm:$0xff] %v1241_v35 }
  0x84   : > { %1244 = vst [vmem:[%s5196_s19 + $0xe0] sm:$0xff] %v1243_v36  ;;  %1246 = vst [vmem:[%s5196_s19 + $0xe8] sm:$0xff] %v1245_v37  ;;  %v1247_v38 = vld [vmem:[%s5191_s9 + $0x1e0] sm:$0xff]  ;;  %v1249_v39 = vld [vmem:[%s5191_s9 + $0x1f0] sm:$0xff] }
  0x85   : > { %v1251_v40 = vld [vmem:[%s5191_s9 + $0x200] sm:$0xff]  ;;  %1248 = vst [vmem:[%s5196_s19 + $0xf0] sm:$0xff] %v1247_v38  ;;  %1250 = vst [vmem:[%s5196_s19 + $0xf8] sm:$0xff] %v1249_v39  ;;  %v1253_v41 = vld [vmem:[%s5191_s9 + $0x210] sm:$0xff] }
  0x86   : > { %1252 = vst [vmem:[%s5196_s19 + $0x100] sm:$0xff] %v1251_v40  ;;  %v1255_v42 = vld [vmem:[%s5191_s9 + $0x220] sm:$0xff]  ;;  %v1257_v43 = vld [vmem:[%s5191_s9 + $0x230] sm:$0xff]  ;;  %1254 = vst [vmem:[%s5196_s19 + $0x108] sm:$0xff] %v1253_v41 }
  0x87   : > { %1256 = vst [vmem:[%s5196_s19 + $0x110] sm:$0xff] %v1255_v42  ;;  %1258 = vst [vmem:[%s5196_s19 + $0x118] sm:$0xff] %v1257_v43  ;;  %v1259_v44 = vld [vmem:[%s5191_s9 + $0x240] sm:$0xff]  ;;  %v1261_v45 = vld [vmem:[%s5191_s9 + $0x250] sm:$0xff] }
  0x88   : > { %v1263_v46 = vld [vmem:[%s5191_s9 + $0x260] sm:$0xff]  ;;  %1260 = vst [vmem:[%s5196_s19 + $0x120] sm:$0xff] %v1259_v44  ;;  %1262 = vst [vmem:[%s5196_s19 + $0x128] sm:$0xff] %v1261_v45  ;;  %v1265_v47 = vld [vmem:[%s5191_s9 + $0x270] sm:$0xff] }
  0x89   : > { %1264 = vst [vmem:[%s5196_s19 + $0x130] sm:$0xff] %v1263_v46  ;;  %v1267_v48 = vld [vmem:[%s5191_s9 + $0x280] sm:$0xff]  ;;  %v1269_v49 = vld [vmem:[%s5191_s9 + $0x290] sm:$0xff]  ;;  %1266 = vst [vmem:[%s5196_s19 + $0x138] sm:$0xff] %v1265_v47 }
  0x8a   : > { %1268 = vst [vmem:[%s5196_s19 + $0x140] sm:$0xff] %v1267_v48  ;;  %1270 = vst [vmem:[%s5196_s19 + $0x148] sm:$0xff] %v1269_v49  ;;  %v1271_v50 = vld [vmem:[%s5191_s9 + $0x2a0] sm:$0xff]  ;;  %v1273_v51 = vld [vmem:[%s5191_s9 + $0x2b0] sm:$0xff] }
  0x8b   : > { %v1275_v52 = vld [vmem:[%s5191_s9 + $0x2c0] sm:$0xff]  ;;  %1272 = vst [vmem:[%s5196_s19 + $0x150] sm:$0xff] %v1271_v50  ;;  %1274 = vst [vmem:[%s5196_s19 + $0x158] sm:$0xff] %v1273_v51  ;;  %v1277_v53 = vld [vmem:[%s5191_s9 + $0x2d0] sm:$0xff] }
  0x8c   : > { %1276 = vst [vmem:[%s5196_s19 + $0x160] sm:$0xff] %v1275_v52  ;;  %v1279_v54 = vld [vmem:[%s5191_s9 + $0x2e0] sm:$0xff]  ;;  %v1281_v55 = vld [vmem:[%s5191_s9 + $0x2f0] sm:$0xff]  ;;  %1278 = vst [vmem:[%s5196_s19 + $0x168] sm:$0xff] %v1277_v53 }
  0x8d   : > { %1280 = vst [vmem:[%s5196_s19 + $0x170] sm:$0xff] %v1279_v54  ;;  %1282 = vst [vmem:[%s5196_s19 + $0x178] sm:$0xff] %v1281_v55  ;;  %v1283_v56 = vld [vmem:[%s5191_s9 + $0x300] sm:$0xff]  ;;  %v1285_v57 = vld [vmem:[%s5191_s9 + $0x310] sm:$0xff] }
  0x8e   : > { %v1287_v58 = vld [vmem:[%s5191_s9 + $0x320] sm:$0xff]  ;;  %1284 = vst [vmem:[%s5196_s19 + $0x180] sm:$0xff] %v1283_v56  ;;  %1286 = vst [vmem:[%s5196_s19 + $0x188] sm:$0xff] %v1285_v57  ;;  %v1289_v59 = vld [vmem:[%s5191_s9 + $0x330] sm:$0xff] }
  0x8f   : > { %1288 = vst [vmem:[%s5196_s19 + $0x190] sm:$0xff] %v1287_v58  ;;  %v1291_v60 = vld [vmem:[%s5191_s9 + $0x340] sm:$0xff]  ;;  %v1293_v61 = vld [vmem:[%s5191_s9 + $0x350] sm:$0xff]  ;;  %1290 = vst [vmem:[%s5196_s19 + $0x198] sm:$0xff] %v1289_v59 }
  0x90   : > { %1292 = vst [vmem:[%s5196_s19 + $0x1a0] sm:$0xff] %v1291_v60  ;;  %1294 = vst [vmem:[%s5196_s19 + $0x1a8] sm:$0xff] %v1293_v61  ;;  %v1295_v62 = vld [vmem:[%s5191_s9 + $0x360] sm:$0xff]  ;;  %v1297_v63 = vld [vmem:[%s5191_s9 + $0x370] sm:$0xff] }
  0x91   : > { %v1299_v0 = vld [vmem:[%s5191_s9 + $0x380] sm:$0xff]  ;;  %1296 = vst [vmem:[%s5196_s19 + $0x1b0] sm:$0xff] %v1295_v62  ;;  %1298 = vst [vmem:[%s5196_s19 + $0x1b8] sm:$0xff] %v1297_v63  ;;  %v1301_v1 = vld [vmem:[%s5191_s9 + $0x390] sm:$0xff] }
  0x92   : > { %1300 = vst [vmem:[%s5196_s19 + $0x1c0] sm:$0xff] %v1299_v0  ;;  %v1303_v2 = vld [vmem:[%s5191_s9 + $0x3a0] sm:$0xff]  ;;  %v1305_v3 = vld [vmem:[%s5191_s9 + $0x3b0] sm:$0xff]  ;;  %1302 = vst [vmem:[%s5196_s19 + $0x1c8] sm:$0xff] %v1301_v1 }
  0x93   : > { %1304 = vst [vmem:[%s5196_s19 + $0x1d0] sm:$0xff] %v1303_v2  ;;  %1306 = vst [vmem:[%s5196_s19 + $0x1d8] sm:$0xff] %v1305_v3  ;;  %v1307_v4 = vld [vmem:[%s5191_s9 + $0x3c0] sm:$0xff]  ;;  %v1309_v5 = vld [vmem:[%s5191_s9 + $0x3d0] sm:$0xff] }
  0x94   : > { %v1311_v6 = vld [vmem:[%s5191_s9 + $0x3e0] sm:$0xff]  ;;  %1308 = vst [vmem:[%s5196_s19 + $0x1e0] sm:$0xff] %v1307_v4  ;;  %1310 = vst [vmem:[%s5196_s19 + $0x1e8] sm:$0xff] %v1309_v5  ;;  %v1313_v7 = vld [vmem:[%s5191_s9 + $0x3f0] sm:$0xff] }
  0x95   : > { %1312 = vst [vmem:[%s5196_s19 + $0x1f0] sm:$0xff] %v1311_v6  ;;  %v1315_v8 = vld [vmem:[%s5191_s9 + $0x400] sm:$0xff]  ;;  %v1317_v9 = vld [vmem:[%s5191_s9 + $0x410] sm:$0xff]  ;;  %1314 = vst [vmem:[%s5196_s19 + $0x1f8] sm:$0xff] %v1313_v7 }
  0x96   : > { %1316 = vst [vmem:[%s5196_s19 + $0x200] sm:$0xff] %v1315_v8  ;;  %1318 = vst [vmem:[%s5196_s19 + $0x208] sm:$0xff] %v1317_v9  ;;  %v1319_v10 = vld [vmem:[%s5191_s9 + $0x420] sm:$0xff]  ;;  %v1321_v11 = vld [vmem:[%s5191_s9 + $0x430] sm:$0xff] }
  0x97   : > { %v1323_v12 = vld [vmem:[%s5191_s9 + $0x440] sm:$0xff]  ;;  %1320 = vst [vmem:[%s5196_s19 + $0x210] sm:$0xff] %v1319_v10  ;;  %1322 = vst [vmem:[%s5196_s19 + $0x218] sm:$0xff] %v1321_v11  ;;  %v1325_v13 = vld [vmem:[%s5191_s9 + $0x450] sm:$0xff] }
  0x98   : > { %1324 = vst [vmem:[%s5196_s19 + $0x220] sm:$0xff] %v1323_v12  ;;  %v1327_v14 = vld [vmem:[%s5191_s9 + $0x460] sm:$0xff]  ;;  %v1329_v15 = vld [vmem:[%s5191_s9 + $0x470] sm:$0xff]  ;;  %1326 = vst [vmem:[%s5196_s19 + $0x228] sm:$0xff] %v1325_v13 }
  0x99   : > { %1328 = vst [vmem:[%s5196_s19 + $0x230] sm:$0xff] %v1327_v14  ;;  %1330 = vst [vmem:[%s5196_s19 + $0x238] sm:$0xff] %v1329_v15  ;;  %v1331_v16 = vld [vmem:[%s5191_s9 + $0x480] sm:$0xff]  ;;  %v1333_v17 = vld [vmem:[%s5191_s9 + $0x490] sm:$0xff] }
  0x9a   : > { %v1335_v18 = vld [vmem:[%s5191_s9 + $0x4a0] sm:$0xff]  ;;  %1332 = vst [vmem:[%s5196_s19 + $0x240] sm:$0xff] %v1331_v16  ;;  %1334 = vst [vmem:[%s5196_s19 + $0x248] sm:$0xff] %v1333_v17  ;;  %v1337_v19 = vld [vmem:[%s5191_s9 + $0x4b0] sm:$0xff] }
  0x9b   : > { %1336 = vst [vmem:[%s5196_s19 + $0x250] sm:$0xff] %v1335_v18  ;;  %v1339_v20 = vld [vmem:[%s5191_s9 + $0x4c0] sm:$0xff]  ;;  %v1341_v21 = vld [vmem:[%s5191_s9 + $0x4d0] sm:$0xff]  ;;  %1338 = vst [vmem:[%s5196_s19 + $0x258] sm:$0xff] %v1337_v19 }
  0x9c   : > { %1340 = vst [vmem:[%s5196_s19 + $0x260] sm:$0xff] %v1339_v20  ;;  %1342 = vst [vmem:[%s5196_s19 + $0x268] sm:$0xff] %v1341_v21  ;;  %v1343_v22 = vld [vmem:[%s5191_s9 + $0x4e0] sm:$0xff]  ;;  %v1345_v23 = vld [vmem:[%s5191_s9 + $0x4f0] sm:$0xff] }
  0x9d   : > { %v1347_v24 = vld [vmem:[%s5191_s9 + $0x500] sm:$0xff]  ;;  %1344 = vst [vmem:[%s5196_s19 + $0x270] sm:$0xff] %v1343_v22  ;;  %1346 = vst [vmem:[%s5196_s19 + $0x278] sm:$0xff] %v1345_v23  ;;  %v1349_v25 = vld [vmem:[%s5191_s9 + $0x510] sm:$0xff] }
  0x9e   : > { %1348 = vst [vmem:[%s5196_s19 + $0x280] sm:$0xff] %v1347_v24  ;;  %v1351_v26 = vld [vmem:[%s5191_s9 + $0x520] sm:$0xff]  ;;  %v1353_v27 = vld [vmem:[%s5191_s9 + $0x530] sm:$0xff]  ;;  %1350 = vst [vmem:[%s5196_s19 + $0x288] sm:$0xff] %v1349_v25 }
  0x9f   : > { %1352 = vst [vmem:[%s5196_s19 + $0x290] sm:$0xff] %v1351_v26  ;;  %1354 = vst [vmem:[%s5196_s19 + $0x298] sm:$0xff] %v1353_v27  ;;  %v1355_v28 = vld [vmem:[%s5191_s9 + $0x540] sm:$0xff]  ;;  %v1357_v29 = vld [vmem:[%s5191_s9 + $0x550] sm:$0xff] }
  0xa0   : > { %v1359_v30 = vld [vmem:[%s5191_s9 + $0x560] sm:$0xff]  ;;  %1356 = vst [vmem:[%s5196_s19 + $0x2a0] sm:$0xff] %v1355_v28  ;;  %1358 = vst [vmem:[%s5196_s19 + $0x2a8] sm:$0xff] %v1357_v29  ;;  %v1361_v31 = vld [vmem:[%s5191_s9 + $0x570] sm:$0xff] }
  0xa1   : > { %1360 = vst [vmem:[%s5196_s19 + $0x2b0] sm:$0xff] %v1359_v30  ;;  %v1363_v32 = vld [vmem:[%s5191_s9 + $0x580] sm:$0xff]  ;;  %v1365_v33 = vld [vmem:[%s5191_s9 + $0x590] sm:$0xff]  ;;  %1362 = vst [vmem:[%s5196_s19 + $0x2b8] sm:$0xff] %v1361_v31 }
  0xa2   : > { %1364 = vst [vmem:[%s5196_s19 + $0x2c0] sm:$0xff] %v1363_v32  ;;  %1366 = vst [vmem:[%s5196_s19 + $0x2c8] sm:$0xff] %v1365_v33  ;;  %v1367_v34 = vld [vmem:[%s5191_s9 + $0x5a0] sm:$0xff]  ;;  %v1369_v35 = vld [vmem:[%s5191_s9 + $0x5b0] sm:$0xff] }
  0xa3   : > { %v1371_v36 = vld [vmem:[%s5191_s9 + $0x5c0] sm:$0xff]  ;;  %1368 = vst [vmem:[%s5196_s19 + $0x2d0] sm:$0xff] %v1367_v34  ;;  %1370 = vst [vmem:[%s5196_s19 + $0x2d8] sm:$0xff] %v1369_v35  ;;  %v1373_v37 = vld [vmem:[%s5191_s9 + $0x5d0] sm:$0xff] }
  0xa4   : > { %1372 = vst [vmem:[%s5196_s19 + $0x2e0] sm:$0xff] %v1371_v36  ;;  %v1375_v38 = vld [vmem:[%s5191_s9 + $0x5e0] sm:$0xff]  ;;  %v1377_v39 = vld [vmem:[%s5191_s9 + $0x5f0] sm:$0xff]  ;;  %1374 = vst [vmem:[%s5196_s19 + $0x2e8] sm:$0xff] %v1373_v37 }
  0xa5   : > { %1376 = vst [vmem:[%s5196_s19 + $0x2f0] sm:$0xff] %v1375_v38  ;;  %1378 = vst [vmem:[%s5196_s19 + $0x2f8] sm:$0xff] %v1377_v39  ;;  %v1379_v40 = vld [vmem:[%s5191_s9 + $0x600] sm:$0xff]  ;;  %v1381_v41 = vld [vmem:[%s5191_s9 + $0x610] sm:$0xff] }
  0xa6   : > { %v1383_v42 = vld [vmem:[%s5191_s9 + $0x620] sm:$0xff]  ;;  %1380 = vst [vmem:[%s5196_s19 + $0x300] sm:$0xff] %v1379_v40  ;;  %1382 = vst [vmem:[%s5196_s19 + $0x308] sm:$0xff] %v1381_v41  ;;  %v1385_v43 = vld [vmem:[%s5191_s9 + $0x630] sm:$0xff] }
  0xa7   : > { %1384 = vst [vmem:[%s5196_s19 + $0x310] sm:$0xff] %v1383_v42  ;;  %v1387_v44 = vld [vmem:[%s5191_s9 + $0x640] sm:$0xff]  ;;  %v1389_v45 = vld [vmem:[%s5191_s9 + $0x650] sm:$0xff]  ;;  %1386 = vst [vmem:[%s5196_s19 + $0x318] sm:$0xff] %v1385_v43 }
  0xa8   : > { %1388 = vst [vmem:[%s5196_s19 + $0x320] sm:$0xff] %v1387_v44  ;;  %1390 = vst [vmem:[%s5196_s19 + $0x328] sm:$0xff] %v1389_v45  ;;  %v1391_v46 = vld [vmem:[%s5191_s9 + $0x660] sm:$0xff]  ;;  %v1393_v47 = vld [vmem:[%s5191_s9 + $0x670] sm:$0xff] }
  0xa9   : > { %v1395_v48 = vld [vmem:[%s5191_s9 + $0x680] sm:$0xff]  ;;  %1392 = vst [vmem:[%s5196_s19 + $0x330] sm:$0xff] %v1391_v46  ;;  %1394 = vst [vmem:[%s5196_s19 + $0x338] sm:$0xff] %v1393_v47  ;;  %v1397_v49 = vld [vmem:[%s5191_s9 + $0x690] sm:$0xff] }
  0xaa   : > { %1396 = vst [vmem:[%s5196_s19 + $0x340] sm:$0xff] %v1395_v48  ;;  %v1399_v50 = vld [vmem:[%s5191_s9 + $0x6a0] sm:$0xff]  ;;  %v1401_v51 = vld [vmem:[%s5191_s9 + $0x6b0] sm:$0xff]  ;;  %1398 = vst [vmem:[%s5196_s19 + $0x348] sm:$0xff] %v1397_v49 }
  0xab   : > { %1400 = vst [vmem:[%s5196_s19 + $0x350] sm:$0xff] %v1399_v50  ;;  %1402 = vst [vmem:[%s5196_s19 + $0x358] sm:$0xff] %v1401_v51  ;;  %v1403_v52 = vld [vmem:[%s5191_s9 + $0x6c0] sm:$0xff]  ;;  %v1405_v53 = vld [vmem:[%s5191_s9 + $0x6d0] sm:$0xff] }
  0xac   : > { %v1407_v54 = vld [vmem:[%s5191_s9 + $0x6e0] sm:$0xff]  ;;  %1404 = vst [vmem:[%s5196_s19 + $0x360] sm:$0xff] %v1403_v52  ;;  %1406 = vst [vmem:[%s5196_s19 + $0x368] sm:$0xff] %v1405_v53  ;;  %v1409_v55 = vld [vmem:[%s5191_s9 + $0x6f0] sm:$0xff] }
  0xad   : > { %1408 = vst [vmem:[%s5196_s19 + $0x370] sm:$0xff] %v1407_v54  ;;  %v1411_v56 = vld [vmem:[%s5191_s9 + $0x700] sm:$0xff]  ;;  %v1413_v57 = vld [vmem:[%s5191_s9 + $0x710] sm:$0xff]  ;;  %1410 = vst [vmem:[%s5196_s19 + $0x378] sm:$0xff] %v1409_v55 }
  0xae   : > { %1412 = vst [vmem:[%s5196_s19 + $0x380] sm:$0xff] %v1411_v56  ;;  %1414 = vst [vmem:[%s5196_s19 + $0x388] sm:$0xff] %v1413_v57  ;;  %v1415_v58 = vld [vmem:[%s5191_s9 + $0x720] sm:$0xff]  ;;  %v1417_v59 = vld [vmem:[%s5191_s9 + $0x730] sm:$0xff] }
  0xaf   : > { %v1419_v60 = vld [vmem:[%s5191_s9 + $0x740] sm:$0xff]  ;;  %1416 = vst [vmem:[%s5196_s19 + $0x390] sm:$0xff] %v1415_v58  ;;  %1418 = vst [vmem:[%s5196_s19 + $0x398] sm:$0xff] %v1417_v59  ;;  %v1421_v61 = vld [vmem:[%s5191_s9 + $0x750] sm:$0xff] }
  0xb0   : > { %1420 = vst [vmem:[%s5196_s19 + $0x3a0] sm:$0xff] %v1419_v60  ;;  %v1423_v62 = vld [vmem:[%s5191_s9 + $0x760] sm:$0xff]  ;;  %v1425_v63 = vld [vmem:[%s5191_s9 + $0x770] sm:$0xff]  ;;  %1422 = vst [vmem:[%s5196_s19 + $0x3a8] sm:$0xff] %v1421_v61 }
  0xb1   : > { %1424 = vst [vmem:[%s5196_s19 + $0x3b0] sm:$0xff] %v1423_v62  ;;  %1426 = vst [vmem:[%s5196_s19 + $0x3b8] sm:$0xff] %v1425_v63  ;;  %v1427_v0 = vld [vmem:[%s5191_s9 + $0x780] sm:$0xff]  ;;  %v1429_v1 = vld [vmem:[%s5191_s9 + $0x790] sm:$0xff] }
  0xb2   : > { %v1431_v2 = vld [vmem:[%s5191_s9 + $0x7a0] sm:$0xff]  ;;  %1428 = vst [vmem:[%s5196_s19 + $0x3c0] sm:$0xff] %v1427_v0  ;;  %1430 = vst [vmem:[%s5196_s19 + $0x3c8] sm:$0xff] %v1429_v1  ;;  %v1433_v3 = vld [vmem:[%s5191_s9 + $0x7b0] sm:$0xff] }
  0xb3   : > { %1432 = vst [vmem:[%s5196_s19 + $0x3d0] sm:$0xff] %v1431_v2  ;;  %v1435_v4 = vld [vmem:[%s5191_s9 + $0x7c0] sm:$0xff]  ;;  %v1437_v5 = vld [vmem:[%s5191_s9 + $0x7d0] sm:$0xff]  ;;  %1434 = vst [vmem:[%s5196_s19 + $0x3d8] sm:$0xff] %v1433_v3 }
  0xb4   : > { %1436 = vst [vmem:[%s5196_s19 + $0x3e0] sm:$0xff] %v1435_v4  ;;  %1438 = vst [vmem:[%s5196_s19 + $0x3e8] sm:$0xff] %v1437_v5  ;;  %v1439_v6 = vld [vmem:[%s5191_s9 + $0x7e0] sm:$0xff]  ;;  %v1441_v7 = vld [vmem:[%s5191_s9 + $0x7f0] sm:$0xff] }
  0xb5   : > { %1440 = vst [vmem:[%s5196_s19 + $0x3f0] sm:$0xff] %v1439_v6  ;;  %1442 = vst [vmem:[%s5196_s19 + $0x3f8] sm:$0xff] %v1441_v7 }
  0xb6 PF: > { %1448 = sbr.rel (!%p4880_p6) target bundleno = 250 (0xfa), region = 172  ;;  %s1450_s0 = sand.u32 (%p4880_p6), 1, %s4747_s22  }
  0xb7   : > { %s4244_s20 = sshll.u32 (%p4880_p6), %s4771_s28, 3  ;;  %s4243_s10 = sshll.u32 (%p4880_p6), %s1450_s0, 10 }
  0xb8   : > { %s5458_s15 = scalar_lea.vmem (%p4880_p6), %s6402_s4, %s4244_s20  ;;  %s5463_s12 = scalar_lea.vmem (%p4880_p6), [#allocation6], %s4243_s10 }
  0xb9   : > { %v1737_v8 = vld [vmem:[%s5458_s15] sm:$0xff] (%p4880_p6)  ;;  %v1739_v9 = vld [vmem:[%s5458_s15 + $0x10] sm:$0xff] (%p4880_p6) }
  0xba   : > { %v1741_v10 = vld [vmem:[%s5458_s15 + $0x20] sm:$0xff] (%p4880_p6)  ;;  %1738 = vst [vmem:[%s5463_s12] sm:$0xff] (%p4880_p6), %v1737_v8  ;;  %1740 = vst [vmem:[%s5463_s12 + $0x8] sm:$0xff] (%p4880_p6), %v1739_v9  ;;  %v1743_v11 = vld [vmem:[%s5458_s15 + $0x30] sm:$0xff] (%p4880_p6) }
  0xbb   : > { %1742 = vst [vmem:[%s5463_s12 + $0x10] sm:$0xff] %v1741_v10  ;;  %v1745_v12 = vld [vmem:[%s5458_s15 + $0x40] sm:$0xff]  ;;  %v1747_v13 = vld [vmem:[%s5458_s15 + $0x50] sm:$0xff]  ;;  %1744 = vst [vmem:[%s5463_s12 + $0x18] sm:$0xff] %v1743_v11 }
  0xbc   : > { %1746 = vst [vmem:[%s5463_s12 + $0x20] sm:$0xff] %v1745_v12  ;;  %1748 = vst [vmem:[%s5463_s12 + $0x28] sm:$0xff] %v1747_v13  ;;  %v1749_v14 = vld [vmem:[%s5458_s15 + $0x60] sm:$0xff]  ;;  %v1751_v15 = vld [vmem:[%s5458_s15 + $0x70] sm:$0xff] }
  0xbd   : > { %v1753_v16 = vld [vmem:[%s5458_s15 + $0x80] sm:$0xff]  ;;  %1750 = vst [vmem:[%s5463_s12 + $0x30] sm:$0xff] %v1749_v14  ;;  %1752 = vst [vmem:[%s5463_s12 + $0x38] sm:$0xff] %v1751_v15  ;;  %v1755_v17 = vld [vmem:[%s5458_s15 + $0x90] sm:$0xff] }
  0xbe   : > { %1754 = vst [vmem:[%s5463_s12 + $0x40] sm:$0xff] %v1753_v16  ;;  %v1757_v18 = vld [vmem:[%s5458_s15 + $0xa0] sm:$0xff]  ;;  %v1759_v19 = vld [vmem:[%s5458_s15 + $0xb0] sm:$0xff]  ;;  %1756 = vst [vmem:[%s5463_s12 + $0x48] sm:$0xff] %v1755_v17 }
  0xbf   : > { %1758 = vst [vmem:[%s5463_s12 + $0x50] sm:$0xff] %v1757_v18  ;;  %1760 = vst [vmem:[%s5463_s12 + $0x58] sm:$0xff] %v1759_v19  ;;  %v1761_v20 = vld [vmem:[%s5458_s15 + $0xc0] sm:$0xff]  ;;  %v1763_v21 = vld [vmem:[%s5458_s15 + $0xd0] sm:$0xff] }
  0xc0   : > { %v1765_v22 = vld [vmem:[%s5458_s15 + $0xe0] sm:$0xff]  ;;  %1762 = vst [vmem:[%s5463_s12 + $0x60] sm:$0xff] %v1761_v20  ;;  %1764 = vst [vmem:[%s5463_s12 + $0x68] sm:$0xff] %v1763_v21  ;;  %v1767_v23 = vld [vmem:[%s5458_s15 + $0xf0] sm:$0xff] }
  0xc1   : > { %1766 = vst [vmem:[%s5463_s12 + $0x70] sm:$0xff] %v1765_v22  ;;  %v1769_v24 = vld [vmem:[%s5458_s15 + $0x100] sm:$0xff]  ;;  %v1771_v25 = vld [vmem:[%s5458_s15 + $0x110] sm:$0xff]  ;;  %1768 = vst [vmem:[%s5463_s12 + $0x78] sm:$0xff] %v1767_v23 }
  0xc2   : > { %1770 = vst [vmem:[%s5463_s12 + $0x80] sm:$0xff] %v1769_v24  ;;  %1772 = vst [vmem:[%s5463_s12 + $0x88] sm:$0xff] %v1771_v25  ;;  %v1773_v26 = vld [vmem:[%s5458_s15 + $0x120] sm:$0xff]  ;;  %v1775_v27 = vld [vmem:[%s5458_s15 + $0x130] sm:$0xff] }
  0xc3   : > { %v1777_v28 = vld [vmem:[%s5458_s15 + $0x140] sm:$0xff]  ;;  %1774 = vst [vmem:[%s5463_s12 + $0x90] sm:$0xff] %v1773_v26  ;;  %1776 = vst [vmem:[%s5463_s12 + $0x98] sm:$0xff] %v1775_v27  ;;  %v1779_v29 = vld [vmem:[%s5458_s15 + $0x150] sm:$0xff] }
  0xc4   : > { %1778 = vst [vmem:[%s5463_s12 + $0xa0] sm:$0xff] %v1777_v28  ;;  %v1781_v30 = vld [vmem:[%s5458_s15 + $0x160] sm:$0xff]  ;;  %v1783_v31 = vld [vmem:[%s5458_s15 + $0x170] sm:$0xff]  ;;  %1780 = vst [vmem:[%s5463_s12 + $0xa8] sm:$0xff] %v1779_v29 }
  0xc5   : > { %1782 = vst [vmem:[%s5463_s12 + $0xb0] sm:$0xff] %v1781_v30  ;;  %1784 = vst [vmem:[%s5463_s12 + $0xb8] sm:$0xff] %v1783_v31  ;;  %v1785_v32 = vld [vmem:[%s5458_s15 + $0x180] sm:$0xff]  ;;  %v1787_v33 = vld [vmem:[%s5458_s15 + $0x190] sm:$0xff] }
  0xc6   : > { %v1789_v34 = vld [vmem:[%s5458_s15 + $0x1a0] sm:$0xff]  ;;  %1786 = vst [vmem:[%s5463_s12 + $0xc0] sm:$0xff] %v1785_v32  ;;  %1788 = vst [vmem:[%s5463_s12 + $0xc8] sm:$0xff] %v1787_v33  ;;  %v1791_v35 = vld [vmem:[%s5458_s15 + $0x1b0] sm:$0xff] }
  0xc7   : > { %1790 = vst [vmem:[%s5463_s12 + $0xd0] sm:$0xff] %v1789_v34  ;;  %v1793_v36 = vld [vmem:[%s5458_s15 + $0x1c0] sm:$0xff]  ;;  %v1795_v37 = vld [vmem:[%s5458_s15 + $0x1d0] sm:$0xff]  ;;  %1792 = vst [vmem:[%s5463_s12 + $0xd8] sm:$0xff] %v1791_v35 }
  0xc8   : > { %1794 = vst [vmem:[%s5463_s12 + $0xe0] sm:$0xff] %v1793_v36  ;;  %1796 = vst [vmem:[%s5463_s12 + $0xe8] sm:$0xff] %v1795_v37  ;;  %v1797_v38 = vld [vmem:[%s5458_s15 + $0x1e0] sm:$0xff]  ;;  %v1799_v39 = vld [vmem:[%s5458_s15 + $0x1f0] sm:$0xff] }
  0xc9   : > { %v1801_v40 = vld [vmem:[%s5458_s15 + $0x200] sm:$0xff]  ;;  %1798 = vst [vmem:[%s5463_s12 + $0xf0] sm:$0xff] %v1797_v38  ;;  %1800 = vst [vmem:[%s5463_s12 + $0xf8] sm:$0xff] %v1799_v39  ;;  %v1803_v41 = vld [vmem:[%s5458_s15 + $0x210] sm:$0xff] }
  0xca   : > { %1802 = vst [vmem:[%s5463_s12 + $0x100] sm:$0xff] %v1801_v40  ;;  %v1805_v42 = vld [vmem:[%s5458_s15 + $0x220] sm:$0xff]  ;;  %v1807_v43 = vld [vmem:[%s5458_s15 + $0x230] sm:$0xff]  ;;  %1804 = vst [vmem:[%s5463_s12 + $0x108] sm:$0xff] %v1803_v41 }
  0xcb   : > { %1806 = vst [vmem:[%s5463_s12 + $0x110] sm:$0xff] %v1805_v42  ;;  %1808 = vst [vmem:[%s5463_s12 + $0x118] sm:$0xff] %v1807_v43  ;;  %v1809_v44 = vld [vmem:[%s5458_s15 + $0x240] sm:$0xff]  ;;  %v1811_v45 = vld [vmem:[%s5458_s15 + $0x250] sm:$0xff] }
  0xcc   : > { %v1813_v46 = vld [vmem:[%s5458_s15 + $0x260] sm:$0xff]  ;;  %1810 = vst [vmem:[%s5463_s12 + $0x120] sm:$0xff] %v1809_v44  ;;  %1812 = vst [vmem:[%s5463_s12 + $0x128] sm:$0xff] %v1811_v45  ;;  %v1815_v47 = vld [vmem:[%s5458_s15 + $0x270] sm:$0xff] }
  0xcd   : > { %1814 = vst [vmem:[%s5463_s12 + $0x130] sm:$0xff] %v1813_v46  ;;  %v1817_v48 = vld [vmem:[%s5458_s15 + $0x280] sm:$0xff]  ;;  %v1819_v49 = vld [vmem:[%s5458_s15 + $0x290] sm:$0xff]  ;;  %1816 = vst [vmem:[%s5463_s12 + $0x138] sm:$0xff] %v1815_v47 }
  0xce   : > { %1818 = vst [vmem:[%s5463_s12 + $0x140] sm:$0xff] %v1817_v48  ;;  %1820 = vst [vmem:[%s5463_s12 + $0x148] sm:$0xff] %v1819_v49  ;;  %v1821_v50 = vld [vmem:[%s5458_s15 + $0x2a0] sm:$0xff]  ;;  %v1823_v51 = vld [vmem:[%s5458_s15 + $0x2b0] sm:$0xff] }
  0xcf   : > { %v1825_v52 = vld [vmem:[%s5458_s15 + $0x2c0] sm:$0xff]  ;;  %1822 = vst [vmem:[%s5463_s12 + $0x150] sm:$0xff] %v1821_v50  ;;  %1824 = vst [vmem:[%s5463_s12 + $0x158] sm:$0xff] %v1823_v51  ;;  %v1827_v53 = vld [vmem:[%s5458_s15 + $0x2d0] sm:$0xff] }
  0xd0   : > { %1826 = vst [vmem:[%s5463_s12 + $0x160] sm:$0xff] %v1825_v52  ;;  %v1829_v54 = vld [vmem:[%s5458_s15 + $0x2e0] sm:$0xff]  ;;  %v1831_v55 = vld [vmem:[%s5458_s15 + $0x2f0] sm:$0xff]  ;;  %1828 = vst [vmem:[%s5463_s12 + $0x168] sm:$0xff] %v1827_v53 }
  0xd1   : > { %1830 = vst [vmem:[%s5463_s12 + $0x170] sm:$0xff] %v1829_v54  ;;  %1832 = vst [vmem:[%s5463_s12 + $0x178] sm:$0xff] %v1831_v55  ;;  %v1833_v56 = vld [vmem:[%s5458_s15 + $0x300] sm:$0xff]  ;;  %v1835_v57 = vld [vmem:[%s5458_s15 + $0x310] sm:$0xff] }
  0xd2   : > { %v1837_v58 = vld [vmem:[%s5458_s15 + $0x320] sm:$0xff]  ;;  %1834 = vst [vmem:[%s5463_s12 + $0x180] sm:$0xff] %v1833_v56  ;;  %1836 = vst [vmem:[%s5463_s12 + $0x188] sm:$0xff] %v1835_v57  ;;  %v1839_v59 = vld [vmem:[%s5458_s15 + $0x330] sm:$0xff] }
  0xd3   : > { %1838 = vst [vmem:[%s5463_s12 + $0x190] sm:$0xff] %v1837_v58  ;;  %v1841_v60 = vld [vmem:[%s5458_s15 + $0x340] sm:$0xff]  ;;  %v1843_v61 = vld [vmem:[%s5458_s15 + $0x350] sm:$0xff]  ;;  %1840 = vst [vmem:[%s5463_s12 + $0x198] sm:$0xff] %v1839_v59 }
  0xd4   : > { %1842 = vst [vmem:[%s5463_s12 + $0x1a0] sm:$0xff] %v1841_v60  ;;  %1844 = vst [vmem:[%s5463_s12 + $0x1a8] sm:$0xff] %v1843_v61  ;;  %v1845_v62 = vld [vmem:[%s5458_s15 + $0x360] sm:$0xff]  ;;  %v1847_v63 = vld [vmem:[%s5458_s15 + $0x370] sm:$0xff] }
  0xd5   : > { %v1849_v0 = vld [vmem:[%s5458_s15 + $0x380] sm:$0xff]  ;;  %1846 = vst [vmem:[%s5463_s12 + $0x1b0] sm:$0xff] %v1845_v62  ;;  %1848 = vst [vmem:[%s5463_s12 + $0x1b8] sm:$0xff] %v1847_v63  ;;  %v1851_v1 = vld [vmem:[%s5458_s15 + $0x390] sm:$0xff] }
  0xd6   : > { %1850 = vst [vmem:[%s5463_s12 + $0x1c0] sm:$0xff] %v1849_v0  ;;  %v1853_v2 = vld [vmem:[%s5458_s15 + $0x3a0] sm:$0xff]  ;;  %v1855_v3 = vld [vmem:[%s5458_s15 + $0x3b0] sm:$0xff]  ;;  %1852 = vst [vmem:[%s5463_s12 + $0x1c8] sm:$0xff] %v1851_v1 }
  0xd7   : > { %1854 = vst [vmem:[%s5463_s12 + $0x1d0] sm:$0xff] %v1853_v2  ;;  %1856 = vst [vmem:[%s5463_s12 + $0x1d8] sm:$0xff] %v1855_v3  ;;  %v1857_v4 = vld [vmem:[%s5458_s15 + $0x3c0] sm:$0xff]  ;;  %v1859_v5 = vld [vmem:[%s5458_s15 + $0x3d0] sm:$0xff] }
  0xd8   : > { %v1861_v6 = vld [vmem:[%s5458_s15 + $0x3e0] sm:$0xff]  ;;  %1858 = vst [vmem:[%s5463_s12 + $0x1e0] sm:$0xff] %v1857_v4  ;;  %1860 = vst [vmem:[%s5463_s12 + $0x1e8] sm:$0xff] %v1859_v5  ;;  %v1863_v7 = vld [vmem:[%s5458_s15 + $0x3f0] sm:$0xff] }
  0xd9   : > { %1862 = vst [vmem:[%s5463_s12 + $0x1f0] sm:$0xff] %v1861_v6  ;;  %v1865_v8 = vld [vmem:[%s5458_s15 + $0x400] sm:$0xff]  ;;  %v1867_v9 = vld [vmem:[%s5458_s15 + $0x410] sm:$0xff]  ;;  %1864 = vst [vmem:[%s5463_s12 + $0x1f8] sm:$0xff] %v1863_v7 }
  0xda   : > { %1866 = vst [vmem:[%s5463_s12 + $0x200] sm:$0xff] %v1865_v8  ;;  %1868 = vst [vmem:[%s5463_s12 + $0x208] sm:$0xff] %v1867_v9  ;;  %v1869_v10 = vld [vmem:[%s5458_s15 + $0x420] sm:$0xff]  ;;  %v1871_v11 = vld [vmem:[%s5458_s15 + $0x430] sm:$0xff] }
  0xdb   : > { %v1873_v12 = vld [vmem:[%s5458_s15 + $0x440] sm:$0xff]  ;;  %1870 = vst [vmem:[%s5463_s12 + $0x210] sm:$0xff] %v1869_v10  ;;  %1872 = vst [vmem:[%s5463_s12 + $0x218] sm:$0xff] %v1871_v11  ;;  %v1875_v13 = vld [vmem:[%s5458_s15 + $0x450] sm:$0xff] }
  0xdc   : > { %1874 = vst [vmem:[%s5463_s12 + $0x220] sm:$0xff] %v1873_v12  ;;  %v1877_v14 = vld [vmem:[%s5458_s15 + $0x460] sm:$0xff]  ;;  %v1879_v15 = vld [vmem:[%s5458_s15 + $0x470] sm:$0xff]  ;;  %1876 = vst [vmem:[%s5463_s12 + $0x228] sm:$0xff] %v1875_v13 }
  0xdd   : > { %1878 = vst [vmem:[%s5463_s12 + $0x230] sm:$0xff] %v1877_v14  ;;  %1880 = vst [vmem:[%s5463_s12 + $0x238] sm:$0xff] %v1879_v15  ;;  %v1881_v16 = vld [vmem:[%s5458_s15 + $0x480] sm:$0xff]  ;;  %v1883_v17 = vld [vmem:[%s5458_s15 + $0x490] sm:$0xff] }
  0xde   : > { %v1885_v18 = vld [vmem:[%s5458_s15 + $0x4a0] sm:$0xff]  ;;  %1882 = vst [vmem:[%s5463_s12 + $0x240] sm:$0xff] %v1881_v16  ;;  %1884 = vst [vmem:[%s5463_s12 + $0x248] sm:$0xff] %v1883_v17  ;;  %v1887_v19 = vld [vmem:[%s5458_s15 + $0x4b0] sm:$0xff] }
  0xdf   : > { %1886 = vst [vmem:[%s5463_s12 + $0x250] sm:$0xff] %v1885_v18  ;;  %v1889_v20 = vld [vmem:[%s5458_s15 + $0x4c0] sm:$0xff]  ;;  %v1891_v21 = vld [vmem:[%s5458_s15 + $0x4d0] sm:$0xff]  ;;  %1888 = vst [vmem:[%s5463_s12 + $0x258] sm:$0xff] %v1887_v19 }
  0xe0   : > { %1890 = vst [vmem:[%s5463_s12 + $0x260] sm:$0xff] %v1889_v20  ;;  %1892 = vst [vmem:[%s5463_s12 + $0x268] sm:$0xff] %v1891_v21  ;;  %v1893_v22 = vld [vmem:[%s5458_s15 + $0x4e0] sm:$0xff]  ;;  %v1895_v23 = vld [vmem:[%s5458_s15 + $0x4f0] sm:$0xff] }
  0xe1   : > { %v1897_v24 = vld [vmem:[%s5458_s15 + $0x500] sm:$0xff]  ;;  %1894 = vst [vmem:[%s5463_s12 + $0x270] sm:$0xff] %v1893_v22  ;;  %1896 = vst [vmem:[%s5463_s12 + $0x278] sm:$0xff] %v1895_v23  ;;  %v1899_v25 = vld [vmem:[%s5458_s15 + $0x510] sm:$0xff] }
  0xe2   : > { %1898 = vst [vmem:[%s5463_s12 + $0x280] sm:$0xff] %v1897_v24  ;;  %v1901_v26 = vld [vmem:[%s5458_s15 + $0x520] sm:$0xff]  ;;  %v1903_v27 = vld [vmem:[%s5458_s15 + $0x530] sm:$0xff]  ;;  %1900 = vst [vmem:[%s5463_s12 + $0x288] sm:$0xff] %v1899_v25 }
  0xe3   : > { %1902 = vst [vmem:[%s5463_s12 + $0x290] sm:$0xff] %v1901_v26  ;;  %1904 = vst [vmem:[%s5463_s12 + $0x298] sm:$0xff] %v1903_v27  ;;  %v1905_v28 = vld [vmem:[%s5458_s15 + $0x540] sm:$0xff]  ;;  %v1907_v29 = vld [vmem:[%s5458_s15 + $0x550] sm:$0xff] }
  0xe4   : > { %v1909_v30 = vld [vmem:[%s5458_s15 + $0x560] sm:$0xff]  ;;  %1906 = vst [vmem:[%s5463_s12 + $0x2a0] sm:$0xff] %v1905_v28  ;;  %1908 = vst [vmem:[%s5463_s12 + $0x2a8] sm:$0xff] %v1907_v29  ;;  %v1911_v31 = vld [vmem:[%s5458_s15 + $0x570] sm:$0xff] }
  0xe5   : > { %1910 = vst [vmem:[%s5463_s12 + $0x2b0] sm:$0xff] %v1909_v30  ;;  %v1913_v32 = vld [vmem:[%s5458_s15 + $0x580] sm:$0xff]  ;;  %v1915_v33 = vld [vmem:[%s5458_s15 + $0x590] sm:$0xff]  ;;  %1912 = vst [vmem:[%s5463_s12 + $0x2b8] sm:$0xff] %v1911_v31 }
  0xe6   : > { %1914 = vst [vmem:[%s5463_s12 + $0x2c0] sm:$0xff] %v1913_v32  ;;  %1916 = vst [vmem:[%s5463_s12 + $0x2c8] sm:$0xff] %v1915_v33  ;;  %v1917_v34 = vld [vmem:[%s5458_s15 + $0x5a0] sm:$0xff]  ;;  %v1919_v35 = vld [vmem:[%s5458_s15 + $0x5b0] sm:$0xff] }
  0xe7   : > { %v1921_v36 = vld [vmem:[%s5458_s15 + $0x5c0] sm:$0xff]  ;;  %1918 = vst [vmem:[%s5463_s12 + $0x2d0] sm:$0xff] %v1917_v34  ;;  %1920 = vst [vmem:[%s5463_s12 + $0x2d8] sm:$0xff] %v1919_v35  ;;  %v1923_v37 = vld [vmem:[%s5458_s15 + $0x5d0] sm:$0xff] }
  0xe8   : > { %1922 = vst [vmem:[%s5463_s12 + $0x2e0] sm:$0xff] %v1921_v36  ;;  %v1925_v38 = vld [vmem:[%s5458_s15 + $0x5e0] sm:$0xff]  ;;  %v1927_v39 = vld [vmem:[%s5458_s15 + $0x5f0] sm:$0xff]  ;;  %1924 = vst [vmem:[%s5463_s12 + $0x2e8] sm:$0xff] %v1923_v37 }
  0xe9   : > { %1926 = vst [vmem:[%s5463_s12 + $0x2f0] sm:$0xff] %v1925_v38  ;;  %1928 = vst [vmem:[%s5463_s12 + $0x2f8] sm:$0xff] %v1927_v39  ;;  %v1929_v40 = vld [vmem:[%s5458_s15 + $0x600] sm:$0xff]  ;;  %v1931_v41 = vld [vmem:[%s5458_s15 + $0x610] sm:$0xff] }
  0xea   : > { %v1933_v42 = vld [vmem:[%s5458_s15 + $0x620] sm:$0xff]  ;;  %1930 = vst [vmem:[%s5463_s12 + $0x300] sm:$0xff] %v1929_v40  ;;  %1932 = vst [vmem:[%s5463_s12 + $0x308] sm:$0xff] %v1931_v41  ;;  %v1935_v43 = vld [vmem:[%s5458_s15 + $0x630] sm:$0xff] }
  0xeb   : > { %1934 = vst [vmem:[%s5463_s12 + $0x310] sm:$0xff] %v1933_v42  ;;  %v1937_v44 = vld [vmem:[%s5458_s15 + $0x640] sm:$0xff]  ;;  %v1939_v45 = vld [vmem:[%s5458_s15 + $0x650] sm:$0xff]  ;;  %1936 = vst [vmem:[%s5463_s12 + $0x318] sm:$0xff] %v1935_v43 }
  0xec   : > { %1938 = vst [vmem:[%s5463_s12 + $0x320] sm:$0xff] %v1937_v44  ;;  %1940 = vst [vmem:[%s5463_s12 + $0x328] sm:$0xff] %v1939_v45  ;;  %v1941_v46 = vld [vmem:[%s5458_s15 + $0x660] sm:$0xff]  ;;  %v1943_v47 = vld [vmem:[%s5458_s15 + $0x670] sm:$0xff] }
  0xed   : > { %v1945_v48 = vld [vmem:[%s5458_s15 + $0x680] sm:$0xff]  ;;  %1942 = vst [vmem:[%s5463_s12 + $0x330] sm:$0xff] %v1941_v46  ;;  %1944 = vst [vmem:[%s5463_s12 + $0x338] sm:$0xff] %v1943_v47  ;;  %v1947_v49 = vld [vmem:[%s5458_s15 + $0x690] sm:$0xff] }
  0xee   : > { %1946 = vst [vmem:[%s5463_s12 + $0x340] sm:$0xff] %v1945_v48  ;;  %v1949_v50 = vld [vmem:[%s5458_s15 + $0x6a0] sm:$0xff]  ;;  %v1951_v51 = vld [vmem:[%s5458_s15 + $0x6b0] sm:$0xff]  ;;  %1948 = vst [vmem:[%s5463_s12 + $0x348] sm:$0xff] %v1947_v49 }
  0xef   : > { %1950 = vst [vmem:[%s5463_s12 + $0x350] sm:$0xff] %v1949_v50  ;;  %1952 = vst [vmem:[%s5463_s12 + $0x358] sm:$0xff] %v1951_v51  ;;  %v1953_v52 = vld [vmem:[%s5458_s15 + $0x6c0] sm:$0xff]  ;;  %v1955_v53 = vld [vmem:[%s5458_s15 + $0x6d0] sm:$0xff] }
  0xf0   : > { %v1957_v54 = vld [vmem:[%s5458_s15 + $0x6e0] sm:$0xff]  ;;  %1954 = vst [vmem:[%s5463_s12 + $0x360] sm:$0xff] %v1953_v52  ;;  %1956 = vst [vmem:[%s5463_s12 + $0x368] sm:$0xff] %v1955_v53  ;;  %v1959_v55 = vld [vmem:[%s5458_s15 + $0x6f0] sm:$0xff] }
  0xf1   : > { %1958 = vst [vmem:[%s5463_s12 + $0x370] sm:$0xff] %v1957_v54  ;;  %v1961_v56 = vld [vmem:[%s5458_s15 + $0x700] sm:$0xff]  ;;  %v1963_v57 = vld [vmem:[%s5458_s15 + $0x710] sm:$0xff]  ;;  %1960 = vst [vmem:[%s5463_s12 + $0x378] sm:$0xff] %v1959_v55 }
  0xf2   : > { %1962 = vst [vmem:[%s5463_s12 + $0x380] sm:$0xff] %v1961_v56  ;;  %1964 = vst [vmem:[%s5463_s12 + $0x388] sm:$0xff] %v1963_v57  ;;  %v1965_v58 = vld [vmem:[%s5458_s15 + $0x720] sm:$0xff]  ;;  %v1967_v59 = vld [vmem:[%s5458_s15 + $0x730] sm:$0xff] }
  0xf3   : > { %v1969_v60 = vld [vmem:[%s5458_s15 + $0x740] sm:$0xff]  ;;  %1966 = vst [vmem:[%s5463_s12 + $0x390] sm:$0xff] %v1965_v58  ;;  %1968 = vst [vmem:[%s5463_s12 + $0x398] sm:$0xff] %v1967_v59  ;;  %v1971_v61 = vld [vmem:[%s5458_s15 + $0x750] sm:$0xff] }
  0xf4   : > { %1970 = vst [vmem:[%s5463_s12 + $0x3a0] sm:$0xff] %v1969_v60  ;;  %v1973_v62 = vld [vmem:[%s5458_s15 + $0x760] sm:$0xff]  ;;  %v1975_v63 = vld [vmem:[%s5458_s15 + $0x770] sm:$0xff]  ;;  %1972 = vst [vmem:[%s5463_s12 + $0x3a8] sm:$0xff] %v1971_v61 }
  0xf5   : > { %1974 = vst [vmem:[%s5463_s12 + $0x3b0] sm:$0xff] %v1973_v62  ;;  %1976 = vst [vmem:[%s5463_s12 + $0x3b8] sm:$0xff] %v1975_v63  ;;  %v1977_v0 = vld [vmem:[%s5458_s15 + $0x780] sm:$0xff]  ;;  %v1979_v1 = vld [vmem:[%s5458_s15 + $0x790] sm:$0xff] }
  0xf6   : > { %v1981_v2 = vld [vmem:[%s5458_s15 + $0x7a0] sm:$0xff]  ;;  %1978 = vst [vmem:[%s5463_s12 + $0x3c0] sm:$0xff] %v1977_v0  ;;  %1980 = vst [vmem:[%s5463_s12 + $0x3c8] sm:$0xff] %v1979_v1  ;;  %v1983_v3 = vld [vmem:[%s5458_s15 + $0x7b0] sm:$0xff] }
  0xf7   : > { %1982 = vst [vmem:[%s5463_s12 + $0x3d0] sm:$0xff] %v1981_v2  ;;  %v1985_v4 = vld [vmem:[%s5458_s15 + $0x7c0] sm:$0xff]  ;;  %v1987_v5 = vld [vmem:[%s5458_s15 + $0x7d0] sm:$0xff]  ;;  %1984 = vst [vmem:[%s5463_s12 + $0x3d8] sm:$0xff] %v1983_v3 }
  0xf8   : > { %1986 = vst [vmem:[%s5463_s12 + $0x3e0] sm:$0xff] %v1985_v4  ;;  %1988 = vst [vmem:[%s5463_s12 + $0x3e8] sm:$0xff] %v1987_v5  ;;  %v1989_v6 = vld [vmem:[%s5458_s15 + $0x7e0] sm:$0xff]  ;;  %v1991_v7 = vld [vmem:[%s5458_s15 + $0x7f0] sm:$0xff] }
  0xf9   : > { %1990 = vst [vmem:[%s5463_s12 + $0x3f0] sm:$0xff] %v1989_v6  ;;  %1992 = vst [vmem:[%s5463_s12 + $0x3f8] sm:$0xff] %v1991_v7 }
  0xfa PF: > { %p4245_p12 = scmp.ge.s32.totalorder %s4775_s29, 1  ;;  %p1997_p13 = scmp.lt.s32.totalorder %s4775_s29, 5 }
  0xfc   : > { %p1998_p0 = pnand %p4245_p12, %p1997_p13 }
  0xfd   : > { %s2004_s8 = sand.u32 (!%p1998_p0), 1, %s4751_s23   ;;  %s2018_s14 = sand.u32 (!%p1998_p0), 1, %s4743_s21  }
  0xfe   : > { %2001 = sbr.rel (%p1998_p0) target bundleno = 538 (0x21a), region = 210  ;;  %s5722_s11 = sshll.u32 (!%p1998_p0), %s2004_s8, 5 }
  0xff   : > { %s4248_s9 = sshll.u32 (!%p1998_p0), %s2018_s14, 10  ;;  %s5725_s19 = scalar_lea.vmem (!%p1998_p0), [#allocation2], %s5722_s11 }
 0x100   : > { %s5729_s0 = scalar_lea.vmem (!%p1998_p0), [#allocation3], %s5722_s11  ;;  %s5734_s23 = scalar_lea.vmem (!%p1998_p0), [#allocation4], %s4248_s9 }
 0x101   : > { %s5740_s21 = scalar_lea.vmem (!%p1998_p0), [#allocation5], %s4248_s9  ;;  %s5743_s20 = scalar_lea.vmem (!%p1998_p0), [#allocation6], %s4248_s9 }
 0x102   : > { %s2073_s10 = scalar_lea.vmem (!%p1998_p0), [#allocation7], %s5722_s11  ;;  %s2079_s7 = scalar_lea.vmem (!%p1998_p0), [#allocation8], %s5722_s11 }
 0x103   : > { %v2095_v8 = vlaneseq  ;;  %v2080_v10 = vld [vmem:[%s5725_s19] sm:$0x1]  ;;  %v2083_v15 = vld [vmem:[%s5734_s23 + $0x8] sm:$0xff]  ;;  %v2084_v16 = vld [vmem:[%s5734_s23 + $0x10] sm:$0xff]  ;;  %s4627_s13 = sshll.u32 (%p4890_p10), %s4759_s25, 3 }
 0x104   : > { %v2081_v11 = vld [vmem:[%s5729_s0] sm:$0x1]  ;;  %v2085_v17 = vld [vmem:[%s5734_s23 + $0x18] sm:$0xff]  ;;  %v2091_v23 = vld [vmem:[%s5743_s20 + $0x8] sm:$0xff]  ;;  %s3953_s15 = sadd.s32 (%p4890_p10), %s4763_s26, %s4627_s13 }
 0x105   : > { %v2096_v9 = vshrl.u32 %v2095_v8, 7  ;;  %v2094_v12 = vadd.f32 %v2081_v11, %v2080_v10  ;;  %v2082_v14 = vld [vmem:[%s5734_s23] sm:$0xff]  ;;  %v2092_v24 = vld [vmem:[%s5743_s20 + $0x10] sm:$0xff]  ;;  %v2093_v25 = vld [vmem:[%s5743_s20 + $0x18] sm:$0xff]  ;;  %s4628_s12 = sshll.u32 (%p4890_p10), %s3953_s15, 3 }
 0x106   : > { %v2086_v18 = vld [vmem:[%s5740_s21] sm:$0xff]  ;;  %v2087_v26 = vld [vmem:[%s5740_s21 + $0x8] sm:$0xff]  ;;  %v2088_v29 = vld [vmem:[%s5740_s21 + $0x10] sm:$0xff]  ;;  %s3955_s11 = scalar_lea.vmem (%p4890_p10), %s6403_s5, %s4628_s12 }
 0x107   : > { %v5732_v13 = vsub.s32 0, %v2096_v9  ;;  %v2090_v19 = vld [vmem:[%s5743_s20] sm:$0xff]  ;;  %v2089_v30 = vld [vmem:[%s5740_s21 + $0x18] sm:$0xff]  ;;  %v4258_v42 = vld [vmem:[%s5740_s21 + $0x28] sm:$0xff] }
 0x108   : > { %v2135_v38 = vld [vmem:[%s5725_s19 + $0x1] sm:$0x1]  ;;  %v4262_v49 = vld [vmem:[%s5743_s20 + $0x28] sm:$0xff]  ;;  %v4263_v50 = vld [vmem:[%s5743_s20 + $0x30] sm:$0xff] }
 0x109   : > { %v2098_v20 = vrot.slane %v2094_v12, %v5732_v13  ;;  %v2106_v21 = vrot.slane %v2081_v11, %v5732_v13  ;;  %v2122_v22 = vrot.slane %v2080_v10, %v5732_v13  ;;  %v2136_v39 = vld [vmem:[%s5729_s0 + $0x1] sm:$0x1]  ;;  %v2193_v51 = vld [vmem:[%s5725_s19 + $0x2] sm:$0x1]  ;;  %v4259_v53 = vld [vmem:[%s5740_s21 + $0x30] sm:$0xff]  ;;  %v2180_v57 = vrot.slane %v2135_v38, %v5732_v13 }
 0x10a   : > { %v4257_v41 = vld [vmem:[%s5740_s21 + $0x20] sm:$0xff]  ;;  %v4264_v54 = vld [vmem:[%s5743_s20 + $0x38] sm:$0xff]  ;;  %v2152_v55 = vadd.f32 %v2136_v39, %v2135_v38  ;;  %v2164_v56 = vrot.slane %v2136_v39, %v5732_v13  ;;  %v4254_v61 = vld [vmem:[%s5734_s23 + $0x28] sm:$0xff] }
 0x10b   : > { %v5753_v27 = vmul.f32 %v2098_v20, %v2082_v14  ;;  %v5755_v28 = vmul.f32 %v2098_v20, %v2083_v15  ;;  %v5759_v31 = vmul.f32 %v2098_v20, %v2084_v16  ;;  %v5761_v32 = vmul.f32 %v2106_v21, %v2090_v19  ;;  %v4261_v43 = vld [vmem:[%s5743_s20 + $0x20] sm:$0xff]  ;;  %v4255_v62 = vld [vmem:[%s5734_s23 + $0x30] sm:$0xff]  ;;  %v4256_v63 = vld [vmem:[%s5734_s23 + $0x38] sm:$0xff] }
 0x10c   : > { %v5763_v33 = vmul.f32 %v2106_v21, %v2091_v23  ;;  %v5765_v34 = vmul.f32 %v2106_v21, %v2092_v24  ;;  %v5767_v35 = vmul.f32 %v2098_v20, %v2085_v17  ;;  %v5769_v36 = vmul.f32 %v2106_v21, %v2093_v25  ;;  %v4253_v48 = vld [vmem:[%s5734_s23 + $0x20] sm:$0xff]  ;;  %v4260_v2 = vld [vmem:[%s5740_s21 + $0x38] sm:$0xff]  ;;  %v4274_v17 = vld [vmem:[%s5743_s20 + $0x48] sm:$0xff] }
 0x10d   : > { %v2123_v37 = vmul.f32 %v2122_v22, %v2086_v18  ;;  %v2124_v40 = vmul.f32 %v2122_v22, %v2087_v26  ;;  %v2111_v44 = vsub.f32 %v5753_v27, %v5761_v32  ;;  %v2125_v46 = vmul.f32 %v2122_v22, %v2088_v29  ;;  %v2194_v58 = vld [vmem:[%s5729_s0 + $0x2] sm:$0x1]  ;;  %v4268_v32 = vld [vmem:[%s5734_s23 + $0x58] sm:$0xff] }
 0x10e   : > { %v2112_v45 = vsub.f32 %v5755_v28, %v5763_v33  ;;  %v2126_v47 = vmul.f32 %v2122_v22, %v2089_v30  ;;  %v2113_v52 = vsub.f32 %v5759_v31, %v5765_v34  ;;  %v2114_v59 = vsub.f32 %v5767_v35, %v5769_v36  ;;  %v4273_v16 = vld [vmem:[%s5743_s20 + $0x40] sm:$0xff]  ;;  %v4267_v30 = vld [vmem:[%s5734_s23 + $0x50] sm:$0xff] }
 0x10f   : > { %v5794_v60 = vadd.f32 %v2123_v37, %v5753_v27  ;;  %v2210_v0 = vadd.f32 %v2194_v58, %v2193_v51  ;;  %v2222_v1 = vrot.slane %v2194_v58, %v5732_v13  ;;  %v2156_v3 = vrot.slane %v2152_v55, %v5732_v13  ;;  %v4265_v26 = vld [vmem:[%s5734_s23 + $0x40] sm:$0xff]  ;;  %v4266_v27 = vld [vmem:[%s5734_s23 + $0x48] sm:$0xff] }
 0x110   : > { %v2165_v4 = vmul.f32 %v4261_v43, %v2164_v56  ;;  %v2166_v5 = vmul.f32 %v4262_v49, %v2164_v56  ;;  %v2167_v6 = vmul.f32 %v4263_v50, %v2164_v56  ;;  %v2168_v7 = vmul.f32 %v4264_v54, %v2164_v56  ;;  %v4272_v49 = vld [vmem:[%s5740_s21 + $0x58] sm:$0xff] }
 0x111   : > { %v2181_v8 = vmul.f32 %v4257_v41, %v2180_v57  ;;  %v2182_v9 = vmul.f32 %v4258_v42, %v2180_v57  ;;  %v2183_v10 = vmul.f32 %v4259_v53, %v2180_v57  ;;  %v2157_v11 = vmul.f32 %v4253_v48, %v2156_v3  ;;  %v4275_v41 = vld [vmem:[%s5743_s20 + $0x50] sm:$0xff]  ;;  %v4276_v42 = vld [vmem:[%s5743_s20 + $0x58] sm:$0xff] }
 0x112   : > { %v2158_v12 = vmul.f32 %v4254_v61, %v2156_v3  ;;  %v2159_v14 = vmul.f32 %v4255_v62, %v2156_v3  ;;  %v2160_v15 = vmul.f32 %v4256_v63, %v2156_v3  ;;  %v2128_v18 = vadd.f32 %v2124_v40, %v5755_v28  ;;  %v4269_v28 = vld [vmem:[%s5740_s21 + $0x40] sm:$0xff]  ;;  %v4270_v40 = vld [vmem:[%s5740_s21 + $0x48] sm:$0xff] }
 0x113   : > { %v2129_v19 = vadd.f32 %v2125_v46, %v5759_v31  ;;  %v2184_v20 = vmul.f32 %v4260_v2, %v2180_v57  ;;  %v2214_v21 = vrot.slane %v2210_v0, %v5732_v13  ;;  %v2169_v22 = vsub.f32 %v2157_v11, %v2165_v4  ;;  %v2251_v2 = vld [vmem:[%s5725_s19 + $0x3] sm:$0x1] }
 0x114   : > { %v2170_v23 = vsub.f32 %v2158_v12, %v2166_v5  ;;  %v2171_v24 = vsub.f32 %v2159_v14, %v2167_v6  ;;  %v2172_v25 = vsub.f32 %v2160_v15, %v2168_v7  ;;  %v2130_v29 = vadd.f32 %v2126_v47, %v5767_v35  ;;  %v4271_v47 = vld [vmem:[%s5740_s21 + $0x50] sm:$0xff]  ;;  %v4281_v7 = vld [vmem:[%s5740_s21 + $0x60] sm:$0xff] }
 0x115   : > { %v2223_v31 = vmul.f32 %v4273_v16, %v2222_v1  ;;  %v2224_v33 = vmul.f32 %v4274_v17, %v2222_v1  ;;  %v2238_v34 = vrot.slane %v2193_v51, %v5732_v13  ;;  %v2185_v36 = vadd.f32 %v2181_v8, %v2157_v11  ;;  %v2309_v8 = vld [vmem:[%s5725_s19 + $0x4] sm:$0x1]  ;;  %v4286_v16 = vld [vmem:[%s5743_s20 + $0x68] sm:$0xff]  ;;  %v4287_v17 = vld [vmem:[%s5743_s20 + $0x70] sm:$0xff] }
 0x116   : > { %v2186_v37 = vadd.f32 %v2182_v9, %v2158_v12  ;;  %v2187_v38 = vadd.f32 %v2183_v10, %v2159_v14  ;;  %v2188_v39 = vadd.f32 %v2184_v20, %v2160_v15  ;;  %v2173_v43 = vadd.f32 %v2169_v22, %v2111_v44  ;;  %v2310_v9 = vld [vmem:[%s5729_s0 + $0x4] sm:$0x1]  ;;  %v4282_v20 = vld [vmem:[%s5740_s21 + $0x68] sm:$0xff]  ;;  %v4288_v22 = vld [vmem:[%s5743_s20 + $0x78] sm:$0xff] }
 0x117   : > { %v2174_v46 = vadd.f32 %v2170_v23, %v2112_v45  ;;  %v2175_v48 = vadd.f32 %v2171_v24, %v2113_v52  ;;  %v2176_v35 = vadd.f32 %v2172_v25, %v2114_v59  ;;  %v2215_v50 = vmul.f32 %v4265_v26, %v2214_v21  ;;  %v4277_v14 = vld [vmem:[%s5734_s23 + $0x60] sm:$0xff]  ;;  %v4278_v26 = vld [vmem:[%s5734_s23 + $0x68] sm:$0xff] }
 0x118   : > { %v2216_v53 = vmul.f32 %v4266_v27, %v2214_v21  ;;  %v2217_v54 = vmul.f32 %v4267_v30, %v2214_v21  ;;  %v2218_v55 = vmul.f32 %v4268_v32, %v2214_v21  ;;  %v2225_v51 = vmul.f32 %v4275_v41, %v2222_v1  ;;  %v4285_v15 = vld [vmem:[%s5743_s20 + $0x60] sm:$0xff]  ;;  %v4283_v21 = vld [vmem:[%s5740_s21 + $0x70] sm:$0xff] }
 0x119   : > { %v2226_v56 = vmul.f32 %v4276_v42, %v2222_v1  ;;  %v2239_v57 = vmul.f32 %v4269_v28, %v2238_v34  ;;  %v2240_v58 = vmul.f32 %v4270_v40, %v2238_v34  ;;  %v2227_v61 = vsub.f32 %v2215_v50, %v2223_v31  ;;  %v2252_v1 = vld [vmem:[%s5729_s0 + $0x3] sm:$0x1]  ;;  %v4279_v27 = vld [vmem:[%s5734_s23 + $0x70] sm:$0xff]  ;;  %v4284_v31 = vld [vmem:[%s5740_s21 + $0x78] sm:$0xff] }
 0x11a   : > { %v2228_v44 = vsub.f32 %v2216_v53, %v2224_v33  ;;  %v2241_v45 = vmul.f32 %v4271_v47, %v2238_v34  ;;  %v2242_v52 = vmul.f32 %v4272_v49, %v2238_v34  ;;  %v2189_v59 = vadd.f32 %v2185_v36, %v5794_v60  ;;  %v4298_v47 = vld [vmem:[%s5743_s20 + $0x88] sm:$0xff] }
 0x11b   : > { %v2229_v62 = vsub.f32 %v2217_v54, %v2225_v51  ;;  %v2230_v63 = vsub.f32 %v2218_v55, %v2226_v56  ;;  %v2243_v0 = vadd.f32 %v2239_v57, %v2215_v50  ;;  %v2190_v3 = vadd.f32 %v2186_v37, %v2128_v18 }
 0x11c   : > { %v2191_v4 = vadd.f32 %v2187_v38, %v2129_v19  ;;  %v2192_v5 = vadd.f32 %v2188_v39, %v2130_v29  ;;  %v2244_v6 = vadd.f32 %v2240_v58, %v2216_v53  ;;  %v2231_v60 = vadd.f32 %v2227_v61, %v2173_v43  ;;  %v4280_v29 = vld [vmem:[%s5734_s23 + $0x78] sm:$0xff]  ;;  %v4289_v58 = vld [vmem:[%s5734_s23 + $0x80] sm:$0xff]  ;;  %v4290_v61 = vld [vmem:[%s5734_s23 + $0x88] sm:$0xff] }
 0x11d   : > { %v2232_v10 = vadd.f32 %v2228_v44, %v2174_v46  ;;  %v2245_v11 = vadd.f32 %v2241_v45, %v2217_v54  ;;  %v2246_v12 = vadd.f32 %v2242_v52, %v2218_v55  ;;  %v2233_v18 = vadd.f32 %v2229_v62, %v2175_v48  ;;  %v4291_v45 = vld [vmem:[%s5734_s23 + $0x90] sm:$0xff]  ;;  %v4292_v52 = vld [vmem:[%s5734_s23 + $0x98] sm:$0xff] }
 0x11e   : > { %v2234_v19 = vadd.f32 %v2230_v63, %v2176_v35  ;;  %v2268_v23 = vadd.f32 %v2252_v1, %v2251_v2  ;;  %v2280_v24 = vrot.slane %v2252_v1, %v5732_v13  ;;  %v5833_v25 = vadd.f32 %v2243_v0, %v2189_v59  ;;  %v4297_v35 = vld [vmem:[%s5743_s20 + $0x80] sm:$0xff] }
 0x11f   : > { %v2296_v30 = vrot.slane %v2251_v2, %v5732_v13  ;;  %v2326_v32 = vadd.f32 %v2310_v9, %v2309_v8  ;;  %v2338_v28 = vrot.slane %v2310_v9, %v5732_v13  ;;  %v2248_v49 = vadd.f32 %v2244_v6, %v2190_v3  ;;  %v4293_v59 = vld [vmem:[%s5740_s21 + $0x80] sm:$0xff]  ;;  %v4294_v6 = vld [vmem:[%s5740_s21 + $0x88] sm:$0xff]  ;;  %v4300_v9 = vld [vmem:[%s5743_s20 + $0x98] sm:$0xff] }
 0x120   : > { %v2272_v33 = vrot.slane %v2268_v23, %v5732_v13  ;;  %v2281_v34 = vmul.f32 %v4285_v15, %v2280_v24  ;;  %v2282_v36 = vmul.f32 %v4286_v16, %v2280_v24  ;;  %v2283_v37 = vmul.f32 %v4287_v17, %v2280_v24  ;;  %v4296_v16 = vld [vmem:[%s5740_s21 + $0x98] sm:$0xff] }
 0x121   : > { %v2284_v38 = vmul.f32 %v4288_v22, %v2280_v24  ;;  %v2297_v39 = vmul.f32 %v4281_v7, %v2296_v30  ;;  %v2298_v40 = vmul.f32 %v4282_v20, %v2296_v30  ;;  %v2299_v41 = vmul.f32 %v4283_v21, %v2296_v30  ;;  %v4299_v7 = vld [vmem:[%s5743_s20 + $0x90] sm:$0xff] }
 0x122   : > { %v2273_v42 = vmul.f32 %v4277_v14, %v2272_v33  ;;  %v2274_v43 = vmul.f32 %v4278_v26, %v2272_v33  ;;  %v2275_v46 = vmul.f32 %v4279_v27, %v2272_v33  ;;  %v2276_v48 = vmul.f32 %v4280_v29, %v2272_v33 }
 0x123   : > { %v2249_v50 = vadd.f32 %v2245_v11, %v2191_v4  ;;  %v2300_v53 = vmul.f32 %v4284_v31, %v2296_v30  ;;  %v2330_v54 = vrot.slane %v2326_v32, %v5732_v13  ;;  %v2250_v44 = vadd.f32 %v2246_v12, %v2192_v5  ;;  %v4295_v12 = vld [vmem:[%s5740_s21 + $0x90] sm:$0xff]  ;;  %v2367_v31 = vld [vmem:[%s5725_s19 + $0x5] sm:$0x1] }
 0x124   : > { %v2285_v55 = vsub.f32 %v2273_v42, %v2281_v34  ;;  %v2286_v51 = vsub.f32 %v2274_v43, %v2282_v36  ;;  %v2287_v56 = vsub.f32 %v2275_v46, %v2283_v37  ;;  %v2288_v57 = vsub.f32 %v2276_v48, %v2284_v38  ;;  %v4305_v38 = vld [vmem:[%s5740_s21 + $0xa0] sm:$0xff] }
 0x125   : > { %v2339_v62 = vmul.f32 %v4297_v35, %v2338_v28  ;;  %v2340_v63 = vmul.f32 %v4298_v47, %v2338_v28  ;;  %v2354_v0 = vrot.slane %v2309_v8, %v5732_v13  ;;  %v2301_v2 = vadd.f32 %v2297_v39, %v2273_v42  ;;  %v2425_v39 = vld [vmem:[%s5725_s19 + $0x6] sm:$0x1]  ;;  %v4310_v35 = vld [vmem:[%s5743_s20 + $0xa8] sm:$0xff]  ;;  %v4311_v47 = vld [vmem:[%s5743_s20 + $0xb0] sm:$0xff] }
 0x126   : > { %v2302_v1 = vadd.f32 %v2298_v40, %v2274_v43  ;;  %v2303_v3 = vadd.f32 %v2299_v41, %v2275_v46  ;;  %v2304_v4 = vadd.f32 %v2300_v53, %v2276_v48  ;;  %v2289_v11 = vadd.f32 %v2285_v55, %v2231_v60  ;;  %v2426_v40 = vld [vmem:[%s5729_s0 + $0x6] sm:$0x1]  ;;  %v4306_v53 = vld [vmem:[%s5740_s21 + $0xa8] sm:$0xff]  ;;  %v4312_v55 = vld [vmem:[%s5743_s20 + $0xb8] sm:$0xff] }
 0x127   : > { %v2290_v14 = vadd.f32 %v2286_v51, %v2232_v10  ;;  %v2291_v15 = vadd.f32 %v2287_v56, %v2233_v18  ;;  %v2292_v5 = vadd.f32 %v2288_v57, %v2234_v19  ;;  %v2331_v17 = vmul.f32 %v4289_v58, %v2330_v54  ;;  %v4301_v46 = vld [vmem:[%s5734_s23 + $0xa0] sm:$0xff]  ;;  %v4302_v58 = vld [vmem:[%s5734_s23 + $0xa8] sm:$0xff] }
 0x128   : > { %v2332_v20 = vmul.f32 %v4290_v61, %v2330_v54  ;;  %v2333_v21 = vmul.f32 %v4291_v45, %v2330_v54  ;;  %v2334_v22 = vmul.f32 %v4292_v52, %v2330_v54  ;;  %v2341_v8 = vmul.f32 %v4299_v7, %v2338_v28  ;;  %v4309_v48 = vld [vmem:[%s5743_s20 + $0xa0] sm:$0xff]  ;;  %v4307_v54 = vld [vmem:[%s5740_s21 + $0xb0] sm:$0xff] }
 0x129   : > { %v2342_v23 = vmul.f32 %v4300_v9, %v2338_v28  ;;  %v2355_v24 = vmul.f32 %v4293_v59, %v2354_v0  ;;  %v2356_v26 = vmul.f32 %v4294_v6, %v2354_v0  ;;  %v2343_v27 = vsub.f32 %v2331_v17, %v2339_v62  ;;  %v2368_v28 = vld [vmem:[%s5729_s0 + $0x5] sm:$0x1]  ;;  %v4303_v61 = vld [vmem:[%s5734_s23 + $0xb0] sm:$0xff]  ;;  %v4308_v62 = vld [vmem:[%s5740_s21 + $0xb8] sm:$0xff] }
 0x12a   : > { %v2344_v60 = vsub.f32 %v2332_v20, %v2340_v63  ;;  %v2357_v10 = vmul.f32 %v4295_v12, %v2354_v0  ;;  %v2358_v18 = vmul.f32 %v4296_v16, %v2354_v0  ;;  %v2305_v19 = vadd.f32 %v2301_v2, %v5833_v25  ;;  %v4322_v12 = vld [vmem:[%s5743_s20 + $0xc8] sm:$0xff] }
 0x12b   : > { %v2345_v29 = vsub.f32 %v2333_v21, %v2341_v8  ;;  %v2346_v30 = vsub.f32 %v2334_v22, %v2342_v23  ;;  %v2359_v32 = vadd.f32 %v2355_v24, %v2331_v17  ;;  %v2306_v33 = vadd.f32 %v2302_v1, %v2248_v49 }
 0x12c   : > { %v2307_v34 = vadd.f32 %v2303_v3, %v2249_v50  ;;  %v2308_v36 = vadd.f32 %v2304_v4, %v2250_v44  ;;  %v2360_v37 = vadd.f32 %v2356_v26, %v2332_v20  ;;  %v2347_v25 = vadd.f32 %v2343_v27, %v2289_v11  ;;  %v4304_v44 = vld [vmem:[%s5734_s23 + $0xb8] sm:$0xff]  ;;  %v4313_v26 = vld [vmem:[%s5734_s23 + $0xc0] sm:$0xff]  ;;  %v4314_v27 = vld [vmem:[%s5734_s23 + $0xc8] sm:$0xff] }
 0x12d   : > { %v2348_v41 = vadd.f32 %v2344_v60, %v2290_v14  ;;  %v2361_v42 = vadd.f32 %v2357_v10, %v2333_v21  ;;  %v2362_v43 = vadd.f32 %v2358_v18, %v2334_v22  ;;  %v2349_v49 = vadd.f32 %v2345_v29, %v2291_v15  ;;  %v4315_v10 = vld [vmem:[%s5734_s23 + $0xd0] sm:$0xff]  ;;  %v4316_v18 = vld [vmem:[%s5734_s23 + $0xd8] sm:$0xff] }
 0x12e   : > { %v2350_v50 = vadd.f32 %v2346_v30, %v2292_v5  ;;  %v2384_v51 = vadd.f32 %v2368_v28, %v2367_v31  ;;  %v2396_v56 = vrot.slane %v2368_v28, %v5732_v13  ;;  %v5870_v57 = vadd.f32 %v2359_v32, %v2305_v19  ;;  %v4321_v5 = vld [vmem:[%s5743_s20 + $0xc0] sm:$0xff] }
 0x12f   : > { %v2412_v45 = vrot.slane %v2367_v31, %v5732_v13  ;;  %v2442_v52 = vadd.f32 %v2426_v40, %v2425_v39  ;;  %v2454_v59 = vrot.slane %v2426_v40, %v5732_v13  ;;  %v2364_v16 = vadd.f32 %v2360_v37, %v2306_v33  ;;  %v4317_v19 = vld [vmem:[%s5740_s21 + $0xc0] sm:$0xff]  ;;  %v4318_v37 = vld [vmem:[%s5740_s21 + $0xc8] sm:$0xff]  ;;  %v4324_v40 = vld [vmem:[%s5743_s20 + $0xd8] sm:$0xff] }
 0x130   : > { %v2388_v63 = vrot.slane %v2384_v51, %v5732_v13  ;;  %v2397_v0 = vmul.f32 %v4309_v48, %v2396_v56  ;;  %v2398_v2 = vmul.f32 %v4310_v35, %v2396_v56  ;;  %v2399_v1 = vmul.f32 %v4311_v47, %v2396_v56  ;;  %v4320_v35 = vld [vmem:[%s5740_s21 + $0xd8] sm:$0xff] }
 0x131   : > { %v2400_v3 = vmul.f32 %v4312_v55, %v2396_v56  ;;  %v2413_v4 = vmul.f32 %v4305_v38, %v2412_v45  ;;  %v2414_v6 = vmul.f32 %v4306_v53, %v2412_v45  ;;  %v2415_v7 = vmul.f32 %v4307_v54, %v2412_v45  ;;  %v4323_v38 = vld [vmem:[%s5743_s20 + $0xd0] sm:$0xff] }
 0x132   : > { %v2389_v9 = vmul.f32 %v4301_v46, %v2388_v63  ;;  %v2390_v11 = vmul.f32 %v4302_v58, %v2388_v63  ;;  %v2391_v14 = vmul.f32 %v4303_v61, %v2388_v63  ;;  %v2392_v15 = vmul.f32 %v4304_v44, %v2388_v63 }
 0x133   : > { %v2365_v17 = vadd.f32 %v2361_v42, %v2307_v34  ;;  %v2416_v20 = vmul.f32 %v4308_v62, %v2412_v45  ;;  %v2446_v21 = vrot.slane %v2442_v52, %v5732_v13  ;;  %v2366_v60 = vadd.f32 %v2362_v43, %v2308_v36  ;;  %v4319_v43 = vld [vmem:[%s5740_s21 + $0xd0] sm:$0xff]  ;;  %v2483_v62 = vld [vmem:[%s5725_s19 + $0x7] sm:$0x1] }
 0x134   : > { %v2401_v22 = vsub.f32 %v2389_v9, %v2397_v0  ;;  %v2402_v8 = vsub.f32 %v2390_v11, %v2398_v2  ;;  %v2403_v23 = vsub.f32 %v2391_v14, %v2399_v1  ;;  %v2404_v24 = vsub.f32 %v2392_v15, %v2400_v3  ;;  %v4329_v3 = vld [vmem:[%s5740_s21 + $0xe0] sm:$0xff] }
 0x135   : > { %v2455_v29 = vmul.f32 %v4321_v5, %v2454_v59  ;;  %v2456_v30 = vmul.f32 %v4322_v12, %v2454_v59  ;;  %v2470_v32 = vrot.slane %v2425_v39, %v5732_v13  ;;  %v2417_v31 = vadd.f32 %v2413_v4, %v2389_v9  ;;  %v2541_v4 = vld [vmem:[%s5725_s19 + $0x8] sm:$0x1]  ;;  %v4335_v12 = vld [vmem:[%s5743_s20 + $0xf0] sm:$0xff] }
 0x136   : > { %v2418_v28 = vadd.f32 %v2414_v6, %v2390_v11  ;;  %v2419_v33 = vadd.f32 %v2415_v7, %v2391_v14  ;;  %v2420_v34 = vadd.f32 %v2416_v20, %v2392_v15  ;;  %v2405_v42 = vadd.f32 %v2401_v22, %v2347_v25  ;;  %v2542_v6 = vld [vmem:[%s5729_s0 + $0x8] sm:$0x1]  ;;  %v4325_v14 = vld [vmem:[%s5734_s23 + $0xe0] sm:$0xff]  ;;  %v4336_v22 = vld [vmem:[%s5743_s20 + $0xf8] sm:$0xff] }
 0x137   : > { %v2406_v46 = vadd.f32 %v2402_v8, %v2348_v41  ;;  %v2407_v48 = vadd.f32 %v2403_v23, %v2349_v49  ;;  %v2408_v36 = vadd.f32 %v2404_v24, %v2350_v50  ;;  %v2447_v47 = vmul.f32 %v4313_v26, %v2446_v21  ;;  %v4333_v15 = vld [vmem:[%s5743_s20 + $0xe0] sm:$0xff]  ;;  %v4334_v5 = vld [vmem:[%s5743_s20 + $0xe8] sm:$0xff] }
 0x138   : > { %v2448_v53 = vmul.f32 %v4314_v27, %v2446_v21  ;;  %v2449_v54 = vmul.f32 %v4315_v10, %v2446_v21  ;;  %v2450_v55 = vmul.f32 %v4316_v18, %v2446_v21  ;;  %v2457_v39 = vmul.f32 %v4323_v38, %v2454_v59  ;;  %v4330_v20 = vld [vmem:[%s5740_s21 + $0xe8] sm:$0xff]  ;;  %v4331_v21 = vld [vmem:[%s5740_s21 + $0xf0] sm:$0xff] }
 0x139   : > { %v2458_v51 = vmul.f32 %v4324_v40, %v2454_v59  ;;  %v2471_v56 = vmul.f32 %v4317_v19, %v2470_v32  ;;  %v2472_v58 = vmul.f32 %v4318_v37, %v2470_v32  ;;  %v2459_v61 = vsub.f32 %v2447_v47, %v2455_v29  ;;  %v2484_v59 = vld [vmem:[%s5729_s0 + $0x7] sm:$0x1]  ;;  %v4326_v26 = vld [vmem:[%s5734_s23 + $0xe8] sm:$0xff]  ;;  %v4327_v27 = vld [vmem:[%s5734_s23 + $0xf0] sm:$0xff] }
 0x13a   : > { %v2460_v25 = vsub.f32 %v2448_v53, %v2456_v30  ;;  %v2473_v41 = vmul.f32 %v4319_v43, %v2470_v32  ;;  %v2474_v49 = vmul.f32 %v4320_v35, %v2470_v32  ;;  %v2421_v50 = vadd.f32 %v2417_v31, %v5870_v57  ;;  %v4332_v29 = vld [vmem:[%s5740_s21 + $0xf8] sm:$0xff]  ;;  %v4346_v43 = vld [vmem:[%s5743_s20 + $0x108] sm:$0xff] }
 0x13b   : > { %v2461_v44 = vsub.f32 %v2449_v54, %v2457_v39  ;;  %v2462_v45 = vsub.f32 %v2450_v55, %v2458_v51  ;;  %v2475_v52 = vadd.f32 %v2471_v56, %v2447_v47  ;;  %v2422_v63 = vadd.f32 %v2418_v28, %v2364_v16 }
 0x13c   : > { %v2423_v0 = vadd.f32 %v2419_v33, %v2365_v17  ;;  %v2424_v2 = vadd.f32 %v2420_v34, %v2366_v60  ;;  %v2476_v1 = vadd.f32 %v2472_v58, %v2448_v53  ;;  %v2463_v57 = vadd.f32 %v2459_v61, %v2405_v42  ;;  %v4328_v60 = vld [vmem:[%s5734_s23 + $0xf8] sm:$0xff]  ;;  %v4337_v58 = vld [vmem:[%s5734_s23 + $0x100] sm:$0xff]  ;;  %v4338_v61 = vld [vmem:[%s5734_s23 + $0x108] sm:$0xff] }
 0x13d   : > { %v2464_v7 = vadd.f32 %v2460_v25, %v2406_v46  ;;  %v2477_v9 = vadd.f32 %v2473_v41, %v2449_v54  ;;  %v2478_v11 = vadd.f32 %v2474_v49, %v2450_v55  ;;  %v2465_v16 = vadd.f32 %v2461_v44, %v2407_v48  ;;  %v4339_v41 = vld [vmem:[%s5734_s23 + $0x110] sm:$0xff]  ;;  %v4340_v49 = vld [vmem:[%s5734_s23 + $0x118] sm:$0xff] }
 0x13e   : > { %v2466_v17 = vadd.f32 %v2462_v45, %v2408_v36  ;;  %v2500_v8 = vadd.f32 %v2484_v59, %v2483_v62  ;;  %v2512_v23 = vrot.slane %v2484_v59, %v5732_v13  ;;  %v5907_v24 = vadd.f32 %v2475_v52, %v2421_v50  ;;  %v4345_v36 = vld [vmem:[%s5743_s20 + $0x100] sm:$0xff] }
 0x13f   : > { %v2528_v10 = vrot.slane %v2483_v62, %v5732_v13  ;;  %v2558_v18 = vadd.f32 %v2542_v6, %v2541_v4  ;;  %v2570_v19 = vrot.slane %v2542_v6, %v5732_v13  ;;  %v2480_v35 = vadd.f32 %v2476_v1, %v2422_v63  ;;  %v4341_v50 = vld [vmem:[%s5740_s21 + $0x100] sm:$0xff]  ;;  %v4342_v1 = vld [vmem:[%s5740_s21 + $0x108] sm:$0xff]  ;;  %v4348_v6 = vld [vmem:[%s5743_s20 + $0x118] sm:$0xff] }
 0x140   : > { %v2504_v30 = vrot.slane %v2500_v8, %v5732_v13  ;;  %v2513_v32 = vmul.f32 %v4333_v15, %v2512_v23  ;;  %v2514_v31 = vmul.f32 %v4334_v5, %v2512_v23  ;;  %v2515_v28 = vmul.f32 %v4335_v12, %v2512_v23  ;;  %v4344_v5 = vld [vmem:[%s5740_s21 + $0x118] sm:$0xff] }
 0x141   : > { %v2516_v33 = vmul.f32 %v4336_v22, %v2512_v23  ;;  %v2529_v34 = vmul.f32 %v4329_v3, %v2528_v10  ;;  %v2530_v37 = vmul.f32 %v4330_v20, %v2528_v10  ;;  %v2531_v38 = vmul.f32 %v4331_v21, %v2528_v10  ;;  %v4347_v3 = vld [vmem:[%s5743_s20 + $0x110] sm:$0xff] }
 0x142   : > { %v2505_v40 = vmul.f32 %v4325_v14, %v2504_v30  ;;  %v2506_v42 = vmul.f32 %v4326_v26, %v2504_v30  ;;  %v2507_v46 = vmul.f32 %v4327_v27, %v2504_v30  ;;  %v2508_v48 = vmul.f32 %v4328_v60, %v2504_v30 }
 0x143   : > { %v2481_v47 = vadd.f32 %v2477_v9, %v2423_v0  ;;  %v2532_v53 = vmul.f32 %v4332_v29, %v2528_v10  ;;  %v2562_v54 = vrot.slane %v2558_v18, %v5732_v13  ;;  %v2482_v25 = vadd.f32 %v2478_v11, %v2424_v2  ;;  %v4343_v11 = vld [vmem:[%s5740_s21 + $0x110] sm:$0xff]  ;;  %v2599_v29 = vld [vmem:[%s5725_s19 + $0x9] sm:$0x1] }
 0x144   : > { %v2517_v55 = vsub.f32 %v2505_v40, %v2513_v32  ;;  %v2518_v39 = vsub.f32 %v2506_v42, %v2514_v31  ;;  %v2519_v51 = vsub.f32 %v2507_v46, %v2515_v28  ;;  %v2520_v56 = vsub.f32 %v2508_v48, %v2516_v33  ;;  %v4353_v33 = vld [vmem:[%s5740_s21 + $0x120] sm:$0xff] }
 0x145   : > { %v2571_v44 = vmul.f32 %v4345_v36, %v2570_v19  ;;  %v2572_v45 = vmul.f32 %v4346_v43, %v2570_v19  ;;  %v2586_v52 = vrot.slane %v2541_v4, %v5732_v13  ;;  %v2533_v62 = vadd.f32 %v2529_v34, %v2505_v40  ;;  %v2657_v34 = vld [vmem:[%s5725_s19 + $0xa] sm:$0x1]  ;;  %v4359_v43 = vld [vmem:[%s5743_s20 + $0x130] sm:$0xff] }
 0x146   : > { %v2534_v59 = vadd.f32 %v2530_v37, %v2506_v42  ;;  %v2535_v63 = vadd.f32 %v2531_v38, %v2507_v46  ;;  %v2536_v0 = vadd.f32 %v2532_v53, %v2508_v48  ;;  %v2521_v9 = vadd.f32 %v2517_v55, %v2463_v57  ;;  %v2658_v37 = vld [vmem:[%s5729_s0 + $0xa] sm:$0x1]  ;;  %v4349_v46 = vld [vmem:[%s5734_s23 + $0x120] sm:$0xff]  ;;  %v4360_v55 = vld [vmem:[%s5743_s20 + $0x138] sm:$0xff] }
 0x147   : > { %v2522_v14 = vadd.f32 %v2518_v39, %v2464_v7  ;;  %v2523_v15 = vadd.f32 %v2519_v51, %v2465_v16  ;;  %v2524_v2 = vadd.f32 %v2520_v56, %v2466_v17  ;;  %v2563_v12 = vmul.f32 %v4337_v58, %v2562_v54  ;;  %v4357_v48 = vld [vmem:[%s5743_s20 + $0x120] sm:$0xff]  ;;  %v4358_v36 = vld [vmem:[%s5743_s20 + $0x128] sm:$0xff] }
 0x148   : > { %v2564_v20 = vmul.f32 %v4338_v61, %v2562_v54  ;;  %v2565_v21 = vmul.f32 %v4339_v41, %v2562_v54  ;;  %v2566_v22 = vmul.f32 %v4340_v49, %v2562_v54  ;;  %v2573_v4 = vmul.f32 %v4347_v3, %v2570_v19  ;;  %v4354_v53 = vld [vmem:[%s5740_s21 + $0x128] sm:$0xff]  ;;  %v4355_v54 = vld [vmem:[%s5740_s21 + $0x130] sm:$0xff] }
 0x149   : > { %v2574_v8 = vmul.f32 %v4348_v6, %v2570_v19  ;;  %v2587_v23 = vmul.f32 %v4341_v50, %v2586_v52  ;;  %v2588_v26 = vmul.f32 %v4342_v1, %v2586_v52  ;;  %v2575_v27 = vsub.f32 %v2563_v12, %v2571_v44  ;;  %v2600_v19 = vld [vmem:[%s5729_s0 + $0x9] sm:$0x1]  ;;  %v4351_v61 = vld [vmem:[%s5734_s23 + $0x130] sm:$0xff]  ;;  %v4356_v44 = vld [vmem:[%s5740_s21 + $0x138] sm:$0xff] }
 0x14a   : > { %v2576_v57 = vsub.f32 %v2564_v20, %v2572_v45  ;;  %v2589_v7 = vmul.f32 %v4343_v11, %v2586_v52  ;;  %v2590_v16 = vmul.f32 %v4344_v5, %v2586_v52  ;;  %v2537_v17 = vadd.f32 %v2533_v62, %v5907_v24  ;;  %v4350_v58 = vld [vmem:[%s5734_s23 + $0x128] sm:$0xff] }
 0x14b   : > { %v2577_v60 = vsub.f32 %v2565_v21, %v2573_v4  ;;  %v2578_v10 = vsub.f32 %v2566_v22, %v2574_v8  ;;  %v2591_v18 = vadd.f32 %v2587_v23, %v2563_v12  ;;  %v2538_v30 = vadd.f32 %v2534_v59, %v2480_v35  ;;  %v4370_v11 = vld [vmem:[%s5743_s20 + $0x148] sm:$0xff] }
 0x14c   : > { %v2539_v32 = vadd.f32 %v2535_v63, %v2481_v47  ;;  %v2540_v31 = vadd.f32 %v2536_v0, %v2482_v25  ;;  %v2592_v28 = vadd.f32 %v2588_v26, %v2564_v20  ;;  %v2579_v24 = vadd.f32 %v2575_v27, %v2521_v9  ;;  %v4352_v25 = vld [vmem:[%s5734_s23 + $0x138] sm:$0xff]  ;;  %v4361_v26 = vld [vmem:[%s5734_s23 + $0x140] sm:$0xff]  ;;  %v4362_v27 = vld [vmem:[%s5734_s23 + $0x148] sm:$0xff] }
 0x14d   : > { %v2580_v38 = vadd.f32 %v2576_v57, %v2522_v14  ;;  %v2593_v40 = vadd.f32 %v2589_v7, %v2565_v21  ;;  %v2594_v42 = vadd.f32 %v2590_v16, %v2566_v22  ;;  %v2581_v35 = vadd.f32 %v2577_v60, %v2523_v15  ;;  %v4363_v7 = vld [vmem:[%s5734_s23 + $0x150] sm:$0xff]  ;;  %v4364_v16 = vld [vmem:[%s5734_s23 + $0x158] sm:$0xff] }
 0x14e   : > { %v2582_v47 = vadd.f32 %v2578_v10, %v2524_v2  ;;  %v2616_v39 = vadd.f32 %v2600_v19, %v2599_v29  ;;  %v2628_v51 = vrot.slane %v2600_v19, %v5732_v13  ;;  %v5944_v56 = vadd.f32 %v2591_v18, %v2537_v17  ;;  %v4369_v2 = vld [vmem:[%s5743_s20 + $0x140] sm:$0xff] }
 0x14f   : > { %v2644_v41 = vrot.slane %v2599_v29, %v5732_v13  ;;  %v2674_v49 = vadd.f32 %v2658_v37, %v2657_v34  ;;  %v2686_v50 = vrot.slane %v2658_v37, %v5732_v13  ;;  %v2596_v5 = vadd.f32 %v2592_v28, %v2538_v30  ;;  %v4365_v17 = vld [vmem:[%s5740_s21 + $0x140] sm:$0xff]  ;;  %v4366_v28 = vld [vmem:[%s5740_s21 + $0x148] sm:$0xff]  ;;  %v4372_v37 = vld [vmem:[%s5743_s20 + $0x158] sm:$0xff] }
 0x150   : > { %v2620_v45 = vrot.slane %v2616_v39, %v5732_v13  ;;  %v2629_v52 = vmul.f32 %v4357_v48, %v2628_v51  ;;  %v2630_v62 = vmul.f32 %v4358_v36, %v2628_v51  ;;  %v2631_v59 = vmul.f32 %v4359_v43, %v2628_v51  ;;  %v4368_v36 = vld [vmem:[%s5740_s21 + $0x158] sm:$0xff] }
 0x151   : > { %v2632_v63 = vmul.f32 %v4360_v55, %v2628_v51  ;;  %v2645_v0 = vmul.f32 %v4353_v33, %v2644_v41  ;;  %v2646_v1 = vmul.f32 %v4354_v53, %v2644_v41  ;;  %v2647_v3 = vmul.f32 %v4355_v54, %v2644_v41  ;;  %v4371_v33 = vld [vmem:[%s5743_s20 + $0x150] sm:$0xff] }
 0x152   : > { %v2621_v6 = vmul.f32 %v4349_v46, %v2620_v45  ;;  %v2622_v9 = vmul.f32 %v4350_v58, %v2620_v45  ;;  %v2623_v14 = vmul.f32 %v4351_v61, %v2620_v45  ;;  %v2624_v15 = vmul.f32 %v4352_v25, %v2620_v45 }
 0x153   : > { %v2597_v12 = vadd.f32 %v2593_v40, %v2539_v32  ;;  %v2648_v20 = vmul.f32 %v4356_v44, %v2644_v41  ;;  %v2678_v21 = vrot.slane %v2674_v49, %v5732_v13  ;;  %v2598_v57 = vadd.f32 %v2594_v42, %v2540_v31  ;;  %v4367_v42 = vld [vmem:[%s5740_s21 + $0x150] sm:$0xff]  ;;  %v2715_v44 = vld [vmem:[%s5725_s19 + $0xb] sm:$0x1] }
 0x154   : > { %v2633_v22 = vsub.f32 %v2621_v6, %v2629_v52  ;;  %v2634_v4 = vsub.f32 %v2622_v9, %v2630_v62  ;;  %v2635_v8 = vsub.f32 %v2623_v14, %v2631_v59  ;;  %v2636_v23 = vsub.f32 %v2624_v15, %v2632_v63  ;;  %v4377_v63 = vld [vmem:[%s5740_s21 + $0x160] sm:$0xff] }
 0x155   : > { %v2687_v60 = vmul.f32 %v4369_v2, %v2686_v50  ;;  %v2688_v10 = vmul.f32 %v4370_v11, %v2686_v50  ;;  %v2702_v18 = vrot.slane %v2657_v34, %v5732_v13  ;;  %v2649_v29 = vadd.f32 %v2645_v0, %v2621_v6  ;;  %v2773_v0 = vld [vmem:[%s5725_s19 + $0xc] sm:$0x1]  ;;  %v4383_v11 = vld [vmem:[%s5743_s20 + $0x170] sm:$0xff] }
 0x156   : > { %v2650_v19 = vadd.f32 %v2646_v1, %v2622_v9  ;;  %v2651_v30 = vadd.f32 %v2647_v3, %v2623_v14  ;;  %v2652_v32 = vadd.f32 %v2648_v20, %v2624_v15  ;;  %v2637_v40 = vadd.f32 %v2633_v22, %v2579_v24  ;;  %v2774_v1 = vld [vmem:[%s5729_s0 + $0xc] sm:$0x1]  ;;  %v4373_v14 = vld [vmem:[%s5734_s23 + $0x160] sm:$0xff]  ;;  %v4384_v22 = vld [vmem:[%s5743_s20 + $0x178] sm:$0xff] }
 0x157   : > { %v2638_v46 = vadd.f32 %v2634_v4, %v2580_v38  ;;  %v2639_v48 = vadd.f32 %v2635_v8, %v2581_v35  ;;  %v2640_v31 = vadd.f32 %v2636_v23, %v2582_v47  ;;  %v2679_v43 = vmul.f32 %v4361_v26, %v2678_v21  ;;  %v4381_v15 = vld [vmem:[%s5743_s20 + $0x160] sm:$0xff]  ;;  %v4382_v2 = vld [vmem:[%s5743_s20 + $0x168] sm:$0xff] }
 0x158   : > { %v2680_v53 = vmul.f32 %v4362_v27, %v2678_v21  ;;  %v2681_v54 = vmul.f32 %v4363_v7, %v2678_v21  ;;  %v2682_v55 = vmul.f32 %v4364_v16, %v2678_v21  ;;  %v2689_v34 = vmul.f32 %v4371_v33, %v2686_v50  ;;  %v4378_v20 = vld [vmem:[%s5740_s21 + $0x168] sm:$0xff]  ;;  %v4379_v21 = vld [vmem:[%s5740_s21 + $0x170] sm:$0xff] }
 0x159   : > { %v2690_v39 = vmul.f32 %v4372_v37, %v2686_v50  ;;  %v2703_v51 = vmul.f32 %v4365_v17, %v2702_v18  ;;  %v2704_v58 = vmul.f32 %v4366_v28, %v2702_v18  ;;  %v2691_v61 = vsub.f32 %v2679_v43, %v2687_v60  ;;  %v2716_v50 = vld [vmem:[%s5729_s0 + $0xb] sm:$0x1]  ;;  %v4375_v27 = vld [vmem:[%s5734_s23 + $0x170] sm:$0xff]  ;;  %v4380_v60 = vld [vmem:[%s5740_s21 + $0x178] sm:$0xff] }
 0x15a   : > { %v2692_v24 = vsub.f32 %v2680_v53, %v2688_v10  ;;  %v2705_v38 = vmul.f32 %v4367_v42, %v2702_v18  ;;  %v2706_v35 = vmul.f32 %v4368_v36, %v2702_v18  ;;  %v2653_v47 = vadd.f32 %v2649_v29, %v5944_v56  ;;  %v4374_v26 = vld [vmem:[%s5734_s23 + $0x168] sm:$0xff] }
 0x15b   : > { %v2693_v25 = vsub.f32 %v2681_v54, %v2689_v34  ;;  %v2694_v41 = vsub.f32 %v2682_v55, %v2690_v39  ;;  %v2707_v49 = vadd.f32 %v2703_v51, %v2679_v43  ;;  %v2654_v45 = vadd.f32 %v2650_v19, %v2596_v5  ;;  %v4394_v42 = vld [vmem:[%s5743_s20 + $0x188] sm:$0xff] }
 0x15c   : > { %v2655_v52 = vadd.f32 %v2651_v30, %v2597_v12  ;;  %v2656_v62 = vadd.f32 %v2652_v32, %v2598_v57  ;;  %v2708_v59 = vadd.f32 %v2704_v58, %v2680_v53  ;;  %v2695_v56 = vadd.f32 %v2691_v61, %v2637_v40  ;;  %v4376_v57 = vld [vmem:[%s5734_s23 + $0x178] sm:$0xff]  ;;  %v4385_v58 = vld [vmem:[%s5734_s23 + $0x180] sm:$0xff]  ;;  %v4386_v61 = vld [vmem:[%s5734_s23 + $0x188] sm:$0xff] }
 0x15d   : > { %v2696_v3 = vadd.f32 %v2692_v24, %v2638_v46  ;;  %v2709_v6 = vadd.f32 %v2705_v38, %v2681_v54  ;;  %v2710_v9 = vadd.f32 %v2706_v35, %v2682_v55  ;;  %v2697_v5 = vadd.f32 %v2693_v25, %v2639_v48  ;;  %v4387_v38 = vld [vmem:[%s5734_s23 + $0x190] sm:$0xff]  ;;  %v4388_v35 = vld [vmem:[%s5734_s23 + $0x198] sm:$0xff] }
 0x15e   : > { %v2698_v12 = vadd.f32 %v2694_v41, %v2640_v31  ;;  %v2732_v4 = vadd.f32 %v2716_v50, %v2715_v44  ;;  %v2744_v8 = vrot.slane %v2716_v50, %v5732_v13  ;;  %v5981_v23 = vadd.f32 %v2707_v49, %v2653_v47  ;;  %v4393_v31 = vld [vmem:[%s5743_s20 + $0x180] sm:$0xff] }
 0x15f   : > { %v2760_v7 = vrot.slane %v2715_v44, %v5732_v13  ;;  %v2790_v16 = vadd.f32 %v2774_v1, %v2773_v0  ;;  %v2802_v17 = vrot.slane %v2774_v1, %v5732_v13  ;;  %v2712_v36 = vadd.f32 %v2708_v59, %v2654_v45  ;;  %v4389_v47 = vld [vmem:[%s5740_s21 + $0x180] sm:$0xff]  ;;  %v4390_v59 = vld [vmem:[%s5740_s21 + $0x188] sm:$0xff]  ;;  %v4396_v1 = vld [vmem:[%s5743_s20 + $0x198] sm:$0xff] }
 0x160   : > { %v2736_v10 = vrot.slane %v2732_v4, %v5732_v13  ;;  %v2745_v18 = vmul.f32 %v4381_v15, %v2744_v8  ;;  %v2746_v29 = vmul.f32 %v4382_v2, %v2744_v8  ;;  %v2747_v19 = vmul.f32 %v4383_v11, %v2744_v8  ;;  %v4392_v2 = vld [vmem:[%s5740_s21 + $0x198] sm:$0xff] }
 0x161   : > { %v2748_v30 = vmul.f32 %v4384_v22, %v2744_v8  ;;  %v2761_v32 = vmul.f32 %v4377_v63, %v2760_v7  ;;  %v2762_v28 = vmul.f32 %v4378_v20, %v2760_v7  ;;  %v2763_v33 = vmul.f32 %v4379_v21, %v2760_v7  ;;  %v4395_v63 = vld [vmem:[%s5743_s20 + $0x190] sm:$0xff] }
 0x162   : > { %v2737_v37 = vmul.f32 %v4373_v14, %v2736_v10  ;;  %v2738_v40 = vmul.f32 %v4374_v26, %v2736_v10  ;;  %v2739_v46 = vmul.f32 %v4375_v27, %v2736_v10  ;;  %v2740_v48 = vmul.f32 %v4376_v57, %v2736_v10 }
 0x163   : > { %v2713_v43 = vadd.f32 %v2709_v6, %v2655_v52  ;;  %v2764_v53 = vmul.f32 %v4380_v60, %v2760_v7  ;;  %v2794_v54 = vrot.slane %v2790_v16, %v5732_v13  ;;  %v2714_v24 = vadd.f32 %v2710_v9, %v2656_v62  ;;  %v4391_v9 = vld [vmem:[%s5740_s21 + $0x190] sm:$0xff]  ;;  %v2831_v60 = vld [vmem:[%s5725_s19 + $0xd] sm:$0x1] }
 0x164   : > { %v2749_v55 = vsub.f32 %v2737_v37, %v2745_v18  ;;  %v2750_v34 = vsub.f32 %v2738_v40, %v2746_v29  ;;  %v2751_v39 = vsub.f32 %v2739_v46, %v2747_v19  ;;  %v2752_v51 = vsub.f32 %v2740_v48, %v2748_v30  ;;  %v4401_v30 = vld [vmem:[%s5740_s21 + $0x1a0] sm:$0xff] }
 0x165   : > { %v2803_v25 = vmul.f32 %v4393_v31, %v2802_v17  ;;  %v2804_v41 = vmul.f32 %v4394_v42, %v2802_v17  ;;  %v2818_v49 = vrot.slane %v2773_v0, %v5732_v13  ;;  %v2765_v44 = vadd.f32 %v2761_v32, %v2737_v37  ;;  %v2889_v32 = vld [vmem:[%s5725_s19 + $0xe] sm:$0x1]  ;;  %v4407_v42 = vld [vmem:[%s5743_s20 + $0x1b0] sm:$0xff] }
 0x166   : > { %v2766_v50 = vadd.f32 %v2762_v28, %v2738_v40  ;;  %v2767_v45 = vadd.f32 %v2763_v33, %v2739_v46  ;;  %v2768_v52 = vadd.f32 %v2764_v53, %v2740_v48  ;;  %v2753_v6 = vadd.f32 %v2749_v55, %v2695_v56  ;;  %v2890_v28 = vld [vmem:[%s5729_s0 + $0xe] sm:$0x1]  ;;  %v4397_v46 = vld [vmem:[%s5734_s23 + $0x1a0] sm:$0xff]  ;;  %v4408_v55 = vld [vmem:[%s5743_s20 + $0x1b8] sm:$0xff] }
 0x167   : > { %v2754_v14 = vadd.f32 %v2750_v34, %v2696_v3  ;;  %v2755_v15 = vadd.f32 %v2751_v39, %v2697_v5  ;;  %v2756_v62 = vadd.f32 %v2752_v51, %v2698_v12  ;;  %v2795_v11 = vmul.f32 %v4385_v58, %v2794_v54  ;;  %v4405_v48 = vld [vmem:[%s5743_s20 + $0x1a0] sm:$0xff]  ;;  %v4406_v31 = vld [vmem:[%s5743_s20 + $0x1a8] sm:$0xff] }
 0x168   : > { %v2796_v20 = vmul.f32 %v4386_v61, %v2794_v54  ;;  %v2797_v21 = vmul.f32 %v4387_v38, %v2794_v54  ;;  %v2798_v22 = vmul.f32 %v4388_v35, %v2794_v54  ;;  %v2805_v0 = vmul.f32 %v4395_v63, %v2802_v17  ;;  %v4402_v53 = vld [vmem:[%s5740_s21 + $0x1a8] sm:$0xff]  ;;  %v4403_v54 = vld [vmem:[%s5740_s21 + $0x1b0] sm:$0xff] }
 0x169   : > { %v2806_v4 = vmul.f32 %v4396_v1, %v2802_v17  ;;  %v2819_v8 = vmul.f32 %v4389_v47, %v2818_v49  ;;  %v2820_v26 = vmul.f32 %v4390_v59, %v2818_v49  ;;  %v2807_v27 = vsub.f32 %v2795_v11, %v2803_v25  ;;  %v2832_v17 = vld [vmem:[%s5729_s0 + $0xd] sm:$0x1]  ;;  %v4399_v61 = vld [vmem:[%s5734_s23 + $0x1b0] sm:$0xff]  ;;  %v4404_v25 = vld [vmem:[%s5740_s21 + $0x1b8] sm:$0xff] }
 0x16a   : > { %v2808_v56 = vsub.f32 %v2796_v20, %v2804_v41  ;;  %v2821_v3 = vmul.f32 %v4391_v9, %v2818_v49  ;;  %v2822_v5 = vmul.f32 %v4392_v2, %v2818_v49  ;;  %v2769_v12 = vadd.f32 %v2765_v44, %v5981_v23  ;;  %v4398_v58 = vld [vmem:[%s5734_s23 + $0x1a8] sm:$0xff] }
 0x16b   : > { %v2809_v57 = vsub.f32 %v2797_v21, %v2805_v0  ;;  %v2810_v7 = vsub.f32 %v2798_v22, %v2806_v4  ;;  %v2823_v16 = vadd.f32 %v2819_v8, %v2795_v11  ;;  %v2770_v10 = vadd.f32 %v2766_v50, %v2712_v36  ;;  %v4418_v9 = vld [vmem:[%s5743_s20 + $0x1c8] sm:$0xff] }
 0x16c   : > { %v2771_v18 = vadd.f32 %v2767_v45, %v2713_v43  ;;  %v2772_v29 = vadd.f32 %v2768_v52, %v2714_v24  ;;  %v2824_v19 = vadd.f32 %v2820_v26, %v2796_v20  ;;  %v2811_v23 = vadd.f32 %v2807_v27, %v2753_v6  ;;  %v4400_v24 = vld [vmem:[%s5734_s23 + $0x1b8] sm:$0xff]  ;;  %v4409_v26 = vld [vmem:[%s5734_s23 + $0x1c0] sm:$0xff]  ;;  %v4410_v27 = vld [vmem:[%s5734_s23 + $0x1c8] sm:$0xff] }
 0x16d   : > { %v2812_v33 = vadd.f32 %v2808_v56, %v2754_v14  ;;  %v2825_v37 = vadd.f32 %v2821_v3, %v2797_v21  ;;  %v2826_v40 = vadd.f32 %v2822_v5, %v2798_v22  ;;  %v2813_v36 = vadd.f32 %v2809_v57, %v2755_v15  ;;  %v4411_v3 = vld [vmem:[%s5734_s23 + $0x1d0] sm:$0xff]  ;;  %v4412_v5 = vld [vmem:[%s5734_s23 + $0x1d8] sm:$0xff] }
 0x16e   : > { %v2814_v43 = vadd.f32 %v2810_v7, %v2756_v62  ;;  %v2848_v34 = vadd.f32 %v2832_v17, %v2831_v60  ;;  %v2860_v39 = vrot.slane %v2832_v17, %v5732_v13  ;;  %v6018_v51 = vadd.f32 %v2823_v16, %v2769_v12  ;;  %v4417_v62 = vld [vmem:[%s5743_s20 + $0x1c0] sm:$0xff] }
 0x16f   : > { %v2876_v38 = vrot.slane %v2831_v60, %v5732_v13  ;;  %v2906_v35 = vadd.f32 %v2890_v28, %v2889_v32  ;;  %v2918_v47 = vrot.slane %v2890_v28, %v5732_v13  ;;  %v2828_v2 = vadd.f32 %v2824_v19, %v2770_v10  ;;  %v4413_v12 = vld [vmem:[%s5740_s21 + $0x1c0] sm:$0xff]  ;;  %v4414_v19 = vld [vmem:[%s5740_s21 + $0x1c8] sm:$0xff]  ;;  %v4420_v28 = vld [vmem:[%s5743_s20 + $0x1d8] sm:$0xff] }
 0x170   : > { %v2852_v41 = vrot.slane %v2848_v34, %v5732_v13  ;;  %v2861_v49 = vmul.f32 %v4405_v48, %v2860_v39  ;;  %v2862_v44 = vmul.f32 %v4406_v31, %v2860_v39  ;;  %v2863_v50 = vmul.f32 %v4407_v42, %v2860_v39  ;;  %v4416_v31 = vld [vmem:[%s5740_s21 + $0x1d8] sm:$0xff] }
 0x171   : > { %v2864_v45 = vmul.f32 %v4408_v55, %v2860_v39  ;;  %v2877_v52 = vmul.f32 %v4401_v30, %v2876_v38  ;;  %v2878_v59 = vmul.f32 %v4402_v53, %v2876_v38  ;;  %v2879_v63 = vmul.f32 %v4403_v54, %v2876_v38  ;;  %v4419_v30 = vld [vmem:[%s5743_s20 + $0x1d0] sm:$0xff] }
 0x172   : > { %v2853_v1 = vmul.f32 %v4397_v46, %v2852_v41  ;;  %v2854_v6 = vmul.f32 %v4398_v58, %v2852_v41  ;;  %v2855_v14 = vmul.f32 %v4399_v61, %v2852_v41  ;;  %v2856_v15 = vmul.f32 %v4400_v24, %v2852_v41 }
 0x173   : > { %v2829_v11 = vadd.f32 %v2825_v37, %v2771_v18  ;;  %v2880_v20 = vmul.f32 %v4404_v25, %v2876_v38  ;;  %v2910_v21 = vrot.slane %v2906_v35, %v5732_v13  ;;  %v2830_v56 = vadd.f32 %v2826_v40, %v2772_v29  ;;  %v4415_v40 = vld [vmem:[%s5740_s21 + $0x1d0] sm:$0xff]  ;;  %v2947_v25 = vld [vmem:[%s5725_s19 + $0xf] sm:$0x1] }
 0x174   : > { %v2865_v22 = vsub.f32 %v2853_v1, %v2861_v49  ;;  %v2866_v0 = vsub.f32 %v2854_v6, %v2862_v44  ;;  %v2867_v4 = vsub.f32 %v2855_v14, %v2863_v50  ;;  %v2868_v8 = vsub.f32 %v2856_v15, %v2864_v45  ;;  %v4425_v45 = vld [vmem:[%s5740_s21 + $0x1e0] sm:$0xff] }
 0x175   : > { %v2919_v57 = vmul.f32 %v4417_v62, %v2918_v47  ;;  %v2920_v7 = vmul.f32 %v4418_v9, %v2918_v47  ;;  %v2934_v16 = vrot.slane %v2889_v32, %v5732_v13  ;;  %v2881_v60 = vadd.f32 %v2877_v52, %v2853_v1  ;;  %v3005_v52 = vld [vmem:[%s5725_s19 + $0x10] sm:$0x1]  ;;  %v4430_v62 = vld [vmem:[%s5743_s20 + $0x1e8] sm:$0xff] }
 0x176   : > { %v2882_v17 = vadd.f32 %v2878_v59, %v2854_v6  ;;  %v2883_v10 = vadd.f32 %v2879_v63, %v2855_v14  ;;  %v2884_v18 = vadd.f32 %v2880_v20, %v2856_v15  ;;  %v2869_v37 = vadd.f32 %v2865_v22, %v2811_v23  ;;  %v3006_v59 = vld [vmem:[%s5729_s0 + $0x10] sm:$0x1]  ;;  %v4421_v14 = vld [vmem:[%s5734_s23 + $0x1e0] sm:$0xff]  ;;  %v4426_v20 = vld [vmem:[%s5740_s21 + $0x1e8] sm:$0xff] }
 0x177   : > { %v2870_v46 = vadd.f32 %v2866_v0, %v2812_v33  ;;  %v2871_v48 = vadd.f32 %v2867_v4, %v2813_v36  ;;  %v2872_v29 = vadd.f32 %v2868_v8, %v2814_v43  ;;  %v2911_v42 = vmul.f32 %v4409_v26, %v2910_v21  ;;  %v4429_v15 = vld [vmem:[%s5743_s20 + $0x1e0] sm:$0xff]  ;;  %v4431_v9 = vld [vmem:[%s5743_s20 + $0x1f0] sm:$0xff]  ;;  %v4432_v22 = vld [vmem:[%s5743_s20 + $0x1f8] sm:$0xff] }
 0x178   : > { %v2912_v53 = vmul.f32 %v4410_v27, %v2910_v21  ;;  %v2913_v54 = vmul.f32 %v4411_v3, %v2910_v21  ;;  %v2914_v55 = vmul.f32 %v4412_v5, %v2910_v21  ;;  %v2921_v32 = vmul.f32 %v4419_v30, %v2918_v47  ;;  %v4427_v21 = vld [vmem:[%s5740_s21 + $0x1f0] sm:$0xff]  ;;  %v4422_v26 = vld [vmem:[%s5734_s23 + $0x1e8] sm:$0xff] }
 0x179   : > { %v2922_v34 = vmul.f32 %v4420_v28, %v2918_v47  ;;  %v2935_v39 = vmul.f32 %v4413_v12, %v2934_v16  ;;  %v2936_v58 = vmul.f32 %v4414_v19, %v2934_v16  ;;  %v2923_v61 = vsub.f32 %v2911_v42, %v2919_v57  ;;  %v2948_v47 = vld [vmem:[%s5729_s0 + $0xf] sm:$0x1]  ;;  %v4423_v27 = vld [vmem:[%s5734_s23 + $0x1f0] sm:$0xff]  ;;  %v4428_v57 = vld [vmem:[%s5740_s21 + $0x1f8] sm:$0xff] }
 0x17a   : > { %v2924_v23 = vsub.f32 %v2912_v53, %v2920_v7  ;;  %v2937_v33 = vmul.f32 %v4415_v40, %v2934_v16  ;;  %v2938_v36 = vmul.f32 %v4416_v31, %v2934_v16  ;;  %v2885_v43 = vadd.f32 %v2881_v60, %v6018_v51  ;;  %v4442_v40 = vld [vmem:[%s5743_s20 + $0x208] sm:$0xff] }
 0x17b   : > { %v2925_v24 = vsub.f32 %v2913_v54, %v2921_v32  ;;  %v2926_v38 = vsub.f32 %v2914_v55, %v2922_v34  ;;  %v2939_v35 = vadd.f32 %v2935_v39, %v2911_v42  ;;  %v2886_v41 = vadd.f32 %v2882_v17, %v2828_v2 }
 0x17c   : > { %v2887_v49 = vadd.f32 %v2883_v10, %v2829_v11  ;;  %v2888_v44 = vadd.f32 %v2884_v18, %v2830_v56  ;;  %v2940_v50 = vadd.f32 %v2936_v58, %v2912_v53  ;;  %v2927_v51 = vadd.f32 %v2923_v61, %v2869_v37  ;;  %v4424_v56 = vld [vmem:[%s5734_s23 + $0x1f8] sm:$0xff]  ;;  %v4433_v58 = vld [vmem:[%s5734_s23 + $0x200] sm:$0xff]  ;;  %v4434_v61 = vld [vmem:[%s5734_s23 + $0x208] sm:$0xff] }
 0x17d   : > { %v2928_v63 = vadd.f32 %v2924_v23, %v2870_v46  ;;  %v2941_v1 = vadd.f32 %v2937_v33, %v2913_v54  ;;  %v2942_v6 = vadd.f32 %v2938_v36, %v2914_v55  ;;  %v2929_v2 = vadd.f32 %v2925_v24, %v2871_v48  ;;  %v4435_v33 = vld [vmem:[%s5734_s23 + $0x210] sm:$0xff]  ;;  %v4436_v36 = vld [vmem:[%s5734_s23 + $0x218] sm:$0xff] }
 0x17e   : > { %v2930_v11 = vadd.f32 %v2926_v38, %v2872_v29  ;;  %v2964_v0 = vadd.f32 %v2948_v47, %v2947_v25  ;;  %v2976_v4 = vrot.slane %v2948_v47, %v5732_v13  ;;  %v6055_v8 = vadd.f32 %v2939_v35, %v2885_v43  ;;  %v4441_v29 = vld [vmem:[%s5743_s20 + $0x200] sm:$0xff] }
 0x17f   : > { %v2992_v3 = vrot.slane %v2947_v25, %v5732_v13  ;;  %v3022_v5 = vadd.f32 %v3006_v59, %v3005_v52  ;;  %v3034_v12 = vrot.slane %v3006_v59, %v5732_v13  ;;  %v2944_v31 = vadd.f32 %v2940_v50, %v2886_v41  ;;  %v4437_v43 = vld [vmem:[%s5740_s21 + $0x200] sm:$0xff]  ;;  %v4438_v50 = vld [vmem:[%s5740_s21 + $0x208] sm:$0xff]  ;;  %v4444_v59 = vld [vmem:[%s5743_s20 + $0x218] sm:$0xff] }
 0x180   : > { %v2968_v7 = vrot.slane %v2964_v0, %v5732_v13  ;;  %v2977_v16 = vmul.f32 %v4429_v15, %v2976_v4  ;;  %v2978_v60 = vmul.f32 %v4430_v62, %v2976_v4  ;;  %v2979_v17 = vmul.f32 %v4431_v9, %v2976_v4  ;;  %v4440_v62 = vld [vmem:[%s5740_s21 + $0x218] sm:$0xff] }
 0x181   : > { %v2980_v10 = vmul.f32 %v4432_v22, %v2976_v4  ;;  %v2993_v18 = vmul.f32 %v4425_v45, %v2992_v3  ;;  %v2994_v19 = vmul.f32 %v4426_v20, %v2992_v3  ;;  %v2995_v30 = vmul.f32 %v4427_v21, %v2992_v3  ;;  %v4443_v45 = vld [vmem:[%s5743_s20 + $0x210] sm:$0xff] }
 0x182   : > { %v2969_v28 = vmul.f32 %v4421_v14, %v2968_v7  ;;  %v2970_v37 = vmul.f32 %v4422_v26, %v2968_v7  ;;  %v2971_v46 = vmul.f32 %v4423_v27, %v2968_v7  ;;  %v2972_v48 = vmul.f32 %v4424_v56, %v2968_v7 }
 0x183   : > { %v2945_v42 = vadd.f32 %v2941_v1, %v2887_v49  ;;  %v2996_v53 = vmul.f32 %v4428_v57, %v2992_v3  ;;  %v3026_v54 = vrot.slane %v3022_v5, %v5732_v13  ;;  %v2946_v23 = vadd.f32 %v2942_v6, %v2888_v44  ;;  %v4439_v6 = vld [vmem:[%s5740_s21 + $0x210] sm:$0xff] }
 0x184   : > { %v2981_v55 = vsub.f32 %v2969_v28, %v2977_v16  ;;  %v2982_v32 = vsub.f32 %v2970_v37, %v2978_v60  ;;  %v2983_v34 = vsub.f32 %v2971_v46, %v2979_v17  ;;  %v2984_v39 = vsub.f32 %v2972_v48, %v2980_v10  ;;  %v3063_v57 = vld [vmem:[%s5725_s19 + $0x11] sm:$0x1]  ;;  %v4449_v10 = vld [vmem:[%s5740_s21 + $0x220] sm:$0xff] }
 0x185   : > { %v3035_v24 = vmul.f32 %v4441_v29, %v3034_v12  ;;  %v3036_v38 = vmul.f32 %v4442_v40, %v3034_v12  ;;  %v3050_v35 = vrot.slane %v3005_v52, %v5732_v13  ;;  %v2997_v25 = vadd.f32 %v2993_v18, %v2969_v28  ;;  %v3121_v18 = vld [vmem:[%s5725_s19 + $0x12] sm:$0x1]  ;;  %v4454_v29 = vld [vmem:[%s5743_s20 + $0x228] sm:$0xff] }
 0x186   : > { %v2998_v47 = vadd.f32 %v2994_v19, %v2970_v37  ;;  %v2999_v41 = vadd.f32 %v2995_v30, %v2971_v46  ;;  %v3000_v49 = vadd.f32 %v2996_v53, %v2972_v48  ;;  %v2985_v1 = vadd.f32 %v2981_v55, %v2927_v51  ;;  %v3122_v19 = vld [vmem:[%s5729_s0 + $0x12] sm:$0x1]  ;;  %v4445_v46 = vld [vmem:[%s5734_s23 + $0x220] sm:$0xff]  ;;  %v4450_v53 = vld [vmem:[%s5740_s21 + $0x228] sm:$0xff] }
 0x187   : > { %v2986_v14 = vadd.f32 %v2982_v32, %v2928_v63  ;;  %v2987_v15 = vadd.f32 %v2983_v34, %v2929_v2  ;;  %v2988_v44 = vadd.f32 %v2984_v39, %v2930_v11  ;;  %v3027_v9 = vmul.f32 %v4433_v58, %v3026_v54  ;;  %v4453_v48 = vld [vmem:[%s5743_s20 + $0x220] sm:$0xff]  ;;  %v4455_v40 = vld [vmem:[%s5743_s20 + $0x230] sm:$0xff]  ;;  %v4456_v55 = vld [vmem:[%s5743_s20 + $0x238] sm:$0xff] }
 0x188   : > { %v3028_v20 = vmul.f32 %v4434_v61, %v3026_v54  ;;  %v3029_v21 = vmul.f32 %v4435_v33, %v3026_v54  ;;  %v3030_v22 = vmul.f32 %v4436_v36, %v3026_v54  ;;  %v3037_v52 = vmul.f32 %v4443_v45, %v3034_v12  ;;  %v4451_v54 = vld [vmem:[%s5740_s21 + $0x230] sm:$0xff]  ;;  %v4446_v58 = vld [vmem:[%s5734_s23 + $0x228] sm:$0xff] }
 0x189   : > { %v3038_v0 = vmul.f32 %v4444_v59, %v3034_v12  ;;  %v3051_v4 = vmul.f32 %v4437_v43, %v3050_v35  ;;  %v3052_v26 = vmul.f32 %v4438_v50, %v3050_v35  ;;  %v3039_v27 = vsub.f32 %v3027_v9, %v3035_v24  ;;  %v3064_v12 = vld [vmem:[%s5729_s0 + $0x11] sm:$0x1]  ;;  %v4452_v24 = vld [vmem:[%s5740_s21 + $0x238] sm:$0xff] }
 0x18a   : > { %v3040_v51 = vsub.f32 %v3028_v20, %v3036_v38  ;;  %v3053_v63 = vmul.f32 %v4439_v6, %v3050_v35  ;;  %v3054_v2 = vmul.f32 %v4440_v62, %v3050_v35  ;;  %v3001_v11 = vadd.f32 %v2997_v25, %v6055_v8  ;;  %v4447_v61 = vld [vmem:[%s5734_s23 + $0x230] sm:$0xff]  ;;  %v4466_v6 = vld [vmem:[%s5743_s20 + $0x248] sm:$0xff] }
 0x18b   : > { %v3041_v56 = vsub.f32 %v3029_v21, %v3037_v52  ;;  %v3042_v3 = vsub.f32 %v3030_v22, %v3038_v0  ;;  %v3055_v5 = vadd.f32 %v3051_v4, %v3027_v9  ;;  %v3002_v7 = vadd.f32 %v2998_v47, %v2944_v31 }
 0x18c   : > { %v3003_v16 = vadd.f32 %v2999_v41, %v2945_v42  ;;  %v3004_v60 = vadd.f32 %v3000_v49, %v2946_v23  ;;  %v3056_v17 = vadd.f32 %v3052_v26, %v3028_v20  ;;  %v3043_v8 = vadd.f32 %v3039_v27, %v2985_v1  ;;  %v4448_v23 = vld [vmem:[%s5734_s23 + $0x238] sm:$0xff]  ;;  %v4457_v26 = vld [vmem:[%s5734_s23 + $0x240] sm:$0xff]  ;;  %v4458_v27 = vld [vmem:[%s5734_s23 + $0x248] sm:$0xff] }
 0x18d   : > { %v3044_v30 = vadd.f32 %v3040_v51, %v2986_v14  ;;  %v3057_v28 = vadd.f32 %v3053_v63, %v3029_v21  ;;  %v3058_v37 = vadd.f32 %v3054_v2, %v3030_v22  ;;  %v3045_v31 = vadd.f32 %v3041_v56, %v2987_v15  ;;  %v4459_v63 = vld [vmem:[%s5734_s23 + $0x250] sm:$0xff]  ;;  %v4460_v2 = vld [vmem:[%s5734_s23 + $0x258] sm:$0xff] }
 0x18e   : > { %v3046_v42 = vadd.f32 %v3042_v3, %v2988_v44  ;;  %v3080_v32 = vadd.f32 %v3064_v12, %v3063_v57  ;;  %v3092_v34 = vrot.slane %v3064_v12, %v5732_v13  ;;  %v6092_v39 = vadd.f32 %v3055_v5, %v3001_v11  ;;  %v4465_v44 = vld [vmem:[%s5743_s20 + $0x240] sm:$0xff] }
 0x18f   : > { %v3108_v33 = vrot.slane %v3063_v57, %v5732_v13  ;;  %v3138_v36 = vadd.f32 %v3122_v19, %v3121_v18  ;;  %v3150_v43 = vrot.slane %v3122_v19, %v5732_v13  ;;  %v3060_v62 = vadd.f32 %v3056_v17, %v3002_v7  ;;  %v4461_v11 = vld [vmem:[%s5740_s21 + $0x240] sm:$0xff]  ;;  %v4462_v17 = vld [vmem:[%s5740_s21 + $0x248] sm:$0xff]  ;;  %v4468_v19 = vld [vmem:[%s5743_s20 + $0x258] sm:$0xff] }
 0x190   : > { %v3084_v38 = vrot.slane %v3080_v32, %v5732_v13  ;;  %v3093_v35 = vmul.f32 %v4453_v48, %v3092_v34  ;;  %v3094_v25 = vmul.f32 %v4454_v29, %v3092_v34  ;;  %v3095_v47 = vmul.f32 %v4455_v40, %v3092_v34  ;;  %v4464_v29 = vld [vmem:[%s5740_s21 + $0x258] sm:$0xff] }
 0x191   : > { %v3096_v41 = vmul.f32 %v4456_v55, %v3092_v34  ;;  %v3109_v49 = vmul.f32 %v4449_v10, %v3108_v33  ;;  %v3110_v50 = vmul.f32 %v4450_v53, %v3108_v33  ;;  %v3111_v45 = vmul.f32 %v4451_v54, %v3108_v33  ;;  %v4467_v10 = vld [vmem:[%s5743_s20 + $0x250] sm:$0xff] }
 0x192   : > { %v3085_v59 = vmul.f32 %v4445_v46, %v3084_v38  ;;  %v3086_v1 = vmul.f32 %v4446_v58, %v3084_v38  ;;  %v3087_v14 = vmul.f32 %v4447_v61, %v3084_v38  ;;  %v3088_v15 = vmul.f32 %v4448_v23, %v3084_v38 }
 0x193   : > { %v3061_v9 = vadd.f32 %v3057_v28, %v3003_v16  ;;  %v3112_v20 = vmul.f32 %v4452_v24, %v3108_v33  ;;  %v3142_v21 = vrot.slane %v3138_v36, %v5732_v13  ;;  %v3062_v51 = vadd.f32 %v3058_v37, %v3004_v60  ;;  %v4463_v37 = vld [vmem:[%s5740_s21 + $0x250] sm:$0xff] }
 0x194   : > { %v3097_v22 = vsub.f32 %v3085_v59, %v3093_v35  ;;  %v3098_v52 = vsub.f32 %v3086_v1, %v3094_v25  ;;  %v3099_v0 = vsub.f32 %v3087_v14, %v3095_v47  ;;  %v3100_v4 = vsub.f32 %v3088_v15, %v3096_v41  ;;  %v3179_v24 = vld [vmem:[%s5725_s19 + $0x13] sm:$0x1]  ;;  %v4473_v41 = vld [vmem:[%s5740_s21 + $0x260] sm:$0xff] }
 0x195   : > { %v3151_v56 = vmul.f32 %v4465_v44, %v3150_v43  ;;  %v3152_v3 = vmul.f32 %v4466_v6, %v3150_v43  ;;  %v3166_v5 = vrot.slane %v3121_v18, %v5732_v13  ;;  %v3113_v57 = vadd.f32 %v3109_v49, %v3085_v59  ;;  %v3237_v49 = vld [vmem:[%s5725_s19 + $0x14] sm:$0x1]  ;;  %v4478_v44 = vld [vmem:[%s5743_s20 + $0x268] sm:$0xff] }
 0x196   : > { %v3114_v12 = vadd.f32 %v3110_v50, %v3086_v1  ;;  %v3115_v7 = vadd.f32 %v3111_v45, %v3087_v14  ;;  %v3116_v16 = vadd.f32 %v3112_v20, %v3088_v15  ;;  %v3101_v28 = vadd.f32 %v3097_v22, %v3043_v8  ;;  %v3238_v50 = vld [vmem:[%s5729_s0 + $0x14] sm:$0x1]  ;;  %v4469_v14 = vld [vmem:[%s5734_s23 + $0x260] sm:$0xff]  ;;  %v4474_v20 = vld [vmem:[%s5740_s21 + $0x268] sm:$0xff] }
 0x197   : > { %v3102_v46 = vadd.f32 %v3098_v52, %v3044_v30  ;;  %v3103_v48 = vadd.f32 %v3099_v0, %v3045_v31  ;;  %v3104_v60 = vadd.f32 %v3100_v4, %v3046_v42  ;;  %v3143_v40 = vmul.f32 %v4457_v26, %v3142_v21  ;;  %v4477_v15 = vld [vmem:[%s5743_s20 + $0x260] sm:$0xff]  ;;  %v4479_v6 = vld [vmem:[%s5743_s20 + $0x270] sm:$0xff]  ;;  %v4480_v22 = vld [vmem:[%s5743_s20 + $0x278] sm:$0xff] }
 0x198   : > { %v3144_v53 = vmul.f32 %v4458_v27, %v3142_v21  ;;  %v3145_v54 = vmul.f32 %v4459_v63, %v3142_v21  ;;  %v3146_v55 = vmul.f32 %v4460_v2, %v3142_v21  ;;  %v3153_v18 = vmul.f32 %v4467_v10, %v3150_v43  ;;  %v4475_v21 = vld [vmem:[%s5740_s21 + $0x270] sm:$0xff]  ;;  %v4470_v26 = vld [vmem:[%s5734_s23 + $0x268] sm:$0xff] }
 0x199   : > { %v3154_v32 = vmul.f32 %v4468_v19, %v3150_v43  ;;  %v3167_v34 = vmul.f32 %v4461_v11, %v3166_v5  ;;  %v3168_v58 = vmul.f32 %v4462_v17, %v3166_v5  ;;  %v3155_v61 = vsub.f32 %v3143_v40, %v3151_v56  ;;  %v3180_v43 = vld [vmem:[%s5729_s0 + $0x13] sm:$0x1]  ;;  %v4476_v56 = vld [vmem:[%s5740_s21 + $0x278] sm:$0xff] }
 0x19a   : > { %v3156_v8 = vsub.f32 %v3144_v53, %v3152_v3  ;;  %v3169_v30 = vmul.f32 %v4463_v37, %v3166_v5  ;;  %v3170_v31 = vmul.f32 %v4464_v29, %v3166_v5  ;;  %v3117_v42 = vadd.f32 %v3113_v57, %v6092_v39  ;;  %v4471_v27 = vld [vmem:[%s5734_s23 + $0x270] sm:$0xff]  ;;  %v4490_v37 = vld [vmem:[%s5743_s20 + $0x288] sm:$0xff] }
 0x19b   : > { %v3157_v23 = vsub.f32 %v3145_v54, %v3153_v18  ;;  %v3158_v33 = vsub.f32 %v3146_v55, %v3154_v32  ;;  %v3171_v36 = vadd.f32 %v3167_v34, %v3143_v40  ;;  %v3118_v38 = vadd.f32 %v3114_v12, %v3060_v62 }
 0x19c   : > { %v3119_v35 = vadd.f32 %v3115_v7, %v3061_v9  ;;  %v3120_v25 = vadd.f32 %v3116_v16, %v3062_v51  ;;  %v3172_v47 = vadd.f32 %v3168_v58, %v3144_v53  ;;  %v3159_v39 = vadd.f32 %v3155_v61, %v3101_v28  ;;  %v4472_v51 = vld [vmem:[%s5734_s23 + $0x278] sm:$0xff]  ;;  %v4481_v58 = vld [vmem:[%s5734_s23 + $0x280] sm:$0xff]  ;;  %v4482_v61 = vld [vmem:[%s5734_s23 + $0x288] sm:$0xff] }
 0x19d   : > { %v3160_v45 = vadd.f32 %v3156_v8, %v3102_v46  ;;  %v3173_v59 = vadd.f32 %v3169_v30, %v3145_v54  ;;  %v3174_v1 = vadd.f32 %v3170_v31, %v3146_v55  ;;  %v3161_v62 = vadd.f32 %v3157_v23, %v3103_v48  ;;  %v4483_v30 = vld [vmem:[%s5734_s23 + $0x290] sm:$0xff]  ;;  %v4484_v31 = vld [vmem:[%s5734_s23 + $0x298] sm:$0xff] }
 0x19e   : > { %v3162_v9 = vadd.f32 %v3158_v33, %v3104_v60  ;;  %v3196_v52 = vadd.f32 %v3180_v43, %v3179_v24  ;;  %v3208_v0 = vrot.slane %v3180_v43, %v5732_v13  ;;  %v6129_v4 = vadd.f32 %v3171_v36, %v3117_v42  ;;  %v4489_v60 = vld [vmem:[%s5743_s20 + $0x280] sm:$0xff] }
 0x19f   : > { %v3224_v63 = vrot.slane %v3179_v24, %v5732_v13  ;;  %v3254_v2 = vadd.f32 %v3238_v50, %v3237_v49  ;;  %v3266_v11 = vrot.slane %v3238_v50, %v5732_v13  ;;  %v3176_v29 = vadd.f32 %v3172_v47, %v3118_v38  ;;  %v4485_v42 = vld [vmem:[%s5740_s21 + $0x280] sm:$0xff]  ;;  %v4486_v47 = vld [vmem:[%s5740_s21 + $0x288] sm:$0xff]  ;;  %v4492_v50 = vld [vmem:[%s5743_s20 + $0x298] sm:$0xff] }
 0x1a0   : > { %v3200_v3 = vrot.slane %v3196_v52, %v5732_v13  ;;  %v3209_v5 = vmul.f32 %v4477_v15, %v3208_v0  ;;  %v3210_v57 = vmul.f32 %v4478_v44, %v3208_v0  ;;  %v3211_v12 = vmul.f32 %v4479_v6, %v3208_v0  ;;  %v4488_v44 = vld [vmem:[%s5740_s21 + $0x298] sm:$0xff] }
 0x1a1   : > { %v3212_v7 = vmul.f32 %v4480_v22, %v3208_v0  ;;  %v3225_v16 = vmul.f32 %v4473_v41, %v3224_v63  ;;  %v3226_v17 = vmul.f32 %v4474_v20, %v3224_v63  ;;  %v3227_v10 = vmul.f32 %v4475_v21, %v3224_v63  ;;  %v4491_v41 = vld [vmem:[%s5743_s20 + $0x290] sm:$0xff] }
 0x1a2   : > { %v3201_v19 = vmul.f32 %v4469_v14, %v3200_v3  ;;  %v3202_v28 = vmul.f32 %v4470_v26, %v3200_v3  ;;  %v3203_v46 = vmul.f32 %v4471_v27, %v3200_v3  ;;  %v3204_v48 = vmul.f32 %v4472_v51, %v3200_v3 }
 0x1a3   : > { %v3177_v40 = vadd.f32 %v3173_v59, %v3119_v35  ;;  %v3228_v53 = vmul.f32 %v4476_v56, %v3224_v63  ;;  %v3258_v54 = vrot.slane %v3254_v2, %v5732_v13  ;;  %v3178_v8 = vadd.f32 %v3174_v1, %v3120_v25  ;;  %v4487_v1 = vld [vmem:[%s5740_s21 + $0x290] sm:$0xff] }
 0x1a4   : > { %v3213_v55 = vsub.f32 %v3201_v19, %v3209_v5  ;;  %v3214_v18 = vsub.f32 %v3202_v28, %v3210_v57  ;;  %v3215_v32 = vsub.f32 %v3203_v46, %v3211_v12  ;;  %v3216_v34 = vsub.f32 %v3204_v48, %v3212_v7  ;;  %v3295_v56 = vld [vmem:[%s5725_s19 + $0x15] sm:$0x1]  ;;  %v4497_v7 = vld [vmem:[%s5740_s21 + $0x2a0] sm:$0xff] }
 0x1a5   : > { %v3267_v23 = vmul.f32 %v4489_v60, %v3266_v11  ;;  %v3268_v33 = vmul.f32 %v4490_v37, %v3266_v11  ;;  %v3282_v36 = vrot.slane %v3237_v49, %v5732_v13  ;;  %v3229_v24 = vadd.f32 %v3225_v16, %v3201_v19  ;;  %v3353_v16 = vld [vmem:[%s5725_s19 + $0x16] sm:$0x1]  ;;  %v4502_v60 = vld [vmem:[%s5743_s20 + $0x2a8] sm:$0xff] }
 0x1a6   : > { %v3230_v43 = vadd.f32 %v3226_v17, %v3202_v28  ;;  %v3231_v38 = vadd.f32 %v3227_v10, %v3203_v46  ;;  %v3232_v35 = vadd.f32 %v3228_v53, %v3204_v48  ;;  %v3217_v59 = vadd.f32 %v3213_v55, %v3159_v39  ;;  %v3354_v17 = vld [vmem:[%s5729_s0 + $0x16] sm:$0x1]  ;;  %v4493_v46 = vld [vmem:[%s5734_s23 + $0x2a0] sm:$0xff]  ;;  %v4498_v53 = vld [vmem:[%s5740_s21 + $0x2a8] sm:$0xff] }
 0x1a7   : > { %v3218_v14 = vadd.f32 %v3214_v18, %v3160_v45  ;;  %v3219_v15 = vadd.f32 %v3215_v32, %v3161_v62  ;;  %v3220_v25 = vadd.f32 %v3216_v34, %v3162_v9  ;;  %v3259_v6 = vmul.f32 %v4481_v58, %v3258_v54  ;;  %v4501_v48 = vld [vmem:[%s5743_s20 + $0x2a0] sm:$0xff]  ;;  %v4503_v37 = vld [vmem:[%s5743_s20 + $0x2b0] sm:$0xff]  ;;  %v4504_v55 = vld [vmem:[%s5743_s20 + $0x2b8] sm:$0xff] }
 0x1a8   : > { %v3260_v20 = vmul.f32 %v4482_v61, %v3258_v54  ;;  %v3261_v21 = vmul.f32 %v4483_v30, %v3258_v54  ;;  %v3262_v22 = vmul.f32 %v4484_v31, %v3258_v54  ;;  %v3269_v49 = vmul.f32 %v4491_v41, %v3266_v11  ;;  %v4499_v54 = vld [vmem:[%s5740_s21 + $0x2b0] sm:$0xff]  ;;  %v4494_v58 = vld [vmem:[%s5734_s23 + $0x2a8] sm:$0xff] }
 0x1a9   : > { %v3270_v52 = vmul.f32 %v4492_v50, %v3266_v11  ;;  %v3283_v0 = vmul.f32 %v4485_v42, %v3282_v36  ;;  %v3284_v26 = vmul.f32 %v4486_v47, %v3282_v36  ;;  %v3271_v27 = vsub.f32 %v3259_v6, %v3267_v23  ;;  %v3296_v11 = vld [vmem:[%s5729_s0 + $0x15] sm:$0x1]  ;;  %v4500_v23 = vld [vmem:[%s5740_s21 + $0x2b8] sm:$0xff] }
 0x1aa   : > { %v3272_v39 = vsub.f32 %v3260_v20, %v3268_v33  ;;  %v3285_v45 = vmul.f32 %v4487_v1, %v3282_v36  ;;  %v3286_v62 = vmul.f32 %v4488_v44, %v3282_v36  ;;  %v3233_v9 = vadd.f32 %v3229_v24, %v6129_v4  ;;  %v4495_v61 = vld [vmem:[%s5734_s23 + $0x2b0] sm:$0xff]  ;;  %v4514_v1 = vld [vmem:[%s5743_s20 + $0x2c8] sm:$0xff] }
 0x1ab   : > { %v3273_v51 = vsub.f32 %v3261_v21, %v3269_v49  ;;  %v3274_v63 = vsub.f32 %v3262_v22, %v3270_v52  ;;  %v3287_v2 = vadd.f32 %v3283_v0, %v3259_v6  ;;  %v3234_v3 = vadd.f32 %v3230_v43, %v3176_v29 }
 0x1ac   : > { %v3235_v5 = vadd.f32 %v3231_v38, %v3177_v40  ;;  %v3236_v57 = vadd.f32 %v3232_v35, %v3178_v8  ;;  %v3288_v12 = vadd.f32 %v3284_v26, %v3260_v20  ;;  %v3275_v4 = vadd.f32 %v3271_v27, %v3217_v59  ;;  %v4496_v8 = vld [vmem:[%s5734_s23 + $0x2b8] sm:$0xff]  ;;  %v4505_v26 = vld [vmem:[%s5734_s23 + $0x2c0] sm:$0xff]  ;;  %v4506_v27 = vld [vmem:[%s5734_s23 + $0x2c8] sm:$0xff] }
 0x1ad   : > { %v3276_v10 = vadd.f32 %v3272_v39, %v3218_v14  ;;  %v3289_v19 = vadd.f32 %v3285_v45, %v3261_v21  ;;  %v3290_v28 = vadd.f32 %v3286_v62, %v3262_v22  ;;  %v3277_v29 = vadd.f32 %v3273_v51, %v3219_v15  ;;  %v4507_v45 = vld [vmem:[%s5734_s23 + $0x2d0] sm:$0xff]  ;;  %v4508_v62 = vld [vmem:[%s5734_s23 + $0x2d8] sm:$0xff] }
 0x1ae   : > { %v3278_v40 = vadd.f32 %v3274_v63, %v3220_v25  ;;  %v3312_v18 = vadd.f32 %v3296_v11, %v3295_v56  ;;  %v3324_v32 = vrot.slane %v3296_v11, %v5732_v13  ;;  %v6166_v34 = vadd.f32 %v3287_v2, %v3233_v9  ;;  %v4513_v25 = vld [vmem:[%s5743_s20 + $0x2c0] sm:$0xff] }
 0x1af   : > { %v3340_v30 = vrot.slane %v3295_v56, %v5732_v13  ;;  %v3370_v31 = vadd.f32 %v3354_v17, %v3353_v16  ;;  %v3382_v42 = vrot.slane %v3354_v17, %v5732_v13  ;;  %v3292_v44 = vadd.f32 %v3288_v12, %v3234_v3  ;;  %v4509_v9 = vld [vmem:[%s5740_s21 + $0x2c0] sm:$0xff]  ;;  %v4510_v12 = vld [vmem:[%s5740_s21 + $0x2c8] sm:$0xff]  ;;  %v4516_v17 = vld [vmem:[%s5743_s20 + $0x2d8] sm:$0xff] }
 0x1b0   : > { %v3316_v33 = vrot.slane %v3312_v18, %v5732_v13  ;;  %v3325_v36 = vmul.f32 %v4501_v48, %v3324_v32  ;;  %v3326_v24 = vmul.f32 %v4502_v60, %v3324_v32  ;;  %v3327_v43 = vmul.f32 %v4503_v37, %v3324_v32  ;;  %v4512_v60 = vld [vmem:[%s5740_s21 + $0x2d8] sm:$0xff] }
 0x1b1   : > { %v3328_v38 = vmul.f32 %v4504_v55, %v3324_v32  ;;  %v3341_v35 = vmul.f32 %v4497_v7, %v3340_v30  ;;  %v3342_v47 = vmul.f32 %v4498_v53, %v3340_v30  ;;  %v3343_v41 = vmul.f32 %v4499_v54, %v3340_v30  ;;  %v4515_v7 = vld [vmem:[%s5743_s20 + $0x2d0] sm:$0xff] }
 0x1b2   : > { %v3317_v50 = vmul.f32 %v4493_v46, %v3316_v33  ;;  %v3318_v59 = vmul.f32 %v4494_v58, %v3316_v33  ;;  %v3319_v14 = vmul.f32 %v4495_v61, %v3316_v33  ;;  %v3320_v15 = vmul.f32 %v4496_v8, %v3316_v33 }
 0x1b3   : > { %v3293_v6 = vadd.f32 %v3289_v19, %v3235_v5  ;;  %v3344_v20 = vmul.f32 %v4500_v23, %v3340_v30  ;;  %v3374_v21 = vrot.slane %v3370_v31, %v5732_v13  ;;  %v3294_v39 = vadd.f32 %v3290_v28, %v3236_v57  ;;  %v4511_v28 = vld [vmem:[%s5740_s21 + $0x2d0] sm:$0xff] }
 0x1b4   : > { %v3329_v22 = vsub.f32 %v3317_v50, %v3325_v36  ;;  %v3330_v49 = vsub.f32 %v3318_v59, %v3326_v24  ;;  %v3331_v52 = vsub.f32 %v3319_v14, %v3327_v43  ;;  %v3332_v0 = vsub.f32 %v3320_v15, %v3328_v38  ;;  %v3411_v23 = vld [vmem:[%s5725_s19 + $0x17] sm:$0x1]  ;;  %v4521_v38 = vld [vmem:[%s5740_s21 + $0x2e0] sm:$0xff] }
 0x1b5   : > { %v3383_v51 = vmul.f32 %v4513_v25, %v3382_v42  ;;  %v3384_v63 = vmul.f32 %v4514_v1, %v3382_v42  ;;  %v3398_v2 = vrot.slane %v3353_v16, %v5732_v13  ;;  %v3345_v56 = vadd.f32 %v3341_v35, %v3317_v50  ;;  %v3469_v35 = vld [vmem:[%s5725_s19 + $0x18] sm:$0x1]  ;;  %v4526_v25 = vld [vmem:[%s5743_s20 + $0x2e8] sm:$0xff]  ;;  %v4527_v1 = vld [vmem:[%s5743_s20 + $0x2f0] sm:$0xff] }
 0x1b6   : > { %v3346_v11 = vadd.f32 %v3342_v47, %v3318_v59  ;;  %v3347_v3 = vadd.f32 %v3343_v41, %v3319_v14  ;;  %v3348_v5 = vadd.f32 %v3344_v20, %v3320_v15  ;;  %v3333_v19 = vadd.f32 %v3329_v22, %v3275_v4  ;;  %v3470_v47 = vld [vmem:[%s5729_s0 + $0x18] sm:$0x1]  ;;  %v4517_v14 = vld [vmem:[%s5734_s23 + $0x2e0] sm:$0xff]  ;;  %v4522_v20 = vld [vmem:[%s5740_s21 + $0x2e8] sm:$0xff] }
 0x1b7   : > { %v3334_v46 = vadd.f32 %v3330_v49, %v3276_v10  ;;  %v3335_v48 = vadd.f32 %v3331_v52, %v3277_v29  ;;  %v3336_v57 = vadd.f32 %v3332_v0, %v3278_v40  ;;  %v3375_v37 = vmul.f32 %v4505_v26, %v3374_v21  ;;  %v4525_v15 = vld [vmem:[%s5743_s20 + $0x2e0] sm:$0xff]  ;;  %v4528_v22 = vld [vmem:[%s5743_s20 + $0x2f8] sm:$0xff]  ;;  %v4518_v26 = vld [vmem:[%s5734_s23 + $0x2e8] sm:$0xff] }
 0x1b8   : > { %v3376_v53 = vmul.f32 %v4506_v27, %v3374_v21  ;;  %v3377_v54 = vmul.f32 %v4507_v45, %v3374_v21  ;;  %v3378_v55 = vmul.f32 %v4508_v62, %v3374_v21  ;;  %v3385_v16 = vmul.f32 %v4515_v7, %v3382_v42  ;;  %v4523_v21 = vld [vmem:[%s5740_s21 + $0x2f0] sm:$0xff] }
 0x1b9   : > { %v3386_v18 = vmul.f32 %v4516_v17, %v3382_v42  ;;  %v3399_v32 = vmul.f32 %v4509_v9, %v3398_v2  ;;  %v3400_v58 = vmul.f32 %v4510_v12, %v3398_v2  ;;  %v3387_v61 = vsub.f32 %v3375_v37, %v3383_v51  ;;  %v3412_v42 = vld [vmem:[%s5729_s0 + $0x17] sm:$0x1]  ;;  %v4524_v51 = vld [vmem:[%s5740_s21 + $0x2f8] sm:$0xff] }
 0x1ba   : > { %v3388_v4 = vsub.f32 %v3376_v53, %v3384_v63  ;;  %v3401_v10 = vmul.f32 %v4511_v28, %v3398_v2  ;;  %v3402_v29 = vmul.f32 %v4512_v60, %v3398_v2  ;;  %v3349_v40 = vadd.f32 %v3345_v56, %v6166_v34  ;;  %v4519_v27 = vld [vmem:[%s5734_s23 + $0x2f0] sm:$0xff]  ;;  %v4538_v28 = vld [vmem:[%s5743_s20 + $0x308] sm:$0xff] }
 0x1bb   : > { %v3389_v8 = vsub.f32 %v3377_v54, %v3385_v16  ;;  %v3390_v30 = vsub.f32 %v3378_v55, %v3386_v18  ;;  %v3403_v31 = vadd.f32 %v3399_v32, %v3375_v37  ;;  %v3350_v33 = vadd.f32 %v3346_v11, %v3292_v44 }
 0x1bc   : > { %v3351_v36 = vadd.f32 %v3347_v3, %v3293_v6  ;;  %v3352_v24 = vadd.f32 %v3348_v5, %v3294_v39  ;;  %v3404_v43 = vadd.f32 %v3400_v58, %v3376_v53  ;;  %v3391_v34 = vadd.f32 %v3387_v61, %v3333_v19  ;;  %v4520_v39 = vld [vmem:[%s5734_s23 + $0x2f8] sm:$0xff]  ;;  %v4529_v58 = vld [vmem:[%s5734_s23 + $0x300] sm:$0xff]  ;;  %v4530_v61 = vld [vmem:[%s5734_s23 + $0x308] sm:$0xff] }
 0x1bd   : > { %v3392_v41 = vadd.f32 %v3388_v4, %v3334_v46  ;;  %v3405_v50 = vadd.f32 %v3401_v10, %v3377_v54  ;;  %v3406_v59 = vadd.f32 %v3402_v29, %v3378_v55  ;;  %v3393_v44 = vadd.f32 %v3389_v8, %v3335_v48  ;;  %v4531_v10 = vld [vmem:[%s5734_s23 + $0x310] sm:$0xff]  ;;  %v4532_v29 = vld [vmem:[%s5734_s23 + $0x318] sm:$0xff] }
 0x1be   : > { %v3394_v6 = vadd.f32 %v3390_v30, %v3336_v57  ;;  %v3428_v49 = vadd.f32 %v3412_v42, %v3411_v23  ;;  %v3440_v52 = vrot.slane %v3412_v42, %v5732_v13  ;;  %v6203_v0 = vadd.f32 %v3403_v31, %v3349_v40  ;;  %v4537_v57 = vld [vmem:[%s5743_s20 + $0x300] sm:$0xff] }
 0x1bf   : > { %v3456_v45 = vrot.slane %v3411_v23, %v5732_v13  ;;  %v3486_v62 = vadd.f32 %v3470_v47, %v3469_v35  ;;  %v3498_v9 = vrot.slane %v3470_v47, %v5732_v13  ;;  %v3408_v60 = vadd.f32 %v3404_v43, %v3350_v33  ;;  %v4533_v40 = vld [vmem:[%s5740_s21 + $0x300] sm:$0xff]  ;;  %v4534_v43 = vld [vmem:[%s5740_s21 + $0x308] sm:$0xff]  ;;  %v4540_v47 = vld [vmem:[%s5743_s20 + $0x318] sm:$0xff] }
 0x1c0   : > { %v3432_v63 = vrot.slane %v3428_v49, %v5732_v13  ;;  %v3441_v2 = vmul.f32 %v4525_v15, %v3440_v52  ;;  %v3442_v56 = vmul.f32 %v4526_v25, %v3440_v52  ;;  %v3443_v11 = vmul.f32 %v4527_v1, %v3440_v52  ;;  %v4536_v25 = vld [vmem:[%s5740_s21 + $0x318] sm:$0xff] }
 0x1c1   : > { %v3444_v3 = vmul.f32 %v4528_v22, %v3440_v52  ;;  %v3457_v5 = vmul.f32 %v4521_v38, %v3456_v45  ;;  %v3458_v12 = vmul.f32 %v4522_v20, %v3456_v45  ;;  %v3459_v7 = vmul.f32 %v4523_v21, %v3456_v45  ;;  %v4539_v38 = vld [vmem:[%s5743_s20 + $0x310] sm:$0xff] }
 0x1c2   : > { %v3433_v17 = vmul.f32 %v4517_v14, %v3432_v63  ;;  %v3434_v19 = vmul.f32 %v4518_v26, %v3432_v63  ;;  %v3435_v46 = vmul.f32 %v4519_v27, %v3432_v63  ;;  %v3436_v48 = vmul.f32 %v4520_v39, %v3432_v63 }
 0x1c3   : > { %v3409_v37 = vadd.f32 %v3405_v50, %v3351_v36  ;;  %v3460_v53 = vmul.f32 %v4524_v51, %v3456_v45  ;;  %v3490_v54 = vrot.slane %v3486_v62, %v5732_v13  ;;  %v3410_v4 = vadd.f32 %v3406_v59, %v3352_v24  ;;  %v4535_v59 = vld [vmem:[%s5740_s21 + $0x310] sm:$0xff]  ;;  %v3527_v51 = vld [vmem:[%s5725_s19 + $0x19] sm:$0x1] }
 0x1c4   : > { %v3445_v55 = vsub.f32 %v3433_v17, %v3441_v2  ;;  %v3446_v16 = vsub.f32 %v3434_v19, %v3442_v56  ;;  %v3447_v18 = vsub.f32 %v3435_v46, %v3443_v11  ;;  %v3448_v32 = vsub.f32 %v3436_v48, %v3444_v3  ;;  %v4545_v3 = vld [vmem:[%s5740_s21 + $0x320] sm:$0xff] }
 0x1c5   : > { %v3499_v8 = vmul.f32 %v4537_v57, %v3498_v9  ;;  %v3500_v30 = vmul.f32 %v4538_v28, %v3498_v9  ;;  %v3514_v31 = vrot.slane %v3469_v35, %v5732_v13  ;;  %v3461_v23 = vadd.f32 %v3457_v5, %v3433_v17  ;;  %v3585_v5 = vld [vmem:[%s5725_s19 + $0x1a] sm:$0x1]  ;;  %v4550_v57 = vld [vmem:[%s5743_s20 + $0x328] sm:$0xff]  ;;  %v4551_v28 = vld [vmem:[%s5743_s20 + $0x330] sm:$0xff] }
 0x1c6   : > { %v3462_v42 = vadd.f32 %v3458_v12, %v3434_v19  ;;  %v3463_v33 = vadd.f32 %v3459_v7, %v3435_v46  ;;  %v3464_v36 = vadd.f32 %v3460_v53, %v3436_v48  ;;  %v3449_v50 = vadd.f32 %v3445_v55, %v3391_v34  ;;  %v3586_v12 = vld [vmem:[%s5729_s0 + $0x1a] sm:$0x1]  ;;  %v4541_v46 = vld [vmem:[%s5734_s23 + $0x320] sm:$0xff]  ;;  %v4546_v53 = vld [vmem:[%s5740_s21 + $0x328] sm:$0xff] }
 0x1c7   : > { %v3450_v14 = vadd.f32 %v3446_v16, %v3392_v41  ;;  %v3451_v15 = vadd.f32 %v3447_v18, %v3393_v44  ;;  %v3452_v24 = vadd.f32 %v3448_v32, %v3394_v6  ;;  %v3491_v1 = vmul.f32 %v4529_v58, %v3490_v54  ;;  %v4549_v48 = vld [vmem:[%s5743_s20 + $0x320] sm:$0xff]  ;;  %v4552_v55 = vld [vmem:[%s5743_s20 + $0x338] sm:$0xff]  ;;  %v4542_v58 = vld [vmem:[%s5734_s23 + $0x328] sm:$0xff] }
 0x1c8   : > { %v3492_v20 = vmul.f32 %v4530_v61, %v3490_v54  ;;  %v3493_v21 = vmul.f32 %v4531_v10, %v3490_v54  ;;  %v3494_v22 = vmul.f32 %v4532_v29, %v3490_v54  ;;  %v3501_v35 = vmul.f32 %v4539_v38, %v3498_v9  ;;  %v4547_v54 = vld [vmem:[%s5740_s21 + $0x330] sm:$0xff] }
 0x1c9   : > { %v3502_v49 = vmul.f32 %v4540_v47, %v3498_v9  ;;  %v3515_v52 = vmul.f32 %v4533_v40, %v3514_v31  ;;  %v3516_v26 = vmul.f32 %v4534_v43, %v3514_v31  ;;  %v3503_v27 = vsub.f32 %v3491_v1, %v3499_v8  ;;  %v3528_v9 = vld [vmem:[%s5729_s0 + $0x19] sm:$0x1]  ;;  %v4543_v61 = vld [vmem:[%s5734_s23 + $0x330] sm:$0xff] }
 0x1ca   : > { %v3504_v34 = vsub.f32 %v3492_v20, %v3500_v30  ;;  %v3517_v41 = vmul.f32 %v4535_v59, %v3514_v31  ;;  %v3518_v44 = vmul.f32 %v4536_v25, %v3514_v31  ;;  %v3465_v6 = vadd.f32 %v3461_v23, %v6203_v0  ;;  %v4548_v8 = vld [vmem:[%s5740_s21 + $0x338] sm:$0xff]  ;;  %v4562_v59 = vld [vmem:[%s5743_s20 + $0x348] sm:$0xff] }
 0x1cb   : > { %v3505_v39 = vsub.f32 %v3493_v21, %v3501_v35  ;;  %v3506_v45 = vsub.f32 %v3494_v22, %v3502_v49  ;;  %v3519_v62 = vadd.f32 %v3515_v52, %v3491_v1  ;;  %v3466_v63 = vadd.f32 %v3462_v42, %v3408_v60 }
 0x1cc   : > { %v3467_v2 = vadd.f32 %v3463_v33, %v3409_v37  ;;  %v3468_v56 = vadd.f32 %v3464_v36, %v3410_v4  ;;  %v3520_v11 = vadd.f32 %v3516_v26, %v3492_v20  ;;  %v3507_v0 = vadd.f32 %v3503_v27, %v3449_v50  ;;  %v4544_v4 = vld [vmem:[%s5734_s23 + $0x338] sm:$0xff]  ;;  %v4553_v26 = vld [vmem:[%s5734_s23 + $0x340] sm:$0xff]  ;;  %v4554_v27 = vld [vmem:[%s5734_s23 + $0x348] sm:$0xff] }
 0x1cd   : > { %v3508_v7 = vadd.f32 %v3504_v34, %v3450_v14  ;;  %v3521_v17 = vadd.f32 %v3517_v41, %v3493_v21  ;;  %v3522_v19 = vadd.f32 %v3518_v44, %v3494_v22  ;;  %v3509_v60 = vadd.f32 %v3505_v39, %v3451_v15  ;;  %v4555_v41 = vld [vmem:[%s5734_s23 + $0x350] sm:$0xff]  ;;  %v4556_v44 = vld [vmem:[%s5734_s23 + $0x358] sm:$0xff] }
 0x1ce   : > { %v3510_v37 = vadd.f32 %v3506_v45, %v3452_v24  ;;  %v3544_v16 = vadd.f32 %v3528_v9, %v3527_v51  ;;  %v3556_v18 = vrot.slane %v3528_v9, %v5732_v13  ;;  %v6240_v32 = vadd.f32 %v3519_v62, %v3465_v6  ;;  %v4561_v24 = vld [vmem:[%s5743_s20 + $0x340] sm:$0xff] }
 0x1cf   : > { %v3572_v10 = vrot.slane %v3527_v51, %v5732_v13  ;;  %v3602_v29 = vadd.f32 %v3586_v12, %v3585_v5  ;;  %v3614_v40 = vrot.slane %v3586_v12, %v5732_v13  ;;  %v3524_v25 = vadd.f32 %v3520_v11, %v3466_v63  ;;  %v4557_v6 = vld [vmem:[%s5740_s21 + $0x340] sm:$0xff]  ;;  %v4558_v11 = vld [vmem:[%s5740_s21 + $0x348] sm:$0xff]  ;;  %v4564_v12 = vld [vmem:[%s5743_s20 + $0x358] sm:$0xff] }
 0x1d0   : > { %v3548_v30 = vrot.slane %v3544_v16, %v5732_v13  ;;  %v3557_v31 = vmul.f32 %v4549_v48, %v3556_v18  ;;  %v3558_v23 = vmul.f32 %v4550_v57, %v3556_v18  ;;  %v3559_v42 = vmul.f32 %v4551_v28, %v3556_v18  ;;  %v4560_v57 = vld [vmem:[%s5740_s21 + $0x358] sm:$0xff] }
 0x1d1   : > { %v3560_v33 = vmul.f32 %v4552_v55, %v3556_v18  ;;  %v3573_v36 = vmul.f32 %v4545_v3, %v3572_v10  ;;  %v3574_v43 = vmul.f32 %v4546_v53, %v3572_v10  ;;  %v3575_v38 = vmul.f32 %v4547_v54, %v3572_v10  ;;  %v4563_v3 = vld [vmem:[%s5743_s20 + $0x350] sm:$0xff] }
 0x1d2   : > { %v3549_v47 = vmul.f32 %v4541_v46, %v3548_v30  ;;  %v3550_v50 = vmul.f32 %v4542_v58, %v3548_v30  ;;  %v3551_v14 = vmul.f32 %v4543_v61, %v3548_v30  ;;  %v3552_v15 = vmul.f32 %v4544_v4, %v3548_v30 }
 0x1d3   : > { %v3525_v1 = vadd.f32 %v3521_v17, %v3467_v2  ;;  %v3576_v20 = vmul.f32 %v4548_v8, %v3572_v10  ;;  %v3606_v21 = vrot.slane %v3602_v29, %v5732_v13  ;;  %v3526_v34 = vadd.f32 %v3522_v19, %v3468_v56  ;;  %v4559_v19 = vld [vmem:[%s5740_s21 + $0x350] sm:$0xff]  ;;  %v3643_v8 = vld [vmem:[%s5725_s19 + $0x1b] sm:$0x1] }
 0x1d4   : > { %v3561_v22 = vsub.f32 %v3549_v47, %v3557_v31  ;;  %v3562_v35 = vsub.f32 %v3550_v50, %v3558_v23  ;;  %v3563_v49 = vsub.f32 %v3551_v14, %v3559_v42  ;;  %v3564_v52 = vsub.f32 %v3552_v15, %v3560_v33  ;;  %v4569_v33 = vld [vmem:[%s5740_s21 + $0x360] sm:$0xff] }
 0x1d5   : > { %v3615_v39 = vmul.f32 %v4561_v24, %v3614_v40  ;;  %v3616_v45 = vmul.f32 %v4562_v59, %v3614_v40  ;;  %v3630_v62 = vrot.slane %v3585_v5, %v5732_v13  ;;  %v3577_v51 = vadd.f32 %v3573_v36, %v3549_v47  ;;  %v3701_v36 = vld [vmem:[%s5725_s19 + $0x1c] sm:$0x1]  ;;  %v4574_v24 = vld [vmem:[%s5743_s20 + $0x368] sm:$0xff]  ;;  %v4575_v59 = vld [vmem:[%s5743_s20 + $0x370] sm:$0xff] }
 0x1d6   : > { %v3578_v9 = vadd.f32 %v3574_v43, %v3550_v50  ;;  %v3579_v63 = vadd.f32 %v3575_v38, %v3551_v14  ;;  %v3580_v2 = vadd.f32 %v3576_v20, %v3552_v15  ;;  %v3565_v17 = vadd.f32 %v3561_v22, %v3507_v0  ;;  %v3702_v43 = vld [vmem:[%s5729_s0 + $0x1c] sm:$0x1]  ;;  %v4565_v14 = vld [vmem:[%s5734_s23 + $0x360] sm:$0xff]  ;;  %v4570_v20 = vld [vmem:[%s5740_s21 + $0x368] sm:$0xff] }
 0x1d7   : > { %v3566_v46 = vadd.f32 %v3562_v35, %v3508_v7  ;;  %v3567_v48 = vadd.f32 %v3563_v49, %v3509_v60  ;;  %v3568_v56 = vadd.f32 %v3564_v52, %v3510_v37  ;;  %v3607_v28 = vmul.f32 %v4553_v26, %v3606_v21  ;;  %v4573_v15 = vld [vmem:[%s5743_s20 + $0x360] sm:$0xff]  ;;  %v4576_v22 = vld [vmem:[%s5743_s20 + $0x378] sm:$0xff]  ;;  %v4566_v26 = vld [vmem:[%s5734_s23 + $0x368] sm:$0xff] }
 0x1d8   : > { %v3608_v53 = vmul.f32 %v4554_v27, %v3606_v21  ;;  %v3609_v54 = vmul.f32 %v4555_v41, %v3606_v21  ;;  %v3610_v55 = vmul.f32 %v4556_v44, %v3606_v21  ;;  %v3617_v5 = vmul.f32 %v4563_v3, %v3614_v40  ;;  %v4571_v21 = vld [vmem:[%s5740_s21 + $0x370] sm:$0xff] }
 0x1d9   : > { %v3618_v16 = vmul.f32 %v4564_v12, %v3614_v40  ;;  %v3631_v18 = vmul.f32 %v4557_v6, %v3630_v62  ;;  %v3632_v58 = vmul.f32 %v4558_v11, %v3630_v62  ;;  %v3619_v61 = vsub.f32 %v3607_v28, %v3615_v39  ;;  %v3644_v40 = vld [vmem:[%s5729_s0 + $0x1b] sm:$0x1]  ;;  %v4567_v27 = vld [vmem:[%s5734_s23 + $0x370] sm:$0xff] }
 0x1da   : > { %v3620_v0 = vsub.f32 %v3608_v53, %v3616_v45  ;;  %v3633_v7 = vmul.f32 %v4559_v19, %v3630_v62  ;;  %v3634_v60 = vmul.f32 %v4560_v57, %v3630_v62  ;;  %v3581_v37 = vadd.f32 %v3577_v51, %v6240_v32  ;;  %v4572_v39 = vld [vmem:[%s5740_s21 + $0x378] sm:$0xff]  ;;  %v4586_v19 = vld [vmem:[%s5743_s20 + $0x388] sm:$0xff] }
 0x1db   : > { %v3621_v4 = vsub.f32 %v3609_v54, %v3617_v5  ;;  %v3622_v10 = vsub.f32 %v3610_v55, %v3618_v16  ;;  %v3635_v29 = vadd.f32 %v3631_v18, %v3607_v28  ;;  %v3582_v30 = vadd.f32 %v3578_v9, %v3524_v25 }
 0x1dc   : > { %v3583_v31 = vadd.f32 %v3579_v63, %v3525_v1  ;;  %v3584_v23 = vadd.f32 %v3580_v2, %v3526_v34  ;;  %v3636_v42 = vadd.f32 %v3632_v58, %v3608_v53  ;;  %v3623_v32 = vadd.f32 %v3619_v61, %v3565_v17  ;;  %v4568_v34 = vld [vmem:[%s5734_s23 + $0x378] sm:$0xff]  ;;  %v4577_v58 = vld [vmem:[%s5734_s23 + $0x380] sm:$0xff]  ;;  %v4578_v61 = vld [vmem:[%s5734_s23 + $0x388] sm:$0xff] }
 0x1dd   : > { %v3624_v38 = vadd.f32 %v3620_v0, %v3566_v46  ;;  %v3637_v47 = vadd.f32 %v3633_v7, %v3609_v54  ;;  %v3638_v50 = vadd.f32 %v3634_v60, %v3610_v55  ;;  %v3625_v25 = vadd.f32 %v3621_v4, %v3567_v48  ;;  %v4579_v7 = vld [vmem:[%s5734_s23 + $0x390] sm:$0xff]  ;;  %v4580_v60 = vld [vmem:[%s5734_s23 + $0x398] sm:$0xff] }
 0x1de   : > { %v3626_v1 = vadd.f32 %v3622_v10, %v3568_v56  ;;  %v3660_v35 = vadd.f32 %v3644_v40, %v3643_v8  ;;  %v3672_v49 = vrot.slane %v3644_v40, %v5732_v13  ;;  %v6277_v52 = vadd.f32 %v3635_v29, %v3581_v37  ;;  %v4585_v56 = vld [vmem:[%s5743_s20 + $0x380] sm:$0xff] }
 0x1df   : > { %v3688_v41 = vrot.slane %v3643_v8, %v5732_v13  ;;  %v3718_v44 = vadd.f32 %v3702_v43, %v3701_v36  ;;  %v3730_v6 = vrot.slane %v3702_v43, %v5732_v13  ;;  %v3640_v57 = vadd.f32 %v3636_v42, %v3582_v30  ;;  %v4581_v37 = vld [vmem:[%s5740_s21 + $0x380] sm:$0xff]  ;;  %v4582_v42 = vld [vmem:[%s5740_s21 + $0x388] sm:$0xff]  ;;  %v4588_v43 = vld [vmem:[%s5743_s20 + $0x398] sm:$0xff] }
 0x1e0   : > { %v3664_v45 = vrot.slane %v3660_v35, %v5732_v13  ;;  %v3673_v62 = vmul.f32 %v4573_v15, %v3672_v49  ;;  %v3674_v51 = vmul.f32 %v4574_v24, %v3672_v49  ;;  %v3675_v9 = vmul.f32 %v4575_v59, %v3672_v49  ;;  %v4584_v24 = vld [vmem:[%s5740_s21 + $0x398] sm:$0xff] }
 0x1e1   : > { %v3676_v63 = vmul.f32 %v4576_v22, %v3672_v49  ;;  %v3689_v2 = vmul.f32 %v4569_v33, %v3688_v41  ;;  %v3690_v11 = vmul.f32 %v4570_v20, %v3688_v41  ;;  %v3691_v3 = vmul.f32 %v4571_v21, %v3688_v41  ;;  %v4587_v33 = vld [vmem:[%s5743_s20 + $0x390] sm:$0xff] }
 0x1e2   : > { %v3665_v12 = vmul.f32 %v4565_v14, %v3664_v45  ;;  %v3666_v17 = vmul.f32 %v4566_v26, %v3664_v45  ;;  %v3667_v46 = vmul.f32 %v4567_v27, %v3664_v45  ;;  %v3668_v48 = vmul.f32 %v4568_v34, %v3664_v45 }
 0x1e3   : > { %v3641_v28 = vadd.f32 %v3637_v47, %v3583_v31  ;;  %v3692_v53 = vmul.f32 %v4572_v39, %v3688_v41  ;;  %v3722_v54 = vrot.slane %v3718_v44, %v5732_v13  ;;  %v3642_v0 = vadd.f32 %v3638_v50, %v3584_v23  ;;  %v4583_v50 = vld [vmem:[%s5740_s21 + $0x390] sm:$0xff]  ;;  %v3759_v39 = vld [vmem:[%s5725_s19 + $0x1d] sm:$0x1] }
 0x1e4   : > { %v3677_v55 = vsub.f32 %v3665_v12, %v3673_v62  ;;  %v3678_v5 = vsub.f32 %v3666_v17, %v3674_v51  ;;  %v3679_v16 = vsub.f32 %v3667_v46, %v3675_v9  ;;  %v3680_v18 = vsub.f32 %v3668_v48, %v3676_v63  ;;  %v4593_v63 = vld [vmem:[%s5740_s21 + $0x3a0] sm:$0xff] }
 0x1e5   : > { %v3731_v4 = vmul.f32 %v4585_v56, %v3730_v6  ;;  %v3732_v10 = vmul.f32 %v4586_v19, %v3730_v6  ;;  %v3746_v29 = vrot.slane %v3701_v36, %v5732_v13  ;;  %v3693_v8 = vadd.f32 %v3689_v2, %v3665_v12  ;;  %v3817_v2 = vld [vmem:[%s5725_s19 + $0x1e] sm:$0x1]  ;;  %v4598_v56 = vld [vmem:[%s5743_s20 + $0x3a8] sm:$0xff]  ;;  %v4599_v19 = vld [vmem:[%s5743_s20 + $0x3b0] sm:$0xff] }
 0x1e6   : > { %v3694_v40 = vadd.f32 %v3690_v11, %v3666_v17  ;;  %v3695_v30 = vadd.f32 %v3691_v3, %v3667_v46  ;;  %v3696_v31 = vadd.f32 %v3692_v53, %v3668_v48  ;;  %v3681_v47 = vadd.f32 %v3677_v55, %v3623_v32  ;;  %v3818_v11 = vld [vmem:[%s5729_s0 + $0x1e] sm:$0x1]  ;;  %v4589_v46 = vld [vmem:[%s5734_s23 + $0x3a0] sm:$0xff]  ;;  %v4594_v53 = vld [vmem:[%s5740_s21 + $0x3a8] sm:$0xff] }
 0x1e7   : > { %v3682_v14 = vadd.f32 %v3678_v5, %v3624_v38  ;;  %v3683_v15 = vadd.f32 %v3679_v16, %v3625_v25  ;;  %v3684_v23 = vadd.f32 %v3680_v18, %v3626_v1  ;;  %v3723_v59 = vmul.f32 %v4577_v58, %v3722_v54  ;;  %v4597_v48 = vld [vmem:[%s5743_s20 + $0x3a0] sm:$0xff]  ;;  %v4600_v55 = vld [vmem:[%s5743_s20 + $0x3b8] sm:$0xff]  ;;  %v4590_v58 = vld [vmem:[%s5734_s23 + $0x3a8] sm:$0xff] }
 0x1e8   : > { %v3724_v20 = vmul.f32 %v4578_v61, %v3722_v54  ;;  %v3725_v21 = vmul.f32 %v4579_v7, %v3722_v54  ;;  %v3726_v22 = vmul.f32 %v4580_v60, %v3722_v54  ;;  %v3733_v36 = vmul.f32 %v4587_v33, %v3730_v6  ;;  %v4595_v54 = vld [vmem:[%s5740_s21 + $0x3b0] sm:$0xff] }
 0x1e9   : > { %v3734_v35 = vmul.f32 %v4588_v43, %v3730_v6  ;;  %v3747_v49 = vmul.f32 %v4581_v37, %v3746_v29  ;;  %v3748_v26 = vmul.f32 %v4582_v42, %v3746_v29  ;;  %v3735_v27 = vsub.f32 %v3723_v59, %v3731_v4  ;;  %v3760_v6 = vld [vmem:[%s5729_s0 + $0x1d] sm:$0x1]  ;;  %v4591_v61 = vld [vmem:[%s5734_s23 + $0x3b0] sm:$0xff] }
 0x1ea   : > { %v3736_v32 = vsub.f32 %v3724_v20, %v3732_v10  ;;  %v3749_v38 = vmul.f32 %v4583_v50, %v3746_v29  ;;  %v3750_v25 = vmul.f32 %v4584_v24, %v3746_v29  ;;  %v3697_v1 = vadd.f32 %v3693_v8, %v6277_v52  ;;  %v4596_v4 = vld [vmem:[%s5740_s21 + $0x3b8] sm:$0xff]  ;;  %v4610_v50 = vld [vmem:[%s5743_s20 + $0x3c8] sm:$0xff] }
 0x1eb   : > { %v3737_v34 = vsub.f32 %v3725_v21, %v3733_v36  ;;  %v3738_v41 = vsub.f32 %v3726_v22, %v3734_v35  ;;  %v3751_v44 = vadd.f32 %v3747_v49, %v3723_v59  ;;  %v3698_v45 = vadd.f32 %v3694_v40, %v3640_v57 }
 0x1ec   : > { %v3699_v62 = vadd.f32 %v3695_v30, %v3641_v28  ;;  %v3700_v51 = vadd.f32 %v3696_v31, %v3642_v0  ;;  %v3752_v9 = vadd.f32 %v3748_v26, %v3724_v20  ;;  %v3739_v52 = vadd.f32 %v3735_v27, %v3681_v47  ;;  %v4592_v0 = vld [vmem:[%s5734_s23 + $0x3b8] sm:$0xff]  ;;  %v4601_v26 = vld [vmem:[%s5734_s23 + $0x3c0] sm:$0xff]  ;;  %v4602_v27 = vld [vmem:[%s5734_s23 + $0x3c8] sm:$0xff] }
 0x1ed   : > { %v3740_v3 = vadd.f32 %v3736_v32, %v3682_v14  ;;  %v3753_v12 = vadd.f32 %v3749_v38, %v3725_v21  ;;  %v3754_v17 = vadd.f32 %v3750_v25, %v3726_v22  ;;  %v3741_v57 = vadd.f32 %v3737_v34, %v3683_v15  ;;  %v4603_v38 = vld [vmem:[%s5734_s23 + $0x3d0] sm:$0xff]  ;;  %v4604_v25 = vld [vmem:[%s5734_s23 + $0x3d8] sm:$0xff] }
 0x1ee   : > { %v3742_v28 = vadd.f32 %v3738_v41, %v3684_v23  ;;  %v3776_v5 = vadd.f32 %v3760_v6, %v3759_v39  ;;  %v3788_v16 = vrot.slane %v3760_v6, %v5732_v13  ;;  %v6314_v18 = vadd.f32 %v3751_v44, %v3697_v1  ;;  %v4609_v23 = vld [vmem:[%s5743_s20 + $0x3c0] sm:$0xff] }
 0x1ef   : > { %v3804_v7 = vrot.slane %v3759_v39, %v5732_v13  ;;  %v3834_v60 = vadd.f32 %v3818_v11, %v3817_v2  ;;  %v3846_v37 = vrot.slane %v3818_v11, %v5732_v13  ;;  %v3756_v24 = vadd.f32 %v3752_v9, %v3698_v45  ;;  %v4605_v1 = vld [vmem:[%s5740_s21 + $0x3c0] sm:$0xff]  ;;  %v4606_v9 = vld [vmem:[%s5740_s21 + $0x3c8] sm:$0xff]  ;;  %v4612_v11 = vld [vmem:[%s5743_s20 + $0x3d8] sm:$0xff] }
 0x1f0   : > { %v3780_v10 = vrot.slane %v3776_v5, %v5732_v13  ;;  %v3789_v29 = vmul.f32 %v4597_v48, %v3788_v16  ;;  %v3790_v8 = vmul.f32 %v4598_v56, %v3788_v16  ;;  %v3791_v40 = vmul.f32 %v4599_v19, %v3788_v16  ;;  %v4608_v56 = vld [vmem:[%s5740_s21 + $0x3d8] sm:$0xff] }
 0x1f1   : > { %v3792_v30 = vmul.f32 %v4600_v55, %v3788_v16  ;;  %v3805_v31 = vmul.f32 %v4593_v63, %v3804_v7  ;;  %v3806_v42 = vmul.f32 %v4594_v53, %v3804_v7  ;;  %v3807_v33 = vmul.f32 %v4595_v54, %v3804_v7  ;;  %v4611_v63 = vld [vmem:[%s5743_s20 + $0x3d0] sm:$0xff] }
 0x1f2   : > { %v3781_v43 = vmul.f32 %v4589_v46, %v3780_v10  ;;  %v3782_v47 = vmul.f32 %v4590_v58, %v3780_v10  ;;  %v3783_v14 = vmul.f32 %v4591_v61, %v3780_v10  ;;  %v3784_v15 = vmul.f32 %v4592_v0, %v3780_v10  ;;  %v3876_v10 = vld [vmem:[%s5729_s0 + $0x1f] sm:$0x1] }
 0x1f3   : > { %v3757_v59 = vadd.f32 %v3753_v12, %v3699_v62  ;;  %v3808_v20 = vmul.f32 %v4596_v4, %v3804_v7  ;;  %v3838_v21 = vrot.slane %v3834_v60, %v5732_v13  ;;  %v3758_v32 = vadd.f32 %v3754_v17, %v3700_v51  ;;  %v4607_v17 = vld [vmem:[%s5740_s21 + $0x3d0] sm:$0xff]  ;;  %v3875_v4 = vld [vmem:[%s5725_s19 + $0x1f] sm:$0x1] }
 0x1f4   : > { %v3793_v22 = vsub.f32 %v3781_v43, %v3789_v29  ;;  %v3794_v36 = vsub.f32 %v3782_v47, %v3790_v8  ;;  %v3795_v35 = vsub.f32 %v3783_v14, %v3791_v40  ;;  %v3796_v49 = vsub.f32 %v3784_v15, %v3792_v30  ;;  %v4617_v8 = vld [vmem:[%s5740_s21 + $0x3e0] sm:$0xff] }
 0x1f5   : > { %v3847_v34 = vmul.f32 %v4609_v23, %v3846_v37  ;;  %v3848_v41 = vmul.f32 %v4610_v50, %v3846_v37  ;;  %v3862_v44 = vrot.slane %v3817_v2, %v5732_v13  ;;  %v3809_v39 = vadd.f32 %v3805_v31, %v3781_v43  ;;  %v4622_v43 = vld [vmem:[%s5743_s20 + $0x3e8] sm:$0xff]  ;;  %v4619_v50 = vld [vmem:[%s5740_s21 + $0x3f0] sm:$0xff] }
 0x1f6   : > { %v3810_v6 = vadd.f32 %v3806_v42, %v3782_v47  ;;  %v3811_v45 = vadd.f32 %v3807_v33, %v3783_v14  ;;  %v3812_v62 = vadd.f32 %v3808_v20, %v3784_v15  ;;  %v3797_v12 = vadd.f32 %v3793_v22, %v3739_v52  ;;  %v4613_v33 = vld [vmem:[%s5734_s23 + $0x3e0] sm:$0xff]  ;;  %v4623_v47 = vld [vmem:[%s5743_s20 + $0x3f0] sm:$0xff]  ;;  %v4618_v23 = vld [vmem:[%s5740_s21 + $0x3e8] sm:$0xff] }
 0x1f7   : > { %v3798_v46 = vadd.f32 %v3794_v36, %v3740_v3  ;;  %v3799_v48 = vadd.f32 %v3795_v35, %v3741_v57  ;;  %v3800_v51 = vadd.f32 %v3796_v49, %v3742_v28  ;;  %v3839_v19 = vmul.f32 %v4601_v26, %v3838_v21  ;;  %v4624_v20 = vld [vmem:[%s5743_s20 + $0x3f8] sm:$0xff]  ;;  %v4614_v35 = vld [vmem:[%s5734_s23 + $0x3e8] sm:$0xff]  ;;  %v4615_v49 = vld [vmem:[%s5734_s23 + $0x3f0] sm:$0xff] }
 0x1f8   : > { %v3840_v53 = vmul.f32 %v4602_v27, %v3838_v21  ;;  %v3841_v54 = vmul.f32 %v4603_v38, %v3838_v21  ;;  %v3842_v55 = vmul.f32 %v4604_v25, %v3838_v21  ;;  %v3849_v2 = vmul.f32 %v4611_v63, %v3846_v37  ;;  %v4616_v26 = vld [vmem:[%s5734_s23 + $0x3f8] sm:$0xff] }
 0x1f9   : > { %v3850_v5 = vmul.f32 %v4612_v11, %v3846_v37  ;;  %v3863_v16 = vmul.f32 %v4605_v1, %v3862_v44  ;;  %v3864_v58 = vmul.f32 %v4606_v9, %v3862_v44  ;;  %v3851_v61 = vsub.f32 %v3839_v19, %v3847_v34 }
 0x1fa   : > { %v3852_v0 = vsub.f32 %v3840_v53, %v3848_v41  ;;  %v3865_v52 = vmul.f32 %v4607_v17, %v3862_v44  ;;  %v3866_v3 = vmul.f32 %v4608_v56, %v3862_v44  ;;  %v3813_v57 = vadd.f32 %v3809_v39, %v6314_v18  ;;  %v4621_v18 = vld [vmem:[%s5743_s20 + $0x3e0] sm:$0xff] }
 0x1fb   : > { %v3853_v28 = vsub.f32 %v3841_v54, %v3849_v2  ;;  %v3854_v7 = vsub.f32 %v3842_v55, %v3850_v5  ;;  %v3867_v60 = vadd.f32 %v3863_v16, %v3839_v19  ;;  %v3814_v37 = vadd.f32 %v3810_v6, %v3756_v24 }
 0x1fc   : > { %v3815_v29 = vadd.f32 %v3811_v45, %v3757_v59  ;;  %v3816_v40 = vadd.f32 %v3812_v62, %v3758_v32  ;;  %v3855_v30 = vadd.f32 %v3851_v61, %v3797_v12  ;;  %v3856_v31 = vadd.f32 %v3852_v0, %v3798_v46  ;;  %v4620_v32 = vld [vmem:[%s5740_s21 + $0x3f8] sm:$0xff] }
 0x1fd   : > { %v3868_v42 = vadd.f32 %v3864_v58, %v3840_v53  ;;  %v3869_v14 = vadd.f32 %v3865_v52, %v3841_v54  ;;  %v3870_v15 = vadd.f32 %v3866_v3, %v3842_v55  ;;  %v3892_v24 = vadd.f32 %v3876_v10, %v3875_v4 }
 0x1fe   : > { %v3904_v59 = vrot.slane %v3876_v10, %v5732_v13  ;;  %v3857_v21 = vadd.f32 %v3853_v28, %v3799_v48  ;;  %v3858_v22 = vadd.f32 %v3854_v7, %v3800_v51  ;;  %v3871_v36 = vadd.f32 %v3867_v60, %v3813_v57 }
 0x1ff   : > { %v3920_v27 = vrot.slane %v3875_v4, %v5732_v13  ;;  %v3896_v38 = vrot.slane %v3892_v24, %v5732_v13  ;;  %v3872_v11 = vadd.f32 %v3868_v42, %v3814_v37  ;;  %v3873_v12 = vadd.f32 %v3869_v14, %v3815_v29 }
 0x200   : > { %v3905_v25 = vmul.f32 %v4621_v18, %v3904_v59  ;;  %v3906_v1 = vmul.f32 %v4622_v43, %v3904_v59  ;;  %v3907_v34 = vmul.f32 %v4623_v47, %v3904_v59  ;;  %v3908_v41 = vmul.f32 %v4624_v20, %v3904_v59 }
 0x201   : > { %v3921_v44 = vmul.f32 %v4617_v8, %v3920_v27  ;;  %v3922_v39 = vmul.f32 %v4618_v23, %v3920_v27  ;;  %v3923_v6 = vmul.f32 %v4619_v50, %v3920_v27  ;;  %v3897_v45 = vmul.f32 %v4613_v33, %v3896_v38 }
 0x202   : > { %v3898_v62 = vmul.f32 %v4614_v35, %v3896_v38  ;;  %v3899_v9 = vmul.f32 %v4615_v49, %v3896_v38  ;;  %v3900_v63 = vmul.f32 %v4616_v26, %v3896_v38  ;;  %v3874_v46 = vadd.f32 %v3870_v15, %v3816_v40 }
 0x203   : > { %v3924_v48 = vmul.f32 %v4620_v32, %v3920_v27  ;;  %v3909_v51 = vsub.f32 %v3897_v45, %v3905_v25  ;;  %v3925_v19 = vadd.f32 %v3921_v44, %v3897_v45 }
 0x204   : > { %v3910_v17 = vsub.f32 %v3898_v62, %v3906_v1  ;;  %v3911_v56 = vsub.f32 %v3899_v9, %v3907_v34  ;;  %v3912_v13 = vsub.f32 %v3900_v63, %v3908_v41  ;;  %v3926_v53 = vadd.f32 %v3922_v39, %v3898_v62 }
 0x205   : > { %v3927_v54 = vadd.f32 %v3923_v6, %v3899_v9  ;;  %v3928_v55 = vadd.f32 %v3924_v48, %v3900_v63  ;;  %v3913_v2 = vadd.f32 %v3909_v51, %v3855_v30  ;;  %v3929_v61 = vadd.f32 %v3925_v19, %v3871_v36 }
 0x206   : > { %v3914_v5 = vadd.f32 %v3910_v17, %v3856_v31  ;;  %v3915_v16 = vadd.f32 %v3911_v56, %v3857_v21  ;;  %v3916_v58 = vadd.f32 %v3912_v13, %v3858_v22  ;;  %v3930_v0 = vadd.f32 %v3926_v53, %v3872_v11  ;;  %3951 = sbr.rel (!%p4890_p10) target bundleno = 530 (0x212), region = 234 }
 0x207   : > { %v3931_v52 = vadd.f32 %v3927_v54, %v3873_v12  ;;  %v3932_v3 = vadd.f32 %v3928_v55, %v3874_v46  ;;  %3933 = vst [vmem:[%s2073_s10] sm:$0xff] %v3913_v2  ;;  %3937 = vst [vmem:[%s2079_s7] sm:$0xff] %v3929_v61 }
 0x208   : > { %3934 = vst [vmem:[%s2073_s10 + $0x8] sm:$0xff] %v3914_v5  ;;  %3935 = vst [vmem:[%s2073_s10 + $0x10] sm:$0xff] %v3915_v16 }
 0x209   : > { %3936 = vst [vmem:[%s2073_s10 + $0x18] sm:$0xff] %v3916_v58  ;;  %3938 = vst [vmem:[%s2079_s7 + $0x8] sm:$0xff] %v3930_v0 }
 0x20a   : > { %3939 = vst [vmem:[%s2079_s7 + $0x10] sm:$0xff] %v3931_v52  ;;  %3940 = vst [vmem:[%s2079_s7 + $0x18] sm:$0xff] %v3932_v3 }
 0x20e   : > { %v3990_v57 = vld [vmem:[%s2073_s10] sm:$0xff] }
 0x20f   : > { %v3992_v28 = vld [vmem:[%s2073_s10 + $0x8] sm:$0xff]  ;;  %v3994_v7 = vld [vmem:[%s2073_s10 + $0x10] sm:$0xff]  ;;  %3991 = vst [vmem:[%s3955_s11] sm:$0xff] %v3990_v57 }
 0x210   : > { %v3996_v60 = vld [vmem:[%s2073_s10 + $0x18] sm:$0xff]  ;;  %3993 = vst [vmem:[%s3955_s11 + $0x10] sm:$0xff] %v3992_v28  ;;  %3995 = vst [vmem:[%s3955_s11 + $0x20] sm:$0xff] %v3994_v7 }
 0x211   : > { %3997 = vst [vmem:[%s3955_s11 + $0x30] sm:$0xff] %v3996_v60 }
 0x212 PF: > { %4003 = sbr.rel (!%p4890_p10) target bundleno = 538 (0x21a), region = 272  ;;  %s4629_s9 = sshll.u32 (%p4890_p10), %s4759_s25, 3 }
 0x213   : > { %s4005_s19 = sadd.s32 (%p4890_p10), %s4763_s26, %s4629_s9 }
 0x214   : > { %s4630_s0 = sshll.u32 (%p4890_p10), %s4005_s19, 3 }
 0x215   : > { %v4042_v4 = vld [vmem:[%s2079_s7] sm:$0xff] (%p4890_p10)  ;;  %s4007_s20 = scalar_lea.vmem (%p4890_p10), %s6404_s6, %s4630_s0 }
 0x216   : > { %4043 = vst [vmem:[%s4007_s20] sm:$0xff] (%p4890_p10), %v4042_v4 }
 0x217   : > { %v4044_v10 = vld [vmem:[%s2079_s7 + $0x8] sm:$0xff] }
 0x218   : > { %v4046_v37 = vld [vmem:[%s2079_s7 + $0x10] sm:$0xff]  ;;  %v4048_v29 = vld [vmem:[%s2079_s7 + $0x18] sm:$0xff]  ;;  %4045 = vst [vmem:[%s4007_s20 + $0x10] sm:$0xff] %v4044_v10 }
 0x219   : > { %4047 = vst [vmem:[%s4007_s20 + $0x20] sm:$0xff] %v4046_v37  ;;  %4049 = vst [vmem:[%s4007_s20 + $0x30] sm:$0xff] %v4048_v29 }
 0x21a PF: > { %s17_s29 = sadd.s32 1, %s4775_s29   ;;  %s6412_s16 = sld [smem:[#allocation9_spill]] }
 0x21b   : > { %p14_p1 = scmp.ge.s32.totalorder %s17_s29, 6   ;;  %s6413_s21 = smov %s4747_s22 }
 0x21c   : > { %s6414_s22 = smov %s4895_s17  ;;  %s6415_s23 = smov %s4755_s24 }
 0x21d   : > { %s6416_s24 = smov %s4898_s18  ;;  %s6417_s25 = smov %s4767_s27 }
 0x21e   : > { %s6418_s26 = smov %s4771_s28  ;;  %s6419_s27 = smov %s6422_s30 }
 0x21f   :  { %16 = sbr.rel (!%p14_p1) target bundleno = 7 (0x7), region = 478 }
 0x220   : > { %s6420_s28 = smov %s6412_s16 }

// kernel: reverse.4
= control target key start
LH: loop header
LB: loop body
LE: loop exit
PB: predicated region body
PF: predicated region fallthrough
CT: control target
= control target key end

     0   :  { %s2312_s0 = inlined_call_operand.vmem [shape: f32[32,2,16,16,3], index: 0, kind: input, shape index: {}]   ;;  %s2313_s1 = inlined_call_operand.vmem [shape: f32[32,2,16,16,3], index: 1, kind: output, shape index: {}]  }
   0x1   :  { %v768_v0 = vld [vmem:[%s2312_s0 + $0x200] sm:$0xff]  ;;  %v778_v6 = vld [vmem:[%s2312_s0 + $0x210] sm:$0xff] }
   0x2   :  { %v769_v1 = vld [vmem:[%s2312_s0 + $0x500] sm:$0xff]  ;;  %4 = vst [vmem:[%s2313_s1] sm:$0xff] %v768_v0  ;;  %v780_v7 = vld [vmem:[%s2312_s0 + $0x510] sm:$0xff]  ;;  %779 = vst [vmem:[%s2313_s1 + $0x10] sm:$0xff] %v778_v6 }
   0x3   :  { %v771_v2 = vld [vmem:[%s2312_s0 + $0x100] sm:$0xff]  ;;  %770 = vst [vmem:[%s2313_s1 + $0x300] sm:$0xff] %v769_v1  ;;  %v782_v8 = vld [vmem:[%s2312_s0 + $0x110] sm:$0xff]  ;;  %781 = vst [vmem:[%s2313_s1 + $0x310] sm:$0xff] %v780_v7 }
   0x4   :  { %772 = vst [vmem:[%s2313_s1 + $0x100] sm:$0xff] %v771_v2  ;;  %v773_v3 = vld [vmem:[%s2312_s0 + $0x400] sm:$0xff]  ;;  %783 = vst [vmem:[%s2313_s1 + $0x110] sm:$0xff] %v782_v8  ;;  %v784_v9 = vld [vmem:[%s2312_s0 + $0x410] sm:$0xff] }
   0x5   :  { %v17_v4 = vld [vmem:[%s2312_s0] sm:$0xff]  ;;  %774 = vst [vmem:[%s2313_s1 + $0x400] sm:$0xff] %v773_v3  ;;  %v786_v10 = vld [vmem:[%s2312_s0 + $0x10] sm:$0xff]  ;;  %785 = vst [vmem:[%s2313_s1 + $0x410] sm:$0xff] %v784_v9 }
   0x6   :  { %v776_v5 = vld [vmem:[%s2312_s0 + $0x300] sm:$0xff]  ;;  %775 = vst [vmem:[%s2313_s1 + $0x200] sm:$0xff] %v17_v4  ;;  %v788_v11 = vld [vmem:[%s2312_s0 + $0x310] sm:$0xff]  ;;  %787 = vst [vmem:[%s2313_s1 + $0x210] sm:$0xff] %v786_v10 }
   0x7   :  { %777 = vst [vmem:[%s2313_s1 + $0x500] sm:$0xff] %v776_v5  ;;  %789 = vst [vmem:[%s2313_s1 + $0x510] sm:$0xff] %v788_v11  ;;  %v790_v12 = vld [vmem:[%s2312_s0 + $0x220] sm:$0xff]  ;;  %v802_v18 = vld [vmem:[%s2312_s0 + $0x230] sm:$0xff] }
   0x8   :  { %v792_v13 = vld [vmem:[%s2312_s0 + $0x520] sm:$0xff]  ;;  %791 = vst [vmem:[%s2313_s1 + $0x20] sm:$0xff] %v790_v12  ;;  %v804_v19 = vld [vmem:[%s2312_s0 + $0x530] sm:$0xff]  ;;  %803 = vst [vmem:[%s2313_s1 + $0x30] sm:$0xff] %v802_v18 }
   0x9   :  { %v794_v14 = vld [vmem:[%s2312_s0 + $0x120] sm:$0xff]  ;;  %793 = vst [vmem:[%s2313_s1 + $0x320] sm:$0xff] %v792_v13  ;;  %v806_v20 = vld [vmem:[%s2312_s0 + $0x130] sm:$0xff]  ;;  %805 = vst [vmem:[%s2313_s1 + $0x330] sm:$0xff] %v804_v19 }
   0xa   :  { %795 = vst [vmem:[%s2313_s1 + $0x120] sm:$0xff] %v794_v14  ;;  %v796_v15 = vld [vmem:[%s2312_s0 + $0x420] sm:$0xff]  ;;  %807 = vst [vmem:[%s2313_s1 + $0x130] sm:$0xff] %v806_v20  ;;  %v808_v21 = vld [vmem:[%s2312_s0 + $0x430] sm:$0xff] }
   0xb   :  { %v798_v16 = vld [vmem:[%s2312_s0 + $0x20] sm:$0xff]  ;;  %797 = vst [vmem:[%s2313_s1 + $0x420] sm:$0xff] %v796_v15  ;;  %v810_v22 = vld [vmem:[%s2312_s0 + $0x30] sm:$0xff]  ;;  %809 = vst [vmem:[%s2313_s1 + $0x430] sm:$0xff] %v808_v21 }
   0xc   :  { %v800_v17 = vld [vmem:[%s2312_s0 + $0x320] sm:$0xff]  ;;  %799 = vst [vmem:[%s2313_s1 + $0x220] sm:$0xff] %v798_v16  ;;  %v812_v23 = vld [vmem:[%s2312_s0 + $0x330] sm:$0xff]  ;;  %811 = vst [vmem:[%s2313_s1 + $0x230] sm:$0xff] %v810_v22 }
   0xd   :  { %801 = vst [vmem:[%s2313_s1 + $0x520] sm:$0xff] %v800_v17  ;;  %813 = vst [vmem:[%s2313_s1 + $0x530] sm:$0xff] %v812_v23  ;;  %v814_v24 = vld [vmem:[%s2312_s0 + $0x240] sm:$0xff]  ;;  %v826_v30 = vld [vmem:[%s2312_s0 + $0x250] sm:$0xff] }
   0xe   :  { %v816_v25 = vld [vmem:[%s2312_s0 + $0x540] sm:$0xff]  ;;  %815 = vst [vmem:[%s2313_s1 + $0x40] sm:$0xff] %v814_v24  ;;  %v828_v31 = vld [vmem:[%s2312_s0 + $0x550] sm:$0xff]  ;;  %827 = vst [vmem:[%s2313_s1 + $0x50] sm:$0xff] %v826_v30 }
   0xf   :  { %v818_v26 = vld [vmem:[%s2312_s0 + $0x140] sm:$0xff]  ;;  %817 = vst [vmem:[%s2313_s1 + $0x340] sm:$0xff] %v816_v25  ;;  %v830_v32 = vld [vmem:[%s2312_s0 + $0x150] sm:$0xff]  ;;  %829 = vst [vmem:[%s2313_s1 + $0x350] sm:$0xff] %v828_v31 }
  0x10   :  { %819 = vst [vmem:[%s2313_s1 + $0x140] sm:$0xff] %v818_v26  ;;  %v820_v27 = vld [vmem:[%s2312_s0 + $0x440] sm:$0xff]  ;;  %831 = vst [vmem:[%s2313_s1 + $0x150] sm:$0xff] %v830_v32  ;;  %v832_v33 = vld [vmem:[%s2312_s0 + $0x450] sm:$0xff] }
  0x11   :  { %v822_v28 = vld [vmem:[%s2312_s0 + $0x40] sm:$0xff]  ;;  %821 = vst [vmem:[%s2313_s1 + $0x440] sm:$0xff] %v820_v27  ;;  %v834_v34 = vld [vmem:[%s2312_s0 + $0x50] sm:$0xff]  ;;  %833 = vst [vmem:[%s2313_s1 + $0x450] sm:$0xff] %v832_v33 }
  0x12   :  { %v824_v29 = vld [vmem:[%s2312_s0 + $0x340] sm:$0xff]  ;;  %823 = vst [vmem:[%s2313_s1 + $0x240] sm:$0xff] %v822_v28  ;;  %v836_v35 = vld [vmem:[%s2312_s0 + $0x350] sm:$0xff]  ;;  %835 = vst [vmem:[%s2313_s1 + $0x250] sm:$0xff] %v834_v34 }
  0x13   :  { %825 = vst [vmem:[%s2313_s1 + $0x540] sm:$0xff] %v824_v29  ;;  %837 = vst [vmem:[%s2313_s1 + $0x550] sm:$0xff] %v836_v35  ;;  %v838_v36 = vld [vmem:[%s2312_s0 + $0x260] sm:$0xff]  ;;  %v850_v42 = vld [vmem:[%s2312_s0 + $0x270] sm:$0xff] }
  0x14   :  { %v840_v37 = vld [vmem:[%s2312_s0 + $0x560] sm:$0xff]  ;;  %839 = vst [vmem:[%s2313_s1 + $0x60] sm:$0xff] %v838_v36  ;;  %v852_v43 = vld [vmem:[%s2312_s0 + $0x570] sm:$0xff]  ;;  %851 = vst [vmem:[%s2313_s1 + $0x70] sm:$0xff] %v850_v42 }
  0x15   :  { %v842_v38 = vld [vmem:[%s2312_s0 + $0x160] sm:$0xff]  ;;  %841 = vst [vmem:[%s2313_s1 + $0x360] sm:$0xff] %v840_v37  ;;  %v854_v44 = vld [vmem:[%s2312_s0 + $0x170] sm:$0xff]  ;;  %853 = vst [vmem:[%s2313_s1 + $0x370] sm:$0xff] %v852_v43 }
  0x16   :  { %843 = vst [vmem:[%s2313_s1 + $0x160] sm:$0xff] %v842_v38  ;;  %v844_v39 = vld [vmem:[%s2312_s0 + $0x460] sm:$0xff]  ;;  %855 = vst [vmem:[%s2313_s1 + $0x170] sm:$0xff] %v854_v44  ;;  %v856_v45 = vld [vmem:[%s2312_s0 + $0x470] sm:$0xff] }
  0x17   :  { %v846_v40 = vld [vmem:[%s2312_s0 + $0x60] sm:$0xff]  ;;  %845 = vst [vmem:[%s2313_s1 + $0x460] sm:$0xff] %v844_v39  ;;  %v858_v46 = vld [vmem:[%s2312_s0 + $0x70] sm:$0xff]  ;;  %857 = vst [vmem:[%s2313_s1 + $0x470] sm:$0xff] %v856_v45 }
  0x18   :  { %v848_v41 = vld [vmem:[%s2312_s0 + $0x360] sm:$0xff]  ;;  %847 = vst [vmem:[%s2313_s1 + $0x260] sm:$0xff] %v846_v40  ;;  %v860_v47 = vld [vmem:[%s2312_s0 + $0x370] sm:$0xff]  ;;  %859 = vst [vmem:[%s2313_s1 + $0x270] sm:$0xff] %v858_v46 }
  0x19   :  { %849 = vst [vmem:[%s2313_s1 + $0x560] sm:$0xff] %v848_v41  ;;  %861 = vst [vmem:[%s2313_s1 + $0x570] sm:$0xff] %v860_v47  ;;  %v862_v48 = vld [vmem:[%s2312_s0 + $0x280] sm:$0xff]  ;;  %v874_v54 = vld [vmem:[%s2312_s0 + $0x290] sm:$0xff] }
  0x1a   :  { %v864_v49 = vld [vmem:[%s2312_s0 + $0x580] sm:$0xff]  ;;  %863 = vst [vmem:[%s2313_s1 + $0x80] sm:$0xff] %v862_v48  ;;  %v876_v55 = vld [vmem:[%s2312_s0 + $0x590] sm:$0xff]  ;;  %875 = vst [vmem:[%s2313_s1 + $0x90] sm:$0xff] %v874_v54 }
  0x1b   :  { %v866_v50 = vld [vmem:[%s2312_s0 + $0x180] sm:$0xff]  ;;  %865 = vst [vmem:[%s2313_s1 + $0x380] sm:$0xff] %v864_v49  ;;  %v878_v56 = vld [vmem:[%s2312_s0 + $0x190] sm:$0xff]  ;;  %877 = vst [vmem:[%s2313_s1 + $0x390] sm:$0xff] %v876_v55 }
  0x1c   :  { %867 = vst [vmem:[%s2313_s1 + $0x180] sm:$0xff] %v866_v50  ;;  %v868_v51 = vld [vmem:[%s2312_s0 + $0x480] sm:$0xff]  ;;  %879 = vst [vmem:[%s2313_s1 + $0x190] sm:$0xff] %v878_v56  ;;  %v880_v57 = vld [vmem:[%s2312_s0 + $0x490] sm:$0xff] }
  0x1d   :  { %v870_v52 = vld [vmem:[%s2312_s0 + $0x80] sm:$0xff]  ;;  %869 = vst [vmem:[%s2313_s1 + $0x480] sm:$0xff] %v868_v51  ;;  %v882_v58 = vld [vmem:[%s2312_s0 + $0x90] sm:$0xff]  ;;  %881 = vst [vmem:[%s2313_s1 + $0x490] sm:$0xff] %v880_v57 }
  0x1e   :  { %v872_v53 = vld [vmem:[%s2312_s0 + $0x380] sm:$0xff]  ;;  %871 = vst [vmem:[%s2313_s1 + $0x280] sm:$0xff] %v870_v52  ;;  %v884_v59 = vld [vmem:[%s2312_s0 + $0x390] sm:$0xff]  ;;  %883 = vst [vmem:[%s2313_s1 + $0x290] sm:$0xff] %v882_v58 }
  0x1f   :  { %873 = vst [vmem:[%s2313_s1 + $0x580] sm:$0xff] %v872_v53  ;;  %885 = vst [vmem:[%s2313_s1 + $0x590] sm:$0xff] %v884_v59  ;;  %v886_v60 = vld [vmem:[%s2312_s0 + $0x2a0] sm:$0xff]  ;;  %v898_v2 = vld [vmem:[%s2312_s0 + $0x2b0] sm:$0xff] }
  0x20   :  { %v888_v61 = vld [vmem:[%s2312_s0 + $0x5a0] sm:$0xff]  ;;  %887 = vst [vmem:[%s2313_s1 + $0xa0] sm:$0xff] %v886_v60  ;;  %v900_v3 = vld [vmem:[%s2312_s0 + $0x5b0] sm:$0xff]  ;;  %899 = vst [vmem:[%s2313_s1 + $0xb0] sm:$0xff] %v898_v2 }
  0x21   :  { %v890_v62 = vld [vmem:[%s2312_s0 + $0x1a0] sm:$0xff]  ;;  %889 = vst [vmem:[%s2313_s1 + $0x3a0] sm:$0xff] %v888_v61  ;;  %v902_v4 = vld [vmem:[%s2312_s0 + $0x1b0] sm:$0xff]  ;;  %901 = vst [vmem:[%s2313_s1 + $0x3b0] sm:$0xff] %v900_v3 }
  0x22   :  { %891 = vst [vmem:[%s2313_s1 + $0x1a0] sm:$0xff] %v890_v62  ;;  %v892_v63 = vld [vmem:[%s2312_s0 + $0x4a0] sm:$0xff]  ;;  %903 = vst [vmem:[%s2313_s1 + $0x1b0] sm:$0xff] %v902_v4  ;;  %v904_v5 = vld [vmem:[%s2312_s0 + $0x4b0] sm:$0xff] }
  0x23   :  { %v894_v0 = vld [vmem:[%s2312_s0 + $0xa0] sm:$0xff]  ;;  %893 = vst [vmem:[%s2313_s1 + $0x4a0] sm:$0xff] %v892_v63  ;;  %v906_v6 = vld [vmem:[%s2312_s0 + $0xb0] sm:$0xff]  ;;  %905 = vst [vmem:[%s2313_s1 + $0x4b0] sm:$0xff] %v904_v5 }
  0x24   :  { %v896_v1 = vld [vmem:[%s2312_s0 + $0x3a0] sm:$0xff]  ;;  %895 = vst [vmem:[%s2313_s1 + $0x2a0] sm:$0xff] %v894_v0  ;;  %v908_v7 = vld [vmem:[%s2312_s0 + $0x3b0] sm:$0xff]  ;;  %907 = vst [vmem:[%s2313_s1 + $0x2b0] sm:$0xff] %v906_v6 }
  0x25   :  { %897 = vst [vmem:[%s2313_s1 + $0x5a0] sm:$0xff] %v896_v1  ;;  %909 = vst [vmem:[%s2313_s1 + $0x5b0] sm:$0xff] %v908_v7  ;;  %v910_v8 = vld [vmem:[%s2312_s0 + $0x2c0] sm:$0xff]  ;;  %v922_v14 = vld [vmem:[%s2312_s0 + $0x2d0] sm:$0xff] }
  0x26   :  { %v912_v9 = vld [vmem:[%s2312_s0 + $0x5c0] sm:$0xff]  ;;  %911 = vst [vmem:[%s2313_s1 + $0xc0] sm:$0xff] %v910_v8  ;;  %v924_v15 = vld [vmem:[%s2312_s0 + $0x5d0] sm:$0xff]  ;;  %923 = vst [vmem:[%s2313_s1 + $0xd0] sm:$0xff] %v922_v14 }
  0x27   :  { %v914_v10 = vld [vmem:[%s2312_s0 + $0x1c0] sm:$0xff]  ;;  %913 = vst [vmem:[%s2313_s1 + $0x3c0] sm:$0xff] %v912_v9  ;;  %v926_v16 = vld [vmem:[%s2312_s0 + $0x1d0] sm:$0xff]  ;;  %925 = vst [vmem:[%s2313_s1 + $0x3d0] sm:$0xff] %v924_v15 }
  0x28   :  { %915 = vst [vmem:[%s2313_s1 + $0x1c0] sm:$0xff] %v914_v10  ;;  %v916_v11 = vld [vmem:[%s2312_s0 + $0x4c0] sm:$0xff]  ;;  %927 = vst [vmem:[%s2313_s1 + $0x1d0] sm:$0xff] %v926_v16  ;;  %v928_v17 = vld [vmem:[%s2312_s0 + $0x4d0] sm:$0xff] }
  0x29   :  { %v918_v12 = vld [vmem:[%s2312_s0 + $0xc0] sm:$0xff]  ;;  %917 = vst [vmem:[%s2313_s1 + $0x4c0] sm:$0xff] %v916_v11  ;;  %v930_v18 = vld [vmem:[%s2312_s0 + $0xd0] sm:$0xff]  ;;  %929 = vst [vmem:[%s2313_s1 + $0x4d0] sm:$0xff] %v928_v17 }
  0x2a   :  { %v920_v13 = vld [vmem:[%s2312_s0 + $0x3c0] sm:$0xff]  ;;  %919 = vst [vmem:[%s2313_s1 + $0x2c0] sm:$0xff] %v918_v12  ;;  %v932_v19 = vld [vmem:[%s2312_s0 + $0x3d0] sm:$0xff]  ;;  %931 = vst [vmem:[%s2313_s1 + $0x2d0] sm:$0xff] %v930_v18 }
  0x2b   :  { %921 = vst [vmem:[%s2313_s1 + $0x5c0] sm:$0xff] %v920_v13  ;;  %933 = vst [vmem:[%s2313_s1 + $0x5d0] sm:$0xff] %v932_v19  ;;  %v934_v20 = vld [vmem:[%s2312_s0 + $0x2e0] sm:$0xff]  ;;  %v946_v26 = vld [vmem:[%s2312_s0 + $0x2f0] sm:$0xff] }
  0x2c   :  { %v936_v21 = vld [vmem:[%s2312_s0 + $0x5e0] sm:$0xff]  ;;  %935 = vst [vmem:[%s2313_s1 + $0xe0] sm:$0xff] %v934_v20  ;;  %v948_v27 = vld [vmem:[%s2312_s0 + $0x5f0] sm:$0xff]  ;;  %947 = vst [vmem:[%s2313_s1 + $0xf0] sm:$0xff] %v946_v26 }
  0x2d   :  { %v938_v22 = vld [vmem:[%s2312_s0 + $0x1e0] sm:$0xff]  ;;  %937 = vst [vmem:[%s2313_s1 + $0x3e0] sm:$0xff] %v936_v21  ;;  %v950_v28 = vld [vmem:[%s2312_s0 + $0x1f0] sm:$0xff]  ;;  %949 = vst [vmem:[%s2313_s1 + $0x3f0] sm:$0xff] %v948_v27 }
  0x2e   :  { %939 = vst [vmem:[%s2313_s1 + $0x1e0] sm:$0xff] %v938_v22  ;;  %v940_v23 = vld [vmem:[%s2312_s0 + $0x4e0] sm:$0xff]  ;;  %951 = vst [vmem:[%s2313_s1 + $0x1f0] sm:$0xff] %v950_v28  ;;  %v952_v29 = vld [vmem:[%s2312_s0 + $0x4f0] sm:$0xff] }
  0x2f   :  { %v942_v24 = vld [vmem:[%s2312_s0 + $0xe0] sm:$0xff]  ;;  %941 = vst [vmem:[%s2313_s1 + $0x4e0] sm:$0xff] %v940_v23  ;;  %v954_v30 = vld [vmem:[%s2312_s0 + $0xf0] sm:$0xff]  ;;  %953 = vst [vmem:[%s2313_s1 + $0x4f0] sm:$0xff] %v952_v29 }
  0x30   :  { %v944_v25 = vld [vmem:[%s2312_s0 + $0x3e0] sm:$0xff]  ;;  %943 = vst [vmem:[%s2313_s1 + $0x2e0] sm:$0xff] %v942_v24  ;;  %v956_v31 = vld [vmem:[%s2312_s0 + $0x3f0] sm:$0xff]  ;;  %955 = vst [vmem:[%s2313_s1 + $0x2f0] sm:$0xff] %v954_v30 }
  0x31   :  { %945 = vst [vmem:[%s2313_s1 + $0x5e0] sm:$0xff] %v944_v25  ;;  %957 = vst [vmem:[%s2313_s1 + $0x5f0] sm:$0xff] %v956_v31  ;;  %v958_v32 = vld [vmem:[%s2312_s0 + $0x208] sm:$0xff]  ;;  %v970_v38 = vld [vmem:[%s2312_s0 + $0x218] sm:$0xff] }
  0x32   :  { %v960_v33 = vld [vmem:[%s2312_s0 + $0x508] sm:$0xff]  ;;  %959 = vst [vmem:[%s2313_s1 + $0x8] sm:$0xff] %v958_v32  ;;  %v972_v39 = vld [vmem:[%s2312_s0 + $0x518] sm:$0xff]  ;;  %971 = vst [vmem:[%s2313_s1 + $0x18] sm:$0xff] %v970_v38 }
  0x33   :  { %v962_v34 = vld [vmem:[%s2312_s0 + $0x108] sm:$0xff]  ;;  %961 = vst [vmem:[%s2313_s1 + $0x308] sm:$0xff] %v960_v33  ;;  %v974_v40 = vld [vmem:[%s2312_s0 + $0x118] sm:$0xff]  ;;  %973 = vst [vmem:[%s2313_s1 + $0x318] sm:$0xff] %v972_v39 }
  0x34   :  { %963 = vst [vmem:[%s2313_s1 + $0x108] sm:$0xff] %v962_v34  ;;  %v964_v35 = vld [vmem:[%s2312_s0 + $0x408] sm:$0xff]  ;;  %975 = vst [vmem:[%s2313_s1 + $0x118] sm:$0xff] %v974_v40  ;;  %v976_v41 = vld [vmem:[%s2312_s0 + $0x418] sm:$0xff] }
  0x35   :  { %v966_v36 = vld [vmem:[%s2312_s0 + $0x8] sm:$0xff]  ;;  %965 = vst [vmem:[%s2313_s1 + $0x408] sm:$0xff] %v964_v35  ;;  %v978_v42 = vld [vmem:[%s2312_s0 + $0x18] sm:$0xff]  ;;  %977 = vst [vmem:[%s2313_s1 + $0x418] sm:$0xff] %v976_v41 }
  0x36   :  { %v968_v37 = vld [vmem:[%s2312_s0 + $0x308] sm:$0xff]  ;;  %967 = vst [vmem:[%s2313_s1 + $0x208] sm:$0xff] %v966_v36  ;;  %v980_v43 = vld [vmem:[%s2312_s0 + $0x318] sm:$0xff]  ;;  %979 = vst [vmem:[%s2313_s1 + $0x218] sm:$0xff] %v978_v42 }
  0x37   :  { %969 = vst [vmem:[%s2313_s1 + $0x508] sm:$0xff] %v968_v37  ;;  %981 = vst [vmem:[%s2313_s1 + $0x518] sm:$0xff] %v980_v43  ;;  %v982_v44 = vld [vmem:[%s2312_s0 + $0x228] sm:$0xff]  ;;  %v994_v50 = vld [vmem:[%s2312_s0 + $0x238] sm:$0xff] }
  0x38   :  { %v984_v45 = vld [vmem:[%s2312_s0 + $0x528] sm:$0xff]  ;;  %983 = vst [vmem:[%s2313_s1 + $0x28] sm:$0xff] %v982_v44  ;;  %v996_v51 = vld [vmem:[%s2312_s0 + $0x538] sm:$0xff]  ;;  %995 = vst [vmem:[%s2313_s1 + $0x38] sm:$0xff] %v994_v50 }
  0x39   :  { %v986_v46 = vld [vmem:[%s2312_s0 + $0x128] sm:$0xff]  ;;  %985 = vst [vmem:[%s2313_s1 + $0x328] sm:$0xff] %v984_v45  ;;  %v998_v52 = vld [vmem:[%s2312_s0 + $0x138] sm:$0xff]  ;;  %997 = vst [vmem:[%s2313_s1 + $0x338] sm:$0xff] %v996_v51 }
  0x3a   :  { %987 = vst [vmem:[%s2313_s1 + $0x128] sm:$0xff] %v986_v46  ;;  %v988_v47 = vld [vmem:[%s2312_s0 + $0x428] sm:$0xff]  ;;  %999 = vst [vmem:[%s2313_s1 + $0x138] sm:$0xff] %v998_v52  ;;  %v1000_v53 = vld [vmem:[%s2312_s0 + $0x438] sm:$0xff] }
  0x3b   :  { %v990_v48 = vld [vmem:[%s2312_s0 + $0x28] sm:$0xff]  ;;  %989 = vst [vmem:[%s2313_s1 + $0x428] sm:$0xff] %v988_v47  ;;  %v1002_v54 = vld [vmem:[%s2312_s0 + $0x38] sm:$0xff]  ;;  %1001 = vst [vmem:[%s2313_s1 + $0x438] sm:$0xff] %v1000_v53 }
  0x3c   :  { %v992_v49 = vld [vmem:[%s2312_s0 + $0x328] sm:$0xff]  ;;  %991 = vst [vmem:[%s2313_s1 + $0x228] sm:$0xff] %v990_v48  ;;  %v1004_v55 = vld [vmem:[%s2312_s0 + $0x338] sm:$0xff]  ;;  %1003 = vst [vmem:[%s2313_s1 + $0x238] sm:$0xff] %v1002_v54 }
  0x3d   :  { %993 = vst [vmem:[%s2313_s1 + $0x528] sm:$0xff] %v992_v49  ;;  %1005 = vst [vmem:[%s2313_s1 + $0x538] sm:$0xff] %v1004_v55  ;;  %v1006_v56 = vld [vmem:[%s2312_s0 + $0x248] sm:$0xff]  ;;  %v1018_v62 = vld [vmem:[%s2312_s0 + $0x258] sm:$0xff] }
  0x3e   :  { %v1008_v57 = vld [vmem:[%s2312_s0 + $0x548] sm:$0xff]  ;;  %1007 = vst [vmem:[%s2313_s1 + $0x48] sm:$0xff] %v1006_v56  ;;  %v1020_v63 = vld [vmem:[%s2312_s0 + $0x558] sm:$0xff]  ;;  %1019 = vst [vmem:[%s2313_s1 + $0x58] sm:$0xff] %v1018_v62 }
  0x3f   :  { %v1010_v58 = vld [vmem:[%s2312_s0 + $0x148] sm:$0xff]  ;;  %1009 = vst [vmem:[%s2313_s1 + $0x348] sm:$0xff] %v1008_v57  ;;  %v1022_v0 = vld [vmem:[%s2312_s0 + $0x158] sm:$0xff]  ;;  %1021 = vst [vmem:[%s2313_s1 + $0x358] sm:$0xff] %v1020_v63 }
  0x40   :  { %1011 = vst [vmem:[%s2313_s1 + $0x148] sm:$0xff] %v1010_v58  ;;  %v1012_v59 = vld [vmem:[%s2312_s0 + $0x448] sm:$0xff]  ;;  %1023 = vst [vmem:[%s2313_s1 + $0x158] sm:$0xff] %v1022_v0  ;;  %v1024_v1 = vld [vmem:[%s2312_s0 + $0x458] sm:$0xff] }
  0x41   :  { %v1014_v60 = vld [vmem:[%s2312_s0 + $0x48] sm:$0xff]  ;;  %1013 = vst [vmem:[%s2313_s1 + $0x448] sm:$0xff] %v1012_v59  ;;  %v1026_v2 = vld [vmem:[%s2312_s0 + $0x58] sm:$0xff]  ;;  %1025 = vst [vmem:[%s2313_s1 + $0x458] sm:$0xff] %v1024_v1 }
  0x42   :  { %v1016_v61 = vld [vmem:[%s2312_s0 + $0x348] sm:$0xff]  ;;  %1015 = vst [vmem:[%s2313_s1 + $0x248] sm:$0xff] %v1014_v60  ;;  %v1028_v3 = vld [vmem:[%s2312_s0 + $0x358] sm:$0xff]  ;;  %1027 = vst [vmem:[%s2313_s1 + $0x258] sm:$0xff] %v1026_v2 }
  0x43   :  { %1017 = vst [vmem:[%s2313_s1 + $0x548] sm:$0xff] %v1016_v61  ;;  %1029 = vst [vmem:[%s2313_s1 + $0x558] sm:$0xff] %v1028_v3  ;;  %v1030_v4 = vld [vmem:[%s2312_s0 + $0x268] sm:$0xff]  ;;  %v1042_v10 = vld [vmem:[%s2312_s0 + $0x278] sm:$0xff] }
  0x44   :  { %v1032_v5 = vld [vmem:[%s2312_s0 + $0x568] sm:$0xff]  ;;  %1031 = vst [vmem:[%s2313_s1 + $0x68] sm:$0xff] %v1030_v4  ;;  %v1044_v11 = vld [vmem:[%s2312_s0 + $0x578] sm:$0xff]  ;;  %1043 = vst [vmem:[%s2313_s1 + $0x78] sm:$0xff] %v1042_v10 }
  0x45   :  { %v1034_v6 = vld [vmem:[%s2312_s0 + $0x168] sm:$0xff]  ;;  %1033 = vst [vmem:[%s2313_s1 + $0x368] sm:$0xff] %v1032_v5  ;;  %v1046_v12 = vld [vmem:[%s2312_s0 + $0x178] sm:$0xff]  ;;  %1045 = vst [vmem:[%s2313_s1 + $0x378] sm:$0xff] %v1044_v11 }
  0x46   :  { %1035 = vst [vmem:[%s2313_s1 + $0x168] sm:$0xff] %v1034_v6  ;;  %v1036_v7 = vld [vmem:[%s2312_s0 + $0x468] sm:$0xff]  ;;  %1047 = vst [vmem:[%s2313_s1 + $0x178] sm:$0xff] %v1046_v12  ;;  %v1048_v13 = vld [vmem:[%s2312_s0 + $0x478] sm:$0xff] }
  0x47   :  { %v1038_v8 = vld [vmem:[%s2312_s0 + $0x68] sm:$0xff]  ;;  %1037 = vst [vmem:[%s2313_s1 + $0x468] sm:$0xff] %v1036_v7  ;;  %v1050_v14 = vld [vmem:[%s2312_s0 + $0x78] sm:$0xff]  ;;  %1049 = vst [vmem:[%s2313_s1 + $0x478] sm:$0xff] %v1048_v13 }
  0x48   :  { %v1040_v9 = vld [vmem:[%s2312_s0 + $0x368] sm:$0xff]  ;;  %1039 = vst [vmem:[%s2313_s1 + $0x268] sm:$0xff] %v1038_v8  ;;  %v1052_v15 = vld [vmem:[%s2312_s0 + $0x378] sm:$0xff]  ;;  %1051 = vst [vmem:[%s2313_s1 + $0x278] sm:$0xff] %v1050_v14 }
  0x49   :  { %1041 = vst [vmem:[%s2313_s1 + $0x568] sm:$0xff] %v1040_v9  ;;  %1053 = vst [vmem:[%s2313_s1 + $0x578] sm:$0xff] %v1052_v15  ;;  %v1054_v16 = vld [vmem:[%s2312_s0 + $0x288] sm:$0xff]  ;;  %v1066_v22 = vld [vmem:[%s2312_s0 + $0x298] sm:$0xff] }
  0x4a   :  { %v1056_v17 = vld [vmem:[%s2312_s0 + $0x588] sm:$0xff]  ;;  %1055 = vst [vmem:[%s2313_s1 + $0x88] sm:$0xff] %v1054_v16  ;;  %v1068_v23 = vld [vmem:[%s2312_s0 + $0x598] sm:$0xff]  ;;  %1067 = vst [vmem:[%s2313_s1 + $0x98] sm:$0xff] %v1066_v22 }
  0x4b   :  { %v1058_v18 = vld [vmem:[%s2312_s0 + $0x188] sm:$0xff]  ;;  %1057 = vst [vmem:[%s2313_s1 + $0x388] sm:$0xff] %v1056_v17  ;;  %v1070_v24 = vld [vmem:[%s2312_s0 + $0x198] sm:$0xff]  ;;  %1069 = vst [vmem:[%s2313_s1 + $0x398] sm:$0xff] %v1068_v23 }
  0x4c   :  { %1059 = vst [vmem:[%s2313_s1 + $0x188] sm:$0xff] %v1058_v18  ;;  %v1060_v19 = vld [vmem:[%s2312_s0 + $0x488] sm:$0xff]  ;;  %1071 = vst [vmem:[%s2313_s1 + $0x198] sm:$0xff] %v1070_v24  ;;  %v1072_v25 = vld [vmem:[%s2312_s0 + $0x498] sm:$0xff] }
  0x4d   :  { %v1062_v20 = vld [vmem:[%s2312_s0 + $0x88] sm:$0xff]  ;;  %1061 = vst [vmem:[%s2313_s1 + $0x488] sm:$0xff] %v1060_v19  ;;  %v1074_v26 = vld [vmem:[%s2312_s0 + $0x98] sm:$0xff]  ;;  %1073 = vst [vmem:[%s2313_s1 + $0x498] sm:$0xff] %v1072_v25 }
  0x4e   :  { %v1064_v21 = vld [vmem:[%s2312_s0 + $0x388] sm:$0xff]  ;;  %1063 = vst [vmem:[%s2313_s1 + $0x288] sm:$0xff] %v1062_v20  ;;  %v1076_v27 = vld [vmem:[%s2312_s0 + $0x398] sm:$0xff]  ;;  %1075 = vst [vmem:[%s2313_s1 + $0x298] sm:$0xff] %v1074_v26 }
  0x4f   :  { %1065 = vst [vmem:[%s2313_s1 + $0x588] sm:$0xff] %v1064_v21  ;;  %1077 = vst [vmem:[%s2313_s1 + $0x598] sm:$0xff] %v1076_v27  ;;  %v1078_v28 = vld [vmem:[%s2312_s0 + $0x2a8] sm:$0xff]  ;;  %v1090_v34 = vld [vmem:[%s2312_s0 + $0x2b8] sm:$0xff] }
  0x50   :  { %v1080_v29 = vld [vmem:[%s2312_s0 + $0x5a8] sm:$0xff]  ;;  %1079 = vst [vmem:[%s2313_s1 + $0xa8] sm:$0xff] %v1078_v28  ;;  %v1092_v35 = vld [vmem:[%s2312_s0 + $0x5b8] sm:$0xff]  ;;  %1091 = vst [vmem:[%s2313_s1 + $0xb8] sm:$0xff] %v1090_v34 }
  0x51   :  { %v1082_v30 = vld [vmem:[%s2312_s0 + $0x1a8] sm:$0xff]  ;;  %1081 = vst [vmem:[%s2313_s1 + $0x3a8] sm:$0xff] %v1080_v29  ;;  %v1094_v36 = vld [vmem:[%s2312_s0 + $0x1b8] sm:$0xff]  ;;  %1093 = vst [vmem:[%s2313_s1 + $0x3b8] sm:$0xff] %v1092_v35 }
  0x52   :  { %1083 = vst [vmem:[%s2313_s1 + $0x1a8] sm:$0xff] %v1082_v30  ;;  %v1084_v31 = vld [vmem:[%s2312_s0 + $0x4a8] sm:$0xff]  ;;  %1095 = vst [vmem:[%s2313_s1 + $0x1b8] sm:$0xff] %v1094_v36  ;;  %v1096_v37 = vld [vmem:[%s2312_s0 + $0x4b8] sm:$0xff] }
  0x53   :  { %v1086_v32 = vld [vmem:[%s2312_s0 + $0xa8] sm:$0xff]  ;;  %1085 = vst [vmem:[%s2313_s1 + $0x4a8] sm:$0xff] %v1084_v31  ;;  %v1098_v38 = vld [vmem:[%s2312_s0 + $0xb8] sm:$0xff]  ;;  %1097 = vst [vmem:[%s2313_s1 + $0x4b8] sm:$0xff] %v1096_v37 }
  0x54   :  { %v1088_v33 = vld [vmem:[%s2312_s0 + $0x3a8] sm:$0xff]  ;;  %1087 = vst [vmem:[%s2313_s1 + $0x2a8] sm:$0xff] %v1086_v32  ;;  %v1100_v39 = vld [vmem:[%s2312_s0 + $0x3b8] sm:$0xff]  ;;  %1099 = vst [vmem:[%s2313_s1 + $0x2b8] sm:$0xff] %v1098_v38 }
  0x55   :  { %1089 = vst [vmem:[%s2313_s1 + $0x5a8] sm:$0xff] %v1088_v33  ;;  %1101 = vst [vmem:[%s2313_s1 + $0x5b8] sm:$0xff] %v1100_v39  ;;  %v1102_v40 = vld [vmem:[%s2312_s0 + $0x2c8] sm:$0xff]  ;;  %v1114_v46 = vld [vmem:[%s2312_s0 + $0x2d8] sm:$0xff] }
  0x56   :  { %v1104_v41 = vld [vmem:[%s2312_s0 + $0x5c8] sm:$0xff]  ;;  %1103 = vst [vmem:[%s2313_s1 + $0xc8] sm:$0xff] %v1102_v40  ;;  %v1116_v47 = vld [vmem:[%s2312_s0 + $0x5d8] sm:$0xff]  ;;  %1115 = vst [vmem:[%s2313_s1 + $0xd8] sm:$0xff] %v1114_v46 }
  0x57   :  { %v1106_v42 = vld [vmem:[%s2312_s0 + $0x1c8] sm:$0xff]  ;;  %1105 = vst [vmem:[%s2313_s1 + $0x3c8] sm:$0xff] %v1104_v41  ;;  %v1118_v48 = vld [vmem:[%s2312_s0 + $0x1d8] sm:$0xff]  ;;  %1117 = vst [vmem:[%s2313_s1 + $0x3d8] sm:$0xff] %v1116_v47 }
  0x58   :  { %1107 = vst [vmem:[%s2313_s1 + $0x1c8] sm:$0xff] %v1106_v42  ;;  %v1108_v43 = vld [vmem:[%s2312_s0 + $0x4c8] sm:$0xff]  ;;  %1119 = vst [vmem:[%s2313_s1 + $0x1d8] sm:$0xff] %v1118_v48  ;;  %v1120_v49 = vld [vmem:[%s2312_s0 + $0x4d8] sm:$0xff] }
  0x59   :  { %v1110_v44 = vld [vmem:[%s2312_s0 + $0xc8] sm:$0xff]  ;;  %1109 = vst [vmem:[%s2313_s1 + $0x4c8] sm:$0xff] %v1108_v43  ;;  %v1122_v50 = vld [vmem:[%s2312_s0 + $0xd8] sm:$0xff]  ;;  %1121 = vst [vmem:[%s2313_s1 + $0x4d8] sm:$0xff] %v1120_v49 }
  0x5a   :  { %v1112_v45 = vld [vmem:[%s2312_s0 + $0x3c8] sm:$0xff]  ;;  %1111 = vst [vmem:[%s2313_s1 + $0x2c8] sm:$0xff] %v1110_v44  ;;  %v1124_v51 = vld [vmem:[%s2312_s0 + $0x3d8] sm:$0xff]  ;;  %1123 = vst [vmem:[%s2313_s1 + $0x2d8] sm:$0xff] %v1122_v50 }
  0x5b   :  { %1113 = vst [vmem:[%s2313_s1 + $0x5c8] sm:$0xff] %v1112_v45  ;;  %1125 = vst [vmem:[%s2313_s1 + $0x5d8] sm:$0xff] %v1124_v51  ;;  %v1126_v52 = vld [vmem:[%s2312_s0 + $0x2e8] sm:$0xff]  ;;  %v1138_v58 = vld [vmem:[%s2312_s0 + $0x2f8] sm:$0xff] }
  0x5c   :  { %v1128_v53 = vld [vmem:[%s2312_s0 + $0x5e8] sm:$0xff]  ;;  %1127 = vst [vmem:[%s2313_s1 + $0xe8] sm:$0xff] %v1126_v52  ;;  %v1140_v59 = vld [vmem:[%s2312_s0 + $0x5f8] sm:$0xff]  ;;  %1139 = vst [vmem:[%s2313_s1 + $0xf8] sm:$0xff] %v1138_v58 }
  0x5d   :  { %v1130_v54 = vld [vmem:[%s2312_s0 + $0x1e8] sm:$0xff]  ;;  %1129 = vst [vmem:[%s2313_s1 + $0x3e8] sm:$0xff] %v1128_v53  ;;  %v1142_v60 = vld [vmem:[%s2312_s0 + $0x1f8] sm:$0xff]  ;;  %1141 = vst [vmem:[%s2313_s1 + $0x3f8] sm:$0xff] %v1140_v59 }
  0x5e   :  { %1131 = vst [vmem:[%s2313_s1 + $0x1e8] sm:$0xff] %v1130_v54  ;;  %v1132_v55 = vld [vmem:[%s2312_s0 + $0x4e8] sm:$0xff]  ;;  %1143 = vst [vmem:[%s2313_s1 + $0x1f8] sm:$0xff] %v1142_v60  ;;  %v1144_v61 = vld [vmem:[%s2312_s0 + $0x4f8] sm:$0xff] }
  0x5f   :  { %v1134_v56 = vld [vmem:[%s2312_s0 + $0xe8] sm:$0xff]  ;;  %1133 = vst [vmem:[%s2313_s1 + $0x4e8] sm:$0xff] %v1132_v55  ;;  %v1146_v62 = vld [vmem:[%s2312_s0 + $0xf8] sm:$0xff]  ;;  %1145 = vst [vmem:[%s2313_s1 + $0x4f8] sm:$0xff] %v1144_v61 }
  0x60   :  { %v1136_v57 = vld [vmem:[%s2312_s0 + $0x3e8] sm:$0xff]  ;;  %1135 = vst [vmem:[%s2313_s1 + $0x2e8] sm:$0xff] %v1134_v56  ;;  %v1148_v63 = vld [vmem:[%s2312_s0 + $0x3f8] sm:$0xff]  ;;  %1147 = vst [vmem:[%s2313_s1 + $0x2f8] sm:$0xff] %v1146_v62 }
  0x61   :  { %1137 = vst [vmem:[%s2313_s1 + $0x5e8] sm:$0xff] %v1136_v57  ;;  %1149 = vst [vmem:[%s2313_s1 + $0x5f8] sm:$0xff] %v1148_v63 }

// kernel: pwno_forward.7
= control target key start
LH: loop header
LB: loop body
LE: loop exit
PB: predicated region body
PF: predicated region fallthrough
CT: control target
= control target key end

     0   :  { %s813_s15 = smov 0   ;;  %s815_s16 = smov 0   ;;  %s956_s0 = inlined_call_operand.vmem [shape: bf16[32,4096], index: 0, kind: input, shape index: {}]   ;;  %s957_s1 = inlined_call_operand.vmem [shape: bf16[32,4096], index: 1, kind: input, shape index: {}]   ;;  %s958_s2 = inlined_call_operand.vmem [shape: bf16[32,32], index: 2, kind: input, shape index: {}]   ;;  %s959_s3 = inlined_call_operand.vmem [shape: f32[32,1], index: 3, kind: input, shape index: {}]   ;;  %s960_s4 = inlined_call_operand.vmem [shape: f32[32,4096], index: 4, kind: output, shape index: {}]  }
   0x1   :  { %s817_s17 = smov 0  }
   0x2 LB: > { %s686_s18 = sadd.s32 4294967295, %s785_s17   ;;  %s830_s19 = sadd.s32 1, %s785_s17   ;;  %s785_s17 = sphi %s817_s17, %s965_s17   ;;  %s781_s16 = sphi %s815_s16, %s964_s16   ;;  %s777_s15 = sphi %s813_s15, %s963_s15  }
   0x3   : > { %s18_s20 = ssub.s32 %s785_s17, %s830_s19  ;;  %s21_s21 = sadd.s32 1, %s781_s16 }
   0x4   : > { %p19_p0 = scmp.eq.s32.totalorder %s18_s20, 0  ;;  %p28_p1 = scmp.ne.s32.totalorder %s781_s16, %s777_s15 }
   0x5   : > { %p29_p2 = scmp.eq.s32.totalorder %s785_s17, 0  ;;  %p126_p3 = scmp.eq.s32.totalorder %s686_s18, 7 }
   0x6   : > { %s841_s22 = scalar_select %p19_p0, %s781_s16, %s21_s21  }
   0x7   : > { %p843_p4 = por %p29_p2, %p28_p1  ;;  %p847_p5 = por %p126_p3, %p28_p1 }
   0x8   : > { %p689_p6 = scmp.ge.s32.totalorder %s785_s17, 8 }
   0xa   : > { %154 = sbr.rel (%p689_p6) target bundleno = 31 (0x1f), region = 24 }
   0xf   : > { %157 = sbr.rel (!%p843_p4) target bundleno = 23 (0x17), region = 28  ;;  %s159_s25 = sand.u32 (%p843_p4), 1, %s781_s16  }
  0x10   : > { %s719_s26 = sshll.u32 (%p843_p4), %s785_s17, 4  ;;  %s690_s27 = sshll.u32 (%p843_p4), %s159_s25, 6 }
  0x11   : > { %s164_s30 = scalar_lea.vmem (%p843_p4), %s956_s0, %s719_s26  ;;  %s161_s5 = scalar_lea.vmem (%p843_p4), [#allocation2], %s690_s27 }
  0x12   : > { %v177_v0 = vld [vmem:[%s164_s30] sm:$0xff] (%p843_p4)  ;;  %v179_v1 = vld [vmem:[%s164_s30 + $0x8] sm:$0xff] (%p843_p4) }
  0x13   : > { %v181_v2 = vld [vmem:[%s164_s30 + $0x80] sm:$0xff] (%p843_p4)  ;;  %178 = vst [vmem:[%s161_s5] sm:$0xff] (%p843_p4), %v177_v0  ;;  %180 = vst [vmem:[%s161_s5 + $0x8] sm:$0xff] (%p843_p4), %v179_v1  ;;  %v183_v3 = vld [vmem:[%s164_s30 + $0x88] sm:$0xff] (%p843_p4) }
  0x14   : > { %182 = vst [vmem:[%s161_s5 + $0x10] sm:$0xff] %v181_v2  ;;  %v185_v4 = vld [vmem:[%s164_s30 + $0x100] sm:$0xff]  ;;  %v187_v5 = vld [vmem:[%s164_s30 + $0x108] sm:$0xff]  ;;  %184 = vst [vmem:[%s161_s5 + $0x18] sm:$0xff] %v183_v3 }
  0x15   : > { %186 = vst [vmem:[%s161_s5 + $0x20] sm:$0xff] %v185_v4  ;;  %188 = vst [vmem:[%s161_s5 + $0x28] sm:$0xff] %v187_v5  ;;  %v189_v6 = vld [vmem:[%s164_s30 + $0x180] sm:$0xff]  ;;  %v191_v7 = vld [vmem:[%s164_s30 + $0x188] sm:$0xff] }
  0x16   : > { %190 = vst [vmem:[%s161_s5 + $0x30] sm:$0xff] %v189_v6  ;;  %192 = vst [vmem:[%s161_s5 + $0x38] sm:$0xff] %v191_v7 }
  0x17 PF: > { %198 = sbr.rel (!%p843_p4) target bundleno = 31 (0x1f), region = 51  ;;  %s200_s6 = sand.u32 (%p843_p4), 1, %s781_s16  }
  0x18   : > { %s720_s7 = sshll.u32 (%p843_p4), %s785_s17, 4  ;;  %s693_s8 = sshll.u32 (%p843_p4), %s200_s6, 6 }
  0x19   : > { %s205_s11 = scalar_lea.vmem (%p843_p4), %s957_s1, %s720_s7  ;;  %s202_s12 = scalar_lea.vmem (%p843_p4), [#allocation3], %s693_s8 }
  0x1a   : > { %v218_v8 = vld [vmem:[%s205_s11] sm:$0xff] (%p843_p4)  ;;  %v220_v9 = vld [vmem:[%s205_s11 + $0x8] sm:$0xff] (%p843_p4) }
  0x1b   : > { %v222_v10 = vld [vmem:[%s205_s11 + $0x80] sm:$0xff] (%p843_p4)  ;;  %219 = vst [vmem:[%s202_s12] sm:$0xff] (%p843_p4), %v218_v8  ;;  %221 = vst [vmem:[%s202_s12 + $0x8] sm:$0xff] (%p843_p4), %v220_v9  ;;  %v224_v11 = vld [vmem:[%s205_s11 + $0x88] sm:$0xff] (%p843_p4) }
  0x1c   : > { %223 = vst [vmem:[%s202_s12 + $0x10] sm:$0xff] %v222_v10  ;;  %v226_v12 = vld [vmem:[%s205_s11 + $0x100] sm:$0xff]  ;;  %v228_v13 = vld [vmem:[%s205_s11 + $0x108] sm:$0xff]  ;;  %225 = vst [vmem:[%s202_s12 + $0x18] sm:$0xff] %v224_v11 }
  0x1d   : > { %227 = vst [vmem:[%s202_s12 + $0x20] sm:$0xff] %v226_v12  ;;  %229 = vst [vmem:[%s202_s12 + $0x28] sm:$0xff] %v228_v13  ;;  %v230_v14 = vld [vmem:[%s205_s11 + $0x180] sm:$0xff]  ;;  %v232_v15 = vld [vmem:[%s205_s11 + $0x188] sm:$0xff] }
  0x1e   : > { %231 = vst [vmem:[%s202_s12 + $0x30] sm:$0xff] %v230_v14  ;;  %233 = vst [vmem:[%s202_s12 + $0x38] sm:$0xff] %v232_v15 }
  0x1f PF: > { %p696_p7 = scmp.ge.s32.totalorder %s785_s17, 1  ;;  %p238_p8 = scmp.lt.s32.totalorder %s785_s17, 9 }
  0x21   : > { %p239_p9 = pnand %p696_p7, %p238_p8 }
  0x22   : > { %s245_s13 = sand.u32 (!%p239_p9), 1, %s777_s15  }
  0x23   : > { %242 = sbr.rel (%p239_p9) target bundleno = 272 (0x110), region = 74  ;;  %s871_s14 = sshll.u32 (!%p239_p9), %s245_s13, 6 }
  0x24   : > { %s247_s23 = scalar_lea.vmem (!%p239_p9), [#allocation2], %s871_s14  ;;  %s893_s9 = scalar_lea.vmem (!%p239_p9), [#allocation3], %s871_s14 }
  0x25   : > { %s699_s10 = sshll.u32 (!%p239_p9), %s245_s13, 7 }
  0x26   : > { %s903_s15 = scalar_lea.vmem (!%p239_p9), [#allocation4], %s699_s10 }
  0x28   : > { %v787_v16 = vmov 0   ;;  %v499_v17 = vld [vmem:[%s959_s3] sm:$0xff]  ;;  %v751_v19 = vld [vmem:[%s247_s23 + $0x2c] ss:$16 sps:$4 sm:$0xff]   ;;  %v754_v21 = vld [vmem:[%s247_s23 + $0x28] ss:$16 sps:$4 sm:$0xff]  }
  0x29   : > { %385 = vmatprep.mubr.bf16.mxu0 %v787_v16  ;;  %438 = vmatprep.mubr.bf16.mxu1 %v787_v16  ;;  %v749_v18 = vld [vmem:[%s247_s23 + $0x24] ss:$16 sps:$4 sm:$0xff]   ;;  %v753_v20 = vld [vmem:[%s247_s23 + $0x20] ss:$16 sps:$4 sm:$0xff]   ;;  %v757_v23 = vld [vmem:[%s247_s23 + $0xc] ss:$16 sps:$4 sm:$0xff]  }
  0x2a   : > { %747 = vset.pattern.permute.xlu0 %v787_v16  ;;  %748 = vset.pattern.permute.xlu1 %v787_v16  ;;  %v755_v22 = vld [vmem:[%s247_s23 + $0x4] ss:$16 sps:$4 sm:$0xff]   ;;  %v759_v24 = vld [vmem:[%s247_s23] ss:$16 sps:$4 sm:$0xff]   ;;  %v760_v25 = vld [vmem:[%s247_s23 + $0x8] ss:$16 sps:$4 sm:$0xff]  }
  0x2b   : > { %505 = vperm.xlu0 %747, %v499_v17   ;;  %365 = vmatprep.subr.bf16.mxu0 %v749_v18  ;;  %v500_v26 = vld [vmem:[%s959_s3 + $0x8] sm:$0xff]  ;;  %v501_v27 = vld [vmem:[%s959_s3 + $0x10] sm:$0xff]  ;;  %v761_v28 = vld [vmem:[%s958_s2] sm:$0xff]   ;;  %vm346_vm0 = vcmask 261120   ;;  %s721_s11 = sshll.u32 (%p847_p5), %s686_s18, 5 }
  0x2c   : > { %418 = vmatprep.subr.bf16.mxu1 %v751_v19  ;;  %366 = vmatpush1.bf16.msra.mxu0 %v753_v20  ;;  %v502_v29 = vld [vmem:[%s959_s3 + $0x18] sm:$0xff]  ;;  %v762_v30 = vld [vmem:[%s958_s2 + $0x8] sm:$0xff]   ;;  %v459_v31 = vld [vmem:[%s893_s9] sm:$0xff]  ;;  %s564_s24 = scalar_lea.vmem (%p847_p5), %s960_s4, %s721_s11 }
  0x2d   : > { %419 = vmatpush1.bf16.msra.mxu1 %v754_v21  ;;  %367 = vmatprep.subr.bf16.mxu0 %v755_v22  ;;  %v460_v32 = vld [vmem:[%s893_s9 + $0x8] sm:$0xff]  ;;  %v467_v33 = vunpack.c.l.bf16 %v459_v31  ;;  %v461_v36 = vld [vmem:[%s893_s9 + $0x10] sm:$0xff]  ;;  %v462_v37 = vld [vmem:[%s893_s9 + $0x18] sm:$0xff]  ;;  %v468_v38 = vunpack.c.h.bf16 %v459_v31 }
  0x2e   : > { %420 = vmatprep.subr.bf16.mxu1 %v757_v23  ;;  %515 = vperm.xlu1 %748, %v501_v27   ;;  %v469_v34 = vunpack.c.l.bf16 %v460_v32  ;;  %v470_v39 = vunpack.c.h.bf16 %v460_v32  ;;  %v471_v44 = vunpack.c.l.bf16 %v461_v36  ;;  %v473_v45 = vunpack.c.l.bf16 %v462_v37  ;;  %v463_v46 = vld [vmem:[%s893_s9 + $0x20] sm:$0xff]  ;;  %v464_v47 = vld [vmem:[%s893_s9 + $0x28] sm:$0xff]  ;;  %v465_v1 = vld [vmem:[%s893_s9 + $0x30] sm:$0xff] }
  0x2f   : > { %510 = vperm.xlu0 %747, %v500_v26   ;;  %v472_v50 = vunpack.c.h.bf16 %v461_v36  ;;  %v474_v51 = vunpack.c.h.bf16 %v462_v37  ;;  %v475_v59 = vunpack.c.l.bf16 %v463_v46  ;;  %v477_v60 = vunpack.c.l.bf16 %v464_v47  ;;  %v466_v2 = vld [vmem:[%s893_s9 + $0x38] sm:$0xff] }
  0x30   : > { %368 = vmatpush1.bf16.msra.mxu0 %v759_v24  ;;  %v476_v5 = vunpack.c.h.bf16 %v463_v46  ;;  %v478_v6 = vunpack.c.h.bf16 %v464_v47  ;;  %v479_v14 = vunpack.c.l.bf16 %v465_v1  ;;  %v481_v15 = vunpack.c.l.bf16 %v466_v2 }
  0x31   : > { %421 = vmatpush1.bf16.msra.mxu1 %v760_v25  ;;  %v480_v22 = vunpack.c.h.bf16 %v465_v1  ;;  %v482_v23 = vunpack.c.h.bf16 %v466_v2 }
  0x32   : > { %520 = vperm.xlu1 %748, %v502_v29  }
  0x33   : > { %710 = vmatmul.mubr.msk.bf16.vlgmr.msra.gmra.mxu0 %vm346_vm0, %v761_v28 }
  0x34   : > { %712 = vmatmul.mubr.msk.bf16.vlgmr.msra.gmra.mxu1 %vm346_vm0, %v761_v28  ;;  %395 = vmatprep.mubr.bf16.mxu0 %v787_v16 }
  0x35   : > { %448 = vmatprep.mubr.bf16.mxu1 %v787_v16 }
  0x3b   : > { %711 = vmatmul.mubr.msk.bf16.gmra.mxu0 %vm346_vm0, %v762_v30 }
  0x3c   : > { %713 = vmatmul.mubr.msk.bf16.gmra.mxu1 %vm346_vm0, %v762_v30 }
  0xa6   : > { %v506_v35 = vpop.permute.xlu0 %505 }
  0xa9   : > { %v516_v11 = vpop.permute.xlu1 %515 }
  0xaa   : > { %v511_v56 = vpop.permute.xlu0 %510 }
  0xad   : > { %v521_v32 = vpop.permute.xlu1 %520 }
  0xf3   : > { %v387_v40 = vpop.f32.mrf.mxu0 }
  0xf4   : > { %v440_v41 = vpop.f32.mrf.mxu1  ;;  %v483_v42 = vadd.f32 %v467_v33, %v387_v40 }
  0xf5   : > { %v485_v43 = vadd.f32 %v469_v34, %v440_v41  ;;  %v389_v48 = vpop.f32.mrf.mxu0 }
  0xf6   : > { %v442_v49 = vpop.f32.mrf.mxu1  ;;  %v523_v52 = vadd.f32 %v506_v35, %v483_v42  ;;  %v484_v54 = vadd.f32 %v468_v38, %v389_v48 }
  0xf7   : > { %v525_v53 = vadd.f32 %v506_v35, %v485_v43  ;;  %v486_v55 = vadd.f32 %v470_v39, %v442_v49  ;;  %v391_v57 = vpop.f32.mrf.mxu0 }
  0xf8   : > { %v444_v58 = vpop.f32.mrf.mxu1  ;;  %539 = vst [vmem:[%s903_s15] sm:$0xff] %v523_v52  ;;  %v524_v61 = vadd.f32 %v506_v35, %v484_v54  ;;  %v487_v63 = vadd.f32 %v471_v44, %v391_v57 }
  0xf9   : > { %541 = vst [vmem:[%s903_s15 + $0x10] sm:$0xff] %v525_v53  ;;  %v526_v62 = vadd.f32 %v506_v35, %v486_v55  ;;  %v489_v0 = vadd.f32 %v473_v45, %v444_v58  ;;  %v393_v3 = vpop.f32.mrf.mxu0 }
  0xfa   : > { %v446_v4 = vpop.f32.mrf.mxu1  ;;  %540 = vst [vmem:[%s903_s15 + $0x8] sm:$0xff] %v524_v61  ;;  %v527_v7 = vadd.f32 %v511_v56, %v487_v63  ;;  %v488_v9 = vadd.f32 %v472_v50, %v393_v3 }
  0xfb   : > { %542 = vst [vmem:[%s903_s15 + $0x18] sm:$0xff] %v526_v62  ;;  %v529_v8 = vadd.f32 %v511_v56, %v489_v0  ;;  %v490_v10 = vadd.f32 %v474_v51, %v446_v4  ;;  %v397_v12 = vpop.f32.mrf.mxu0 }
  0xfc   : > { %v450_v13 = vpop.f32.mrf.mxu1  ;;  %543 = vst [vmem:[%s903_s15 + $0x20] sm:$0xff] %v527_v7  ;;  %v528_v16 = vadd.f32 %v511_v56, %v488_v9  ;;  %v491_v18 = vadd.f32 %v475_v59, %v397_v12 }
  0xfd   : > { %545 = vst [vmem:[%s903_s15 + $0x30] sm:$0xff] %v529_v8  ;;  %v530_v17 = vadd.f32 %v511_v56, %v490_v10  ;;  %v493_v19 = vadd.f32 %v477_v60, %v450_v13  ;;  %v399_v20 = vpop.f32.mrf.mxu0 }
  0xfe   : > { %v452_v21 = vpop.f32.mrf.mxu1  ;;  %544 = vst [vmem:[%s903_s15 + $0x28] sm:$0xff] %v528_v16  ;;  %v531_v24 = vadd.f32 %v516_v11, %v491_v18  ;;  %v492_v26 = vadd.f32 %v476_v5, %v399_v20 }
  0xff   : > { %546 = vst [vmem:[%s903_s15 + $0x38] sm:$0xff] %v530_v17  ;;  %v533_v25 = vadd.f32 %v516_v11, %v493_v19  ;;  %v494_v27 = vadd.f32 %v478_v6, %v452_v21  ;;  %v401_v28 = vpop.f32.mrf.mxu0  ;;  %v577_v43 = vld [vmem:[%s903_s15] sm:$0xff] (%p847_p5) }
 0x100   : > { %v454_v29 = vpop.f32.mrf.mxu1  ;;  %547 = vst [vmem:[%s903_s15 + $0x40] sm:$0xff] %v531_v24  ;;  %v532_v30 = vadd.f32 %v516_v11, %v492_v26  ;;  %v495_v33 = vadd.f32 %v479_v14, %v401_v28  ;;  %v581_v45 = vld [vmem:[%s903_s15 + $0x10] sm:$0xff] (%p847_p5)  ;;  %578 = vst [vmem:[%s564_s24] sm:$0xff] (%p847_p5), %v577_v43 }
 0x101   : > { %549 = vst [vmem:[%s903_s15 + $0x50] sm:$0xff] %v533_v25  ;;  %v534_v31 = vadd.f32 %v516_v11, %v494_v27  ;;  %v497_v34 = vadd.f32 %v481_v15, %v454_v29  ;;  %v403_v35 = vpop.f32.mrf.mxu0  ;;  %v579_v44 = vld [vmem:[%s903_s15 + $0x8] sm:$0xff] (%p847_p5)  ;;  %582 = vst [vmem:[%s564_s24 + $0x10] sm:$0xff] (%p847_p5), %v581_v45 }
 0x102   : > { %v456_v36 = vpop.f32.mrf.mxu1  ;;  %548 = vst [vmem:[%s903_s15 + $0x48] sm:$0xff] %v532_v30  ;;  %v535_v37 = vadd.f32 %v521_v32, %v495_v33  ;;  %v496_v39 = vadd.f32 %v480_v22, %v403_v35  ;;  %v583_v46 = vld [vmem:[%s903_s15 + $0x18] sm:$0xff] (%p847_p5)  ;;  %580 = vst [vmem:[%s564_s24 + $0x8] sm:$0xff] (%p847_p5), %v579_v44 }
 0x103   : > { %550 = vst [vmem:[%s903_s15 + $0x58] sm:$0xff] %v534_v31  ;;  %v537_v38 = vadd.f32 %v521_v32, %v497_v34  ;;  %v498_v40 = vadd.f32 %v482_v23, %v456_v36  ;;  %561 = sbr.rel (!%p847_p5) target bundleno = 272 (0x110), region = 86  ;;  %v585_v47 = vld [vmem:[%s903_s15 + $0x20] sm:$0xff] (%p847_p5)  ;;  %584 = vst [vmem:[%s564_s24 + $0x18] sm:$0xff] (%p847_p5), %v583_v46 }
 0x104   : > { %551 = vst [vmem:[%s903_s15 + $0x60] sm:$0xff] %v535_v37  ;;  %v536_v41 = vadd.f32 %v521_v32, %v496_v39  ;;  %586 = vst [vmem:[%s564_s24 + $0x100] sm:$0xff] (%p847_p5), %v585_v47  ;;  %v589_v49 = vld [vmem:[%s903_s15 + $0x30] sm:$0xff] (%p847_p5) }
 0x105   : > { %553 = vst [vmem:[%s903_s15 + $0x70] sm:$0xff] %v537_v38  ;;  %v538_v42 = vadd.f32 %v521_v32, %v498_v40  ;;  %v587_v48 = vld [vmem:[%s903_s15 + $0x28] sm:$0xff] (%p847_p5)  ;;  %590 = vst [vmem:[%s564_s24 + $0x110] sm:$0xff] (%p847_p5), %v589_v49 }
 0x106   : > { %552 = vst [vmem:[%s903_s15 + $0x68] sm:$0xff] %v536_v41  ;;  %588 = vst [vmem:[%s564_s24 + $0x108] sm:$0xff] (%p847_p5), %v587_v48  ;;  %v591_v50 = vld [vmem:[%s903_s15 + $0x38] sm:$0xff] (%p847_p5) }
 0x107   : > { %554 = vst [vmem:[%s903_s15 + $0x78] sm:$0xff] %v538_v42  ;;  %v593_v51 = vld [vmem:[%s903_s15 + $0x40] sm:$0xff] (%p847_p5)  ;;  %592 = vst [vmem:[%s564_s24 + $0x118] sm:$0xff] (%p847_p5), %v591_v50 }
 0x108   : > { %594 = vst [vmem:[%s564_s24 + $0x200] sm:$0xff] %v593_v51  ;;  %v597_v53 = vld [vmem:[%s903_s15 + $0x50] sm:$0xff] }
 0x109   : > { %v595_v52 = vld [vmem:[%s903_s15 + $0x48] sm:$0xff]  ;;  %598 = vst [vmem:[%s564_s24 + $0x210] sm:$0xff] %v597_v53 }
 0x10a   : > { %v599_v54 = vld [vmem:[%s903_s15 + $0x58] sm:$0xff]  ;;  %596 = vst [vmem:[%s564_s24 + $0x208] sm:$0xff] %v595_v52 }
 0x10b   : > { %600 = vst [vmem:[%s564_s24 + $0x218] sm:$0xff] %v599_v54  ;;  %v601_v55 = vld [vmem:[%s903_s15 + $0x60] sm:$0xff] }
 0x10c   : > { %v605_v57 = vld [vmem:[%s903_s15 + $0x70] sm:$0xff]  ;;  %602 = vst [vmem:[%s564_s24 + $0x300] sm:$0xff] %v601_v55 }
 0x10d   : > { %v603_v56 = vld [vmem:[%s903_s15 + $0x68] sm:$0xff]  ;;  %606 = vst [vmem:[%s564_s24 + $0x310] sm:$0xff] %v605_v57 }
 0x10e   : > { %604 = vst [vmem:[%s564_s24 + $0x308] sm:$0xff] %v603_v56  ;;  %v607_v58 = vld [vmem:[%s903_s15 + $0x78] sm:$0xff] }
 0x10f   : > { %608 = vst [vmem:[%s564_s24 + $0x318] sm:$0xff] %v607_v58 }
 0x110 PF: > { %p11_p10 = scmp.ge.s32.totalorder %s830_s19, 10   ;;  %s963_s15 = smov %s781_s16 }
 0x111   : > { %s964_s16 = smov %s841_s22  ;;  %s965_s17 = smov %s830_s19 }
 0x112   :  { %13 = sbr.rel (!%p11_p10) target bundleno = 2 (0x2), region = 148 }

</bundles_post_ra>
